<compile_context>
chip_gen: v7x
topology: tpu7x:2x2x1
jax: 0.10.0
libtpu: 0.0.40
codegen_flags: <defaults>
</compile_context>

<pallas_src>
import jax
import jax.numpy as jnp
from jax.experimental import pallas as pl
from jax.experimental.pallas import tpu as pltpu


def _round_up(x, m):
    return ((x + m - 1) // m) * m


def make_gru_kernel(T, Bp, Hp):
    """Build the Pallas kernel for window T, padded batch Bp, padded hidden Hp."""
    G3 = 3 * Hp          # width of one layer's gate block [r|z|n]
    G6 = 6 * Hp          # two layers' hh gate blocks concatenated

    # Bias-blob lane offsets: [a0 | c0 | b_hh_cat | b_ih1 | fc1_b | fc2_b]
    OFF_A0 = 0
    OFF_C0 = OFF_A0 + G3
    OFF_BHH = OFF_C0 + G3
    OFF_BIH1 = OFF_BHH + G6
    OFF_FC1B = OFF_BIH1 + G3
    OFF_FC2B = OFF_FC1B + Hp
    BIAS_W = OFF_FC2B + 128

    def kernel(x_ref, w_ref, b_ref, out_ref, gi0_scr):
        # ---- loop-invariant loads (hoisted out of the recurrence) -------------
        a0 = b_ref[:, OFF_A0:OFF_A0 + G3]                       # (1, 3Hp)
        c0 = b_ref[:, OFF_C0:OFF_C0 + G3]                       # (1, 3Hp)
        b_hh = jnp.broadcast_to(b_ref[:, OFF_BHH:OFF_BHH + G6], (Bp, G6))
        b_ih1 = jnp.broadcast_to(b_ref[:, OFF_BIH1:OFF_BIH1 + G3], (Bp, G3))

        w_hh = w_ref[0:2 * Hp, :]                               # (2Hp, 6Hp) blockdiag
        w_ih1 = w_ref[2 * Hp:3 * Hp, 0:G3]                      # (Hp, 3Hp)

        # Layer-0 input pre-activations for all timesteps in one vectorized pass:
        #   gi0[t] = x[t] * (emb_w @ W_ih0) + (emb_b @ W_ih0 + b_ih0)
        gi0_scr[...] = x_ref[...] * a0[None] + c0[None]         # (T, Bp, 3Hp)

        def gates(gi, gh, h):
            # PyTorch gate order [r | z | n]; each gate is a full 128-lane block.
            r = jax.nn.sigmoid(gi[:, 0:Hp] + gh[:, 0:Hp])
            z = jax.nn.sigmoid(gi[:, Hp:2 * Hp] + gh[:, Hp:2 * Hp])
            n = jnp.tanh(gi[:, 2 * Hp:G3] + r * gh[:, 2 * Hp:G3])
            return (1.0 - z) * n + z * h

        h_init = jnp.zeros((Bp, Hp), jnp.float32)

        def step(t, carry):
            h0, h1 = carry
            hcat = jnp.concatenate([h0, h1], axis=1)            # (Bp, 2Hp)
            # Fused hidden-path matmul for both layers (block-diagonal weights).
            gh = jnp.dot(hcat, w_hh, preferred_element_type=jnp.float32) + b_hh
            gh0 = gh[:, 0:G3]
            gh1 = gh[:, G3:G6]
            # Layer 0: input path is the precomputed gi0 (no matmul).
            h0n = gates(gi0_scr[t], gh0, h0)
            # Layer 1: only serialized matmul besides the hh-dot.
            gi1 = jnp.dot(h0n, w_ih1, preferred_element_type=jnp.float32) + b_ih1
            h1n = gates(gi1, gh1, h1)
            return h0n, h1n

        _, h_last = jax.lax.fori_loop(0, T, step, (h_init, h_init), unroll=True)

        # Head: fc_1 -> ReLU -> (dropout = identity at inference) -> fc_2
        # TODO(synk): dropout omitted (eval-mode identity); no RNG drop mask applied.
        fc1_w = w_ref[2 * Hp:3 * Hp, G3:G3 + Hp]                # (Hp, Hp)
        fc2_w = w_ref[2 * Hp:3 * Hp, 4 * Hp:4 * Hp + 128]       # (Hp, 128) out-padded
        fc1_b = b_ref[:, OFF_FC1B:OFF_FC1B + Hp]
        fc2_b = b_ref[:, OFF_FC2B:OFF_FC2B + 128]

        y = jnp.dot(h_last, fc1_w, preferred_element_type=jnp.float32) + fc1_b
        y = jnp.maximum(y, 0.0)
        out_ref[...] = jnp.dot(y, fc2_w, preferred_element_type=jnp.float32) + fc2_b

    return kernel, BIAS_W


def gru_model_forward(x, params):
    """x: (B, window) float32 -> (B,) float32."""
    B, T = x.shape
    H = params["emb_w"].shape[1]
    Hp = _round_up(max(H, 128), 128)      # pad hidden to a full 128-lane block/gate
    Bp = _round_up(max(B, 8), 8)          # pad batch to full sublanes
    f32 = jnp.float32
    G3, G6 = 3 * Hp, 6 * Hp

    def gate_pad(a, rows_to):
        # (rows, 3H) -> (rows_to, 3Hp); pad each gate block [r|z|n] to Hp lanes.
        rows = a.shape[0]
        a3 = a.astype(f32).reshape(rows, 3, H)
        a3 = jnp.pad(a3, ((0, rows_to - rows), (0, 0), (0, Hp - H)))
        return a3.reshape(rows_to, 3 * Hp)

    def pad2(a, rows_to, cols_to):
        return jnp.pad(a.astype(f32),
                       ((0, rows_to - a.shape[0]), (0, cols_to - a.shape[1])))

    # -- algebraic hoist of the layer-0 input path (done once, outside the kernel) --
    a0 = params["emb_w"].astype(f32) @ params["w_ih0"].astype(f32)            # (1, 3H)
    c0 = (params["emb_b"].astype(f32) @ params["w_ih0"].astype(f32)
          + params["b_ih0"].astype(f32))                                      # (1, 3H)
    a0 = gate_pad(a0, 1)
    c0 = gate_pad(c0, 1)

    # -- gate-padded recurrent / head parameters --
    w_hh0 = gate_pad(params["w_hh0"], Hp)
    w_hh1 = gate_pad(params["w_hh1"], Hp)
    w_ih1 = gate_pad(params["w_ih1"], Hp)
    b_hh_cat = jnp.concatenate([gate_pad(params["b_hh0"], 1),
                                gate_pad(params["b_hh1"], 1)], axis=1)        # (1, 6Hp)
    b_ih1 = gate_pad(params["b_ih1"], 1)
    fc1_w = pad2(params["fc1_w"], Hp, Hp)
    fc1_b = pad2(params["fc1_b"], 1, Hp)
    fc2_w = pad2(params["fc2_w"], Hp, 128)          # output dim 1 -> 128 (lane-dense)
    fc2_b = pad2(params["fc2_b"], 1, 128)

    # -- pack everything into one weight blob + one bias blob (3 DMAs total) --
    wblob = jnp.zeros((3 * Hp, G6), f32)
    wblob = wblob.at[0:Hp, 0:G3].set(w_hh0)                  # block-diag [[W_hh0, 0],
    wblob = wblob.at[Hp:2 * Hp, G3:G6].set(w_hh1)            #              [0, W_hh1]]
    wblob = wblob.at[2 * Hp:3 * Hp, 0:G3].set(w_ih1)
    wblob = wblob.at[2 * Hp:3 * Hp, G3:G3 + Hp].set(fc1_w)
    wblob = wblob.at[2 * Hp:3 * Hp, 4 * Hp:4 * Hp + 128].set(fc2_w)

    bblob = jnp.concatenate([a0, c0, b_hh_cat, b_ih1, fc1_b, fc2_b], axis=1)

    # -- input: time-major, batch padded --
    x_tm = jnp.transpose(x.astype(f32), (1, 0))[:, :, None]     # (T, B, 1)
    x_tm = jnp.pad(x_tm, ((0, 0), (0, Bp - B), (0, 0)))         # (T, Bp, 1)

    kernel, bias_w = make_gru_kernel(T, Bp, Hp)
    assert bblob.shape == (1, bias_w), (bblob.shape, bias_w)

    flops = 2 * T * (Bp * 2 * Hp * G6 + Bp * Hp * G3) + 2 * Bp * Hp * (Hp + 128)
    cost = pl.CostEstimate(
        flops=flops,
        transcendentals=T * Bp * 6 * Hp,
        bytes_accessed=int(x_tm.size + wblob.size + bblob.size + Bp * 128) * 4,
    )

    out = pl.pallas_call(
        kernel,
        out_shape=jax.ShapeDtypeStruct((Bp, 128), f32),
        in_specs=[pl.BlockSpec(memory_space=pltpu.MemorySpace.VMEM)] * 3,
        out_specs=pl.BlockSpec(memory_space=pltpu.MemorySpace.VMEM),
        scratch_shapes=[pltpu.VMEM((T, Bp, G3), f32)],
        cost_estimate=cost,
    )(x_tm, wblob, bblob)
    return out[:B, 0]


def init_params(key, hidden):
    """Deterministic PyTorch-style uniform(-1/sqrt(fan_in), 1/sqrt(fan_in)) init."""
    H = hidden
    ks = list(jax.random.split(key, 16))

    def u(k, shape, bound):
        return jax.random.uniform(k, shape, jnp.float32, -bound, bound)

    kH = 1.0 / jnp.sqrt(H).astype(jnp.float32)
    return {
        # input_embedding: nn.Linear(1, H)  (fan_in = 1)
        "emb_w": u(ks[0], (1, H), 1.0),
        "emb_b": u(ks[1], (1, H), 1.0),
        # GRU layer 0, weights transposed to (in, 3H), gate order [r|z|n]
        "w_ih0": u(ks[2], (H, 3 * H), kH),
        "w_hh0": u(ks[3], (H, 3 * H), kH),
        "b_ih0": u(ks[4], (1, 3 * H), kH),
        "b_hh0": u(ks[5], (1, 3 * H), kH),
        # GRU layer 1
        "w_ih1": u(ks[6], (H, 3 * H), kH),
        "w_hh1": u(ks[7], (H, 3 * H), kH),
        "b_ih1": u(ks[8], (1, 3 * H), kH),
        "b_hh1": u(ks[9], (1, 3 * H), kH),
        # fc_1: Linear(H, H)
        "fc1_w": u(ks[10], (H, H), kH),
        "fc1_b": u(ks[11], (1, H), kH),
        # fc_2: Linear(H, 1)
        "fc2_w": u(ks[12], (H, 1), kH),
        "fc2_b": u(ks[13], (1, 1), kH),
    }


def gru_model_reference(x, params):
    """Pure-JAX reference matching the PyTorch forward (eval mode)."""
    H = params["emb_w"].shape[1]
    x_emb = x[:, :, None] * params["emb_w"][None] + params["emb_b"][None]  # (B,T,H)

    def cell(x_t, h, w_ih, w_hh, b_ih, b_hh):
        gi = x_t @ w_ih + b_ih
        gh = h @ w_hh + b_hh
        r = jax.nn.sigmoid(gi[:, :H] + gh[:, :H])
        z = jax.nn.sigmoid(gi[:, H:2 * H] + gh[:, H:2 * H])
        n = jnp.tanh(gi[:, 2 * H:] + r * gh[:, 2 * H:])
        return (1.0 - z) * n + z * h

    B = x.shape[0]
    h0 = jnp.zeros((B, H), jnp.float32)
    h1 = jnp.zeros((B, H), jnp.float32)

    def scan_step(carry, x_t):
        h0, h1 = carry
        h0 = cell(x_t, h0, params["w_ih0"], params["w_hh0"],
                  params["b_ih0"], params["b_hh0"])
        h1 = cell(h0, h1, params["w_ih1"], params["w_hh1"],
                  params["b_ih1"], params["b_hh1"])
        return (h0, h1), None

    (h0, h1), _ = jax.lax.scan(scan_step, (h0, h1),
                               jnp.transpose(x_emb, (1, 0, 2)))
    y = jnp.maximum(h1 @ params["fc1_w"] + params["fc1_b"], 0.0)
    return (y @ params["fc2_w"] + params["fc2_b"])[:, 0]


if __name__ == "__main__":
    batch = 4
    window_size = 16
    hidden = 32

    key = jax.random.PRNGKey(0)
    kx, kp = jax.random.split(key)
    x = jax.random.normal(kx, (batch, window_size), jnp.float32)
    params = init_params(kp, hidden)

    out = jax.block_until_ready(gru_model_forward(x, params))
    ref = gru_model_reference(x, params)

    assert out.shape == (batch,), out.shape
    # Tolerance covers the (exact-in-math) algebraic hoist + padded block-diag
    # matmul re-association in f32; any structural bug would be orders larger.
    assert jnp.allclose(out, ref, rtol=1e-3, atol=1e-3), (out, ref)

    print("KERNEL_OK")
</pallas_src>

<mosaic_0001>
module attributes {stable_mosaic.version = 11 : i64} {
  func.func @kernel(%arg0: memref<16x8x1xf32, #tpu.memory_space<vmem>>, %arg1: memref<384x768xf32, #tpu.memory_space<vmem>>, %arg2: memref<1x2176xf32, #tpu.memory_space<vmem>>, %arg3: memref<8x128xf32, #tpu.memory_space<vmem>>, %arg4: memref<16x8x384xf32, #tpu.memory_space<vmem>>) attributes {dimension_semantics = [], scalar_prefetch = 0 : i64, scratch_operands = 1 : i64, tpu.core_type = #tpu.core_type<tc>} {
    %c0 = arith.constant 0 : index
    %c0_0 = arith.constant 0 : index
    %0 = vector.load %arg2[%c0, %c0_0] : memref<1x2176xf32, #tpu.memory_space<vmem>>, vector<1x384xf32>
    %c0_1 = arith.constant 0 : index
    %c384 = arith.constant 384 : index
    %1 = vector.load %arg2[%c0_1, %c384] : memref<1x2176xf32, #tpu.memory_space<vmem>>, vector<1x384xf32>
    %c0_2 = arith.constant 0 : index
    %c768 = arith.constant 768 : index
    %2 = vector.load %arg2[%c0_2, %c768] : memref<1x2176xf32, #tpu.memory_space<vmem>>, vector<1x768xf32>
    %3 = vector.shape_cast %2 : vector<1x768xf32> to vector<1x768xf32>
    %4 = vector.broadcast %3 : vector<1x768xf32> to vector<8x768xf32>
    %c0_3 = arith.constant 0 : index
    %c1536 = arith.constant 1536 : index
    %5 = vector.load %arg2[%c0_3, %c1536] : memref<1x2176xf32, #tpu.memory_space<vmem>>, vector<1x384xf32>
    %6 = vector.shape_cast %5 : vector<1x384xf32> to vector<1x384xf32>
    %7 = vector.broadcast %6 : vector<1x384xf32> to vector<8x384xf32>
    %c0_4 = arith.constant 0 : index
    %c0_5 = arith.constant 0 : index
    %8 = vector.load %arg1[%c0_4, %c0_5] : memref<384x768xf32, #tpu.memory_space<vmem>>, vector<256x768xf32>
    %c256 = arith.constant 256 : index
    %c0_6 = arith.constant 0 : index
    %9 = vector.load %arg1[%c256, %c0_6] : memref<384x768xf32, #tpu.memory_space<vmem>>, vector<128x384xf32>
    %c0_7 = arith.constant 0 : index
    %c0_8 = arith.constant 0 : index
    %c0_9 = arith.constant 0 : index
    %10 = vector.load %arg0[%c0_7, %c0_8, %c0_9] : memref<16x8x1xf32, #tpu.memory_space<vmem>>, vector<16x8x1xf32>
    %11 = vector.shape_cast %0 : vector<1x384xf32> to vector<1x1x384xf32>
    %12 = vector.broadcast %10 : vector<16x8x1xf32> to vector<16x8x384xf32>
    %13 = vector.broadcast %11 : vector<1x1x384xf32> to vector<16x8x384xf32>
    %14 = arith.mulf %12, %13 : vector<16x8x384xf32>
    %15 = vector.shape_cast %1 : vector<1x384xf32> to vector<1x1x384xf32>
    %16 = vector.broadcast %15 : vector<1x1x384xf32> to vector<16x8x384xf32>
    %17 = arith.addf %14, %16 : vector<16x8x384xf32>
    %c0_10 = arith.constant 0 : index
    %c0_11 = arith.constant 0 : index
    %c0_12 = arith.constant 0 : index
    %18 = vector.load %arg4[%c0_10, %c0_11, %c0_12] : memref<16x8x384xf32, #tpu.memory_space<vmem>>, vector<16x8x384xf32>
    tpu.vector_store %arg4[%c0_10, %c0_11, %c0_12], %17 {strides = array<i32>} : memref<16x8x384xf32, #tpu.memory_space<vmem>>, vector<16x8x384xf32>,
    %cst = arith.constant 0.000000e+00 : f32
    %19 = vector.broadcast %cst : f32 to vector<8x128xf32>
    %c0_i32 = arith.constant 0 : i32
    %20 = tpu.concatenate %19, %19 in 1 : vector<8x128xf32>, vector<8x128xf32> -> vector<8x256xf32>
    %cst_13 = arith.constant dense<0.000000e+00> : vector<8x768xf32>
    %21 = tpu.matmul %20, %8, %cst_13 {dimension_numbers = #tpu.dot_dimension_numbers<[1], [0], [0], [1], [0, 0, 1, 1], [], []>} : vector<8x256xf32>, vector<256x768xf32>, vector<8x768xf32> -> vector<8x768xf32>
    %22 = arith.addf %21, %4 : vector<8x768xf32>
    %23 = vector.extract_strided_slice %22 {offsets = [0, 0], sizes = [8, 384], strides = [1, 1]} : vector<8x768xf32> to vector<8x384xf32>
    %24 = vector.extract_strided_slice %22 {offsets = [0, 384], sizes = [8, 384], strides = [1, 1]} : vector<8x768xf32> to vector<8x384xf32>
    %25 = arith.index_cast %c0_i32 : i32 to index
    %c0_14 = arith.constant 0 : index
    %c0_15 = arith.constant 0 : index
    %26 = vector.load %arg4[%25, %c0_14, %c0_15] : memref<16x8x384xf32, #tpu.memory_space<vmem>>, vector<1x8x384xf32>
    %27 = vector.shape_cast %26 : vector<1x8x384xf32> to vector<8x384xf32>
    %28 = vector.extract_strided_slice %27 {offsets = [0, 0], sizes = [8, 128], strides = [1, 1]} : vector<8x384xf32> to vector<8x128xf32>
    %29 = vector.extract_strided_slice %23 {offsets = [0, 0], sizes = [8, 128], strides = [1, 1]} : vector<8x384xf32> to vector<8x128xf32>
    %30 = arith.addf %28, %29 : vector<8x128xf32>
    %31 = arith.negf %30 : vector<8x128xf32>
    %32 = math.exp %31 : vector<8x128xf32>
    %cst_16 = arith.constant 1.000000e+00 : f32
    %33 = vector.broadcast %cst_16 : f32 to vector<8x128xf32>
    %34 = arith.addf %33, %32 : vector<8x128xf32>
    %35 = arith.divf %33, %34 : vector<8x128xf32>
    %36 = vector.extract_strided_slice %27 {offsets = [0, 128], sizes = [8, 128], strides = [1, 1]} : vector<8x384xf32> to vector<8x128xf32>
    %37 = vector.extract_strided_slice %23 {offsets = [0, 128], sizes = [8, 128], strides = [1, 1]} : vector<8x384xf32> to vector<8x128xf32>
    %38 = arith.addf %36, %37 : vector<8x128xf32>
    %39 = arith.negf %38 : vector<8x128xf32>
    %40 = math.exp %39 : vector<8x128xf32>
    %cst_17 = arith.constant 1.000000e+00 : f32
    %41 = vector.broadcast %cst_17 : f32 to vector<8x128xf32>
    %42 = arith.addf %41, %40 : vector<8x128xf32>
    %43 = arith.divf %41, %42 : vector<8x128xf32>
    %44 = vector.extract_strided_slice %27 {offsets = [0, 256], sizes = [8, 128], strides = [1, 1]} : vector<8x384xf32> to vector<8x128xf32>
    %45 = vector.extract_strided_slice %23 {offsets = [0, 256], sizes = [8, 128], strides = [1, 1]} : vector<8x384xf32> to vector<8x128xf32>
    %46 = arith.mulf %35, %45 : vector<8x128xf32>
    %47 = arith.addf %44, %46 : vector<8x128xf32>
    %48 = math.tanh %47 : vector<8x128xf32>
    %cst_18 = arith.constant 1.000000e+00 : f32
    %49 = vector.broadcast %cst_18 : f32 to vector<8x128xf32>
    %50 = arith.subf %49, %43 : vector<8x128xf32>
    %51 = arith.mulf %50, %48 : vector<8x128xf32>
    %52 = arith.mulf %43, %19 : vector<8x128xf32>
    %53 = arith.addf %51, %52 : vector<8x128xf32>
    %cst_19 = arith.constant dense<0.000000e+00> : vector<8x384xf32>
    %54 = tpu.matmul %53, %9, %cst_19 {dimension_numbers = #tpu.dot_dimension_numbers<[1], [0], [0], [1], [0, 0, 1, 1], [], []>} : vector<8x128xf32>, vector<128x384xf32>, vector<8x384xf32> -> vector<8x384xf32>
    %55 = arith.addf %54, %7 : vector<8x384xf32>
    %56 = vector.extract_strided_slice %55 {offsets = [0, 0], sizes = [8, 128], strides = [1, 1]} : vector<8x384xf32> to vector<8x128xf32>
    %57 = vector.extract_strided_slice %24 {offsets = [0, 0], sizes = [8, 128], strides = [1, 1]} : vector<8x384xf32> to vector<8x128xf32>
    %58 = arith.addf %56, %57 : vector<8x128xf32>
    %59 = arith.negf %58 : vector<8x128xf32>
    %60 = math.exp %59 : vector<8x128xf32>
    %cst_20 = arith.constant 1.000000e+00 : f32
    %61 = vector.broadcast %cst_20 : f32 to vector<8x128xf32>
    %62 = arith.addf %61, %60 : vector<8x128xf32>
    %63 = arith.divf %61, %62 : vector<8x128xf32>
    %64 = vector.extract_strided_slice %55 {offsets = [0, 128], sizes = [8, 128], strides = [1, 1]} : vector<8x384xf32> to vector<8x128xf32>
    %65 = vector.extract_strided_slice %24 {offsets = [0, 128], sizes = [8, 128], strides = [1, 1]} : vector<8x384xf32> to vector<8x128xf32>
    %66 = arith.addf %64, %65 : vector<8x128xf32>
    %67 = arith.negf %66 : vector<8x128xf32>
    %68 = math.exp %67 : vector<8x128xf32>
    %cst_21 = arith.constant 1.000000e+00 : f32
    %69 = vector.broadcast %cst_21 : f32 to vector<8x128xf32>
    %70 = arith.addf %69, %68 : vector<8x128xf32>
    %71 = arith.divf %69, %70 : vector<8x128xf32>
    %72 = vector.extract_strided_slice %55 {offsets = [0, 256], sizes = [8, 128], strides = [1, 1]} : vector<8x384xf32> to vector<8x128xf32>
    %73 = vector.extract_strided_slice %24 {offsets = [0, 256], sizes = [8, 128], strides = [1, 1]} : vector<8x384xf32> to vector<8x128xf32>
    %74 = arith.mulf %63, %73 : vector<8x128xf32>
    %75 = arith.addf %72, %74 : vector<8x128xf32>
    %76 = math.tanh %75 : vector<8x128xf32>
    %cst_22 = arith.constant 1.000000e+00 : f32
    %77 = vector.broadcast %cst_22 : f32 to vector<8x128xf32>
    %78 = arith.subf %77, %71 : vector<8x128xf32>
    %79 = arith.mulf %78, %76 : vector<8x128xf32>
    %80 = arith.mulf %71, %19 : vector<8x128xf32>
    %81 = arith.addf %79, %80 : vector<8x128xf32>
    %c1_i32 = arith.constant 1 : i32
    %82 = tpu.concatenate %53, %81 in 1 : vector<8x128xf32>, vector<8x128xf32> -> vector<8x256xf32>
    %cst_23 = arith.constant dense<0.000000e+00> : vector<8x768xf32>
    %83 = tpu.matmul %82, %8, %cst_23 {dimension_numbers = #tpu.dot_dimension_numbers<[1], [0], [0], [1], [0, 0, 1, 1], [], []>} : vector<8x256xf32>, vector<256x768xf32>, vector<8x768xf32> -> vector<8x768xf32>
    %84 = arith.addf %83, %4 : vector<8x768xf32>
    %85 = vector.extract_strided_slice %84 {offsets = [0, 0], sizes = [8, 384], strides = [1, 1]} : vector<8x768xf32> to vector<8x384xf32>
    %86 = vector.extract_strided_slice %84 {offsets = [0, 384], sizes = [8, 384], strides = [1, 1]} : vector<8x768xf32> to vector<8x384xf32>
    %87 = arith.index_cast %c1_i32 : i32 to index
    %c0_24 = arith.constant 0 : index
    %c0_25 = arith.constant 0 : index
    %88 = vector.load %arg4[%87, %c0_24, %c0_25] : memref<16x8x384xf32, #tpu.memory_space<vmem>>, vector<1x8x384xf32>
    %89 = vector.shape_cast %88 : vector<1x8x384xf32> to vector<8x384xf32>
    %90 = vector.extract_strided_slice %89 {offsets = [0, 0], sizes = [8, 128], strides = [1, 1]} : vector<8x384xf32> to vector<8x128xf32>
    %91 = vector.extract_strided_slice %85 {offsets = [0, 0], sizes = [8, 128], strides = [1, 1]} : vector<8x384xf32> to vector<8x128xf32>
    %92 = arith.addf %90, %91 : vector<8x128xf32>
    %93 = arith.negf %92 : vector<8x128xf32>
    %94 = math.exp %93 : vector<8x128xf32>
    %cst_26 = arith.constant 1.000000e+00 : f32
    %95 = vector.broadcast %cst_26 : f32 to vector<8x128xf32>
    %96 = arith.addf %95, %94 : vector<8x128xf32>
    %97 = arith.divf %95, %96 : vector<8x128xf32>
    %98 = vector.extract_strided_slice %89 {offsets = [0, 128], sizes = [8, 128], strides = [1, 1]} : vector<8x384xf32> to vector<8x128xf32>
    %99 = vector.extract_strided_slice %85 {offsets = [0, 128], sizes = [8, 128], strides = [1, 1]} : vector<8x384xf32> to vector<8x128xf32>
    %100 = arith.addf %98, %99 : vector<8x128xf32>
    %101 = arith.negf %100 : vector<8x128xf32>
    %102 = math.exp %101 : vector<8x128xf32>
    %cst_27 = arith.constant 1.000000e+00 : f32
    %103 = vector.broadcast %cst_27 : f32 to vector<8x128xf32>
    %104 = arith.addf %103, %102 : vector<8x128xf32>
    %105 = arith.divf %103, %104 : vector<8x128xf32>
    %106 = vector.extract_strided_slice %89 {offsets = [0, 256], sizes = [8, 128], strides = [1, 1]} : vector<8x384xf32> to vector<8x128xf32>
    %107 = vector.extract_strided_slice %85 {offsets = [0, 256], sizes = [8, 128], strides = [1, 1]} : vector<8x384xf32> to vector<8x128xf32>
    %108 = arith.mulf %97, %107 : vector<8x128xf32>
    %109 = arith.addf %106, %108 : vector<8x128xf32>
    %110 = math.tanh %109 : vector<8x128xf32>
    %cst_28 = arith.constant 1.000000e+00 : f32
    %111 = vector.broadcast %cst_28 : f32 to vector<8x128xf32>
    %112 = arith.subf %111, %105 : vector<8x128xf32>
    %113 = arith.mulf %112, %110 : vector<8x128xf32>
    %114 = arith.mulf %105, %53 : vector<8x128xf32>
    %115 = arith.addf %113, %114 : vector<8x128xf32>
    %cst_29 = arith.constant dense<0.000000e+00> : vector<8x384xf32>
    %116 = tpu.matmul %115, %9, %cst_29 {dimension_numbers = #tpu.dot_dimension_numbers<[1], [0], [0], [1], [0, 0, 1, 1], [], []>} : vector<8x128xf32>, vector<128x384xf32>, vector<8x384xf32> -> vector<8x384xf32>
    %117 = arith.addf %116, %7 : vector<8x384xf32>
    %118 = vector.extract_strided_slice %117 {offsets = [0, 0], sizes = [8, 128], strides = [1, 1]} : vector<8x384xf32> to vector<8x128xf32>
    %119 = vector.extract_strided_slice %86 {offsets = [0, 0], sizes = [8, 128], strides = [1, 1]} : vector<8x384xf32> to vector<8x128xf32>
    %120 = arith.addf %118, %119 : vector<8x128xf32>
    %121 = arith.negf %120 : vector<8x128xf32>
    %122 = math.exp %121 : vector<8x128xf32>
    %cst_30 = arith.constant 1.000000e+00 : f32
    %123 = vector.broadcast %cst_30 : f32 to vector<8x128xf32>
    %124 = arith.addf %123, %122 : vector<8x128xf32>
    %125 = arith.divf %123, %124 : vector<8x128xf32>
    %126 = vector.extract_strided_slice %117 {offsets = [0, 128], sizes = [8, 128], strides = [1, 1]} : vector<8x384xf32> to vector<8x128xf32>
    %127 = vector.extract_strided_slice %86 {offsets = [0, 128], sizes = [8, 128], strides = [1, 1]} : vector<8x384xf32> to vector<8x128xf32>
    %128 = arith.addf %126, %127 : vector<8x128xf32>
    %129 = arith.negf %128 : vector<8x128xf32>
    %130 = math.exp %129 : vector<8x128xf32>
    %cst_31 = arith.constant 1.000000e+00 : f32
    %131 = vector.broadcast %cst_31 : f32 to vector<8x128xf32>
    %132 = arith.addf %131, %130 : vector<8x128xf32>
    %133 = arith.divf %131, %132 : vector<8x128xf32>
    %134 = vector.extract_strided_slice %117 {offsets = [0, 256], sizes = [8, 128], strides = [1, 1]} : vector<8x384xf32> to vector<8x128xf32>
    %135 = vector.extract_strided_slice %86 {offsets = [0, 256], sizes = [8, 128], strides = [1, 1]} : vector<8x384xf32> to vector<8x128xf32>
    %136 = arith.mulf %125, %135 : vector<8x128xf32>
    %137 = arith.addf %134, %136 : vector<8x128xf32>
    %138 = math.tanh %137 : vector<8x128xf32>
    %cst_32 = arith.constant 1.000000e+00 : f32
    %139 = vector.broadcast %cst_32 : f32 to vector<8x128xf32>
    %140 = arith.subf %139, %133 : vector<8x128xf32>
    %141 = arith.mulf %140, %138 : vector<8x128xf32>
    %142 = arith.mulf %133, %81 : vector<8x128xf32>
    %143 = arith.addf %141, %142 : vector<8x128xf32>
    %c2_i32 = arith.constant 2 : i32
    %144 = tpu.concatenate %115, %143 in 1 : vector<8x128xf32>, vector<8x128xf32> -> vector<8x256xf32>
    %cst_33 = arith.constant dense<0.000000e+00> : vector<8x768xf32>
    %145 = tpu.matmul %144, %8, %cst_33 {dimension_numbers = #tpu.dot_dimension_numbers<[1], [0], [0], [1], [0, 0, 1, 1], [], []>} : vector<8x256xf32>, vector<256x768xf32>, vector<8x768xf32> -> vector<8x768xf32>
    %146 = arith.addf %145, %4 : vector<8x768xf32>
    %147 = vector.extract_strided_slice %146 {offsets = [0, 0], sizes = [8, 384], strides = [1, 1]} : vector<8x768xf32> to vector<8x384xf32>
    %148 = vector.extract_strided_slice %146 {offsets = [0, 384], sizes = [8, 384], strides = [1, 1]} : vector<8x768xf32> to vector<8x384xf32>
    %149 = arith.index_cast %c2_i32 : i32 to index
    %c0_34 = arith.constant 0 : index
    %c0_35 = arith.constant 0 : index
    %150 = vector.load %arg4[%149, %c0_34, %c0_35] : memref<16x8x384xf32, #tpu.memory_space<vmem>>, vector<1x8x384xf32>
    %151 = vector.shape_cast %150 : vector<1x8x384xf32> to vector<8x384xf32>
    %152 = vector.extract_strided_slice %151 {offsets = [0, 0], sizes = [8, 128], strides = [1, 1]} : vector<8x384xf32> to vector<8x128xf32>
    %153 = vector.extract_strided_slice %147 {offsets = [0, 0], sizes = [8, 128], strides = [1, 1]} : vector<8x384xf32> to vector<8x128xf32>
    %154 = arith.addf %152, %153 : vector<8x128xf32>
    %155 = arith.negf %154 : vector<8x128xf32>
    %156 = math.exp %155 : vector<8x128xf32>
    %cst_36 = arith.constant 1.000000e+00 : f32
    %157 = vector.broadcast %cst_36 : f32 to vector<8x128xf32>
    %158 = arith.addf %157, %156 : vector<8x128xf32>
    %159 = arith.divf %157, %158 : vector<8x128xf32>
    %160 = vector.extract_strided_slice %151 {offsets = [0, 128], sizes = [8, 128], strides = [1, 1]} : vector<8x384xf32> to vector<8x128xf32>
    %161 = vector.extract_strided_slice %147 {offsets = [0, 128], sizes = [8, 128], strides = [1, 1]} : vector<8x384xf32> to vector<8x128xf32>
    %162 = arith.addf %160, %161 : vector<8x128xf32>
    %163 = arith.negf %162 : vector<8x128xf32>
    %164 = math.exp %163 : vector<8x128xf32>
    %cst_37 = arith.constant 1.000000e+00 : f32
    %165 = vector.broadcast %cst_37 : f32 to vector<8x128xf32>
    %166 = arith.addf %165, %164 : vector<8x128xf32>
    %167 = arith.divf %165, %166 : vector<8x128xf32>
    %168 = vector.extract_strided_slice %151 {offsets = [0, 256], sizes = [8, 128], strides = [1, 1]} : vector<8x384xf32> to vector<8x128xf32>
    %169 = vector.extract_strided_slice %147 {offsets = [0, 256], sizes = [8, 128], strides = [1, 1]} : vector<8x384xf32> to vector<8x128xf32>
    %170 = arith.mulf %159, %169 : vector<8x128xf32>
    %171 = arith.addf %168, %170 : vector<8x128xf32>
    %172 = math.tanh %171 : vector<8x128xf32>
    %cst_38 = arith.constant 1.000000e+00 : f32
    %173 = vector.broadcast %cst_38 : f32 to vector<8x128xf32>
    %174 = arith.subf %173, %167 : vector<8x128xf32>
    %175 = arith.mulf %174, %172 : vector<8x128xf32>
    %176 = arith.mulf %167, %115 : vector<8x128xf32>
    %177 = arith.addf %175, %176 : vector<8x128xf32>
    %cst_39 = arith.constant dense<0.000000e+00> : vector<8x384xf32>
    %178 = tpu.matmul %177, %9, %cst_39 {dimension_numbers = #tpu.dot_dimension_numbers<[1], [0], [0], [1], [0, 0, 1, 1], [], []>} : vector<8x128xf32>, vector<128x384xf32>, vector<8x384xf32> -> vector<8x384xf32>
    %179 = arith.addf %178, %7 : vector<8x384xf32>
    %180 = vector.extract_strided_slice %179 {offsets = [0, 0], sizes = [8, 128], strides = [1, 1]} : vector<8x384xf32> to vector<8x128xf32>
    %181 = vector.extract_strided_slice %148 {offsets = [0, 0], sizes = [8, 128], strides = [1, 1]} : vector<8x384xf32> to vector<8x128xf32>
    %182 = arith.addf %180, %181 : vector<8x128xf32>
    %183 = arith.negf %182 : vector<8x128xf32>
    %184 = math.exp %183 : vector<8x128xf32>
    %cst_40 = arith.constant 1.000000e+00 : f32
    %185 = vector.broadcast %cst_40 : f32 to vector<8x128xf32>
    %186 = arith.addf %185, %184 : vector<8x128xf32>
    %187 = arith.divf %185, %186 : vector<8x128xf32>
    %188 = vector.extract_strided_slice %179 {offsets = [0, 128], sizes = [8, 128], strides = [1, 1]} : vector<8x384xf32> to vector<8x128xf32>
    %189 = vector.extract_strided_slice %148 {offsets = [0, 128], sizes = [8, 128], strides = [1, 1]} : vector<8x384xf32> to vector<8x128xf32>
    %190 = arith.addf %188, %189 : vector<8x128xf32>
    %191 = arith.negf %190 : vector<8x128xf32>
    %192 = math.exp %191 : vector<8x128xf32>
    %cst_41 = arith.constant 1.000000e+00 : f32
    %193 = vector.broadcast %cst_41 : f32 to vector<8x128xf32>
    %194 = arith.addf %193, %192 : vector<8x128xf32>
    %195 = arith.divf %193, %194 : vector<8x128xf32>
    %196 = vector.extract_strided_slice %179 {offsets = [0, 256], sizes = [8, 128], strides = [1, 1]} : vector<8x384xf32> to vector<8x128xf32>
    %197 = vector.extract_strided_slice %148 {offsets = [0, 256], sizes = [8, 128], strides = [1, 1]} : vector<8x384xf32> to vector<8x128xf32>
    %198 = arith.mulf %187, %197 : vector<8x128xf32>
    %199 = arith.addf %196, %198 : vector<8x128xf32>
    %200 = math.tanh %199 : vector<8x128xf32>
    %cst_42 = arith.constant 1.000000e+00 : f32
    %201 = vector.broadcast %cst_42 : f32 to vector<8x128xf32>
    %202 = arith.subf %201, %195 : vector<8x128xf32>
    %203 = arith.mulf %202, %200 : vector<8x128xf32>
    %204 = arith.mulf %195, %143 : vector<8x128xf32>
    %205 = arith.addf %203, %204 : vector<8x128xf32>
    %c3_i32 = arith.constant 3 : i32
    %206 = tpu.concatenate %177, %205 in 1 : vector<8x128xf32>, vector<8x128xf32> -> vector<8x256xf32>
    %cst_43 = arith.constant dense<0.000000e+00> : vector<8x768xf32>
    %207 = tpu.matmul %206, %8, %cst_43 {dimension_numbers = #tpu.dot_dimension_numbers<[1], [0], [0], [1], [0, 0, 1, 1], [], []>} : vector<8x256xf32>, vector<256x768xf32>, vector<8x768xf32> -> vector<8x768xf32>
    %208 = arith.addf %207, %4 : vector<8x768xf32>
    %209 = vector.extract_strided_slice %208 {offsets = [0, 0], sizes = [8, 384], strides = [1, 1]} : vector<8x768xf32> to vector<8x384xf32>
    %210 = vector.extract_strided_slice %208 {offsets = [0, 384], sizes = [8, 384], strides = [1, 1]} : vector<8x768xf32> to vector<8x384xf32>
    %211 = arith.index_cast %c3_i32 : i32 to index
    %c0_44 = arith.constant 0 : index
    %c0_45 = arith.constant 0 : index
    %212 = vector.load %arg4[%211, %c0_44, %c0_45] : memref<16x8x384xf32, #tpu.memory_space<vmem>>, vector<1x8x384xf32>
    %213 = vector.shape_cast %212 : vector<1x8x384xf32> to vector<8x384xf32>
    %214 = vector.extract_strided_slice %213 {offsets = [0, 0], sizes = [8, 128], strides = [1, 1]} : vector<8x384xf32> to vector<8x128xf32>
    %215 = vector.extract_strided_slice %209 {offsets = [0, 0], sizes = [8, 128], strides = [1, 1]} : vector<8x384xf32> to vector<8x128xf32>
    %216 = arith.addf %214, %215 : vector<8x128xf32>
    %217 = arith.negf %216 : vector<8x128xf32>
    %218 = math.exp %217 : vector<8x128xf32>
    %cst_46 = arith.constant 1.000000e+00 : f32
    %219 = vector.broadcast %cst_46 : f32 to vector<8x128xf32>
    %220 = arith.addf %219, %218 : vector<8x128xf32>
    %221 = arith.divf %219, %220 : vector<8x128xf32>
    %222 = vector.extract_strided_slice %213 {offsets = [0, 128], sizes = [8, 128], strides = [1, 1]} : vector<8x384xf32> to vector<8x128xf32>
    %223 = vector.extract_strided_slice %209 {offsets = [0, 128], sizes = [8, 128], strides = [1, 1]} : vector<8x384xf32> to vector<8x128xf32>
    %224 = arith.addf %222, %223 : vector<8x128xf32>
    %225 = arith.negf %224 : vector<8x128xf32>
    %226 = math.exp %225 : vector<8x128xf32>
    %cst_47 = arith.constant 1.000000e+00 : f32
    %227 = vector.broadcast %cst_47 : f32 to vector<8x128xf32>
    %228 = arith.addf %227, %226 : vector<8x128xf32>
    %229 = arith.divf %227, %228 : vector<8x128xf32>
    %230 = vector.extract_strided_slice %213 {offsets = [0, 256], sizes = [8, 128], strides = [1, 1]} : vector<8x384xf32> to vector<8x128xf32>
    %231 = vector.extract_strided_slice %209 {offsets = [0, 256], sizes = [8, 128], strides = [1, 1]} : vector<8x384xf32> to vector<8x128xf32>
    %232 = arith.mulf %221, %231 : vector<8x128xf32>
    %233 = arith.addf %230, %232 : vector<8x128xf32>
    %234 = math.tanh %233 : vector<8x128xf32>
    %cst_48 = arith.constant 1.000000e+00 : f32
    %235 = vector.broadcast %cst_48 : f32 to vector<8x128xf32>
    %236 = arith.subf %235, %229 : vector<8x128xf32>
    %237 = arith.mulf %236, %234 : vector<8x128xf32>
    %238 = arith.mulf %229, %177 : vector<8x128xf32>
    %239 = arith.addf %237, %238 : vector<8x128xf32>
    %cst_49 = arith.constant dense<0.000000e+00> : vector<8x384xf32>
    %240 = tpu.matmul %239, %9, %cst_49 {dimension_numbers = #tpu.dot_dimension_numbers<[1], [0], [0], [1], [0, 0, 1, 1], [], []>} : vector<8x128xf32>, vector<128x384xf32>, vector<8x384xf32> -> vector<8x384xf32>
    %241 = arith.addf %240, %7 : vector<8x384xf32>
    %242 = vector.extract_strided_slice %241 {offsets = [0, 0], sizes = [8, 128], strides = [1, 1]} : vector<8x384xf32> to vector<8x128xf32>
    %243 = vector.extract_strided_slice %210 {offsets = [0, 0], sizes = [8, 128], strides = [1, 1]} : vector<8x384xf32> to vector<8x128xf32>
    %244 = arith.addf %242, %243 : vector<8x128xf32>
    %245 = arith.negf %244 : vector<8x128xf32>
    %246 = math.exp %245 : vector<8x128xf32>
    %cst_50 = arith.constant 1.000000e+00 : f32
    %247 = vector.broadcast %cst_50 : f32 to vector<8x128xf32>
    %248 = arith.addf %247, %246 : vector<8x128xf32>
    %249 = arith.divf %247, %248 : vector<8x128xf32>
    %250 = vector.extract_strided_slice %241 {offsets = [0, 128], sizes = [8, 128], strides = [1, 1]} : vector<8x384xf32> to vector<8x128xf32>
    %251 = vector.extract_strided_slice %210 {offsets = [0, 128], sizes = [8, 128], strides = [1, 1]} : vector<8x384xf32> to vector<8x128xf32>
    %252 = arith.addf %250, %251 : vector<8x128xf32>
    %253 = arith.negf %252 : vector<8x128xf32>
    %254 = math.exp %253 : vector<8x128xf32>
    %cst_51 = arith.constant 1.000000e+00 : f32
    %255 = vector.broadcast %cst_51 : f32 to vector<8x128xf32>
    %256 = arith.addf %255, %254 : vector<8x128xf32>
    %257 = arith.divf %255, %256 : vector<8x128xf32>
    %258 = vector.extract_strided_slice %241 {offsets = [0, 256], sizes = [8, 128], strides = [1, 1]} : vector<8x384xf32> to vector<8x128xf32>
    %259 = vector.extract_strided_slice %210 {offsets = [0, 256], sizes = [8, 128], strides = [1, 1]} : vector<8x384xf32> to vector<8x128xf32>
    %260 = arith.mulf %249, %259 : vector<8x128xf32>
    %261 = arith.addf %258, %260 : vector<8x128xf32>
    %262 = math.tanh %261 : vector<8x128xf32>
    %cst_52 = arith.constant 1.000000e+00 : f32
    %263 = vector.broadcast %cst_52 : f32 to vector<8x128xf32>
    %264 = arith.subf %263, %257 : vector<8x128xf32>
    %265 = arith.mulf %264, %262 : vector<8x128xf32>
    %266 = arith.mulf %257, %205 : vector<8x128xf32>
    %267 = arith.addf %265, %266 : vector<8x128xf32>
    %c4_i32 = arith.constant 4 : i32
    %268 = tpu.concatenate %239, %267 in 1 : vector<8x128xf32>, vector<8x128xf32> -> vector<8x256xf32>
    %cst_53 = arith.constant dense<0.000000e+00> : vector<8x768xf32>
    %269 = tpu.matmul %268, %8, %cst_53 {dimension_numbers = #tpu.dot_dimension_numbers<[1], [0], [0], [1], [0, 0, 1, 1], [], []>} : vector<8x256xf32>, vector<256x768xf32>, vector<8x768xf32> -> vector<8x768xf32>
    %270 = arith.addf %269, %4 : vector<8x768xf32>
    %271 = vector.extract_strided_slice %270 {offsets = [0, 0], sizes = [8, 384], strides = [1, 1]} : vector<8x768xf32> to vector<8x384xf32>
    %272 = vector.extract_strided_slice %270 {offsets = [0, 384], sizes = [8, 384], strides = [1, 1]} : vector<8x768xf32> to vector<8x384xf32>
    %273 = arith.index_cast %c4_i32 : i32 to index
    %c0_54 = arith.constant 0 : index
    %c0_55 = arith.constant 0 : index
    %274 = vector.load %arg4[%273, %c0_54, %c0_55] : memref<16x8x384xf32, #tpu.memory_space<vmem>>, vector<1x8x384xf32>
    %275 = vector.shape_cast %274 : vector<1x8x384xf32> to vector<8x384xf32>
    %276 = vector.extract_strided_slice %275 {offsets = [0, 0], sizes = [8, 128], strides = [1, 1]} : vector<8x384xf32> to vector<8x128xf32>
    %277 = vector.extract_strided_slice %271 {offsets = [0, 0], sizes = [8, 128], strides = [1, 1]} : vector<8x384xf32> to vector<8x128xf32>
    %278 = arith.addf %276, %277 : vector<8x128xf32>
    %279 = arith.negf %278 : vector<8x128xf32>
    %280 = math.exp %279 : vector<8x128xf32>
    %cst_56 = arith.constant 1.000000e+00 : f32
    %281 = vector.broadcast %cst_56 : f32 to vector<8x128xf32>
    %282 = arith.addf %281, %280 : vector<8x128xf32>
    %283 = arith.divf %281, %282 : vector<8x128xf32>
    %284 = vector.extract_strided_slice %275 {offsets = [0, 128], sizes = [8, 128], strides = [1, 1]} : vector<8x384xf32> to vector<8x128xf32>
    %285 = vector.extract_strided_slice %271 {offsets = [0, 128], sizes = [8, 128], strides = [1, 1]} : vector<8x384xf32> to vector<8x128xf32>
    %286 = arith.addf %284, %285 : vector<8x128xf32>
    %287 = arith.negf %286 : vector<8x128xf32>
    %288 = math.exp %287 : vector<8x128xf32>
    %cst_57 = arith.constant 1.000000e+00 : f32
    %289 = vector.broadcast %cst_57 : f32 to vector<8x128xf32>
    %290 = arith.addf %289, %288 : vector<8x128xf32>
    %291 = arith.divf %289, %290 : vector<8x128xf32>
    %292 = vector.extract_strided_slice %275 {offsets = [0, 256], sizes = [8, 128], strides = [1, 1]} : vector<8x384xf32> to vector<8x128xf32>
    %293 = vector.extract_strided_slice %271 {offsets = [0, 256], sizes = [8, 128], strides = [1, 1]} : vector<8x384xf32> to vector<8x128xf32>
    %294 = arith.mulf %283, %293 : vector<8x128xf32>
    %295 = arith.addf %292, %294 : vector<8x128xf32>
    %296 = math.tanh %295 : vector<8x128xf32>
    %cst_58 = arith.constant 1.000000e+00 : f32
    %297 = vector.broadcast %cst_58 : f32 to vector<8x128xf32>
    %298 = arith.subf %297, %291 : vector<8x128xf32>
    %299 = arith.mulf %298, %296 : vector<8x128xf32>
    %300 = arith.mulf %291, %239 : vector<8x128xf32>
    %301 = arith.addf %299, %300 : vector<8x128xf32>
    %cst_59 = arith.constant dense<0.000000e+00> : vector<8x384xf32>
    %302 = tpu.matmul %301, %9, %cst_59 {dimension_numbers = #tpu.dot_dimension_numbers<[1], [0], [0], [1], [0, 0, 1, 1], [], []>} : vector<8x128xf32>, vector<128x384xf32>, vector<8x384xf32> -> vector<8x384xf32>
    %303 = arith.addf %302, %7 : vector<8x384xf32>
    %304 = vector.extract_strided_slice %303 {offsets = [0, 0], sizes = [8, 128], strides = [1, 1]} : vector<8x384xf32> to vector<8x128xf32>
    %305 = vector.extract_strided_slice %272 {offsets = [0, 0], sizes = [8, 128], strides = [1, 1]} : vector<8x384xf32> to vector<8x128xf32>
    %306 = arith.addf %304, %305 : vector<8x128xf32>
    %307 = arith.negf %306 : vector<8x128xf32>
    %308 = math.exp %307 : vector<8x128xf32>
    %cst_60 = arith.constant 1.000000e+00 : f32
    %309 = vector.broadcast %cst_60 : f32 to vector<8x128xf32>
    %310 = arith.addf %309, %308 : vector<8x128xf32>
    %311 = arith.divf %309, %310 : vector<8x128xf32>
    %312 = vector.extract_strided_slice %303 {offsets = [0, 128], sizes = [8, 128], strides = [1, 1]} : vector<8x384xf32> to vector<8x128xf32>
    %313 = vector.extract_strided_slice %272 {offsets = [0, 128], sizes = [8, 128], strides = [1, 1]} : vector<8x384xf32> to vector<8x128xf32>
    %314 = arith.addf %312, %313 : vector<8x128xf32>
    %315 = arith.negf %314 : vector<8x128xf32>
    %316 = math.exp %315 : vector<8x128xf32>
    %cst_61 = arith.constant 1.000000e+00 : f32
    %317 = vector.broadcast %cst_61 : f32 to vector<8x128xf32>
    %318 = arith.addf %317, %316 : vector<8x128xf32>
    %319 = arith.divf %317, %318 : vector<8x128xf32>
    %320 = vector.extract_strided_slice %303 {offsets = [0, 256], sizes = [8, 128], strides = [1, 1]} : vector<8x384xf32> to vector<8x128xf32>
    %321 = vector.extract_strided_slice %272 {offsets = [0, 256], sizes = [8, 128], strides = [1, 1]} : vector<8x384xf32> to vector<8x128xf32>
    %322 = arith.mulf %311, %321 : vector<8x128xf32>
    %323 = arith.addf %320, %322 : vector<8x128xf32>
    %324 = math.tanh %323 : vector<8x128xf32>
    %cst_62 = arith.constant 1.000000e+00 : f32
    %325 = vector.broadcast %cst_62 : f32 to vector<8x128xf32>
    %326 = arith.subf %325, %319 : vector<8x128xf32>
    %327 = arith.mulf %326, %324 : vector<8x128xf32>
    %328 = arith.mulf %319, %267 : vector<8x128xf32>
    %329 = arith.addf %327, %328 : vector<8x128xf32>
    %c5_i32 = arith.constant 5 : i32
    %330 = tpu.concatenate %301, %329 in 1 : vector<8x128xf32>, vector<8x128xf32> -> vector<8x256xf32>
    %cst_63 = arith.constant dense<0.000000e+00> : vector<8x768xf32>
    %331 = tpu.matmul %330, %8, %cst_63 {dimension_numbers = #tpu.dot_dimension_numbers<[1], [0], [0], [1], [0, 0, 1, 1], [], []>} : vector<8x256xf32>, vector<256x768xf32>, vector<8x768xf32> -> vector<8x768xf32>
    %332 = arith.addf %331, %4 : vector<8x768xf32>
    %333 = vector.extract_strided_slice %332 {offsets = [0, 0], sizes = [8, 384], strides = [1, 1]} : vector<8x768xf32> to vector<8x384xf32>
    %334 = vector.extract_strided_slice %332 {offsets = [0, 384], sizes = [8, 384], strides = [1, 1]} : vector<8x768xf32> to vector<8x384xf32>
    %335 = arith.index_cast %c5_i32 : i32 to index
    %c0_64 = arith.constant 0 : index
    %c0_65 = arith.constant 0 : index
    %336 = vector.load %arg4[%335, %c0_64, %c0_65] : memref<16x8x384xf32, #tpu.memory_space<vmem>>, vector<1x8x384xf32>
    %337 = vector.shape_cast %336 : vector<1x8x384xf32> to vector<8x384xf32>
    %338 = vector.extract_strided_slice %337 {offsets = [0, 0], sizes = [8, 128], strides = [1, 1]} : vector<8x384xf32> to vector<8x128xf32>
    %339 = vector.extract_strided_slice %333 {offsets = [0, 0], sizes = [8, 128], strides = [1, 1]} : vector<8x384xf32> to vector<8x128xf32>
    %340 = arith.addf %338, %339 : vector<8x128xf32>
    %341 = arith.negf %340 : vector<8x128xf32>
    %342 = math.exp %341 : vector<8x128xf32>
    %cst_66 = arith.constant 1.000000e+00 : f32
    %343 = vector.broadcast %cst_66 : f32 to vector<8x128xf32>
    %344 = arith.addf %343, %342 : vector<8x128xf32>
    %345 = arith.divf %343, %344 : vector<8x128xf32>
    %346 = vector.extract_strided_slice %337 {offsets = [0, 128], sizes = [8, 128], strides = [1, 1]} : vector<8x384xf32> to vector<8x128xf32>
    %347 = vector.extract_strided_slice %333 {offsets = [0, 128], sizes = [8, 128], strides = [1, 1]} : vector<8x384xf32> to vector<8x128xf32>
    %348 = arith.addf %346, %347 : vector<8x128xf32>
    %349 = arith.negf %348 : vector<8x128xf32>
    %350 = math.exp %349 : vector<8x128xf32>
    %cst_67 = arith.constant 1.000000e+00 : f32
    %351 = vector.broadcast %cst_67 : f32 to vector<8x128xf32>
    %352 = arith.addf %351, %350 : vector<8x128xf32>
    %353 = arith.divf %351, %352 : vector<8x128xf32>
    %354 = vector.extract_strided_slice %337 {offsets = [0, 256], sizes = [8, 128], strides = [1, 1]} : vector<8x384xf32> to vector<8x128xf32>
    %355 = vector.extract_strided_slice %333 {offsets = [0, 256], sizes = [8, 128], strides = [1, 1]} : vector<8x384xf32> to vector<8x128xf32>
    %356 = arith.mulf %345, %355 : vector<8x128xf32>
    %357 = arith.addf %354, %356 : vector<8x128xf32>
    %358 = math.tanh %357 : vector<8x128xf32>
    %cst_68 = arith.constant 1.000000e+00 : f32
    %359 = vector.broadcast %cst_68 : f32 to vector<8x128xf32>
    %360 = arith.subf %359, %353 : vector<8x128xf32>
    %361 = arith.mulf %360, %358 : vector<8x128xf32>
    %362 = arith.mulf %353, %301 : vector<8x128xf32>
    %363 = arith.addf %361, %362 : vector<8x128xf32>
    %cst_69 = arith.constant dense<0.000000e+00> : vector<8x384xf32>
    %364 = tpu.matmul %363, %9, %cst_69 {dimension_numbers = #tpu.dot_dimension_numbers<[1], [0], [0], [1], [0, 0, 1, 1], [], []>} : vector<8x128xf32>, vector<128x384xf32>, vector<8x384xf32> -> vector<8x384xf32>
    %365 = arith.addf %364, %7 : vector<8x384xf32>
    %366 = vector.extract_strided_slice %365 {offsets = [0, 0], sizes = [8, 128], strides = [1, 1]} : vector<8x384xf32> to vector<8x128xf32>
    %367 = vector.extract_strided_slice %334 {offsets = [0, 0], sizes = [8, 128], strides = [1, 1]} : vector<8x384xf32> to vector<8x128xf32>
    %368 = arith.addf %366, %367 : vector<8x128xf32>
    %369 = arith.negf %368 : vector<8x128xf32>
    %370 = math.exp %369 : vector<8x128xf32>
    %cst_70 = arith.constant 1.000000e+00 : f32
    %371 = vector.broadcast %cst_70 : f32 to vector<8x128xf32>
    %372 = arith.addf %371, %370 : vector<8x128xf32>
    %373 = arith.divf %371, %372 : vector<8x128xf32>
    %374 = vector.extract_strided_slice %365 {offsets = [0, 128], sizes = [8, 128], strides = [1, 1]} : vector<8x384xf32> to vector<8x128xf32>
    %375 = vector.extract_strided_slice %334 {offsets = [0, 128], sizes = [8, 128], strides = [1, 1]} : vector<8x384xf32> to vector<8x128xf32>
    %376 = arith.addf %374, %375 : vector<8x128xf32>
    %377 = arith.negf %376 : vector<8x128xf32>
    %378 = math.exp %377 : vector<8x128xf32>
    %cst_71 = arith.constant 1.000000e+00 : f32
    %379 = vector.broadcast %cst_71 : f32 to vector<8x128xf32>
    %380 = arith.addf %379, %378 : vector<8x128xf32>
    %381 = arith.divf %379, %380 : vector<8x128xf32>
    %382 = vector.extract_strided_slice %365 {offsets = [0, 256], sizes = [8, 128], strides = [1, 1]} : vector<8x384xf32> to vector<8x128xf32>
    %383 = vector.extract_strided_slice %334 {offsets = [0, 256], sizes = [8, 128], strides = [1, 1]} : vector<8x384xf32> to vector<8x128xf32>
    %384 = arith.mulf %373, %383 : vector<8x128xf32>
    %385 = arith.addf %382, %384 : vector<8x128xf32>
    %386 = math.tanh %385 : vector<8x128xf32>
    %cst_72 = arith.constant 1.000000e+00 : f32
    %387 = vector.broadcast %cst_72 : f32 to vector<8x128xf32>
    %388 = arith.subf %387, %381 : vector<8x128xf32>
    %389 = arith.mulf %388, %386 : vector<8x128xf32>
    %390 = arith.mulf %381, %329 : vector<8x128xf32>
    %391 = arith.addf %389, %390 : vector<8x128xf32>
    %c6_i32 = arith.constant 6 : i32
    %392 = tpu.concatenate %363, %391 in 1 : vector<8x128xf32>, vector<8x128xf32> -> vector<8x256xf32>
    %cst_73 = arith.constant dense<0.000000e+00> : vector<8x768xf32>
    %393 = tpu.matmul %392, %8, %cst_73 {dimension_numbers = #tpu.dot_dimension_numbers<[1], [0], [0], [1], [0, 0, 1, 1], [], []>} : vector<8x256xf32>, vector<256x768xf32>, vector<8x768xf32> -> vector<8x768xf32>
    %394 = arith.addf %393, %4 : vector<8x768xf32>
    %395 = vector.extract_strided_slice %394 {offsets = [0, 0], sizes = [8, 384], strides = [1, 1]} : vector<8x768xf32> to vector<8x384xf32>
    %396 = vector.extract_strided_slice %394 {offsets = [0, 384], sizes = [8, 384], strides = [1, 1]} : vector<8x768xf32> to vector<8x384xf32>
    %397 = arith.index_cast %c6_i32 : i32 to index
    %c0_74 = arith.constant 0 : index
    %c0_75 = arith.constant 0 : index
    %398 = vector.load %arg4[%397, %c0_74, %c0_75] : memref<16x8x384xf32, #tpu.memory_space<vmem>>, vector<1x8x384xf32>
    %399 = vector.shape_cast %398 : vector<1x8x384xf32> to vector<8x384xf32>
    %400 = vector.extract_strided_slice %399 {offsets = [0, 0], sizes = [8, 128], strides = [1, 1]} : vector<8x384xf32> to vector<8x128xf32>
    %401 = vector.extract_strided_slice %395 {offsets = [0, 0], sizes = [8, 128], strides = [1, 1]} : vector<8x384xf32> to vector<8x128xf32>
    %402 = arith.addf %400, %401 : vector<8x128xf32>
    %403 = arith.negf %402 : vector<8x128xf32>
    %404 = math.exp %403 : vector<8x128xf32>
    %cst_76 = arith.constant 1.000000e+00 : f32
    %405 = vector.broadcast %cst_76 : f32 to vector<8x128xf32>
    %406 = arith.addf %405, %404 : vector<8x128xf32>
    %407 = arith.divf %405, %406 : vector<8x128xf32>
    %408 = vector.extract_strided_slice %399 {offsets = [0, 128], sizes = [8, 128], strides = [1, 1]} : vector<8x384xf32> to vector<8x128xf32>
    %409 = vector.extract_strided_slice %395 {offsets = [0, 128], sizes = [8, 128], strides = [1, 1]} : vector<8x384xf32> to vector<8x128xf32>
    %410 = arith.addf %408, %409 : vector<8x128xf32>
    %411 = arith.negf %410 : vector<8x128xf32>
    %412 = math.exp %411 : vector<8x128xf32>
    %cst_77 = arith.constant 1.000000e+00 : f32
    %413 = vector.broadcast %cst_77 : f32 to vector<8x128xf32>
    %414 = arith.addf %413, %412 : vector<8x128xf32>
    %415 = arith.divf %413, %414 : vector<8x128xf32>
    %416 = vector.extract_strided_slice %399 {offsets = [0, 256], sizes = [8, 128], strides = [1, 1]} : vector<8x384xf32> to vector<8x128xf32>
    %417 = vector.extract_strided_slice %395 {offsets = [0, 256], sizes = [8, 128], strides = [1, 1]} : vector<8x384xf32> to vector<8x128xf32>
    %418 = arith.mulf %407, %417 : vector<8x128xf32>
    %419 = arith.addf %416, %418 : vector<8x128xf32>
    %420 = math.tanh %419 : vector<8x128xf32>
    %cst_78 = arith.constant 1.000000e+00 : f32
    %421 = vector.broadcast %cst_78 : f32 to vector<8x128xf32>
    %422 = arith.subf %421, %415 : vector<8x128xf32>
    %423 = arith.mulf %422, %420 : vector<8x128xf32>
    %424 = arith.mulf %415, %363 : vector<8x128xf32>
    %425 = arith.addf %423, %424 : vector<8x128xf32>
    %cst_79 = arith.constant dense<0.000000e+00> : vector<8x384xf32>
    %426 = tpu.matmul %425, %9, %cst_79 {dimension_numbers = #tpu.dot_dimension_numbers<[1], [0], [0], [1], [0, 0, 1, 1], [], []>} : vector<8x128xf32>, vector<128x384xf32>, vector<8x384xf32> -> vector<8x384xf32>
    %427 = arith.addf %426, %7 : vector<8x384xf32>
    %428 = vector.extract_strided_slice %427 {offsets = [0, 0], sizes = [8, 128], strides = [1, 1]} : vector<8x384xf32> to vector<8x128xf32>
    %429 = vector.extract_strided_slice %396 {offsets = [0, 0], sizes = [8, 128], strides = [1, 1]} : vector<8x384xf32> to vector<8x128xf32>
    %430 = arith.addf %428, %429 : vector<8x128xf32>
    %431 = arith.negf %430 : vector<8x128xf32>
    %432 = math.exp %431 : vector<8x128xf32>
    %cst_80 = arith.constant 1.000000e+00 : f32
    %433 = vector.broadcast %cst_80 : f32 to vector<8x128xf32>
    %434 = arith.addf %433, %432 : vector<8x128xf32>
    %435 = arith.divf %433, %434 : vector<8x128xf32>
    %436 = vector.extract_strided_slice %427 {offsets = [0, 128], sizes = [8, 128], strides = [1, 1]} : vector<8x384xf32> to vector<8x128xf32>
    %437 = vector.extract_strided_slice %396 {offsets = [0, 128], sizes = [8, 128], strides = [1, 1]} : vector<8x384xf32> to vector<8x128xf32>
    %438 = arith.addf %436, %437 : vector<8x128xf32>
    %439 = arith.negf %438 : vector<8x128xf32>
    %440 = math.exp %439 : vector<8x128xf32>
    %cst_81 = arith.constant 1.000000e+00 : f32
    %441 = vector.broadcast %cst_81 : f32 to vector<8x128xf32>
    %442 = arith.addf %441, %440 : vector<8x128xf32>
    %443 = arith.divf %441, %442 : vector<8x128xf32>
    %444 = vector.extract_strided_slice %427 {offsets = [0, 256], sizes = [8, 128], strides = [1, 1]} : vector<8x384xf32> to vector<8x128xf32>
    %445 = vector.extract_strided_slice %396 {offsets = [0, 256], sizes = [8, 128], strides = [1, 1]} : vector<8x384xf32> to vector<8x128xf32>
    %446 = arith.mulf %435, %445 : vector<8x128xf32>
    %447 = arith.addf %444, %446 : vector<8x128xf32>
    %448 = math.tanh %447 : vector<8x128xf32>
    %cst_82 = arith.constant 1.000000e+00 : f32
    %449 = vector.broadcast %cst_82 : f32 to vector<8x128xf32>
    %450 = arith.subf %449, %443 : vector<8x128xf32>
    %451 = arith.mulf %450, %448 : vector<8x128xf32>
    %452 = arith.mulf %443, %391 : vector<8x128xf32>
    %453 = arith.addf %451, %452 : vector<8x128xf32>
    %c7_i32 = arith.constant 7 : i32
    %454 = tpu.concatenate %425, %453 in 1 : vector<8x128xf32>, vector<8x128xf32> -> vector<8x256xf32>
    %cst_83 = arith.constant dense<0.000000e+00> : vector<8x768xf32>
    %455 = tpu.matmul %454, %8, %cst_83 {dimension_numbers = #tpu.dot_dimension_numbers<[1], [0], [0], [1], [0, 0, 1, 1], [], []>} : vector<8x256xf32>, vector<256x768xf32>, vector<8x768xf32> -> vector<8x768xf32>
    %456 = arith.addf %455, %4 : vector<8x768xf32>
    %457 = vector.extract_strided_slice %456 {offsets = [0, 0], sizes = [8, 384], strides = [1, 1]} : vector<8x768xf32> to vector<8x384xf32>
    %458 = vector.extract_strided_slice %456 {offsets = [0, 384], sizes = [8, 384], strides = [1, 1]} : vector<8x768xf32> to vector<8x384xf32>
    %459 = arith.index_cast %c7_i32 : i32 to index
    %c0_84 = arith.constant 0 : index
    %c0_85 = arith.constant 0 : index
    %460 = vector.load %arg4[%459, %c0_84, %c0_85] : memref<16x8x384xf32, #tpu.memory_space<vmem>>, vector<1x8x384xf32>
    %461 = vector.shape_cast %460 : vector<1x8x384xf32> to vector<8x384xf32>
    %462 = vector.extract_strided_slice %461 {offsets = [0, 0], sizes = [8, 128], strides = [1, 1]} : vector<8x384xf32> to vector<8x128xf32>
    %463 = vector.extract_strided_slice %457 {offsets = [0, 0], sizes = [8, 128], strides = [1, 1]} : vector<8x384xf32> to vector<8x128xf32>
    %464 = arith.addf %462, %463 : vector<8x128xf32>
    %465 = arith.negf %464 : vector<8x128xf32>
    %466 = math.exp %465 : vector<8x128xf32>
    %cst_86 = arith.constant 1.000000e+00 : f32
    %467 = vector.broadcast %cst_86 : f32 to vector<8x128xf32>
    %468 = arith.addf %467, %466 : vector<8x128xf32>
    %469 = arith.divf %467, %468 : vector<8x128xf32>
    %470 = vector.extract_strided_slice %461 {offsets = [0, 128], sizes = [8, 128], strides = [1, 1]} : vector<8x384xf32> to vector<8x128xf32>
    %471 = vector.extract_strided_slice %457 {offsets = [0, 128], sizes = [8, 128], strides = [1, 1]} : vector<8x384xf32> to vector<8x128xf32>
    %472 = arith.addf %470, %471 : vector<8x128xf32>
    %473 = arith.negf %472 : vector<8x128xf32>
    %474 = math.exp %473 : vector<8x128xf32>
    %cst_87 = arith.constant 1.000000e+00 : f32
    %475 = vector.broadcast %cst_87 : f32 to vector<8x128xf32>
    %476 = arith.addf %475, %474 : vector<8x128xf32>
    %477 = arith.divf %475, %476 : vector<8x128xf32>
    %478 = vector.extract_strided_slice %461 {offsets = [0, 256], sizes = [8, 128], strides = [1, 1]} : vector<8x384xf32> to vector<8x128xf32>
    %479 = vector.extract_strided_slice %457 {offsets = [0, 256], sizes = [8, 128], strides = [1, 1]} : vector<8x384xf32> to vector<8x128xf32>
    %480 = arith.mulf %469, %479 : vector<8x128xf32>
    %481 = arith.addf %478, %480 : vector<8x128xf32>
    %482 = math.tanh %481 : vector<8x128xf32>
    %cst_88 = arith.constant 1.000000e+00 : f32
    %483 = vector.broadcast %cst_88 : f32 to vector<8x128xf32>
    %484 = arith.subf %483, %477 : vector<8x128xf32>
    %485 = arith.mulf %484, %482 : vector<8x128xf32>
    %486 = arith.mulf %477, %425 : vector<8x128xf32>
    %487 = arith.addf %485, %486 : vector<8x128xf32>
    %cst_89 = arith.constant dense<0.000000e+00> : vector<8x384xf32>
    %488 = tpu.matmul %487, %9, %cst_89 {dimension_numbers = #tpu.dot_dimension_numbers<[1], [0], [0], [1], [0, 0, 1, 1], [], []>} : vector<8x128xf32>, vector<128x384xf32>, vector<8x384xf32> -> vector<8x384xf32>
    %489 = arith.addf %488, %7 : vector<8x384xf32>
    %490 = vector.extract_strided_slice %489 {offsets = [0, 0], sizes = [8, 128], strides = [1, 1]} : vector<8x384xf32> to vector<8x128xf32>
    %491 = vector.extract_strided_slice %458 {offsets = [0, 0], sizes = [8, 128], strides = [1, 1]} : vector<8x384xf32> to vector<8x128xf32>
    %492 = arith.addf %490, %491 : vector<8x128xf32>
    %493 = arith.negf %492 : vector<8x128xf32>
    %494 = math.exp %493 : vector<8x128xf32>
    %cst_90 = arith.constant 1.000000e+00 : f32
    %495 = vector.broadcast %cst_90 : f32 to vector<8x128xf32>
    %496 = arith.addf %495, %494 : vector<8x128xf32>
    %497 = arith.divf %495, %496 : vector<8x128xf32>
    %498 = vector.extract_strided_slice %489 {offsets = [0, 128], sizes = [8, 128], strides = [1, 1]} : vector<8x384xf32> to vector<8x128xf32>
    %499 = vector.extract_strided_slice %458 {offsets = [0, 128], sizes = [8, 128], strides = [1, 1]} : vector<8x384xf32> to vector<8x128xf32>
    %500 = arith.addf %498, %499 : vector<8x128xf32>
    %501 = arith.negf %500 : vector<8x128xf32>
    %502 = math.exp %501 : vector<8x128xf32>
    %cst_91 = arith.constant 1.000000e+00 : f32
    %503 = vector.broadcast %cst_91 : f32 to vector<8x128xf32>
    %504 = arith.addf %503, %502 : vector<8x128xf32>
    %505 = arith.divf %503, %504 : vector<8x128xf32>
    %506 = vector.extract_strided_slice %489 {offsets = [0, 256], sizes = [8, 128], strides = [1, 1]} : vector<8x384xf32> to vector<8x128xf32>
    %507 = vector.extract_strided_slice %458 {offsets = [0, 256], sizes = [8, 128], strides = [1, 1]} : vector<8x384xf32> to vector<8x128xf32>
    %508 = arith.mulf %497, %507 : vector<8x128xf32>
    %509 = arith.addf %506, %508 : vector<8x128xf32>
    %510 = math.tanh %509 : vector<8x128xf32>
    %cst_92 = arith.constant 1.000000e+00 : f32
    %511 = vector.broadcast %cst_92 : f32 to vector<8x128xf32>
    %512 = arith.subf %511, %505 : vector<8x128xf32>
    %513 = arith.mulf %512, %510 : vector<8x128xf32>
    %514 = arith.mulf %505, %453 : vector<8x128xf32>
    %515 = arith.addf %513, %514 : vector<8x128xf32>
    %c8_i32 = arith.constant 8 : i32
    %516 = tpu.concatenate %487, %515 in 1 : vector<8x128xf32>, vector<8x128xf32> -> vector<8x256xf32>
    %cst_93 = arith.constant dense<0.000000e+00> : vector<8x768xf32>
    %517 = tpu.matmul %516, %8, %cst_93 {dimension_numbers = #tpu.dot_dimension_numbers<[1], [0], [0], [1], [0, 0, 1, 1], [], []>} : vector<8x256xf32>, vector<256x768xf32>, vector<8x768xf32> -> vector<8x768xf32>
    %518 = arith.addf %517, %4 : vector<8x768xf32>
    %519 = vector.extract_strided_slice %518 {offsets = [0, 0], sizes = [8, 384], strides = [1, 1]} : vector<8x768xf32> to vector<8x384xf32>
    %520 = vector.extract_strided_slice %518 {offsets = [0, 384], sizes = [8, 384], strides = [1, 1]} : vector<8x768xf32> to vector<8x384xf32>
    %521 = arith.index_cast %c8_i32 : i32 to index
    %c0_94 = arith.constant 0 : index
    %c0_95 = arith.constant 0 : index
    %522 = vector.load %arg4[%521, %c0_94, %c0_95] : memref<16x8x384xf32, #tpu.memory_space<vmem>>, vector<1x8x384xf32>
    %523 = vector.shape_cast %522 : vector<1x8x384xf32> to vector<8x384xf32>
    %524 = vector.extract_strided_slice %523 {offsets = [0, 0], sizes = [8, 128], strides = [1, 1]} : vector<8x384xf32> to vector<8x128xf32>
    %525 = vector.extract_strided_slice %519 {offsets = [0, 0], sizes = [8, 128], strides = [1, 1]} : vector<8x384xf32> to vector<8x128xf32>
    %526 = arith.addf %524, %525 : vector<8x128xf32>
    %527 = arith.negf %526 : vector<8x128xf32>
    %528 = math.exp %527 : vector<8x128xf32>
    %cst_96 = arith.constant 1.000000e+00 : f32
    %529 = vector.broadcast %cst_96 : f32 to vector<8x128xf32>
    %530 = arith.addf %529, %528 : vector<8x128xf32>
    %531 = arith.divf %529, %530 : vector<8x128xf32>
    %532 = vector.extract_strided_slice %523 {offsets = [0, 128], sizes = [8, 128], strides = [1, 1]} : vector<8x384xf32> to vector<8x128xf32>
    %533 = vector.extract_strided_slice %519 {offsets = [0, 128], sizes = [8, 128], strides = [1, 1]} : vector<8x384xf32> to vector<8x128xf32>
    %534 = arith.addf %532, %533 : vector<8x128xf32>
    %535 = arith.negf %534 : vector<8x128xf32>
    %536 = math.exp %535 : vector<8x128xf32>
    %cst_97 = arith.constant 1.000000e+00 : f32
    %537 = vector.broadcast %cst_97 : f32 to vector<8x128xf32>
    %538 = arith.addf %537, %536 : vector<8x128xf32>
    %539 = arith.divf %537, %538 : vector<8x128xf32>
    %540 = vector.extract_strided_slice %523 {offsets = [0, 256], sizes = [8, 128], strides = [1, 1]} : vector<8x384xf32> to vector<8x128xf32>
    %541 = vector.extract_strided_slice %519 {offsets = [0, 256], sizes = [8, 128], strides = [1, 1]} : vector<8x384xf32> to vector<8x128xf32>
    %542 = arith.mulf %531, %541 : vector<8x128xf32>
    %543 = arith.addf %540, %542 : vector<8x128xf32>
    %544 = math.tanh %543 : vector<8x128xf32>
    %cst_98 = arith.constant 1.000000e+00 : f32
    %545 = vector.broadcast %cst_98 : f32 to vector<8x128xf32>
    %546 = arith.subf %545, %539 : vector<8x128xf32>
    %547 = arith.mulf %546, %544 : vector<8x128xf32>
    %548 = arith.mulf %539, %487 : vector<8x128xf32>
    %549 = arith.addf %547, %548 : vector<8x128xf32>
    %cst_99 = arith.constant dense<0.000000e+00> : vector<8x384xf32>
    %550 = tpu.matmul %549, %9, %cst_99 {dimension_numbers = #tpu.dot_dimension_numbers<[1], [0], [0], [1], [0, 0, 1, 1], [], []>} : vector<8x128xf32>, vector<128x384xf32>, vector<8x384xf32> -> vector<8x384xf32>
    %551 = arith.addf %550, %7 : vector<8x384xf32>
    %552 = vector.extract_strided_slice %551 {offsets = [0, 0], sizes = [8, 128], strides = [1, 1]} : vector<8x384xf32> to vector<8x128xf32>
    %553 = vector.extract_strided_slice %520 {offsets = [0, 0], sizes = [8, 128], strides = [1, 1]} : vector<8x384xf32> to vector<8x128xf32>
    %554 = arith.addf %552, %553 : vector<8x128xf32>
    %555 = arith.negf %554 : vector<8x128xf32>
    %556 = math.exp %555 : vector<8x128xf32>
    %cst_100 = arith.constant 1.000000e+00 : f32
    %557 = vector.broadcast %cst_100 : f32 to vector<8x128xf32>
    %558 = arith.addf %557, %556 : vector<8x128xf32>
    %559 = arith.divf %557, %558 : vector<8x128xf32>
    %560 = vector.extract_strided_slice %551 {offsets = [0, 128], sizes = [8, 128], strides = [1, 1]} : vector<8x384xf32> to vector<8x128xf32>
    %561 = vector.extract_strided_slice %520 {offsets = [0, 128], sizes = [8, 128], strides = [1, 1]} : vector<8x384xf32> to vector<8x128xf32>
    %562 = arith.addf %560, %561 : vector<8x128xf32>
    %563 = arith.negf %562 : vector<8x128xf32>
    %564 = math.exp %563 : vector<8x128xf32>
    %cst_101 = arith.constant 1.000000e+00 : f32
    %565 = vector.broadcast %cst_101 : f32 to vector<8x128xf32>
    %566 = arith.addf %565, %564 : vector<8x128xf32>
    %567 = arith.divf %565, %566 : vector<8x128xf32>
    %568 = vector.extract_strided_slice %551 {offsets = [0, 256], sizes = [8, 128], strides = [1, 1]} : vector<8x384xf32> to vector<8x128xf32>
    %569 = vector.extract_strided_slice %520 {offsets = [0, 256], sizes = [8, 128], strides = [1, 1]} : vector<8x384xf32> to vector<8x128xf32>
    %570 = arith.mulf %559, %569 : vector<8x128xf32>
    %571 = arith.addf %568, %570 : vector<8x128xf32>
    %572 = math.tanh %571 : vector<8x128xf32>
    %cst_102 = arith.constant 1.000000e+00 : f32
    %573 = vector.broadcast %cst_102 : f32 to vector<8x128xf32>
    %574 = arith.subf %573, %567 : vector<8x128xf32>
    %575 = arith.mulf %574, %572 : vector<8x128xf32>
    %576 = arith.mulf %567, %515 : vector<8x128xf32>
    %577 = arith.addf %575, %576 : vector<8x128xf32>
    %c9_i32 = arith.constant 9 : i32
    %578 = tpu.concatenate %549, %577 in 1 : vector<8x128xf32>, vector<8x128xf32> -> vector<8x256xf32>
    %cst_103 = arith.constant dense<0.000000e+00> : vector<8x768xf32>
    %579 = tpu.matmul %578, %8, %cst_103 {dimension_numbers = #tpu.dot_dimension_numbers<[1], [0], [0], [1], [0, 0, 1, 1], [], []>} : vector<8x256xf32>, vector<256x768xf32>, vector<8x768xf32> -> vector<8x768xf32>
    %580 = arith.addf %579, %4 : vector<8x768xf32>
    %581 = vector.extract_strided_slice %580 {offsets = [0, 0], sizes = [8, 384], strides = [1, 1]} : vector<8x768xf32> to vector<8x384xf32>
    %582 = vector.extract_strided_slice %580 {offsets = [0, 384], sizes = [8, 384], strides = [1, 1]} : vector<8x768xf32> to vector<8x384xf32>
    %583 = arith.index_cast %c9_i32 : i32 to index
    %c0_104 = arith.constant 0 : index
    %c0_105 = arith.constant 0 : index
    %584 = vector.load %arg4[%583, %c0_104, %c0_105] : memref<16x8x384xf32, #tpu.memory_space<vmem>>, vector<1x8x384xf32>
    %585 = vector.shape_cast %584 : vector<1x8x384xf32> to vector<8x384xf32>
    %586 = vector.extract_strided_slice %585 {offsets = [0, 0], sizes = [8, 128], strides = [1, 1]} : vector<8x384xf32> to vector<8x128xf32>
    %587 = vector.extract_strided_slice %581 {offsets = [0, 0], sizes = [8, 128], strides = [1, 1]} : vector<8x384xf32> to vector<8x128xf32>
    %588 = arith.addf %586, %587 : vector<8x128xf32>
    %589 = arith.negf %588 : vector<8x128xf32>
    %590 = math.exp %589 : vector<8x128xf32>
    %cst_106 = arith.constant 1.000000e+00 : f32
    %591 = vector.broadcast %cst_106 : f32 to vector<8x128xf32>
    %592 = arith.addf %591, %590 : vector<8x128xf32>
    %593 = arith.divf %591, %592 : vector<8x128xf32>
    %594 = vector.extract_strided_slice %585 {offsets = [0, 128], sizes = [8, 128], strides = [1, 1]} : vector<8x384xf32> to vector<8x128xf32>
    %595 = vector.extract_strided_slice %581 {offsets = [0, 128], sizes = [8, 128], strides = [1, 1]} : vector<8x384xf32> to vector<8x128xf32>
    %596 = arith.addf %594, %595 : vector<8x128xf32>
    %597 = arith.negf %596 : vector<8x128xf32>
    %598 = math.exp %597 : vector<8x128xf32>
    %cst_107 = arith.constant 1.000000e+00 : f32
    %599 = vector.broadcast %cst_107 : f32 to vector<8x128xf32>
    %600 = arith.addf %599, %598 : vector<8x128xf32>
    %601 = arith.divf %599, %600 : vector<8x128xf32>
    %602 = vector.extract_strided_slice %585 {offsets = [0, 256], sizes = [8, 128], strides = [1, 1]} : vector<8x384xf32> to vector<8x128xf32>
    %603 = vector.extract_strided_slice %581 {offsets = [0, 256], sizes = [8, 128], strides = [1, 1]} : vector<8x384xf32> to vector<8x128xf32>
    %604 = arith.mulf %593, %603 : vector<8x128xf32>
    %605 = arith.addf %602, %604 : vector<8x128xf32>
    %606 = math.tanh %605 : vector<8x128xf32>
    %cst_108 = arith.constant 1.000000e+00 : f32
    %607 = vector.broadcast %cst_108 : f32 to vector<8x128xf32>
    %608 = arith.subf %607, %601 : vector<8x128xf32>
    %609 = arith.mulf %608, %606 : vector<8x128xf32>
    %610 = arith.mulf %601, %549 : vector<8x128xf32>
    %611 = arith.addf %609, %610 : vector<8x128xf32>
    %cst_109 = arith.constant dense<0.000000e+00> : vector<8x384xf32>
    %612 = tpu.matmul %611, %9, %cst_109 {dimension_numbers = #tpu.dot_dimension_numbers<[1], [0], [0], [1], [0, 0, 1, 1], [], []>} : vector<8x128xf32>, vector<128x384xf32>, vector<8x384xf32> -> vector<8x384xf32>
    %613 = arith.addf %612, %7 : vector<8x384xf32>
    %614 = vector.extract_strided_slice %613 {offsets = [0, 0], sizes = [8, 128], strides = [1, 1]} : vector<8x384xf32> to vector<8x128xf32>
    %615 = vector.extract_strided_slice %582 {offsets = [0, 0], sizes = [8, 128], strides = [1, 1]} : vector<8x384xf32> to vector<8x128xf32>
    %616 = arith.addf %614, %615 : vector<8x128xf32>
    %617 = arith.negf %616 : vector<8x128xf32>
    %618 = math.exp %617 : vector<8x128xf32>
    %cst_110 = arith.constant 1.000000e+00 : f32
    %619 = vector.broadcast %cst_110 : f32 to vector<8x128xf32>
    %620 = arith.addf %619, %618 : vector<8x128xf32>
    %621 = arith.divf %619, %620 : vector<8x128xf32>
    %622 = vector.extract_strided_slice %613 {offsets = [0, 128], sizes = [8, 128], strides = [1, 1]} : vector<8x384xf32> to vector<8x128xf32>
    %623 = vector.extract_strided_slice %582 {offsets = [0, 128], sizes = [8, 128], strides = [1, 1]} : vector<8x384xf32> to vector<8x128xf32>
    %624 = arith.addf %622, %623 : vector<8x128xf32>
    %625 = arith.negf %624 : vector<8x128xf32>
    %626 = math.exp %625 : vector<8x128xf32>
    %cst_111 = arith.constant 1.000000e+00 : f32
    %627 = vector.broadcast %cst_111 : f32 to vector<8x128xf32>
    %628 = arith.addf %627, %626 : vector<8x128xf32>
    %629 = arith.divf %627, %628 : vector<8x128xf32>
    %630 = vector.extract_strided_slice %613 {offsets = [0, 256], sizes = [8, 128], strides = [1, 1]} : vector<8x384xf32> to vector<8x128xf32>
    %631 = vector.extract_strided_slice %582 {offsets = [0, 256], sizes = [8, 128], strides = [1, 1]} : vector<8x384xf32> to vector<8x128xf32>
    %632 = arith.mulf %621, %631 : vector<8x128xf32>
    %633 = arith.addf %630, %632 : vector<8x128xf32>
    %634 = math.tanh %633 : vector<8x128xf32>
    %cst_112 = arith.constant 1.000000e+00 : f32
    %635 = vector.broadcast %cst_112 : f32 to vector<8x128xf32>
    %636 = arith.subf %635, %629 : vector<8x128xf32>
    %637 = arith.mulf %636, %634 : vector<8x128xf32>
    %638 = arith.mulf %629, %577 : vector<8x128xf32>
    %639 = arith.addf %637, %638 : vector<8x128xf32>
    %c10_i32 = arith.constant 10 : i32
    %640 = tpu.concatenate %611, %639 in 1 : vector<8x128xf32>, vector<8x128xf32> -> vector<8x256xf32>
    %cst_113 = arith.constant dense<0.000000e+00> : vector<8x768xf32>
    %641 = tpu.matmul %640, %8, %cst_113 {dimension_numbers = #tpu.dot_dimension_numbers<[1], [0], [0], [1], [0, 0, 1, 1], [], []>} : vector<8x256xf32>, vector<256x768xf32>, vector<8x768xf32> -> vector<8x768xf32>
    %642 = arith.addf %641, %4 : vector<8x768xf32>
    %643 = vector.extract_strided_slice %642 {offsets = [0, 0], sizes = [8, 384], strides = [1, 1]} : vector<8x768xf32> to vector<8x384xf32>
    %644 = vector.extract_strided_slice %642 {offsets = [0, 384], sizes = [8, 384], strides = [1, 1]} : vector<8x768xf32> to vector<8x384xf32>
    %645 = arith.index_cast %c10_i32 : i32 to index
    %c0_114 = arith.constant 0 : index
    %c0_115 = arith.constant 0 : index
    %646 = vector.load %arg4[%645, %c0_114, %c0_115] : memref<16x8x384xf32, #tpu.memory_space<vmem>>, vector<1x8x384xf32>
    %647 = vector.shape_cast %646 : vector<1x8x384xf32> to vector<8x384xf32>
    %648 = vector.extract_strided_slice %647 {offsets = [0, 0], sizes = [8, 128], strides = [1, 1]} : vector<8x384xf32> to vector<8x128xf32>
    %649 = vector.extract_strided_slice %643 {offsets = [0, 0], sizes = [8, 128], strides = [1, 1]} : vector<8x384xf32> to vector<8x128xf32>
    %650 = arith.addf %648, %649 : vector<8x128xf32>
    %651 = arith.negf %650 : vector<8x128xf32>
    %652 = math.exp %651 : vector<8x128xf32>
    %cst_116 = arith.constant 1.000000e+00 : f32
    %653 = vector.broadcast %cst_116 : f32 to vector<8x128xf32>
    %654 = arith.addf %653, %652 : vector<8x128xf32>
    %655 = arith.divf %653, %654 : vector<8x128xf32>
    %656 = vector.extract_strided_slice %647 {offsets = [0, 128], sizes = [8, 128], strides = [1, 1]} : vector<8x384xf32> to vector<8x128xf32>
    %657 = vector.extract_strided_slice %643 {offsets = [0, 128], sizes = [8, 128], strides = [1, 1]} : vector<8x384xf32> to vector<8x128xf32>
    %658 = arith.addf %656, %657 : vector<8x128xf32>
    %659 = arith.negf %658 : vector<8x128xf32>
    %660 = math.exp %659 : vector<8x128xf32>
    %cst_117 = arith.constant 1.000000e+00 : f32
    %661 = vector.broadcast %cst_117 : f32 to vector<8x128xf32>
    %662 = arith.addf %661, %660 : vector<8x128xf32>
    %663 = arith.divf %661, %662 : vector<8x128xf32>
    %664 = vector.extract_strided_slice %647 {offsets = [0, 256], sizes = [8, 128], strides = [1, 1]} : vector<8x384xf32> to vector<8x128xf32>
    %665 = vector.extract_strided_slice %643 {offsets = [0, 256], sizes = [8, 128], strides = [1, 1]} : vector<8x384xf32> to vector<8x128xf32>
    %666 = arith.mulf %655, %665 : vector<8x128xf32>
    %667 = arith.addf %664, %666 : vector<8x128xf32>
    %668 = math.tanh %667 : vector<8x128xf32>
    %cst_118 = arith.constant 1.000000e+00 : f32
    %669 = vector.broadcast %cst_118 : f32 to vector<8x128xf32>
    %670 = arith.subf %669, %663 : vector<8x128xf32>
    %671 = arith.mulf %670, %668 : vector<8x128xf32>
    %672 = arith.mulf %663, %611 : vector<8x128xf32>
    %673 = arith.addf %671, %672 : vector<8x128xf32>
    %cst_119 = arith.constant dense<0.000000e+00> : vector<8x384xf32>
    %674 = tpu.matmul %673, %9, %cst_119 {dimension_numbers = #tpu.dot_dimension_numbers<[1], [0], [0], [1], [0, 0, 1, 1], [], []>} : vector<8x128xf32>, vector<128x384xf32>, vector<8x384xf32> -> vector<8x384xf32>
    %675 = arith.addf %674, %7 : vector<8x384xf32>
    %676 = vector.extract_strided_slice %675 {offsets = [0, 0], sizes = [8, 128], strides = [1, 1]} : vector<8x384xf32> to vector<8x128xf32>
    %677 = vector.extract_strided_slice %644 {offsets = [0, 0], sizes = [8, 128], strides = [1, 1]} : vector<8x384xf32> to vector<8x128xf32>
    %678 = arith.addf %676, %677 : vector<8x128xf32>
    %679 = arith.negf %678 : vector<8x128xf32>
    %680 = math.exp %679 : vector<8x128xf32>
    %cst_120 = arith.constant 1.000000e+00 : f32
    %681 = vector.broadcast %cst_120 : f32 to vector<8x128xf32>
    %682 = arith.addf %681, %680 : vector<8x128xf32>
    %683 = arith.divf %681, %682 : vector<8x128xf32>
    %684 = vector.extract_strided_slice %675 {offsets = [0, 128], sizes = [8, 128], strides = [1, 1]} : vector<8x384xf32> to vector<8x128xf32>
    %685 = vector.extract_strided_slice %644 {offsets = [0, 128], sizes = [8, 128], strides = [1, 1]} : vector<8x384xf32> to vector<8x128xf32>
    %686 = arith.addf %684, %685 : vector<8x128xf32>
    %687 = arith.negf %686 : vector<8x128xf32>
    %688 = math.exp %687 : vector<8x128xf32>
    %cst_121 = arith.constant 1.000000e+00 : f32
    %689 = vector.broadcast %cst_121 : f32 to vector<8x128xf32>
    %690 = arith.addf %689, %688 : vector<8x128xf32>
    %691 = arith.divf %689, %690 : vector<8x128xf32>
    %692 = vector.extract_strided_slice %675 {offsets = [0, 256], sizes = [8, 128], strides = [1, 1]} : vector<8x384xf32> to vector<8x128xf32>
    %693 = vector.extract_strided_slice %644 {offsets = [0, 256], sizes = [8, 128], strides = [1, 1]} : vector<8x384xf32> to vector<8x128xf32>
    %694 = arith.mulf %683, %693 : vector<8x128xf32>
    %695 = arith.addf %692, %694 : vector<8x128xf32>
    %696 = math.tanh %695 : vector<8x128xf32>
    %cst_122 = arith.constant 1.000000e+00 : f32
    %697 = vector.broadcast %cst_122 : f32 to vector<8x128xf32>
    %698 = arith.subf %697, %691 : vector<8x128xf32>
    %699 = arith.mulf %698, %696 : vector<8x128xf32>
    %700 = arith.mulf %691, %639 : vector<8x128xf32>
    %701 = arith.addf %699, %700 : vector<8x128xf32>
    %c11_i32 = arith.constant 11 : i32
    %702 = tpu.concatenate %673, %701 in 1 : vector<8x128xf32>, vector<8x128xf32> -> vector<8x256xf32>
    %cst_123 = arith.constant dense<0.000000e+00> : vector<8x768xf32>
    %703 = tpu.matmul %702, %8, %cst_123 {dimension_numbers = #tpu.dot_dimension_numbers<[1], [0], [0], [1], [0, 0, 1, 1], [], []>} : vector<8x256xf32>, vector<256x768xf32>, vector<8x768xf32> -> vector<8x768xf32>
    %704 = arith.addf %703, %4 : vector<8x768xf32>
    %705 = vector.extract_strided_slice %704 {offsets = [0, 0], sizes = [8, 384], strides = [1, 1]} : vector<8x768xf32> to vector<8x384xf32>
    %706 = vector.extract_strided_slice %704 {offsets = [0, 384], sizes = [8, 384], strides = [1, 1]} : vector<8x768xf32> to vector<8x384xf32>
    %707 = arith.index_cast %c11_i32 : i32 to index
    %c0_124 = arith.constant 0 : index
    %c0_125 = arith.constant 0 : index
    %708 = vector.load %arg4[%707, %c0_124, %c0_125] : memref<16x8x384xf32, #tpu.memory_space<vmem>>, vector<1x8x384xf32>
    %709 = vector.shape_cast %708 : vector<1x8x384xf32> to vector<8x384xf32>
    %710 = vector.extract_strided_slice %709 {offsets = [0, 0], sizes = [8, 128], strides = [1, 1]} : vector<8x384xf32> to vector<8x128xf32>
    %711 = vector.extract_strided_slice %705 {offsets = [0, 0], sizes = [8, 128], strides = [1, 1]} : vector<8x384xf32> to vector<8x128xf32>
    %712 = arith.addf %710, %711 : vector<8x128xf32>
    %713 = arith.negf %712 : vector<8x128xf32>
    %714 = math.exp %713 : vector<8x128xf32>
    %cst_126 = arith.constant 1.000000e+00 : f32
    %715 = vector.broadcast %cst_126 : f32 to vector<8x128xf32>
    %716 = arith.addf %715, %714 : vector<8x128xf32>
    %717 = arith.divf %715, %716 : vector<8x128xf32>
    %718 = vector.extract_strided_slice %709 {offsets = [0, 128], sizes = [8, 128], strides = [1, 1]} : vector<8x384xf32> to vector<8x128xf32>
    %719 = vector.extract_strided_slice %705 {offsets = [0, 128], sizes = [8, 128], strides = [1, 1]} : vector<8x384xf32> to vector<8x128xf32>
    %720 = arith.addf %718, %719 : vector<8x128xf32>
    %721 = arith.negf %720 : vector<8x128xf32>
    %722 = math.exp %721 : vector<8x128xf32>
    %cst_127 = arith.constant 1.000000e+00 : f32
    %723 = vector.broadcast %cst_127 : f32 to vector<8x128xf32>
    %724 = arith.addf %723, %722 : vector<8x128xf32>
    %725 = arith.divf %723, %724 : vector<8x128xf32>
    %726 = vector.extract_strided_slice %709 {offsets = [0, 256], sizes = [8, 128], strides = [1, 1]} : vector<8x384xf32> to vector<8x128xf32>
    %727 = vector.extract_strided_slice %705 {offsets = [0, 256], sizes = [8, 128], strides = [1, 1]} : vector<8x384xf32> to vector<8x128xf32>
    %728 = arith.mulf %717, %727 : vector<8x128xf32>
    %729 = arith.addf %726, %728 : vector<8x128xf32>
    %730 = math.tanh %729 : vector<8x128xf32>
    %cst_128 = arith.constant 1.000000e+00 : f32
    %731 = vector.broadcast %cst_128 : f32 to vector<8x128xf32>
    %732 = arith.subf %731, %725 : vector<8x128xf32>
    %733 = arith.mulf %732, %730 : vector<8x128xf32>
    %734 = arith.mulf %725, %673 : vector<8x128xf32>
    %735 = arith.addf %733, %734 : vector<8x128xf32>
    %cst_129 = arith.constant dense<0.000000e+00> : vector<8x384xf32>
    %736 = tpu.matmul %735, %9, %cst_129 {dimension_numbers = #tpu.dot_dimension_numbers<[1], [0], [0], [1], [0, 0, 1, 1], [], []>} : vector<8x128xf32>, vector<128x384xf32>, vector<8x384xf32> -> vector<8x384xf32>
    %737 = arith.addf %736, %7 : vector<8x384xf32>
    %738 = vector.extract_strided_slice %737 {offsets = [0, 0], sizes = [8, 128], strides = [1, 1]} : vector<8x384xf32> to vector<8x128xf32>
    %739 = vector.extract_strided_slice %706 {offsets = [0, 0], sizes = [8, 128], strides = [1, 1]} : vector<8x384xf32> to vector<8x128xf32>
    %740 = arith.addf %738, %739 : vector<8x128xf32>
    %741 = arith.negf %740 : vector<8x128xf32>
    %742 = math.exp %741 : vector<8x128xf32>
    %cst_130 = arith.constant 1.000000e+00 : f32
    %743 = vector.broadcast %cst_130 : f32 to vector<8x128xf32>
    %744 = arith.addf %743, %742 : vector<8x128xf32>
    %745 = arith.divf %743, %744 : vector<8x128xf32>
    %746 = vector.extract_strided_slice %737 {offsets = [0, 128], sizes = [8, 128], strides = [1, 1]} : vector<8x384xf32> to vector<8x128xf32>
    %747 = vector.extract_strided_slice %706 {offsets = [0, 128], sizes = [8, 128], strides = [1, 1]} : vector<8x384xf32> to vector<8x128xf32>
    %748 = arith.addf %746, %747 : vector<8x128xf32>
    %749 = arith.negf %748 : vector<8x128xf32>
    %750 = math.exp %749 : vector<8x128xf32>
    %cst_131 = arith.constant 1.000000e+00 : f32
    %751 = vector.broadcast %cst_131 : f32 to vector<8x128xf32>
    %752 = arith.addf %751, %750 : vector<8x128xf32>
    %753 = arith.divf %751, %752 : vector<8x128xf32>
    %754 = vector.extract_strided_slice %737 {offsets = [0, 256], sizes = [8, 128], strides = [1, 1]} : vector<8x384xf32> to vector<8x128xf32>
    %755 = vector.extract_strided_slice %706 {offsets = [0, 256], sizes = [8, 128], strides = [1, 1]} : vector<8x384xf32> to vector<8x128xf32>
    %756 = arith.mulf %745, %755 : vector<8x128xf32>
    %757 = arith.addf %754, %756 : vector<8x128xf32>
    %758 = math.tanh %757 : vector<8x128xf32>
    %cst_132 = arith.constant 1.000000e+00 : f32
    %759 = vector.broadcast %cst_132 : f32 to vector<8x128xf32>
    %760 = arith.subf %759, %753 : vector<8x128xf32>
    %761 = arith.mulf %760, %758 : vector<8x128xf32>
    %762 = arith.mulf %753, %701 : vector<8x128xf32>
    %763 = arith.addf %761, %762 : vector<8x128xf32>
    %c12_i32 = arith.constant 12 : i32
    %764 = tpu.concatenate %735, %763 in 1 : vector<8x128xf32>, vector<8x128xf32> -> vector<8x256xf32>
    %cst_133 = arith.constant dense<0.000000e+00> : vector<8x768xf32>
    %765 = tpu.matmul %764, %8, %cst_133 {dimension_numbers = #tpu.dot_dimension_numbers<[1], [0], [0], [1], [0, 0, 1, 1], [], []>} : vector<8x256xf32>, vector<256x768xf32>, vector<8x768xf32> -> vector<8x768xf32>
    %766 = arith.addf %765, %4 : vector<8x768xf32>
    %767 = vector.extract_strided_slice %766 {offsets = [0, 0], sizes = [8, 384], strides = [1, 1]} : vector<8x768xf32> to vector<8x384xf32>
    %768 = vector.extract_strided_slice %766 {offsets = [0, 384], sizes = [8, 384], strides = [1, 1]} : vector<8x768xf32> to vector<8x384xf32>
    %769 = arith.index_cast %c12_i32 : i32 to index
    %c0_134 = arith.constant 0 : index
    %c0_135 = arith.constant 0 : index
    %770 = vector.load %arg4[%769, %c0_134, %c0_135] : memref<16x8x384xf32, #tpu.memory_space<vmem>>, vector<1x8x384xf32>
    %771 = vector.shape_cast %770 : vector<1x8x384xf32> to vector<8x384xf32>
    %772 = vector.extract_strided_slice %771 {offsets = [0, 0], sizes = [8, 128], strides = [1, 1]} : vector<8x384xf32> to vector<8x128xf32>
    %773 = vector.extract_strided_slice %767 {offsets = [0, 0], sizes = [8, 128], strides = [1, 1]} : vector<8x384xf32> to vector<8x128xf32>
    %774 = arith.addf %772, %773 : vector<8x128xf32>
    %775 = arith.negf %774 : vector<8x128xf32>
    %776 = math.exp %775 : vector<8x128xf32>
    %cst_136 = arith.constant 1.000000e+00 : f32
    %777 = vector.broadcast %cst_136 : f32 to vector<8x128xf32>
    %778 = arith.addf %777, %776 : vector<8x128xf32>
    %779 = arith.divf %777, %778 : vector<8x128xf32>
    %780 = vector.extract_strided_slice %771 {offsets = [0, 128], sizes = [8, 128], strides = [1, 1]} : vector<8x384xf32> to vector<8x128xf32>
    %781 = vector.extract_strided_slice %767 {offsets = [0, 128], sizes = [8, 128], strides = [1, 1]} : vector<8x384xf32> to vector<8x128xf32>
    %782 = arith.addf %780, %781 : vector<8x128xf32>
    %783 = arith.negf %782 : vector<8x128xf32>
    %784 = math.exp %783 : vector<8x128xf32>
    %cst_137 = arith.constant 1.000000e+00 : f32
    %785 = vector.broadcast %cst_137 : f32 to vector<8x128xf32>
    %786 = arith.addf %785, %784 : vector<8x128xf32>
    %787 = arith.divf %785, %786 : vector<8x128xf32>
    %788 = vector.extract_strided_slice %771 {offsets = [0, 256], sizes = [8, 128], strides = [1, 1]} : vector<8x384xf32> to vector<8x128xf32>
    %789 = vector.extract_strided_slice %767 {offsets = [0, 256], sizes = [8, 128], strides = [1, 1]} : vector<8x384xf32> to vector<8x128xf32>
    %790 = arith.mulf %779, %789 : vector<8x128xf32>
    %791 = arith.addf %788, %790 : vector<8x128xf32>
    %792 = math.tanh %791 : vector<8x128xf32>
    %cst_138 = arith.constant 1.000000e+00 : f32
    %793 = vector.broadcast %cst_138 : f32 to vector<8x128xf32>
    %794 = arith.subf %793, %787 : vector<8x128xf32>
    %795 = arith.mulf %794, %792 : vector<8x128xf32>
    %796 = arith.mulf %787, %735 : vector<8x128xf32>
    %797 = arith.addf %795, %796 : vector<8x128xf32>
    %cst_139 = arith.constant dense<0.000000e+00> : vector<8x384xf32>
    %798 = tpu.matmul %797, %9, %cst_139 {dimension_numbers = #tpu.dot_dimension_numbers<[1], [0], [0], [1], [0, 0, 1, 1], [], []>} : vector<8x128xf32>, vector<128x384xf32>, vector<8x384xf32> -> vector<8x384xf32>
    %799 = arith.addf %798, %7 : vector<8x384xf32>
    %800 = vector.extract_strided_slice %799 {offsets = [0, 0], sizes = [8, 128], strides = [1, 1]} : vector<8x384xf32> to vector<8x128xf32>
    %801 = vector.extract_strided_slice %768 {offsets = [0, 0], sizes = [8, 128], strides = [1, 1]} : vector<8x384xf32> to vector<8x128xf32>
    %802 = arith.addf %800, %801 : vector<8x128xf32>
    %803 = arith.negf %802 : vector<8x128xf32>
    %804 = math.exp %803 : vector<8x128xf32>
    %cst_140 = arith.constant 1.000000e+00 : f32
    %805 = vector.broadcast %cst_140 : f32 to vector<8x128xf32>
    %806 = arith.addf %805, %804 : vector<8x128xf32>
    %807 = arith.divf %805, %806 : vector<8x128xf32>
    %808 = vector.extract_strided_slice %799 {offsets = [0, 128], sizes = [8, 128], strides = [1, 1]} : vector<8x384xf32> to vector<8x128xf32>
    %809 = vector.extract_strided_slice %768 {offsets = [0, 128], sizes = [8, 128], strides = [1, 1]} : vector<8x384xf32> to vector<8x128xf32>
    %810 = arith.addf %808, %809 : vector<8x128xf32>
    %811 = arith.negf %810 : vector<8x128xf32>
    %812 = math.exp %811 : vector<8x128xf32>
    %cst_141 = arith.constant 1.000000e+00 : f32
    %813 = vector.broadcast %cst_141 : f32 to vector<8x128xf32>
    %814 = arith.addf %813, %812 : vector<8x128xf32>
    %815 = arith.divf %813, %814 : vector<8x128xf32>
    %816 = vector.extract_strided_slice %799 {offsets = [0, 256], sizes = [8, 128], strides = [1, 1]} : vector<8x384xf32> to vector<8x128xf32>
    %817 = vector.extract_strided_slice %768 {offsets = [0, 256], sizes = [8, 128], strides = [1, 1]} : vector<8x384xf32> to vector<8x128xf32>
    %818 = arith.mulf %807, %817 : vector<8x128xf32>
    %819 = arith.addf %816, %818 : vector<8x128xf32>
    %820 = math.tanh %819 : vector<8x128xf32>
    %cst_142 = arith.constant 1.000000e+00 : f32
    %821 = vector.broadcast %cst_142 : f32 to vector<8x128xf32>
    %822 = arith.subf %821, %815 : vector<8x128xf32>
    %823 = arith.mulf %822, %820 : vector<8x128xf32>
    %824 = arith.mulf %815, %763 : vector<8x128xf32>
    %825 = arith.addf %823, %824 : vector<8x128xf32>
    %c13_i32 = arith.constant 13 : i32
    %826 = tpu.concatenate %797, %825 in 1 : vector<8x128xf32>, vector<8x128xf32> -> vector<8x256xf32>
    %cst_143 = arith.constant dense<0.000000e+00> : vector<8x768xf32>
    %827 = tpu.matmul %826, %8, %cst_143 {dimension_numbers = #tpu.dot_dimension_numbers<[1], [0], [0], [1], [0, 0, 1, 1], [], []>} : vector<8x256xf32>, vector<256x768xf32>, vector<8x768xf32> -> vector<8x768xf32>
    %828 = arith.addf %827, %4 : vector<8x768xf32>
    %829 = vector.extract_strided_slice %828 {offsets = [0, 0], sizes = [8, 384], strides = [1, 1]} : vector<8x768xf32> to vector<8x384xf32>
    %830 = vector.extract_strided_slice %828 {offsets = [0, 384], sizes = [8, 384], strides = [1, 1]} : vector<8x768xf32> to vector<8x384xf32>
    %831 = arith.index_cast %c13_i32 : i32 to index
    %c0_144 = arith.constant 0 : index
    %c0_145 = arith.constant 0 : index
    %832 = vector.load %arg4[%831, %c0_144, %c0_145] : memref<16x8x384xf32, #tpu.memory_space<vmem>>, vector<1x8x384xf32>
    %833 = vector.shape_cast %832 : vector<1x8x384xf32> to vector<8x384xf32>
    %834 = vector.extract_strided_slice %833 {offsets = [0, 0], sizes = [8, 128], strides = [1, 1]} : vector<8x384xf32> to vector<8x128xf32>
    %835 = vector.extract_strided_slice %829 {offsets = [0, 0], sizes = [8, 128], strides = [1, 1]} : vector<8x384xf32> to vector<8x128xf32>
    %836 = arith.addf %834, %835 : vector<8x128xf32>
    %837 = arith.negf %836 : vector<8x128xf32>
    %838 = math.exp %837 : vector<8x128xf32>
    %cst_146 = arith.constant 1.000000e+00 : f32
    %839 = vector.broadcast %cst_146 : f32 to vector<8x128xf32>
    %840 = arith.addf %839, %838 : vector<8x128xf32>
    %841 = arith.divf %839, %840 : vector<8x128xf32>
    %842 = vector.extract_strided_slice %833 {offsets = [0, 128], sizes = [8, 128], strides = [1, 1]} : vector<8x384xf32> to vector<8x128xf32>
    %843 = vector.extract_strided_slice %829 {offsets = [0, 128], sizes = [8, 128], strides = [1, 1]} : vector<8x384xf32> to vector<8x128xf32>
    %844 = arith.addf %842, %843 : vector<8x128xf32>
    %845 = arith.negf %844 : vector<8x128xf32>
    %846 = math.exp %845 : vector<8x128xf32>
    %cst_147 = arith.constant 1.000000e+00 : f32
    %847 = vector.broadcast %cst_147 : f32 to vector<8x128xf32>
    %848 = arith.addf %847, %846 : vector<8x128xf32>
    %849 = arith.divf %847, %848 : vector<8x128xf32>
    %850 = vector.extract_strided_slice %833 {offsets = [0, 256], sizes = [8, 128], strides = [1, 1]} : vector<8x384xf32> to vector<8x128xf32>
    %851 = vector.extract_strided_slice %829 {offsets = [0, 256], sizes = [8, 128], strides = [1, 1]} : vector<8x384xf32> to vector<8x128xf32>
    %852 = arith.mulf %841, %851 : vector<8x128xf32>
    %853 = arith.addf %850, %852 : vector<8x128xf32>
    %854 = math.tanh %853 : vector<8x128xf32>
    %cst_148 = arith.constant 1.000000e+00 : f32
    %855 = vector.broadcast %cst_148 : f32 to vector<8x128xf32>
    %856 = arith.subf %855, %849 : vector<8x128xf32>
    %857 = arith.mulf %856, %854 : vector<8x128xf32>
    %858 = arith.mulf %849, %797 : vector<8x128xf32>
    %859 = arith.addf %857, %858 : vector<8x128xf32>
    %cst_149 = arith.constant dense<0.000000e+00> : vector<8x384xf32>
    %860 = tpu.matmul %859, %9, %cst_149 {dimension_numbers = #tpu.dot_dimension_numbers<[1], [0], [0], [1], [0, 0, 1, 1], [], []>} : vector<8x128xf32>, vector<128x384xf32>, vector<8x384xf32> -> vector<8x384xf32>
    %861 = arith.addf %860, %7 : vector<8x384xf32>
    %862 = vector.extract_strided_slice %861 {offsets = [0, 0], sizes = [8, 128], strides = [1, 1]} : vector<8x384xf32> to vector<8x128xf32>
    %863 = vector.extract_strided_slice %830 {offsets = [0, 0], sizes = [8, 128], strides = [1, 1]} : vector<8x384xf32> to vector<8x128xf32>
    %864 = arith.addf %862, %863 : vector<8x128xf32>
    %865 = arith.negf %864 : vector<8x128xf32>
    %866 = math.exp %865 : vector<8x128xf32>
    %cst_150 = arith.constant 1.000000e+00 : f32
    %867 = vector.broadcast %cst_150 : f32 to vector<8x128xf32>
    %868 = arith.addf %867, %866 : vector<8x128xf32>
    %869 = arith.divf %867, %868 : vector<8x128xf32>
    %870 = vector.extract_strided_slice %861 {offsets = [0, 128], sizes = [8, 128], strides = [1, 1]} : vector<8x384xf32> to vector<8x128xf32>
    %871 = vector.extract_strided_slice %830 {offsets = [0, 128], sizes = [8, 128], strides = [1, 1]} : vector<8x384xf32> to vector<8x128xf32>
    %872 = arith.addf %870, %871 : vector<8x128xf32>
    %873 = arith.negf %872 : vector<8x128xf32>
    %874 = math.exp %873 : vector<8x128xf32>
    %cst_151 = arith.constant 1.000000e+00 : f32
    %875 = vector.broadcast %cst_151 : f32 to vector<8x128xf32>
    %876 = arith.addf %875, %874 : vector<8x128xf32>
    %877 = arith.divf %875, %876 : vector<8x128xf32>
    %878 = vector.extract_strided_slice %861 {offsets = [0, 256], sizes = [8, 128], strides = [1, 1]} : vector<8x384xf32> to vector<8x128xf32>
    %879 = vector.extract_strided_slice %830 {offsets = [0, 256], sizes = [8, 128], strides = [1, 1]} : vector<8x384xf32> to vector<8x128xf32>
    %880 = arith.mulf %869, %879 : vector<8x128xf32>
    %881 = arith.addf %878, %880 : vector<8x128xf32>
    %882 = math.tanh %881 : vector<8x128xf32>
    %cst_152 = arith.constant 1.000000e+00 : f32
    %883 = vector.broadcast %cst_152 : f32 to vector<8x128xf32>
    %884 = arith.subf %883, %877 : vector<8x128xf32>
    %885 = arith.mulf %884, %882 : vector<8x128xf32>
    %886 = arith.mulf %877, %825 : vector<8x128xf32>
    %887 = arith.addf %885, %886 : vector<8x128xf32>
    %c14_i32 = arith.constant 14 : i32
    %888 = tpu.concatenate %859, %887 in 1 : vector<8x128xf32>, vector<8x128xf32> -> vector<8x256xf32>
    %cst_153 = arith.constant dense<0.000000e+00> : vector<8x768xf32>
    %889 = tpu.matmul %888, %8, %cst_153 {dimension_numbers = #tpu.dot_dimension_numbers<[1], [0], [0], [1], [0, 0, 1, 1], [], []>} : vector<8x256xf32>, vector<256x768xf32>, vector<8x768xf32> -> vector<8x768xf32>
    %890 = arith.addf %889, %4 : vector<8x768xf32>
    %891 = vector.extract_strided_slice %890 {offsets = [0, 0], sizes = [8, 384], strides = [1, 1]} : vector<8x768xf32> to vector<8x384xf32>
    %892 = vector.extract_strided_slice %890 {offsets = [0, 384], sizes = [8, 384], strides = [1, 1]} : vector<8x768xf32> to vector<8x384xf32>
    %893 = arith.index_cast %c14_i32 : i32 to index
    %c0_154 = arith.constant 0 : index
    %c0_155 = arith.constant 0 : index
    %894 = vector.load %arg4[%893, %c0_154, %c0_155] : memref<16x8x384xf32, #tpu.memory_space<vmem>>, vector<1x8x384xf32>
    %895 = vector.shape_cast %894 : vector<1x8x384xf32> to vector<8x384xf32>
    %896 = vector.extract_strided_slice %895 {offsets = [0, 0], sizes = [8, 128], strides = [1, 1]} : vector<8x384xf32> to vector<8x128xf32>
    %897 = vector.extract_strided_slice %891 {offsets = [0, 0], sizes = [8, 128], strides = [1, 1]} : vector<8x384xf32> to vector<8x128xf32>
    %898 = arith.addf %896, %897 : vector<8x128xf32>
    %899 = arith.negf %898 : vector<8x128xf32>
    %900 = math.exp %899 : vector<8x128xf32>
    %cst_156 = arith.constant 1.000000e+00 : f32
    %901 = vector.broadcast %cst_156 : f32 to vector<8x128xf32>
    %902 = arith.addf %901, %900 : vector<8x128xf32>
    %903 = arith.divf %901, %902 : vector<8x128xf32>
    %904 = vector.extract_strided_slice %895 {offsets = [0, 128], sizes = [8, 128], strides = [1, 1]} : vector<8x384xf32> to vector<8x128xf32>
    %905 = vector.extract_strided_slice %891 {offsets = [0, 128], sizes = [8, 128], strides = [1, 1]} : vector<8x384xf32> to vector<8x128xf32>
    %906 = arith.addf %904, %905 : vector<8x128xf32>
    %907 = arith.negf %906 : vector<8x128xf32>
    %908 = math.exp %907 : vector<8x128xf32>
    %cst_157 = arith.constant 1.000000e+00 : f32
    %909 = vector.broadcast %cst_157 : f32 to vector<8x128xf32>
    %910 = arith.addf %909, %908 : vector<8x128xf32>
    %911 = arith.divf %909, %910 : vector<8x128xf32>
    %912 = vector.extract_strided_slice %895 {offsets = [0, 256], sizes = [8, 128], strides = [1, 1]} : vector<8x384xf32> to vector<8x128xf32>
    %913 = vector.extract_strided_slice %891 {offsets = [0, 256], sizes = [8, 128], strides = [1, 1]} : vector<8x384xf32> to vector<8x128xf32>
    %914 = arith.mulf %903, %913 : vector<8x128xf32>
    %915 = arith.addf %912, %914 : vector<8x128xf32>
    %916 = math.tanh %915 : vector<8x128xf32>
    %cst_158 = arith.constant 1.000000e+00 : f32
    %917 = vector.broadcast %cst_158 : f32 to vector<8x128xf32>
    %918 = arith.subf %917, %911 : vector<8x128xf32>
    %919 = arith.mulf %918, %916 : vector<8x128xf32>
    %920 = arith.mulf %911, %859 : vector<8x128xf32>
    %921 = arith.addf %919, %920 : vector<8x128xf32>
    %cst_159 = arith.constant dense<0.000000e+00> : vector<8x384xf32>
    %922 = tpu.matmul %921, %9, %cst_159 {dimension_numbers = #tpu.dot_dimension_numbers<[1], [0], [0], [1], [0, 0, 1, 1], [], []>} : vector<8x128xf32>, vector<128x384xf32>, vector<8x384xf32> -> vector<8x384xf32>
    %923 = arith.addf %922, %7 : vector<8x384xf32>
    %924 = vector.extract_strided_slice %923 {offsets = [0, 0], sizes = [8, 128], strides = [1, 1]} : vector<8x384xf32> to vector<8x128xf32>
    %925 = vector.extract_strided_slice %892 {offsets = [0, 0], sizes = [8, 128], strides = [1, 1]} : vector<8x384xf32> to vector<8x128xf32>
    %926 = arith.addf %924, %925 : vector<8x128xf32>
    %927 = arith.negf %926 : vector<8x128xf32>
    %928 = math.exp %927 : vector<8x128xf32>
    %cst_160 = arith.constant 1.000000e+00 : f32
    %929 = vector.broadcast %cst_160 : f32 to vector<8x128xf32>
    %930 = arith.addf %929, %928 : vector<8x128xf32>
    %931 = arith.divf %929, %930 : vector<8x128xf32>
    %932 = vector.extract_strided_slice %923 {offsets = [0, 128], sizes = [8, 128], strides = [1, 1]} : vector<8x384xf32> to vector<8x128xf32>
    %933 = vector.extract_strided_slice %892 {offsets = [0, 128], sizes = [8, 128], strides = [1, 1]} : vector<8x384xf32> to vector<8x128xf32>
    %934 = arith.addf %932, %933 : vector<8x128xf32>
    %935 = arith.negf %934 : vector<8x128xf32>
    %936 = math.exp %935 : vector<8x128xf32>
    %cst_161 = arith.constant 1.000000e+00 : f32
    %937 = vector.broadcast %cst_161 : f32 to vector<8x128xf32>
    %938 = arith.addf %937, %936 : vector<8x128xf32>
    %939 = arith.divf %937, %938 : vector<8x128xf32>
    %940 = vector.extract_strided_slice %923 {offsets = [0, 256], sizes = [8, 128], strides = [1, 1]} : vector<8x384xf32> to vector<8x128xf32>
    %941 = vector.extract_strided_slice %892 {offsets = [0, 256], sizes = [8, 128], strides = [1, 1]} : vector<8x384xf32> to vector<8x128xf32>
    %942 = arith.mulf %931, %941 : vector<8x128xf32>
    %943 = arith.addf %940, %942 : vector<8x128xf32>
    %944 = math.tanh %943 : vector<8x128xf32>
    %cst_162 = arith.constant 1.000000e+00 : f32
    %945 = vector.broadcast %cst_162 : f32 to vector<8x128xf32>
    %946 = arith.subf %945, %939 : vector<8x128xf32>
    %947 = arith.mulf %946, %944 : vector<8x128xf32>
    %948 = arith.mulf %939, %887 : vector<8x128xf32>
    %949 = arith.addf %947, %948 : vector<8x128xf32>
    %c15_i32 = arith.constant 15 : i32
    %950 = tpu.concatenate %921, %949 in 1 : vector<8x128xf32>, vector<8x128xf32> -> vector<8x256xf32>
    %cst_163 = arith.constant dense<0.000000e+00> : vector<8x768xf32>
    %951 = tpu.matmul %950, %8, %cst_163 {dimension_numbers = #tpu.dot_dimension_numbers<[1], [0], [0], [1], [0, 0, 1, 1], [], []>} : vector<8x256xf32>, vector<256x768xf32>, vector<8x768xf32> -> vector<8x768xf32>
    %952 = arith.addf %951, %4 : vector<8x768xf32>
    %953 = vector.extract_strided_slice %952 {offsets = [0, 0], sizes = [8, 384], strides = [1, 1]} : vector<8x768xf32> to vector<8x384xf32>
    %954 = vector.extract_strided_slice %952 {offsets = [0, 384], sizes = [8, 384], strides = [1, 1]} : vector<8x768xf32> to vector<8x384xf32>
    %955 = arith.index_cast %c15_i32 : i32 to index
    %c0_164 = arith.constant 0 : index
    %c0_165 = arith.constant 0 : index
    %956 = vector.load %arg4[%955, %c0_164, %c0_165] : memref<16x8x384xf32, #tpu.memory_space<vmem>>, vector<1x8x384xf32>
    %957 = vector.shape_cast %956 : vector<1x8x384xf32> to vector<8x384xf32>
    %958 = vector.extract_strided_slice %957 {offsets = [0, 0], sizes = [8, 128], strides = [1, 1]} : vector<8x384xf32> to vector<8x128xf32>
    %959 = vector.extract_strided_slice %953 {offsets = [0, 0], sizes = [8, 128], strides = [1, 1]} : vector<8x384xf32> to vector<8x128xf32>
    %960 = arith.addf %958, %959 : vector<8x128xf32>
    %961 = arith.negf %960 : vector<8x128xf32>
    %962 = math.exp %961 : vector<8x128xf32>
    %cst_166 = arith.constant 1.000000e+00 : f32
    %963 = vector.broadcast %cst_166 : f32 to vector<8x128xf32>
    %964 = arith.addf %963, %962 : vector<8x128xf32>
    %965 = arith.divf %963, %964 : vector<8x128xf32>
    %966 = vector.extract_strided_slice %957 {offsets = [0, 128], sizes = [8, 128], strides = [1, 1]} : vector<8x384xf32> to vector<8x128xf32>
    %967 = vector.extract_strided_slice %953 {offsets = [0, 128], sizes = [8, 128], strides = [1, 1]} : vector<8x384xf32> to vector<8x128xf32>
    %968 = arith.addf %966, %967 : vector<8x128xf32>
    %969 = arith.negf %968 : vector<8x128xf32>
    %970 = math.exp %969 : vector<8x128xf32>
    %cst_167 = arith.constant 1.000000e+00 : f32
    %971 = vector.broadcast %cst_167 : f32 to vector<8x128xf32>
    %972 = arith.addf %971, %970 : vector<8x128xf32>
    %973 = arith.divf %971, %972 : vector<8x128xf32>
    %974 = vector.extract_strided_slice %957 {offsets = [0, 256], sizes = [8, 128], strides = [1, 1]} : vector<8x384xf32> to vector<8x128xf32>
    %975 = vector.extract_strided_slice %953 {offsets = [0, 256], sizes = [8, 128], strides = [1, 1]} : vector<8x384xf32> to vector<8x128xf32>
    %976 = arith.mulf %965, %975 : vector<8x128xf32>
    %977 = arith.addf %974, %976 : vector<8x128xf32>
    %978 = math.tanh %977 : vector<8x128xf32>
    %cst_168 = arith.constant 1.000000e+00 : f32
    %979 = vector.broadcast %cst_168 : f32 to vector<8x128xf32>
    %980 = arith.subf %979, %973 : vector<8x128xf32>
    %981 = arith.mulf %980, %978 : vector<8x128xf32>
    %982 = arith.mulf %973, %921 : vector<8x128xf32>
    %983 = arith.addf %981, %982 : vector<8x128xf32>
    %cst_169 = arith.constant dense<0.000000e+00> : vector<8x384xf32>
    %984 = tpu.matmul %983, %9, %cst_169 {dimension_numbers = #tpu.dot_dimension_numbers<[1], [0], [0], [1], [0, 0, 1, 1], [], []>} : vector<8x128xf32>, vector<128x384xf32>, vector<8x384xf32> -> vector<8x384xf32>
    %985 = arith.addf %984, %7 : vector<8x384xf32>
    %986 = vector.extract_strided_slice %985 {offsets = [0, 0], sizes = [8, 128], strides = [1, 1]} : vector<8x384xf32> to vector<8x128xf32>
    %987 = vector.extract_strided_slice %954 {offsets = [0, 0], sizes = [8, 128], strides = [1, 1]} : vector<8x384xf32> to vector<8x128xf32>
    %988 = arith.addf %986, %987 : vector<8x128xf32>
    %989 = arith.negf %988 : vector<8x128xf32>
    %990 = math.exp %989 : vector<8x128xf32>
    %cst_170 = arith.constant 1.000000e+00 : f32
    %991 = vector.broadcast %cst_170 : f32 to vector<8x128xf32>
    %992 = arith.addf %991, %990 : vector<8x128xf32>
    %993 = arith.divf %991, %992 : vector<8x128xf32>
    %994 = vector.extract_strided_slice %985 {offsets = [0, 128], sizes = [8, 128], strides = [1, 1]} : vector<8x384xf32> to vector<8x128xf32>
    %995 = vector.extract_strided_slice %954 {offsets = [0, 128], sizes = [8, 128], strides = [1, 1]} : vector<8x384xf32> to vector<8x128xf32>
    %996 = arith.addf %994, %995 : vector<8x128xf32>
    %997 = arith.negf %996 : vector<8x128xf32>
    %998 = math.exp %997 : vector<8x128xf32>
    %cst_171 = arith.constant 1.000000e+00 : f32
    %999 = vector.broadcast %cst_171 : f32 to vector<8x128xf32>
    %1000 = arith.addf %999, %998 : vector<8x128xf32>
    %1001 = arith.divf %999, %1000 : vector<8x128xf32>
    %1002 = vector.extract_strided_slice %985 {offsets = [0, 256], sizes = [8, 128], strides = [1, 1]} : vector<8x384xf32> to vector<8x128xf32>
    %1003 = vector.extract_strided_slice %954 {offsets = [0, 256], sizes = [8, 128], strides = [1, 1]} : vector<8x384xf32> to vector<8x128xf32>
    %1004 = arith.mulf %993, %1003 : vector<8x128xf32>
    %1005 = arith.addf %1002, %1004 : vector<8x128xf32>
    %1006 = math.tanh %1005 : vector<8x128xf32>
    %cst_172 = arith.constant 1.000000e+00 : f32
    %1007 = vector.broadcast %cst_172 : f32 to vector<8x128xf32>
    %1008 = arith.subf %1007, %1001 : vector<8x128xf32>
    %1009 = arith.mulf %1008, %1006 : vector<8x128xf32>
    %1010 = arith.mulf %1001, %949 : vector<8x128xf32>
    %1011 = arith.addf %1009, %1010 : vector<8x128xf32>
    %c16_i32 = arith.constant 16 : i32
    %c256_173 = arith.constant 256 : index
    %c384_174 = arith.constant 384 : index
    %1012 = vector.load %arg1[%c256_173, %c384_174] : memref<384x768xf32, #tpu.memory_space<vmem>>, vector<128x128xf32>
    %c256_175 = arith.constant 256 : index
    %c512 = arith.constant 512 : index
    %1013 = vector.load %arg1[%c256_175, %c512] : memref<384x768xf32, #tpu.memory_space<vmem>>, vector<128x128xf32>
    %c0_176 = arith.constant 0 : index
    %c1920 = arith.constant 1920 : index
    %1014 = vector.load %arg2[%c0_176, %c1920] : memref<1x2176xf32, #tpu.memory_space<vmem>>, vector<1x128xf32>
    %c0_177 = arith.constant 0 : index
    %c2048 = arith.constant 2048 : index
    %1015 = vector.load %arg2[%c0_177, %c2048] : memref<1x2176xf32, #tpu.memory_space<vmem>>, vector<1x128xf32>
    %cst_178 = arith.constant dense<0.000000e+00> : vector<8x128xf32>
    %1016 = tpu.matmul %1011, %1012, %cst_178 {dimension_numbers = #tpu.dot_dimension_numbers<[1], [0], [0], [1], [0, 0, 1, 1], [], []>} : vector<8x128xf32>, vector<128x128xf32>, vector<8x128xf32> -> vector<8x128xf32>
    %1017 = vector.broadcast %1014 : vector<1x128xf32> to vector<8x128xf32>
    %1018 = arith.addf %1016, %1017 : vector<8x128xf32>
    %cst_179 = arith.constant 0.000000e+00 : f32
    %1019 = vector.broadcast %cst_179 : f32 to vector<8x128xf32>
    %1020 = arith.maximumf %1018, %1019 : vector<8x128xf32>
    %cst_180 = arith.constant dense<0.000000e+00> : vector<8x128xf32>
    %1021 = tpu.matmul %1020, %1013, %cst_180 {dimension_numbers = #tpu.dot_dimension_numbers<[1], [0], [0], [1], [0, 0, 1, 1], [], []>} : vector<8x128xf32>, vector<128x128xf32>, vector<8x128xf32> -> vector<8x128xf32>
    %1022 = vector.broadcast %1015 : vector<1x128xf32> to vector<8x128xf32>
    %1023 = arith.addf %1021, %1022 : vector<8x128xf32>
    %c0_181 = arith.constant 0 : index
    %c0_182 = arith.constant 0 : index
    %1024 = vector.load %arg3[%c0_181, %c0_182] : memref<8x128xf32, #tpu.memory_space<vmem>>, vector<8x128xf32>
    tpu.vector_store %arg3[%c0_181, %c0_182], %1023 {strides = array<i32>} : memref<8x128xf32, #tpu.memory_space<vmem>>, vector<8x128xf32>,
    return
  }
}

</mosaic_0001>

<bundles_post_ra>
// kernel: tpu_custom_call.1
= control target key start
LH: loop header
LB: loop body
LE: loop exit
PB: predicated region body
PF: predicated region fallthrough
CT: control target
= control target key end

     0   :  { %8 = vsyncpa [#allocation4], 0  ;;  %s15674_s0 = inlined_call_operand.vmem [shape: f32[16,8,1], index: 0, kind: input, shape index: {}]   ;;  %s15675_s1 = inlined_call_operand.hbm [shape: f32[384,768], index: 1, kind: input, shape index: {}]   ;;  %s15676_s2 = inlined_call_operand.hbm [shape: f32[1,2176], index: 2, kind: input, shape index: {}]   ;;  %s15677_s3 = inlined_call_operand.hbm [shape: f32[8,128], index: 3, kind: output, shape index: {}]  }
   0x1   :  { %9 = vsyncpa [#allocation7], 0 }
   0x2   :  { %10 = vsyncpa [#allocation5], 0  ;;  %s12628_s12 = smov [#allocation3]   ;;  %s12556_s16 = scalar_lea.hbm %s15675_s1, 36864 }
   0x3   :  { %s18_s13 = sshll.u32 %s12628_s12, 4  ;;  %p12557_p0 = scmp.ne.s32.totalorder %s15675_s1, %s12556_s16  ;;  %s19_s13 = int_to_ptr.vmem [resolvable:$true] %s18_s13 }
   0x4   :  { %p12560_p1 = scmp.lt.u32.totalorder %s12556_s16, %s15675_s1 }
   0x6   :  { %p12562_p2 = pnand %p12560_p1, %p12557_p0 }
   0x8   :  { %12565 = shalt.err (!%p12562_p2)
}
   0x9   :  { %s12566_s21 = scalar_lea.vmem %s19_s13, 36864  ;;  %p12571_p4 = scmp.lt.s32.totalorder %s19_s13, %s19_s13 }
   0xa   :  { %p12567_p3 = scmp.ne.s32.totalorder %s19_s13, %s12566_s21  ;;  %p12572_p5 = scmp.lt.s32.totalorder %s12566_s21, %s12566_s21 }
   0xc   :  { %p12573_p6 = por %p12572_p5, %p12571_p4 }
   0xe   :  { %p12574_p7 = pnand %p12573_p6, %p12567_p3 }
  0x10   :  { %12577 = shalt.err (!%p12574_p7)
}
  0x11   :  { %s12629_s22 = smov 768   ;;  %s12630_s23 = smov 48  }
  0x12   :  { %24 = dma.hbm_to_vmem [thread:$0]  %s15675_s1, 36864, %s19_s13, [#allocation4], %s12629_s22, %s12629_s22, %s12630_s23  }
  0x13   :  { %s12631_s26 = smov [#allocation6]   ;;  %s12578_s30 = scalar_lea.hbm %s15676_s2, 272 }
  0x14   :  { %s31_s27 = sshll.u32 %s12631_s26, 4  ;;  %p12579_p8 = scmp.ne.s32.totalorder %s15676_s2, %s12578_s30  ;;  %s32_s27 = int_to_ptr.vmem [resolvable:$true] %s31_s27 }
  0x15   :  { %p12582_p9 = scmp.lt.u32.totalorder %s12578_s30, %s15676_s2 }
  0x17   :  { %p12584_p10 = pnand %p12582_p9, %p12579_p8 }
  0x19   :  { %12587 = shalt.err (!%p12584_p10)
}
  0x1a   :  { %s12588_s8 = scalar_lea.vmem %s32_s27, 272  ;;  %s12592_s1 = scalar_lea.vmem %s32_s27, 288 }
  0x1b   :  { %p12589_p11 = scmp.ne.s32.totalorder %s32_s27, %s12588_s8  ;;  %p12593_p12 = scmp.lt.s32.totalorder %s32_s27, %s32_s27 }
  0x1c   :  { %p12594_p13 = scmp.lt.s32.totalorder %s12592_s1, %s12588_s8 }
  0x1e   :  { %p12595_p0 = por %p12594_p13, %p12593_p12 }
  0x20   :  { %p12596_p1 = pnand %p12595_p0, %p12589_p11 }
  0x22   :  { %12599 = shalt.err (!%p12596_p1)
}
  0x23   :  { %34 = dma.hbm_to_vmem [thread:$0]  %s15676_s2, 272, %s32_s27, [#allocation7]  }
  0x24   :  { %12622 = dma.done.wait [#allocation4], 36864  }
  0x25   :  { %12623 = vsyncadd [#allocation4], 4294930432 }
  0x26   :  { %12624 = dma.done.wait [#allocation7], 272  }
  0x27   :  { %12625 = vsyncadd [#allocation7], 4294967024  ;;  %v15678_v0 = vmov 0.0   ;;  %v12633_v1 = vmov 0   ;;  %v93_v2 = vld [vmem:[#allocation3 + $0x8] sm:$0xff]  ;;  %v99_v3 = vld [vmem:[#allocation3 + $0x38] sm:$0xff] }
  0x28   :  { %668 = vmatprep.mubr.f32.mxu0 %v15678_v0  ;;  %739 = vmatprep.mubr.f32.mxu1 %v15678_v0  ;;  %v92_v4 = vld [vmem:[#allocation3] sm:$0xff]  ;;  %v12683_v5 = vpack.c.bf16 %v99_v3, %v93_v2  ;;  %v98_v6 = vld [vmem:[#allocation3 + $0x30] sm:$0xff]  ;;  %v105_v7 = vld [vmem:[#allocation3 + $0x68] sm:$0xff]  ;;  %vm12635_vm0 = vmmov 0  }
  0x29   :  { %12234 = vset.pattern.permute.xlu0 %v12633_v1  ;;  %12235 = vset.pattern.permute.xlu1 %v12633_v1  ;;  %v111_v8 = vld [vmem:[#allocation3 + $0x98] sm:$0xff]  ;;  %v12685_v9 = vpack.c.bf16 %v98_v6, %v92_v4  ;;  %v104_v11 = vld [vmem:[#allocation3 + $0x60] sm:$0xff]  ;;  %v110_v12 = vld [vmem:[#allocation3 + $0x90] sm:$0xff] }
  0x2a   :  { %15937 = vst [vmem:[#allocation12_spill] sm:$0xff] %v12683_v5  ;;  %v12687_v10 = vpack.c.bf16 %v111_v8, %v105_v7  ;;  %v117_v13 = vld [vmem:[#allocation3 + $0xc8] sm:$0xff]  ;;  %8210 = vmatprep.subr.bf16.mxu0 %v12683_v5  ;;  %v123_v14 = vld [vmem:[#allocation3 + $0xf8] sm:$0xff]  ;;  %v12691_v15 = vpack.c.bf16 %v110_v12, %v104_v11  ;;  %v116_v17 = vld [vmem:[#allocation3 + $0xc0] sm:$0xff] }
  0x2b   :  { %15938 = vst [vmem:[#allocation13_spill] sm:$0xff] %v12685_v9  ;;  %8212 = vmatpush1.bf16.msra.mxu0 %v12685_v9  ;;  %v12694_v16 = vpack.c.bf16 %v123_v14, %v117_v13  ;;  %v122_v18 = vld [vmem:[#allocation3 + $0xf0] sm:$0xff]  ;;  %v129_v19 = vld [vmem:[#allocation3 + $0x128] sm:$0xff]  ;;  %v135_v20 = vld [vmem:[#allocation3 + $0x158] sm:$0xff] }
  0x2c   :  { %15939 = vst [vmem:[#allocation14_spill] sm:$0xff] %v12687_v10  ;;  %15940 = vst [vmem:[#allocation15_spill] sm:$0xff] %v12691_v15  ;;  %8214 = vmatprep.subr.bf16.mxu0 %v12687_v10  ;;  %v12697_v21 = vpack.c.bf16 %v122_v18, %v116_v17  ;;  %v128_v22 = vld [vmem:[#allocation3 + $0x120] sm:$0xff]  ;;  %v12700_v23 = vpack.c.bf16 %v135_v20, %v129_v19  ;;  %v134_v24 = vld [vmem:[#allocation3 + $0x150] sm:$0xff] }
  0x2d   :  { %15941 = vst [vmem:[#allocation16_spill] sm:$0xff] %v12694_v16  ;;  %v95_v25 = vld [vmem:[#allocation3 + $0x18] sm:$0xff]  ;;  %v101_v26 = vld [vmem:[#allocation3 + $0x48] sm:$0xff]  ;;  %v94_v30 = vld [vmem:[#allocation3 + $0x10] sm:$0xff]  ;;  %v12705_v32 = vpack.c.bf16 %v134_v24, %v128_v22 }
  0x2e   :  { %15942 = vst [vmem:[#allocation17_spill] sm:$0xff] %v12697_v21  ;;  %15943 = vst [vmem:[#allocation18_spill] sm:$0xff] %v12700_v23  ;;  %v141_v27 = vld [vmem:[#allocation3 + $0x188] sm:$0xff]  ;;  %v147_v28 = vld [vmem:[#allocation3 + $0x1b8] sm:$0xff]  ;;  %v12702_v29 = vpack.c.bf16 %v101_v26, %v95_v25 }
  0x2f   :  { %8216 = vmatpush1.bf16.msra.mxu0 %v12691_v15  ;;  %v100_v31 = vld [vmem:[#allocation3 + $0x40] sm:$0xff]  ;;  %15944 = vst [vmem:[#allocation19_spill] sm:$0xff] %v12705_v32  ;;  %v107_v35 = vld [vmem:[#allocation3 + $0x78] sm:$0xff]  ;;  %v113_v36 = vld [vmem:[#allocation3 + $0xa8] sm:$0xff]  ;;  %v12711_v37 = vpack.c.bf16 %v147_v28, %v141_v27 }
  0x30   :  { %8218 = vmatprep.subr.bf16.mxu0 %v12694_v16  ;;  %v140_v33 = vld [vmem:[#allocation3 + $0x180] sm:$0xff]  ;;  %8274 = vmatprep.subr.bf16.mxu1 %v12702_v29  ;;  %v12708_v34 = vpack.c.bf16 %v100_v31, %v94_v30  ;;  %v146_v38 = vld [vmem:[#allocation3 + $0x1b0] sm:$0xff]  ;;  %v12713_v39 = vpack.c.bf16 %v113_v36, %v107_v35  ;;  %v153_v42 = vld [vmem:[#allocation3 + $0x1e8] sm:$0xff] }
  0x31   :  { %15945 = vst [vmem:[#allocation20_spill] sm:$0xff] %v12711_v37  ;;  %v106_v40 = vld [vmem:[#allocation3 + $0x70] sm:$0xff]  ;;  %v112_v41 = vld [vmem:[#allocation3 + $0xa0] sm:$0xff]  ;;  %v159_v43 = vld [vmem:[#allocation3 + $0x218] sm:$0xff]  ;;  %v12720_v47 = vpack.c.bf16 %v146_v38, %v140_v33 }
  0x32   :  { %8276 = vmatpush1.bf16.msra.mxu1 %v12708_v34  ;;  %v12716_v44 = vpack.c.bf16 %v112_v41, %v106_v40  ;;  %v119_v45 = vld [vmem:[#allocation3 + $0xd8] sm:$0xff]  ;;  %v125_v46 = vld [vmem:[#allocation3 + $0x108] sm:$0xff]  ;;  %v152_v48 = vld [vmem:[#allocation3 + $0x1e0] sm:$0xff]  ;;  %v12725_v52 = vpack.c.bf16 %v159_v43, %v153_v42 }
  0x33   :  { %8220 = vmatpush1.bf16.msra.mxu0 %v12697_v21  ;;  %8278 = vmatprep.subr.bf16.mxu1 %v12713_v39  ;;  %15946 = vst [vmem:[#allocation21_spill] sm:$0xff] %v12720_v47  ;;  %v12722_v49 = vpack.c.bf16 %v125_v46, %v119_v45  ;;  %v118_v50 = vld [vmem:[#allocation3 + $0xd0] sm:$0xff]  ;;  %v124_v51 = vld [vmem:[#allocation3 + $0x100] sm:$0xff]  ;;  %v131_v54 = vld [vmem:[#allocation3 + $0x138] sm:$0xff] }
  0x34   :  { %8222 = vmatprep.subr.bf16.mxu0 %v12700_v23  ;;  %15947 = vst [vmem:[#allocation22_spill] sm:$0xff] %v12725_v52  ;;  %v158_v53 = vld [vmem:[#allocation3 + $0x210] sm:$0xff]  ;;  %v137_v55 = vld [vmem:[#allocation3 + $0x168] sm:$0xff]  ;;  %v171_v57 = vld [vmem:[#allocation3 + $0x278] sm:$0xff]  ;;  %v12728_v58 = vpack.c.bf16 %v124_v51, %v118_v50 }
  0x35   :  { %v165_v56 = vld [vmem:[#allocation3 + $0x248] sm:$0xff]  ;;  %v12731_v59 = vpack.c.bf16 %v137_v55, %v131_v54  ;;  %v130_v60 = vld [vmem:[#allocation3 + $0x130] sm:$0xff]  ;;  %v136_v61 = vld [vmem:[#allocation3 + $0x160] sm:$0xff]  ;;  %v12734_v62 = vpack.c.bf16 %v158_v53, %v152_v48 }
  0x36   :  { %8280 = vmatpush1.bf16.msra.mxu1 %v12716_v44  ;;  %v143_v63 = vld [vmem:[#allocation3 + $0x198] sm:$0xff]  ;;  %v149_v1 = vld [vmem:[#allocation3 + $0x1c8] sm:$0xff]  ;;  %v12737_v2 = vpack.c.bf16 %v171_v57, %v165_v56  ;;  %v164_v3 = vld [vmem:[#allocation3 + $0x240] sm:$0xff]  ;;  %v12740_v8 = vpack.c.bf16 %v136_v61, %v130_v60 }
  0x37   :  { %8224 = vmatpush1.bf16.msra.mxu0 %v12705_v32  ;;  %8282 = vmatprep.subr.bf16.mxu1 %v12722_v49  ;;  %15948 = vst [vmem:[#allocation23_spill] sm:$0xff] %v12731_v59  ;;  %15949 = vst [vmem:[#allocation24_spill] sm:$0xff] %v12734_v62  ;;  %v170_v4 = vld [vmem:[#allocation3 + $0x270] sm:$0xff]  ;;  %v177_v6 = vld [vmem:[#allocation3 + $0x2a8] sm:$0xff]  ;;  %v12743_v11 = vpack.c.bf16 %v149_v1, %v143_v63 }
  0x38   :  { %8226 = vmatprep.subr.bf16.mxu0 %v12711_v37  ;;  %15950 = vst [vmem:[#allocation25_spill] sm:$0xff] %v12737_v2  ;;  %v183_v7 = vld [vmem:[#allocation3 + $0x2d8] sm:$0xff]  ;;  %15951 = vst [vmem:[#allocation26_spill] sm:$0xff] %v12740_v8  ;;  %v142_v12 = vld [vmem:[#allocation3 + $0x190] sm:$0xff]  ;;  %v12746_v14 = vpack.c.bf16 %v170_v4, %v164_v3 }
  0x39   :  { %15952 = vst [vmem:[#allocation27_spill] sm:$0xff] %v12743_v11  ;;  %v148_v13 = vld [vmem:[#allocation3 + $0x1c0] sm:$0xff]  ;;  %v155_v17 = vld [vmem:[#allocation3 + $0x1f8] sm:$0xff]  ;;  %v161_v18 = vld [vmem:[#allocation3 + $0x228] sm:$0xff]  ;;  %v12749_v19 = vpack.c.bf16 %v183_v7, %v177_v6 }
  0x3a   :  { %8284 = vmatpush1.bf16.msra.mxu1 %v12728_v58  ;;  %15953 = vst [vmem:[#allocation28_spill] sm:$0xff] %v12746_v14  ;;  %v176_v20 = vld [vmem:[#allocation3 + $0x2a0] sm:$0xff]  ;;  %v182_v22 = vld [vmem:[#allocation3 + $0x2d0] sm:$0xff]  ;;  %v189_v24 = vld [vmem:[#allocation3 + $0x308] sm:$0xff]  ;;  %v12752_v26 = vpack.c.bf16 %v148_v13, %v142_v12  ;;  %v12755_v27 = vpack.c.bf16 %v161_v18, %v155_v17 }
  0x3b   :  { %8228 = vmatpush1.bf16.msra.mxu0 %v12720_v47  ;;  %8286 = vmatprep.subr.bf16.mxu1 %v12731_v59  ;;  %15954 = vst [vmem:[#allocation29_spill] sm:$0xff] %v12749_v19  ;;  %v195_v25 = vld [vmem:[#allocation3 + $0x338] sm:$0xff]  ;;  %v154_v28 = vld [vmem:[#allocation3 + $0x1f0] sm:$0xff]  ;;  %v160_v30 = vld [vmem:[#allocation3 + $0x220] sm:$0xff]  ;;  %v12758_v31 = vpack.c.bf16 %v182_v22, %v176_v20 }
  0x3c   :  { %8230 = vmatprep.subr.bf16.mxu0 %v12725_v52  ;;  %15955 = vst [vmem:[#allocation30_spill] sm:$0xff] %v12752_v26  ;;  %15956 = vst [vmem:[#allocation31_spill] sm:$0xff] %v12755_v27  ;;  %v167_v33 = vld [vmem:[#allocation3 + $0x258] sm:$0xff]  ;;  %v173_v35 = vld [vmem:[#allocation3 + $0x288] sm:$0xff]  ;;  %v12761_v36 = vpack.c.bf16 %v195_v25, %v189_v24  ;;  %v12764_v43 = vpack.c.bf16 %v160_v30, %v154_v28 }
  0x3d   :  { %15957 = vst [vmem:[#allocation32_spill] sm:$0xff] %v12758_v31  ;;  %v188_v38 = vld [vmem:[#allocation3 + $0x300] sm:$0xff]  ;;  %v194_v40 = vld [vmem:[#allocation3 + $0x330] sm:$0xff]  ;;  %v201_v41 = vld [vmem:[#allocation3 + $0x368] sm:$0xff]  ;;  %v12767_v45 = vpack.c.bf16 %v173_v35, %v167_v33 }
  0x3e   :  { %8288 = vmatpush1.bf16.msra.mxu1 %v12740_v8  ;;  %15958 = vst [vmem:[#allocation33_spill] sm:$0xff] %v12761_v36  ;;  %v207_v42 = vld [vmem:[#allocation3 + $0x398] sm:$0xff]  ;;  %15959 = vst [vmem:[#allocation34_spill] sm:$0xff] %v12764_v43  ;;  %v166_v46 = vld [vmem:[#allocation3 + $0x250] sm:$0xff]  ;;  %v12770_v50 = vpack.c.bf16 %v194_v40, %v188_v38 }
  0x3f   :  { %8232 = vmatpush1.bf16.msra.mxu0 %v12734_v62  ;;  %8290 = vmatprep.subr.bf16.mxu1 %v12743_v11  ;;  %15960 = vst [vmem:[#allocation35_spill] sm:$0xff] %v12767_v45  ;;  %v172_v48 = vld [vmem:[#allocation3 + $0x280] sm:$0xff]  ;;  %v179_v51 = vld [vmem:[#allocation3 + $0x2b8] sm:$0xff]  ;;  %v185_v53 = vld [vmem:[#allocation3 + $0x2e8] sm:$0xff]  ;;  %v12773_v54 = vpack.c.bf16 %v207_v42, %v201_v41 }
  0x40   :  { %8234 = vmatprep.subr.bf16.mxu0 %v12737_v2  ;;  %15961 = vst [vmem:[#allocation36_spill] sm:$0xff] %v12770_v50  ;;  %v200_v55 = vld [vmem:[#allocation3 + $0x360] sm:$0xff]  ;;  %v206_v56 = vld [vmem:[#allocation3 + $0x390] sm:$0xff]  ;;  %v213_v57 = vld [vmem:[#allocation3 + $0x3c8] sm:$0xff]  ;;  %v12776_v61 = vpack.c.bf16 %v172_v48, %v166_v46  ;;  %v12779_v63 = vpack.c.bf16 %v185_v53, %v179_v51 }
  0x41   :  { %15962 = vst [vmem:[#allocation37_spill] sm:$0xff] %v12773_v54  ;;  %v219_v60 = vld [vmem:[#allocation3 + $0x3f8] sm:$0xff]  ;;  %v178_v1 = vld [vmem:[#allocation3 + $0x2b0] sm:$0xff]  ;;  %v184_v3 = vld [vmem:[#allocation3 + $0x2e0] sm:$0xff]  ;;  %v12782_v4 = vpack.c.bf16 %v206_v56, %v200_v55 }
  0x42   :  { %8292 = vmatpush1.bf16.msra.mxu1 %v12752_v26  ;;  %15963 = vst [vmem:[#allocation38_spill] sm:$0xff] %v12776_v61  ;;  %15964 = vst [vmem:[#allocation39_spill] sm:$0xff] %v12779_v63  ;;  %v191_v6 = vld [vmem:[#allocation3 + $0x318] sm:$0xff]  ;;  %v197_v7 = vld [vmem:[#allocation3 + $0x348] sm:$0xff]  ;;  %v12785_v12 = vpack.c.bf16 %v219_v60, %v213_v57  ;;  %v12788_v22 = vpack.c.bf16 %v184_v3, %v178_v1 }
  0x43   :  { %8236 = vmatpush1.bf16.msra.mxu0 %v12746_v14  ;;  %8294 = vmatprep.subr.bf16.mxu1 %v12755_v27  ;;  %15965 = vst [vmem:[#allocation40_spill] sm:$0xff] %v12782_v4  ;;  %v212_v13 = vld [vmem:[#allocation3 + $0x3c0] sm:$0xff]  ;;  %v218_v17 = vld [vmem:[#allocation3 + $0x3f0] sm:$0xff]  ;;  %v225_v18 = vld [vmem:[#allocation3 + $0x428] sm:$0xff]  ;;  %v12791_v24 = vpack.c.bf16 %v197_v7, %v191_v6 }
  0x44   :  { %8238 = vmatprep.subr.bf16.mxu0 %v12749_v19  ;;  %15966 = vst [vmem:[#allocation41_spill] sm:$0xff] %v12785_v12  ;;  %v231_v20 = vld [vmem:[#allocation3 + $0x458] sm:$0xff]  ;;  %15967 = vst [vmem:[#allocation42_spill] sm:$0xff] %v12788_v22  ;;  %v190_v25 = vld [vmem:[#allocation3 + $0x310] sm:$0xff]  ;;  %v12794_v30 = vpack.c.bf16 %v218_v17, %v212_v13 }
  0x45   :  { %15968 = vst [vmem:[#allocation43_spill] sm:$0xff] %v12791_v24  ;;  %v196_v28 = vld [vmem:[#allocation3 + $0x340] sm:$0xff]  ;;  %v203_v33 = vld [vmem:[#allocation3 + $0x378] sm:$0xff]  ;;  %v209_v35 = vld [vmem:[#allocation3 + $0x3a8] sm:$0xff]  ;;  %v12797_v38 = vpack.c.bf16 %v231_v20, %v225_v18 }
  0x46   :  { %8296 = vmatpush1.bf16.msra.mxu1 %v12764_v43  ;;  %15969 = vst [vmem:[#allocation44_spill] sm:$0xff] %v12794_v30  ;;  %v224_v40 = vld [vmem:[#allocation3 + $0x420] sm:$0xff]  ;;  %v230_v41 = vld [vmem:[#allocation3 + $0x450] sm:$0xff]  ;;  %v237_v42 = vld [vmem:[#allocation3 + $0x488] sm:$0xff]  ;;  %v12800_v48 = vpack.c.bf16 %v196_v28, %v190_v25  ;;  %v12806_v53 = vpack.c.bf16 %v209_v35, %v203_v33 }
  0x47   :  { %8240 = vmatpush1.bf16.msra.mxu0 %v12758_v31  ;;  %8298 = vmatprep.subr.bf16.mxu1 %v12767_v45  ;;  %15970 = vst [vmem:[#allocation45_spill] sm:$0xff] %v12797_v38  ;;  %v243_v46 = vld [vmem:[#allocation3 + $0x4b8] sm:$0xff]  ;;  %v332_v51 = vld [vmem:[%s15674_s0] sm:$0xff]  ;;  %v202_v55 = vld [vmem:[#allocation3 + $0x370] sm:$0xff]  ;;  %v12809_v57 = vpack.c.bf16 %v230_v41, %v224_v40 }
  0x48   :  { %8242 = vmatprep.subr.bf16.mxu0 %v12761_v36  ;;  %15971 = vst [vmem:[#allocation46_spill] sm:$0xff] %v12800_v48  ;;  %15972 = vst [vmem:[#allocation47_spill] sm:$0xff] %v12806_v53  ;;  %v208_v56 = vld [vmem:[#allocation3 + $0x3a0] sm:$0xff]  ;;  %350 = vperm.xlu0 %12234, %v332_v51   ;;  %v215_v60 = vld [vmem:[#allocation3 + $0x3d8] sm:$0xff]  ;;  %v12815_v6 = vpack.c.bf16 %v243_v46, %v237_v42 }
  0x49   :  { %15973 = vst [vmem:[#allocation48_spill] sm:$0xff] %v12809_v57  ;;  %v221_v1 = vld [vmem:[#allocation3 + $0x408] sm:$0xff]  ;;  %v236_v7 = vld [vmem:[#allocation3 + $0x480] sm:$0xff]  ;;  %v242_v13 = vld [vmem:[#allocation3 + $0x4b0] sm:$0xff]  ;;  %v12818_v20 = vpack.c.bf16 %v208_v56, %v202_v55 }
  0x4a   :  { %8300 = vmatpush1.bf16.msra.mxu1 %v12776_v61  ;;  %v333_v3 = vld [vmem:[%s15674_s0 + $0x8] sm:$0xff]  ;;  %15974 = vst [vmem:[#allocation49_spill] sm:$0xff] %v12815_v6  ;;  %v255_v18 = vld [vmem:[#allocation3 + $0x518] sm:$0xff]  ;;  %v12821_v25 = vpack.c.bf16 %v221_v1, %v215_v60  ;;  %v214_v28 = vld [vmem:[#allocation3 + $0x3d0] sm:$0xff]  ;;  %v12824_v35 = vpack.c.bf16 %v242_v13, %v236_v7 }
  0x4b   :  { %8244 = vmatpush1.bf16.msra.mxu0 %v12770_v50  ;;  %8302 = vmatprep.subr.bf16.mxu1 %v12779_v63  ;;  %v249_v17 = vld [vmem:[#allocation3 + $0x4e8] sm:$0xff]  ;;  %15975 = vst [vmem:[#allocation50_spill] sm:$0xff] %v12818_v20  ;;  %v220_v33 = vld [vmem:[#allocation3 + $0x400] sm:$0xff]  ;;  %v227_v40 = vld [vmem:[#allocation3 + $0x438] sm:$0xff] }
  0x4c   :  { %8246 = vmatprep.subr.bf16.mxu0 %v12773_v54  ;;  %15976 = vst [vmem:[#allocation51_spill] sm:$0xff] %v12821_v25  ;;  %355 = vperm.xlu0 %12234, %v333_v3   ;;  %15977 = vst [vmem:[#allocation52_spill] sm:$0xff] %v12824_v35  ;;  %v233_v41 = vld [vmem:[#allocation3 + $0x468] sm:$0xff]  ;;  %v336_v42 = vld [vmem:[%s15674_s0 + $0x20] sm:$0xff]  ;;  %v12830_v46 = vpack.c.bf16 %v255_v18, %v249_v17  ;;  %v12833_v1 = vpack.c.bf16 %v220_v33, %v214_v28 }
  0x4d   :  { %v248_v51 = vld [vmem:[#allocation3 + $0x4e0] sm:$0xff]  ;;  %v254_v55 = vld [vmem:[#allocation3 + $0x510] sm:$0xff]  ;;  %v261_v56 = vld [vmem:[#allocation3 + $0x548] sm:$0xff]  ;;  %v12836_v3 = vpack.c.bf16 %v233_v41, %v227_v40 }
  0x4e   :  { %8304 = vmatpush1.bf16.msra.mxu1 %v12788_v22  ;;  %15978 = vst [vmem:[#allocation53_spill] sm:$0xff] %v12830_v46  ;;  %v267_v60 = vld [vmem:[#allocation3 + $0x578] sm:$0xff]  ;;  %15979 = vst [vmem:[#allocation54_spill] sm:$0xff] %v12833_v1  ;;  %v226_v7 = vld [vmem:[#allocation3 + $0x430] sm:$0xff]  ;;  %v12839_v0 = vpack.c.bf16 %v254_v55, %v248_v51 }
  0x4f   :  { %8248 = vmatpush1.bf16.msra.mxu0 %v12782_v4  ;;  %8306 = vmatprep.subr.bf16.mxu1 %v12791_v24  ;;  %15980 = vst [vmem:[#allocation55_spill] sm:$0xff] %v12836_v3  ;;  %v232_v13 = vld [vmem:[#allocation3 + $0x460] sm:$0xff]  ;;  %v239_v17 = vld [vmem:[#allocation3 + $0x498] sm:$0xff]  ;;  %v245_v18 = vld [vmem:[#allocation3 + $0x4c8] sm:$0xff]  ;;  %v12845_v28 = vpack.c.bf16 %v267_v60, %v261_v56 }
  0x50   :  { %8250 = vmatprep.subr.bf16.mxu0 %v12785_v12  ;;  %370 = vperm.xlu0 %12234, %v336_v42   ;;  %15981 = vst [vmem:[#allocation56_spill] sm:$0xff] %v12839_v0  ;;  %v260_v33 = vld [vmem:[#allocation3 + $0x540] sm:$0xff]  ;;  %v266_v40 = vld [vmem:[#allocation3 + $0x570] sm:$0xff]  ;;  %v273_v41 = vld [vmem:[#allocation3 + $0x5a8] sm:$0xff]  ;;  %v12848_v42 = vpack.c.bf16 %v232_v13, %v226_v7  ;;  %v12851_v51 = vpack.c.bf16 %v245_v18, %v239_v17 }
  0x51   :  { %15982 = vst [vmem:[#allocation57_spill] sm:$0xff] %v12845_v28  ;;  %v238_v55 = vld [vmem:[#allocation3 + $0x490] sm:$0xff]  ;;  %v251_v56 = vld [vmem:[#allocation3 + $0x4f8] sm:$0xff]  ;;  %v257_v60 = vld [vmem:[#allocation3 + $0x528] sm:$0xff] }
  0x52   :  { %8308 = vmatpush1.bf16.msra.mxu1 %v12800_v48  ;;  %15983 = vst [vmem:[#allocation58_spill] sm:$0xff] %v12848_v42  ;;  %15984 = vst [vmem:[#allocation59_spill] sm:$0xff] %v12851_v51  ;;  %v12854_v48 = vpack.c.bf16 %v266_v40, %v260_v33  ;;  %v340_v24 = vld [vmem:[%s15674_s0 + $0x40] sm:$0xff]  ;;  %v278_v17 = vld [vmem:[#allocation3 + $0x5d0] sm:$0xff] }
  0x53   :  { %8252 = vmatpush1.bf16.msra.mxu0 %v12794_v30  ;;  %8310 = vmatprep.subr.bf16.mxu1 %v12806_v53  ;;  %v338_v53 = vld [vmem:[%s15674_s0 + $0x30] sm:$0xff]  ;;  %v272_v13 = vld [vmem:[#allocation3 + $0x5a0] sm:$0xff]  ;;  %v275_v22 = vld [vmem:[#allocation3 + $0x5b8] sm:$0xff] }
  0x54   :  { %8254 = vmatprep.subr.bf16.mxu0 %v12797_v38  ;;  %380 = vperm.xlu0 %12234, %v338_v53   ;;  %15985 = vst [vmem:[#allocation60_spill] sm:$0xff] %v12854_v48  ;;  %v12866_v53 = vpack.c.bf16 %v257_v60, %v251_v56  ;;  %v250_v33 = vld [vmem:[#allocation3 + $0x4f0] sm:$0xff]  ;;  %v256_v40 = vld [vmem:[#allocation3 + $0x520] sm:$0xff]  ;;  %v281_v63 = vld [vmem:[#allocation3 + $0x5e8] sm:$0xff] }
  0x55   :  { %v12876_v56 = vpack.c.bf16 %v256_v40, %v250_v33  ;;  %v102_v60 = vld [vmem:[#allocation3 + $0x50] sm:$0xff]  ;;  %v109_v40 = vld [vmem:[#allocation3 + $0x88] sm:$0xff]  ;;  %v12897_v61 = vpack.c.bf16 %v281_v63, %v275_v22  ;;  %v127_v22 = vld [vmem:[#allocation3 + $0x118] sm:$0xff] }
  0x56   :  { %8312 = vmatpush1.bf16.msra.mxu1 %v12818_v20  ;;  %v244_v20 = vld [vmem:[#allocation3 + $0x4c0] sm:$0xff]  ;;  %15988 = vst [vmem:[#allocation63_spill] sm:$0xff] %v12866_v53  ;;  %v121_v63 = vld [vmem:[#allocation3 + $0xe8] sm:$0xff] }
  0x57   :  { %8256 = vmatpush1.bf16.msra.mxu0 %v12809_v57  ;;  %8314 = vmatprep.subr.bf16.mxu1 %v12821_v25  ;;  %v279_v25 = vld [vmem:[#allocation3 + $0x5d8] sm:$0xff]  ;;  %v12863_v18 = vpack.c.bf16 %v244_v20, %v238_v55  ;;  %v97_v20 = vld [vmem:[#allocation3 + $0x28] sm:$0xff]  ;;  %15990 = vst [vmem:[#allocation65_spill] sm:$0xff] %v12876_v56  ;;  %15997 = vst [vmem:[#allocation71_spill] sm:$0xff] %v12897_v61 }
  0x58   :  { %8258 = vmatprep.subr.bf16.mxu0 %v12815_v6  ;;  %v12860_v7 = vpack.c.bf16 %v279_v25, %v273_v41  ;;  %390 = vperm.xlu0 %12234, %v340_v24   ;;  %v269_v25 = vld [vmem:[#allocation3 + $0x588] sm:$0xff]  ;;  %v342_v41 = vld [vmem:[%s15674_s0 + $0x50] sm:$0xff]  ;;  %v103_v55 = vld [vmem:[#allocation3 + $0x58] sm:$0xff] }
  0x59   :  { %15987 = vst [vmem:[#allocation62_spill] sm:$0xff] %v12863_v18  ;;  %v12878_v24 = vpack.c.bf16 %v103_v55, %v97_v20  ;;  %v115_v20 = vld [vmem:[#allocation3 + $0xb8] sm:$0xff]  ;;  %v108_v55 = vld [vmem:[#allocation3 + $0x80] sm:$0xff] }
  0x5a   :  { %8316 = vmatpush1.bf16.msra.mxu1 %v12833_v1  ;;  %15986 = vst [vmem:[#allocation61_spill] sm:$0xff] %v12860_v7  ;;  %v263_v1 = vld [vmem:[#allocation3 + $0x558] sm:$0xff] }
  0x5b   :  { %8260 = vmatpush1.bf16.msra.mxu0 %v12824_v35  ;;  %8318 = vmatprep.subr.bf16.mxu1 %v12836_v3  ;;  %v12869_v3 = vpack.c.bf16 %v278_v17, %v272_v13  ;;  %15991 = vst [vmem:[#allocation66_spill] sm:$0xff] %v12878_v24  ;;  %v12881_v13 = vpack.c.bf16 %v269_v25, %v263_v1  ;;  %v262_v17 = vld [vmem:[#allocation3 + $0x550] sm:$0xff] }
  0x5c   :  { %8262 = vmatprep.subr.bf16.mxu0 %v12830_v46  ;;  %400 = vperm.xlu0 %12234, %v342_v41   ;;  %v12893_v25 = vpack.c.bf16 %v115_v20, %v109_v40  ;;  %v114_v41 = vld [vmem:[#allocation3 + $0xb0] sm:$0xff]  ;;  %v120_v40 = vld [vmem:[#allocation3 + $0xe0] sm:$0xff] }
  0x5d   :  { %15989 = vst [vmem:[#allocation64_spill] sm:$0xff] %v12869_v3  ;;  %15992 = vst [vmem:[#allocation67_spill] sm:$0xff] %v12881_v13  ;;  %v12900_v45 = vpack.c.bf16 %v114_v41, %v108_v55  ;;  %v126_v20 = vld [vmem:[#allocation3 + $0x110] sm:$0xff]  ;;  %v133_v41 = vld [vmem:[#allocation3 + $0x148] sm:$0xff] }
  0x5e   :  { %8320 = vmatpush1.bf16.msra.mxu1 %v12848_v42  ;;  %v268_v42 = vld [vmem:[#allocation3 + $0x580] sm:$0xff]  ;;  %15995 = vst [vmem:[#allocation70_spill] sm:$0xff] %v12893_v25  ;;  %v12914_v55 = vpack.c.bf16 %v126_v20, %v120_v40  ;;  %v145_v40 = vld [vmem:[#allocation3 + $0x1a8] sm:$0xff]  ;;  %v151_v20 = vld [vmem:[#allocation3 + $0x1d8] sm:$0xff] }
  0x5f   :  { %8264 = vmatpush1.bf16.msra.mxu0 %v12839_v0  ;;  %8322 = vmatprep.subr.bf16.mxu1 %v12851_v51  ;;  %v96_v51 = vld [vmem:[#allocation3 + $0x20] sm:$0xff]  ;;  %v12891_v1 = vpack.c.bf16 %v268_v42, %v262_v17  ;;  %15998 = vst [vmem:[#allocation72_spill] sm:$0xff] %v12900_v45  ;;  %v346_v42 = vld [vmem:[%s15674_s0 + $0x70] sm:$0xff] }
  0x60   :  { %8266 = vmatprep.subr.bf16.mxu0 %v12845_v28  ;;  %v12887_v33 = vpack.c.bf16 %v102_v60, %v96_v51  ;;  %v274_v51 = vld [vmem:[#allocation3 + $0x5b0] sm:$0xff]  ;;  %v280_v60 = vld [vmem:[#allocation3 + $0x5e0] sm:$0xff]  ;;  %16001 = vst [vmem:[#allocation75_spill] sm:$0xff] %v12914_v55 }
  0x61   :  { %15994 = vst [vmem:[#allocation69_spill] sm:$0xff] %v12891_v1  ;;  %v12908_v17 = vpack.c.bf16 %v280_v60, %v274_v51  ;;  %v139_v51 = vld [vmem:[#allocation3 + $0x178] sm:$0xff] }
  0x62   :  { %8324 = vmatpush1.bf16.msra.mxu1 %v12863_v18  ;;  %v344_v18 = vld [vmem:[%s15674_s0 + $0x60] sm:$0xff]  ;;  %15993 = vst [vmem:[#allocation68_spill] sm:$0xff] %v12887_v33  ;;  %v12918_v60 = vpack.c.bf16 %v139_v51, %v133_v41  ;;  %v150_v51 = vld [vmem:[#allocation3 + $0x1d0] sm:$0xff] }
  0x63   :  { %8268 = vmatpush1.bf16.msra.mxu0 %v12854_v48  ;;  %8326 = vmatprep.subr.bf16.mxu1 %v12866_v53  ;;  %v15996_v53 = vmov 0.0   ;;  %15999 = vst [vmem:[#allocation73_spill] sm:$0xff] %v12908_v17  ;;  %v144_v41 = vld [vmem:[#allocation3 + $0x1a0] sm:$0xff] }
  0x64   :  { %8270 = vmatprep.subr.bf16.mxu0 %v12860_v7  ;;  %410 = vperm.xlu0 %12234, %v344_v18   ;;  %v12911_v18 = vpack.c.bf16 %v127_v22, %v121_v63  ;;  %16002 = vst [vmem:[#allocation76_spill] sm:$0xff] %v12918_v60  ;;  %v138_v63 = vld [vmem:[#allocation3 + $0x170] sm:$0xff] }
  0x66   :  { %8328 = vmatpush1.bf16.msra.mxu1 %v12876_v56  ;;  %16000 = vst [vmem:[#allocation74_spill] sm:$0xff] %v12911_v18 }
  0x67   :  { %8272 = vmatpush1.bf16.msra.mxu0 %v12869_v3  ;;  %8330 = vmatprep.subr.bf16.mxu1 %v12881_v13 }
  0x68   :  { %8338 = vmatprep.subr.bf16.mxu0 %v12878_v24  ;;  %420 = vperm.xlu0 %12234, %v346_v42   ;;  %v132_v42 = vld [vmem:[#allocation3 + $0x140] sm:$0xff] }
  0x69   :  { %v12924_v22 = vpack.c.bf16 %v138_v63, %v132_v42  ;;  %v156_v42 = vld [vmem:[#allocation3 + $0x200] sm:$0xff]  ;;  %v162_v63 = vld [vmem:[#allocation3 + $0x230] sm:$0xff] }
  0x6a   :  { %669 = vmatmul.mubr.f32.vlgmr.msra.gmra.mrb[0].mxu0 %v15996_v53  ;;  %8332 = vmatpush1.bf16.msra.mxu1 %v12891_v1 }
  0x6b   :  { %8340 = vmatpush1.bf16.msra.mxu0 %v12887_v33  ;;  %810 = vmatprep.mubr.f32.mxu0 %v15996_v53  ;;  %16003 = vst [vmem:[#allocation77_spill] sm:$0xff] %v12924_v22  ;;  %v12935_v33 = vpack.c.bf16 %v162_v63, %v156_v42  ;;  %v180_v63 = vld [vmem:[#allocation3 + $0x2c0] sm:$0xff] }
  0x6c   :  { %8342 = vmatprep.subr.bf16.mxu0 %v12893_v25  ;;  %8334 = vmatprep.subr.bf16.mxu1 %v12897_v61 }
  0x6d   :  { %16007 = vst [vmem:[#allocation81_spill] sm:$0xff] %v12935_v33 }
  0x6e   :  { %8336 = vmatpush1.bf16.msra.mxu1 %v12908_v17  ;;  %v288_v17 = vld [vmem:[#allocation3 + $0x638] sm:$0xff] }
  0x6f   :  { %8344 = vmatpush1.bf16.msra.mxu0 %v12900_v45  ;;  %v12929_v45 = vpack.c.bf16 %v150_v51, %v144_v41  ;;  %v168_v51 = vld [vmem:[#allocation3 + $0x260] sm:$0xff] }
  0x70   :  { %8346 = vmatprep.subr.bf16.mxu0 %v12911_v18  ;;  %v12927_v18 = vpack.c.bf16 %v151_v20, %v145_v40  ;;  %v169_v40 = vld [vmem:[#allocation3 + $0x268] sm:$0xff]  ;;  %v175_v20 = vld [vmem:[#allocation3 + $0x298] sm:$0xff] }
  0x71   :  { %740 = vmatmul.mubr.f32.vlgmr.msra.gmra.mrb[0].mxu1 %v15996_v53  ;;  %16005 = vst [vmem:[#allocation79_spill] sm:$0xff] %v12929_v45  ;;  %v12939_v41 = vpack.c.bf16 %v175_v20, %v169_v40  ;;  %v287_v20 = vld [vmem:[#allocation3 + $0x630] sm:$0xff] }
  0x72   :  { %905 = vmatprep.mubr.f32.mxu1 %v15996_v53  ;;  %16004 = vst [vmem:[#allocation78_spill] sm:$0xff] %v12927_v18 }
  0x73   :  { %8348 = vmatpush1.bf16.msra.mxu0 %v12914_v55  ;;  %v163_v55 = vld [vmem:[#allocation3 + $0x238] sm:$0xff]  ;;  %16008 = vst [vmem:[#allocation82_spill] sm:$0xff] %v12939_v41 }
  0x74   :  { %8350 = vmatprep.subr.bf16.mxu0 %v12918_v60  ;;  %v157_v60 = vld [vmem:[#allocation3 + $0x208] sm:$0xff] }
  0x75   :  { %v12933_v25 = vpack.c.bf16 %v163_v55, %v157_v60  ;;  %v181_v55 = vld [vmem:[#allocation3 + $0x2c8] sm:$0xff]  ;;  %v187_v60 = vld [vmem:[#allocation3 + $0x2f8] sm:$0xff] }
  0x76   :  { %v12945_v42 = vpack.c.bf16 %v187_v60, %v181_v55  ;;  %v198_v60 = vld [vmem:[#allocation3 + $0x350] sm:$0xff] }
  0x77   :  { %8352 = vmatpush1.bf16.msra.mxu0 %v12924_v22  ;;  %16006 = vst [vmem:[#allocation80_spill] sm:$0xff] %v12933_v25 }
  0x78   :  { %8354 = vmatprep.subr.bf16.mxu0 %v12927_v18  ;;  %v174_v18 = vld [vmem:[#allocation3 + $0x290] sm:$0xff]  ;;  %16010 = vst [vmem:[#allocation84_spill] sm:$0xff] %v12945_v42 }
  0x79   :  { %v12941_v22 = vpack.c.bf16 %v174_v18, %v168_v51  ;;  %v284_v18 = vld [vmem:[#allocation3 + $0x600] sm:$0xff] }
  0x7a   :  { %v12953_v51 = vpack.c.bf16 %v287_v20, %v284_v18  ;;  %v290_v18 = vld [vmem:[#allocation3 + $0x660] sm:$0xff]  ;;  %v293_v20 = vld [vmem:[#allocation3 + $0x690] sm:$0xff] }
  0x7b   :  { %8356 = vmatpush1.bf16.msra.mxu0 %v12929_v45  ;;  %16009 = vst [vmem:[#allocation83_spill] sm:$0xff] %v12941_v22 }
  0x7c   :  { %8358 = vmatprep.subr.bf16.mxu0 %v12933_v25  ;;  %v186_v25 = vld [vmem:[#allocation3 + $0x2f0] sm:$0xff]  ;;  %16013 = vst [vmem:[#allocation87_spill] sm:$0xff] %v12953_v51 }
  0x7d   :  { %v12947_v45 = vpack.c.bf16 %v186_v25, %v180_v63  ;;  %v192_v25 = vld [vmem:[#allocation3 + $0x320] sm:$0xff] }
  0x7e   :  { %v12959_v63 = vpack.c.bf16 %v198_v60, %v192_v25  ;;  %v204_v25 = vld [vmem:[#allocation3 + $0x380] sm:$0xff]  ;;  %v210_v60 = vld [vmem:[#allocation3 + $0x3b0] sm:$0xff] }
  0x7f   :  { %8360 = vmatpush1.bf16.msra.mxu0 %v12935_v33  ;;  %16011 = vst [vmem:[#allocation85_spill] sm:$0xff] %v12947_v45  ;;  %v285_v33 = vld [vmem:[#allocation3 + $0x608] sm:$0xff] }
  0x80   :  { %8362 = vmatprep.subr.bf16.mxu0 %v12939_v41  ;;  %v12950_v40 = vpack.c.bf16 %v288_v17, %v285_v33  ;;  %v199_v41 = vld [vmem:[#allocation3 + $0x358] sm:$0xff]  ;;  %16015 = vst [vmem:[#allocation89_spill] sm:$0xff] %v12959_v63  ;;  %v291_v33 = vld [vmem:[#allocation3 + $0x668] sm:$0xff] }
  0x81   :  { %v294_v17 = vld [vmem:[#allocation3 + $0x698] sm:$0xff] }
  0x82   :  { %16012 = vst [vmem:[#allocation86_spill] sm:$0xff] %v12950_v40  ;;  %8402 = vmatprep.subr.bf16.mxu1 %v12950_v40 }
  0x83   :  { %8364 = vmatpush1.bf16.msra.mxu0 %v12941_v22  ;;  %v193_v22 = vld [vmem:[#allocation3 + $0x328] sm:$0xff]  ;;  %8404 = vmatpush1.bf16.msra.mxu1 %v12953_v51  ;;  %v12971_v51 = vpack.c.bf16 %v210_v60, %v204_v25  ;;  %v216_v25 = vld [vmem:[#allocation3 + $0x3e0] sm:$0xff]  ;;  %v222_v60 = vld [vmem:[#allocation3 + $0x410] sm:$0xff] }
  0x84   :  { %8366 = vmatprep.subr.bf16.mxu0 %v12945_v42  ;;  %v12956_v55 = vpack.c.bf16 %v199_v41, %v193_v22  ;;  %v12962_v42 = vpack.c.bf16 %v294_v17, %v291_v33  ;;  %v205_v22 = vld [vmem:[#allocation3 + $0x388] sm:$0xff]  ;;  %v211_v41 = vld [vmem:[#allocation3 + $0x3b8] sm:$0xff] }
  0x85   :  { %v12968_v40 = vpack.c.bf16 %v211_v41, %v205_v22  ;;  %16019 = vst [vmem:[#allocation93_spill] sm:$0xff] %v12971_v51  ;;  %v297_v33 = vld [vmem:[#allocation3 + $0x6c8] sm:$0xff]  ;;  %v300_v17 = vld [vmem:[#allocation3 + $0x6f8] sm:$0xff] }
  0x86   :  { %16014 = vst [vmem:[#allocation88_spill] sm:$0xff] %v12956_v55  ;;  %16016 = vst [vmem:[#allocation90_spill] sm:$0xff] %v12962_v42  ;;  %8406 = vmatprep.subr.bf16.mxu1 %v12962_v42  ;;  %v217_v22 = vld [vmem:[#allocation3 + $0x3e8] sm:$0xff]  ;;  %v223_v41 = vld [vmem:[#allocation3 + $0x418] sm:$0xff] }
  0x87   :  { %8368 = vmatpush1.bf16.msra.mxu0 %v12947_v45  ;;  %v12965_v45 = vpack.c.bf16 %v293_v20, %v290_v18  ;;  %16018 = vst [vmem:[#allocation92_spill] sm:$0xff] %v12968_v40  ;;  %v296_v18 = vld [vmem:[#allocation3 + $0x6c0] sm:$0xff]  ;;  %v299_v20 = vld [vmem:[#allocation3 + $0x6f0] sm:$0xff]  ;;  %v12980_v42 = vpack.c.bf16 %v223_v41, %v217_v22  ;;  %v229_v22 = vld [vmem:[#allocation3 + $0x448] sm:$0xff] }
  0x88   :  { %8370 = vmatprep.subr.bf16.mxu0 %v12956_v55  ;;  %v12974_v55 = vpack.c.bf16 %v300_v17, %v297_v33  ;;  %v303_v33 = vld [vmem:[#allocation3 + $0x728] sm:$0xff]  ;;  %v306_v17 = vld [vmem:[#allocation3 + $0x758] sm:$0xff] }
  0x89   :  { %16017 = vst [vmem:[#allocation91_spill] sm:$0xff] %v12965_v45  ;;  %8408 = vmatpush1.bf16.msra.mxu1 %v12965_v45  ;;  %16022 = vst [vmem:[#allocation96_spill] sm:$0xff] %v12980_v42  ;;  %v12983_v45 = vpack.c.bf16 %v222_v60, %v216_v25  ;;  %v235_v41 = vld [vmem:[#allocation3 + $0x478] sm:$0xff]  ;;  %v228_v25 = vld [vmem:[#allocation3 + $0x440] sm:$0xff] }
  0x8a   :  { %16020 = vst [vmem:[#allocation94_spill] sm:$0xff] %v12974_v55  ;;  %8410 = vmatprep.subr.bf16.mxu1 %v12974_v55  ;;  %v12992_v55 = vpack.c.bf16 %v235_v41, %v229_v22  ;;  %v234_v60 = vld [vmem:[#allocation3 + $0x470] sm:$0xff]  ;;  %v241_v22 = vld [vmem:[#allocation3 + $0x4a8] sm:$0xff]  ;;  %v247_v41 = vld [vmem:[#allocation3 + $0x4d8] sm:$0xff] }
  0x8b   :  { %8372 = vmatpush1.bf16.msra.mxu0 %v12959_v63  ;;  %v12977_v63 = vpack.c.bf16 %v299_v20, %v296_v18  ;;  %16023 = vst [vmem:[#allocation97_spill] sm:$0xff] %v12983_v45  ;;  %v302_v18 = vld [vmem:[#allocation3 + $0x720] sm:$0xff]  ;;  %v305_v20 = vld [vmem:[#allocation3 + $0x750] sm:$0xff] }
  0x8c   :  { %8374 = vmatprep.subr.bf16.mxu0 %v12968_v40  ;;  %v12986_v40 = vpack.c.bf16 %v306_v17, %v303_v33  ;;  %16026 = vst [vmem:[#allocation100_spill] sm:$0xff] %v12992_v55  ;;  %v309_v33 = vld [vmem:[#allocation3 + $0x788] sm:$0xff]  ;;  %v312_v17 = vld [vmem:[#allocation3 + $0x7b8] sm:$0xff] }
  0x8d   :  { %16021 = vst [vmem:[#allocation95_spill] sm:$0xff] %v12977_v63  ;;  %8412 = vmatpush1.bf16.msra.mxu1 %v12977_v63  ;;  %v12995_v63 = vpack.c.bf16 %v234_v60, %v228_v25  ;;  %v240_v25 = vld [vmem:[#allocation3 + $0x4a0] sm:$0xff]  ;;  %v246_v60 = vld [vmem:[#allocation3 + $0x4d0] sm:$0xff] }
  0x8e   :  { %16024 = vst [vmem:[#allocation98_spill] sm:$0xff] %v12986_v40  ;;  %8414 = vmatprep.subr.bf16.mxu1 %v12986_v40  ;;  %v13004_v40 = vpack.c.bf16 %v247_v41, %v241_v22  ;;  %v253_v22 = vld [vmem:[#allocation3 + $0x508] sm:$0xff]  ;;  %v259_v41 = vld [vmem:[#allocation3 + $0x538] sm:$0xff] }
  0x8f   :  { %8376 = vmatpush1.bf16.msra.mxu0 %v12971_v51  ;;  %v12989_v51 = vpack.c.bf16 %v305_v20, %v302_v18  ;;  %16027 = vst [vmem:[#allocation101_spill] sm:$0xff] %v12995_v63  ;;  %v308_v18 = vld [vmem:[#allocation3 + $0x780] sm:$0xff]  ;;  %v311_v20 = vld [vmem:[#allocation3 + $0x7b0] sm:$0xff] }
  0x90   :  { %8378 = vmatprep.subr.bf16.mxu0 %v12980_v42  ;;  %v12998_v42 = vpack.c.bf16 %v312_v17, %v309_v33  ;;  %16030 = vst [vmem:[#allocation104_spill] sm:$0xff] %v13004_v40  ;;  %v315_v33 = vld [vmem:[#allocation3 + $0x7e8] sm:$0xff]  ;;  %v318_v17 = vld [vmem:[#allocation3 + $0x818] sm:$0xff] }
  0x91   :  { %16025 = vst [vmem:[#allocation99_spill] sm:$0xff] %v12989_v51  ;;  %8416 = vmatpush1.bf16.msra.mxu1 %v12989_v51  ;;  %v13007_v51 = vpack.c.bf16 %v246_v60, %v240_v25  ;;  %v252_v25 = vld [vmem:[#allocation3 + $0x500] sm:$0xff]  ;;  %v258_v60 = vld [vmem:[#allocation3 + $0x530] sm:$0xff] }
  0x92   :  { %16028 = vst [vmem:[#allocation102_spill] sm:$0xff] %v12998_v42  ;;  %8418 = vmatprep.subr.bf16.mxu1 %v12998_v42  ;;  %v13016_v42 = vpack.c.bf16 %v259_v41, %v253_v22  ;;  %v265_v22 = vld [vmem:[#allocation3 + $0x568] sm:$0xff]  ;;  %v271_v41 = vld [vmem:[#allocation3 + $0x598] sm:$0xff] }
  0x93   :  { %8380 = vmatpush1.bf16.msra.mxu0 %v12983_v45  ;;  %v13001_v45 = vpack.c.bf16 %v311_v20, %v308_v18  ;;  %16031 = vst [vmem:[#allocation105_spill] sm:$0xff] %v13007_v51  ;;  %v314_v18 = vld [vmem:[#allocation3 + $0x7e0] sm:$0xff]  ;;  %v317_v20 = vld [vmem:[#allocation3 + $0x810] sm:$0xff] }
  0x94   :  { %8382 = vmatprep.subr.bf16.mxu0 %v12992_v55  ;;  %v13010_v55 = vpack.c.bf16 %v318_v17, %v315_v33  ;;  %16034 = vst [vmem:[#allocation108_spill] sm:$0xff] %v13016_v42  ;;  %v321_v33 = vld [vmem:[#allocation3 + $0x848] sm:$0xff]  ;;  %v324_v17 = vld [vmem:[#allocation3 + $0x878] sm:$0xff] }
  0x95   :  { %16029 = vst [vmem:[#allocation103_spill] sm:$0xff] %v13001_v45  ;;  %8420 = vmatpush1.bf16.msra.mxu1 %v13001_v45  ;;  %v13019_v45 = vpack.c.bf16 %v258_v60, %v252_v25  ;;  %v264_v25 = vld [vmem:[#allocation3 + $0x560] sm:$0xff]  ;;  %v270_v60 = vld [vmem:[#allocation3 + $0x590] sm:$0xff] }
  0x96   :  { %16032 = vst [vmem:[#allocation106_spill] sm:$0xff] %v13010_v55  ;;  %8422 = vmatprep.subr.bf16.mxu1 %v13010_v55  ;;  %v13028_v55 = vpack.c.bf16 %v271_v41, %v265_v22  ;;  %v277_v22 = vld [vmem:[#allocation3 + $0x5c8] sm:$0xff]  ;;  %v283_v41 = vld [vmem:[#allocation3 + $0x5f8] sm:$0xff] }
  0x97   :  { %8384 = vmatpush1.bf16.msra.mxu0 %v12995_v63  ;;  %v13013_v63 = vpack.c.bf16 %v317_v20, %v314_v18  ;;  %16035 = vst [vmem:[#allocation109_spill] sm:$0xff] %v13019_v45  ;;  %v320_v18 = vld [vmem:[#allocation3 + $0x840] sm:$0xff]  ;;  %v323_v20 = vld [vmem:[#allocation3 + $0x870] sm:$0xff] }
  0x98   :  { %8386 = vmatprep.subr.bf16.mxu0 %v13004_v40  ;;  %v13022_v40 = vpack.c.bf16 %v324_v17, %v321_v33  ;;  %16038 = vst [vmem:[#allocation112_spill] sm:$0xff] %v13028_v55  ;;  %v327_v33 = vld [vmem:[#allocation3 + $0x8a8] sm:$0xff]  ;;  %v330_v17 = vld [vmem:[#allocation3 + $0x8d8] sm:$0xff] }
  0x99   :  { %16033 = vst [vmem:[#allocation107_spill] sm:$0xff] %v13013_v63  ;;  %8424 = vmatpush1.bf16.msra.mxu1 %v13013_v63  ;;  %v13031_v63 = vpack.c.bf16 %v270_v60, %v264_v25  ;;  %v276_v25 = vld [vmem:[#allocation3 + $0x5c0] sm:$0xff]  ;;  %v282_v60 = vld [vmem:[#allocation3 + $0x5f0] sm:$0xff] }
  0x9a   :  { %16036 = vst [vmem:[#allocation110_spill] sm:$0xff] %v13022_v40  ;;  %8426 = vmatprep.subr.bf16.mxu1 %v13022_v40  ;;  %v13040_v40 = vpack.c.bf16 %v283_v41, %v277_v22  ;;  %v41_v22 = vld [vmem:[#allocation6] sm:$0x7] }
  0x9b   :  { %8388 = vmatpush1.bf16.msra.mxu0 %v13007_v51  ;;  %v13025_v51 = vpack.c.bf16 %v323_v20, %v320_v18  ;;  %16039 = vst [vmem:[#allocation113_spill] sm:$0xff] %v13031_v63  ;;  %v326_v18 = vld [vmem:[#allocation3 + $0x8a0] sm:$0xff]  ;;  %v329_v20 = vld [vmem:[#allocation3 + $0x8d0] sm:$0xff] }
  0x9c   :  { %8390 = vmatprep.subr.bf16.mxu0 %v13016_v42  ;;  %v13034_v42 = vpack.c.bf16 %v330_v17, %v327_v33  ;;  %16042 = vst [vmem:[#allocation116_spill] sm:$0xff] %v13040_v40  ;;  %v15794_v33 = vmov 0.0|0.0   ;;  %v45_v17 = vlaneseq }
  0x9d   :  { %16037 = vst [vmem:[#allocation111_spill] sm:$0xff] %v13025_v51  ;;  %8428 = vmatpush1.bf16.msra.mxu1 %v13025_v51  ;;  %v13043_v51 = vpack.c.bf16 %v282_v60, %v276_v25  ;;  %v42_v60 = vld [vmem:[#allocation6 + $0x3] sm:$0x7] }
  0x9e   :  { %16040 = vst [vmem:[#allocation114_spill] sm:$0xff] %v13034_v42  ;;  %8430 = vmatprep.subr.bf16.mxu1 %v13034_v42 }
  0x9f   :  { %8392 = vmatpush1.bf16.msra.mxu0 %v13019_v45  ;;  %v13037_v45 = vpack.c.bf16 %v329_v20, %v326_v18  ;;  %16043 = vst [vmem:[#allocation117_spill] sm:$0xff] %v13043_v51  ;;  %v13080_v18 = vshrl.u32 %v45_v17, 7  ;;  %v13096_v17 = vld [vmem:[#allocation6 + $0x6] sm:$0x3f] }
  0xa0   :  { %8394 = vmatprep.subr.bf16.mxu0 %v13028_v55 }
  0xa1   :  { %16041 = vst [vmem:[#allocation115_spill] sm:$0xff] %v13037_v45  ;;  %8432 = vmatpush1.bf16.msra.mxu1 %v13037_v45  ;;  %v13085_v20 = vsub.s32 0, %v13080_v18  ;;  %v13088_v41 = vsub.s32 1, %v13080_v18 }
  0xa2   :  { %8433 = vmatprep.subr.bf16.mxu1 %v15794_v33 }
  0xa3   :  { %8396 = vmatpush1.bf16.msra.mxu0 %v13031_v63  ;;  %v13091_v25 = vrot.slane %v41_v22, %v13085_v20 }
  0xa4   :  { %8398 = vmatprep.subr.bf16.mxu0 %v13040_v40 }
  0xa5   :  { %16044 = vst [vmem:[#allocation118_spill] sm:$0xff] %v13091_v25 }
  0xa7   :  { %8400 = vmatpush1.bf16.msra.mxu0 %v13043_v51 }
  0xa8   :  { %8458 = vmatprep.subr.bf16.mxu0 %v12683_v5 }
  0xaa   :  { %811 = vmatmul.mubr.f32.vlgmr.msra.gmra.mrb[2].mxu0 %v15996_v53 }
  0xab   :  { %8460 = vmatpush1.bf16.msra.mxu0 %v12685_v9 }
  0xac   :  { %8462 = vmatprep.subr.bf16.mxu0 %v12687_v10 }
  0xaf   :  { %8464 = vmatpush1.bf16.msra.mxu0 %v12691_v15 }
  0xb0   :  { %8466 = vmatprep.subr.bf16.mxu0 %v12694_v16 }
  0xb3   :  { %8468 = vmatpush1.bf16.msra.mxu0 %v12697_v21 }
  0xb4   :  { %8470 = vmatprep.subr.bf16.mxu0 %v12700_v23 }
  0xb7   :  { %8472 = vmatpush1.bf16.msra.mxu0 %v12705_v32 }
  0xb8   :  { %8474 = vmatprep.subr.bf16.mxu0 %v12711_v37 }
  0xbb   :  { %8476 = vmatpush1.bf16.msra.mxu0 %v12720_v47 }
  0xbc   :  { %8478 = vmatprep.subr.bf16.mxu0 %v12725_v52 }
  0xbf   :  { %8480 = vmatpush1.bf16.msra.mxu0 %v12734_v62 }
  0xc0   :  { %8482 = vmatprep.subr.bf16.mxu0 %v12737_v2 }
  0xc3   :  { %8484 = vmatpush1.bf16.msra.mxu0 %v12746_v14 }
  0xc4   :  { %8486 = vmatprep.subr.bf16.mxu0 %v12749_v19 }
  0xc7   :  { %8488 = vmatpush1.bf16.msra.mxu0 %v12758_v31  ;;  %v351_v33 = vpop.permute.xlu0 %350 }
  0xc8   :  { %8490 = vmatprep.subr.bf16.mxu0 %v12761_v36 }
  0xcb   :  { %8492 = vmatpush1.bf16.msra.mxu0 %v12770_v50 }
  0xcc   :  { %8494 = vmatprep.subr.bf16.mxu0 %v12773_v54 }
  0xcf   :  { %8496 = vmatpush1.bf16.msra.mxu0 %v12782_v4 }
  0xd0   :  { %8498 = vmatprep.subr.bf16.mxu0 %v12785_v12 }
  0xd3   :  { %8500 = vmatpush1.bf16.msra.mxu0 %v12794_v30 }
  0xd4   :  { %8502 = vmatprep.subr.bf16.mxu0 %v12797_v38 }
  0xd7   :  { %8504 = vmatpush1.bf16.msra.mxu0 %v12809_v57 }
  0xd8   :  { %8506 = vmatprep.subr.bf16.mxu0 %v12815_v6 }
  0xdb   :  { %8508 = vmatpush1.bf16.msra.mxu0 %v12824_v35 }
  0xdc   :  { %8510 = vmatprep.subr.bf16.mxu0 %v12830_v46  ;;  %v13112_v46 = vrot.slane %v13096_v17, %v13088_v41 }
  0xde   :  { %16049 = vst [vmem:[#allocation123_spill] sm:$0xff] %v13112_v46 }
  0xdf   :  { %8512 = vmatpush1.bf16.msra.mxu0 %v12839_v0  ;;  %v13108_v0 = vrot.slane %v42_v60, %v13088_v41 }
  0xe0   :  { %8514 = vmatprep.subr.bf16.mxu0 %v12845_v28 }
  0xe1   :  { %16048 = vst [vmem:[#allocation122_spill] sm:$0xff] %v13108_v0 }
  0xe3   :  { %8516 = vmatpush1.bf16.msra.mxu0 %v12854_v48  ;;  %v13104_v48 = vrot.slane %v13096_v17, %v13085_v20 }
  0xe4   :  { %8518 = vmatprep.subr.bf16.mxu0 %v12860_v7  ;;  %v13094_v7 = vrot.slane %v41_v22, %v13088_v41 }
  0xe5   :  { %16047 = vst [vmem:[#allocation121_spill] sm:$0xff] %v13104_v48 }
  0xe6   :  { %16045 = vst [vmem:[#allocation119_spill] sm:$0xff] %v13094_v7  ;;  %v445_v28 = vmul.f32 %v13094_v7, %v351_v33 }
  0xe7   :  { %8520 = vmatpush1.bf16.msra.mxu0 %v12869_v3  ;;  %v444_v3 = vmul.f32 %v13091_v25, %v351_v33 }
  0xe8   :  { %8586 = vmatprep.subr.bf16.mxu0 %v12878_v24  ;;  %v13100_v24 = vrot.slane %v42_v60, %v13085_v20  ;;  %v509_v38 = vadd.f32 %v13108_v0, %v445_v28  ;;  %v289_v0 = vld [vmem:[#allocation3 + $0x640] sm:$0xff] }
  0xea   :  { %16046 = vst [vmem:[#allocation120_spill] sm:$0xff] %v13100_v24  ;;  %v508_v35 = vadd.f32 %v13100_v24, %v444_v3  ;;  %v13121_v3 = vsub.s32 2, %v13080_v18 }
 0x13d   :  { %v670_v6 = vpop.f32.mrb[0].mxu0 }
 0x13e   :  { %v671_v25 = vadd.f32 %v670_v6, %v13104_v48  ;;  %v672_v57 = vpop.f32.mrb[1].mxu0  ;;  %v13124_v6 = vrot.slane %v41_v22, %v13121_v3 }
 0x13f   :  { %v673_v30 = vadd.f32 %v672_v57, %v13112_v46  ;;  %v13128_v57 = vrot.slane %v13096_v17, %v13121_v3 }
 0x140   :  { %v820_v12 = vadd.f32 %v671_v25, %v508_v35  ;;  %16050 = vst [vmem:[#allocation124_spill] sm:$0xff] %v13124_v6  ;;  %v286_v25 = vld [vmem:[#allocation3 + $0x610] sm:$0xff] }
 0x141   :  { %v827_v7 = vadd.f32 %v673_v30, %v509_v38  ;;  %v13132_v30 = vrot.slane %v42_v60, %v13121_v3 }
 0x142   :  { %v7207_v4 = vmul.f32 -1.442695, %v820_v12 }
 0x143   :  { %v7208_v54 = vmul.f32 -1.442695, %v827_v7 }
 0x144   :  { %12236 = vpow2.f32 %v7207_v4  ;;  %v741_v50 = vpop.f32.mrb[0].mxu1  ;;  %v446_v4 = vmul.f32 %v13124_v6, %v351_v33  ;;  %v13136_v6 = vpack.c.bf16 %v289_v0, %v286_v25  ;;  %v319_v25 = vld [vmem:[#allocation3 + $0x820] sm:$0xff] }
 0x145   :  { %v13118_v36 = vpop.f32.mrb[1].mxu1  ;;  %12238 = vpow2.f32 %v7208_v54 }
 0x146   :  { %v510_v35 = vadd.f32 %v13132_v30, %v446_v4 }
 0x14e   :  { %v12237_v31 = vpop.eup %12236 }
 0x14f   :  { %v824_v19 = vadd.f32 1.0, %v12237_v31  ;;  %v12239_v12 = vpop.eup %12238  ;;  %v742_v31 = vadd.f32 %v741_v50, %v13128_v57  ;;  %v295_v50 = vld [vmem:[#allocation3 + $0x6a0] sm:$0xff] }
 0x150   :  { %v831_v54 = vadd.f32 1.0, %v12239_v12  ;;  %v292_v12 = vld [vmem:[#allocation3 + $0x670] sm:$0xff] }
 0x151   :  { %12240 = vrcp.f32 %v824_v19  ;;  %v13142_v4 = vpack.c.bf16 %v295_v50, %v292_v12  ;;  %v322_v12 = vld [vmem:[#allocation3 + $0x850] sm:$0xff]  ;;  %v325_v50 = vld [vmem:[#allocation3 + $0x880] sm:$0xff] }
 0x152   :  { %12242 = vrcp.f32 %v831_v54  ;;  %v16051_v54 = vmov 0.0|0.0  }
 0x15b   :  { %v12241_v38 = vpop.eup %12240 }
 0x15c   :  { %v834_v19 = vmul.f32 %v12241_v38, %v742_v31  ;;  %v12243_v7 = vpop.eup %12242  ;;  %v298_v31 = vld [vmem:[#allocation3 + $0x6d0] sm:$0xff]  ;;  %v307_v38 = vld [vmem:[#allocation3 + $0x760] sm:$0xff] }
 0x15d   :  { %v837_v22 = vsub.f32 1.0, %v12243_v7  ;;  %v839_v48 = vmul.f32 0.0, %v12243_v7 }
 0x15e   :  { %v835_v28 = vadd.f32 %v834_v19, %v510_v35  ;;  %v310_v19 = vld [vmem:[#allocation3 + $0x790] sm:$0xff] }
 0x160   :  { %12244 = vtanh.f32 %v835_v28  ;;  %v313_v28 = vld [vmem:[#allocation3 + $0x7c0] sm:$0xff] }
 0x161   :  { %v13156_v7 = vpack.c.bf16 %v313_v28, %v310_v19  ;;  %v16052_v19 = vld [vmem:[#allocation35_spill] sm:$0xff]  ;;  %v16053_v28 = vld [vmem:[#allocation38_spill] sm:$0xff] }
 0x16a   :  { %v12245_v46 = vpop.eup %12244 }
 0x16b   :  { %v838_v33 = vmul.f32 %v12245_v46, %v837_v22  ;;  %v301_v46 = vld [vmem:[#allocation3 + $0x700] sm:$0xff]  ;;  %v316_v22 = vld [vmem:[#allocation3 + $0x7f0] sm:$0xff] }
 0x16c   :  { %v13148_v0 = vpack.c.bf16 %v301_v46, %v298_v31  ;;  %v13164_v31 = vpack.c.bf16 %v325_v50, %v322_v12  ;;  %v328_v46 = vld [vmem:[#allocation3 + $0x8b0] sm:$0xff] }
 0x16d   :  { %v13138_v60 = vadd.f32 %v839_v48, %v838_v33  ;;  %v304_v48 = vld [vmem:[#allocation3 + $0x730] sm:$0xff]  ;;  %v13160_v33 = vpack.c.bf16 %v319_v25, %v316_v22 }
 0x16e   :  { %v13152_v35 = vpack.c.bf16 %v307_v38, %v304_v48  ;;  %v331_v48 = vld [vmem:[#allocation3 + $0x8e0] sm:$0xff]  ;;  %v16054_v22 = vld [vmem:[#allocation39_spill] sm:$0xff]  ;;  %v16055_v25 = vld [vmem:[#allocation42_spill] sm:$0xff] }
 0x16f   :  { %906 = vmatmul.mubr.f32.vlgmr.msra.gmra.mrb[2].mxu1 %v13138_v60  ;;  %v13168_v38 = vpack.c.bf16 %v331_v48, %v328_v46  ;;  %v16056_v12 = vld [vmem:[#allocation43_spill] sm:$0xff]  ;;  %v16057_v50 = vld [vmem:[#allocation46_spill] sm:$0xff] }
 0x170   :  { %8435 = vmatpush3.bf16.msra.mxu1 %v13136_v6  ;;  %7611 = vmatprep.mubr.msk.f32.mxu1 %vm12635_vm0, %v15996_v53  ;;  %v16058_v46 = vld [vmem:[#allocation47_spill] sm:$0xff]  ;;  %v16059_v48 = vld [vmem:[#allocation50_spill] sm:$0xff] }
 0x171   :  { %8436 = vmatprep.subr.bf16.mxu1 %v16051_v54 }
 0x174   :  { %8438 = vmatpush3.bf16.msra.mxu1 %v13142_v4 }
 0x175   :  { %8439 = vmatprep.subr.bf16.mxu1 %v16051_v54 }
 0x178   :  { %8441 = vmatpush3.bf16.msra.mxu1 %v13148_v0 }
 0x179   :  { %8442 = vmatprep.subr.bf16.mxu1 %v16051_v54 }
 0x17c   :  { %8444 = vmatpush3.bf16.msra.mxu1 %v13152_v35 }
 0x17d   :  { %8445 = vmatprep.subr.bf16.mxu1 %v16051_v54 }
 0x180   :  { %8447 = vmatpush3.bf16.msra.mxu1 %v13156_v7 }
 0x181   :  { %8448 = vmatprep.subr.bf16.mxu1 %v16051_v54 }
 0x184   :  { %8450 = vmatpush3.bf16.msra.mxu1 %v13160_v33 }
 0x185   :  { %8451 = vmatprep.subr.bf16.mxu1 %v16051_v54 }
 0x188   :  { %8453 = vmatpush3.bf16.msra.mxu1 %v13164_v31 }
 0x189   :  { %8454 = vmatprep.subr.bf16.mxu1 %v16051_v54 }
 0x18c   :  { %8456 = vmatpush3.bf16.msra.mxu1 %v13168_v38 }
 0x18d   :  { %8522 = vmatprep.subr.bf16.mxu1 %v12702_v29 }
 0x18f   :  { %7612 = vmatmul.mubr.f32.vlgmr.msra.gmra.mrb[4].mxu1 %v13138_v60 }
 0x190   :  { %8524 = vmatpush1.bf16.msra.mxu1 %v12708_v34 }
 0x191   :  { %8526 = vmatprep.subr.bf16.mxu1 %v12713_v39 }
 0x194   :  { %8528 = vmatpush1.bf16.msra.mxu1 %v12716_v44 }
 0x195   :  { %8530 = vmatprep.subr.bf16.mxu1 %v12722_v49 }
 0x198   :  { %8532 = vmatpush1.bf16.msra.mxu1 %v12728_v58 }
 0x199   :  { %8534 = vmatprep.subr.bf16.mxu1 %v12731_v59  ;;  %v67_v59 = vsub.s32 5, %v13080_v18 }
 0x19c   :  { %8536 = vmatpush1.bf16.msra.mxu1 %v12740_v8 }
 0x19d   :  { %8538 = vmatprep.subr.bf16.mxu1 %v12743_v11 }
 0x1a0   :  { %8540 = vmatpush1.bf16.msra.mxu1 %v12752_v26  ;;  %v16060_v26 = vld [vmem:[#allocation51_spill] sm:$0xff] }
 0x1a1   :  { %8542 = vmatprep.subr.bf16.mxu1 %v12755_v27  ;;  %v16061_v27 = vld [vmem:[#allocation54_spill] sm:$0xff] }
 0x1a4   :  { %8544 = vmatpush1.bf16.msra.mxu1 %v12764_v43  ;;  %v16062_v43 = vld [vmem:[#allocation55_spill] sm:$0xff] }
 0x1a5   :  { %8546 = vmatprep.subr.bf16.mxu1 %v16052_v19  ;;  %v16063_v19 = vld [vmem:[#allocation58_spill] sm:$0xff] }
 0x1a8   :  { %8548 = vmatpush1.bf16.msra.mxu1 %v16053_v28  ;;  %v16064_v28 = vld [vmem:[#allocation59_spill] sm:$0xff] }
 0x1a9   :  { %8550 = vmatprep.subr.bf16.mxu1 %v16054_v22  ;;  %v16065_v22 = vld [vmem:[#allocation62_spill] sm:$0xff] }
 0x1ac   :  { %8552 = vmatpush1.bf16.msra.mxu1 %v16055_v25  ;;  %v16066_v25 = vld [vmem:[#allocation63_spill] sm:$0xff] }
 0x1ad   :  { %8554 = vmatprep.subr.bf16.mxu1 %v16056_v12  ;;  %v812_v12 = vpop.f32.mrb[2].mxu0 }
 0x1b0   :  { %8556 = vmatpush1.bf16.msra.mxu1 %v16057_v50 }
 0x1b1   :  { %8558 = vmatprep.subr.bf16.mxu1 %v16058_v46 }
 0x1b4   :  { %8560 = vmatpush1.bf16.msra.mxu1 %v16059_v48 }
 0x1b5   :  { %8562 = vmatprep.subr.bf16.mxu1 %v16060_v26  ;;  %v75_v26 = vld [vmem:[#allocation6 + $0xc] sm:$0x7] }
 0x1b8   :  { %8564 = vmatpush1.bf16.msra.mxu1 %v16061_v27  ;;  %v16067_v27 = vld [vmem:[#allocation73_spill] sm:$0xff] }
 0x1b9   :  { %8566 = vmatprep.subr.bf16.mxu1 %v16062_v43  ;;  %v16068_v43 = vld [vmem:[#allocation86_spill] sm:$0xff] }
 0x1bc   :  { %8568 = vmatpush1.bf16.msra.mxu1 %v16063_v19  ;;  %v814_v19 = vpop.f32.mrb[3].mxu0 }
 0x1bd   :  { %8570 = vmatprep.subr.bf16.mxu1 %v16064_v28  ;;  %v63_v28 = vsub.s32 4, %v13080_v18 }
 0x1c0   :  { %8572 = vmatpush1.bf16.msra.mxu1 %v16065_v22  ;;  %v59_v22 = vsub.s32 3, %v13080_v18 }
 0x1c1   :  { %8574 = vmatprep.subr.bf16.mxu1 %v16066_v25  ;;  %v13209_v25 = vrot.slane %v13096_v17, %v63_v28 }
 0x1c3   :  { %16069 = vst [vmem:[#allocation125_spill] sm:$0xff] %v13209_v25 }
 0x1c4   :  { %8576 = vmatpush1.bf16.msra.mxu1 %v12876_v56  ;;  %v13212_v56 = vrot.slane %v13096_v17, %v59_v22 }
 0x1c5   :  { %8578 = vmatprep.subr.bf16.mxu1 %v12881_v13 }
 0x1c6   :  { %16070 = vst [vmem:[#allocation126_spill] sm:$0xff] %v13212_v56  ;;  %v744_v13 = vadd.f32 %v13118_v36, %v13212_v56 }
 0x1c8   :  { %8580 = vmatpush1.bf16.msra.mxu1 %v12891_v1  ;;  %v13215_v1 = vrot.slane %v75_v26, %v13085_v20 }
 0x1c9   :  { %8582 = vmatprep.subr.bf16.mxu1 %v12897_v61  ;;  %v13218_v61 = vrot.slane %v75_v26, %v13088_v41 }
 0x1ca   :  { %16071 = vst [vmem:[#allocation127_spill] sm:$0xff] %v13215_v1 }
 0x1cc   :  { %8584 = vmatpush1.bf16.msra.mxu1 %v16067_v27 }
 0x1cd   :  { %8650 = vmatprep.subr.bf16.mxu1 %v16068_v43  ;;  %v813_v43 = vadd.f32 %v812_v12, %v13209_v25  ;;  %v13227_v12 = vrot.slane %v13096_v17, %v67_v59 }
 0x242   :  { %v907_v27 = vpop.f32.mrb[2].mxu1 }
 0x243   :  { %v908_v48 = vadd.f32 %v907_v27, %v13215_v1  ;;  %v909_v46 = vpop.f32.mrb[3].mxu1  ;;  %v815_v27 = vadd.f32 %v814_v19, %v13227_v12  ;;  %v16074_v19 = vld [vmem:[#allocation87_spill] sm:$0xff] }
 0x244   :  { %v910_v28 = vadd.f32 %v909_v46, %v13218_v61  ;;  %v13231_v46 = vrot.slane %v75_v26, %v13121_v3  ;;  %v16072_v26 = vld [vmem:[#allocation68_spill] sm:$0xff]  ;;  %v16073_v3 = vld [vmem:[#allocation70_spill] sm:$0xff] }
 0x245   :  { %v982_v50 = vadd.f32 %v908_v48, %v744_v13 }
 0x246   :  { %v989_v22 = vadd.f32 %v910_v28, %v813_v43 }
 0x247   :  { %v7209_v11 = vmul.f32 -1.442695, %v982_v50 }
 0x248   :  { %v7210_v20 = vmul.f32 -1.442695, %v989_v22 }
 0x249   :  { %12246 = vpow2.f32 %v7209_v11 }
 0x24a   :  { %12248 = vpow2.f32 %v7210_v20 }
 0x253   :  { %v12247_v8 = vpop.eup %12246 }
 0x254   :  { %v986_v41 = vadd.f32 1.0, %v12247_v8  ;;  %v12249_v36 = vpop.eup %12248 }
 0x255   :  { %v993_v25 = vadd.f32 1.0, %v12249_v36  ;;  %v16077_v36 = vld [vmem:[#allocation74_spill] sm:$0xff] }
 0x256   :  { %12250 = vrcp.f32 %v986_v41  ;;  %v16076_v41 = vld [vmem:[#allocation72_spill] sm:$0xff] }
 0x257   :  { %12252 = vrcp.f32 %v993_v25  ;;  %v16075_v25 = vld [vmem:[#allocation90_spill] sm:$0xff] }
 0x260   :  { %v12251_v43 = vpop.eup %12250 }
 0x261   :  { %v996_v13 = vmul.f32 %v12251_v43, %v815_v27  ;;  %v12253_v18 = vpop.eup %12252  ;;  %v16078_v27 = vld [vmem:[#allocation91_spill] sm:$0xff]  ;;  %v16079_v43 = vld [vmem:[#allocation94_spill] sm:$0xff] }
 0x262   :  { %v978_v11 = vpop.f32.mrb[4].mxu1  ;;  %v999_v28 = vsub.f32 1.0, %v12253_v18  ;;  %v1001_v22 = vmul.f32 0.0, %v12253_v18  ;;  %v16085_v18 = vld [vmem:[#allocation78_spill] sm:$0xff] }
 0x263   :  { %v979_v50 = vadd.f32 %v978_v11, %v13231_v46  ;;  %v7613_v8 = vpop.f32.mrb[5].mxu1  ;;  %v16081_v11 = vld [vmem:[#allocation76_spill] sm:$0xff] }
 0x264   :  { %v16083_v8 = vld [vmem:[#allocation98_spill] sm:$0xff] }
 0x265   :  { %v997_v48 = vadd.f32 %v996_v13, %v979_v50  ;;  %v16080_v13 = vld [vmem:[#allocation75_spill] sm:$0xff] }
 0x266   :  { %v16082_v50 = vld [vmem:[#allocation95_spill] sm:$0xff] }
 0x267   :  { %12254 = vtanh.f32 %v997_v48  ;;  %v16084_v48 = vld [vmem:[#allocation77_spill] sm:$0xff] }
 0x271   :  { %v12255_v59 = vpop.eup %12254 }
 0x272   :  { %v1000_v17 = vmul.f32 %v12255_v59, %v999_v28  ;;  %v16086_v28 = vld [vmem:[#allocation99_spill] sm:$0xff]  ;;  %v16087_v59 = vld [vmem:[#allocation102_spill] sm:$0xff] }
 0x274   :  { %v13234_v20 = vadd.f32 %v1001_v22, %v1000_v17  ;;  %v16088_v17 = vld [vmem:[#allocation79_spill] sm:$0xff]  ;;  %v16089_v22 = vld [vmem:[#allocation80_spill] sm:$0xff] }
 0x276   :  { %1067 = vmatprep.mubr.f32.mxu0 %v13234_v20  ;;  %1138 = vmatprep.mubr.f32.mxu1 %v13234_v20 }
 0x277   :  { %1068 = vmatmul.mubr.f32.vlgmr.msra.gmra.mrb[4].mxu0 %v13138_v60  ;;  %1139 = vmatmul.mubr.f32.vlgmr.msra.gmra.mrb[6].mxu1 %v13138_v60 }
 0x278   :  { %8588 = vmatpush1.bf16.msra.mxu0 %v16072_v26  ;;  %1209 = vmatprep.mubr.f32.mxu0 %v13234_v20 }
 0x279   :  { %8590 = vmatprep.subr.bf16.mxu0 %v16073_v3  ;;  %8652 = vmatpush1.bf16.msra.mxu1 %v16074_v19 }
 0x27a   :  { %8654 = vmatprep.subr.bf16.mxu1 %v16075_v25  ;;  %1305 = vmatprep.mubr.f32.mxu1 %v15996_v53 }
 0x27c   :  { %8592 = vmatpush1.bf16.msra.mxu0 %v16076_v41 }
 0x27d   :  { %8594 = vmatprep.subr.bf16.mxu0 %v16077_v36  ;;  %8656 = vmatpush1.bf16.msra.mxu1 %v16078_v27 }
 0x27e   :  { %8658 = vmatprep.subr.bf16.mxu1 %v16079_v43  ;;  %v16090_v43 = vld [vmem:[#allocation103_spill] sm:$0xff] }
 0x280   :  { %8596 = vmatpush1.bf16.msra.mxu0 %v16080_v13  ;;  %v16091_v13 = vld [vmem:[#allocation106_spill] sm:$0xff] }
 0x281   :  { %8598 = vmatprep.subr.bf16.mxu0 %v16081_v11  ;;  %8660 = vmatpush1.bf16.msra.mxu1 %v16082_v50  ;;  %v16092_v11 = vld [vmem:[#allocation81_spill] sm:$0xff]  ;;  %v16093_v50 = vld [vmem:[#allocation82_spill] sm:$0xff] }
 0x282   :  { %8662 = vmatprep.subr.bf16.mxu1 %v16083_v8  ;;  %v16094_v8 = vld [vmem:[#allocation107_spill] sm:$0xff] }
 0x284   :  { %8600 = vmatpush1.bf16.msra.mxu0 %v16084_v48  ;;  %v16095_v48 = vld [vmem:[#allocation110_spill] sm:$0xff] }
 0x285   :  { %8602 = vmatprep.subr.bf16.mxu0 %v16085_v18  ;;  %8664 = vmatpush1.bf16.msra.mxu1 %v16086_v28  ;;  %v16096_v18 = vld [vmem:[#allocation83_spill] sm:$0xff]  ;;  %v16097_v28 = vld [vmem:[#allocation84_spill] sm:$0xff] }
 0x286   :  { %8666 = vmatprep.subr.bf16.mxu1 %v16087_v59  ;;  %v16098_v59 = vld [vmem:[#allocation111_spill] sm:$0xff] }
 0x288   :  { %8604 = vmatpush1.bf16.msra.mxu0 %v16088_v17 }
 0x289   :  { %8606 = vmatprep.subr.bf16.mxu0 %v16089_v22  ;;  %8668 = vmatpush1.bf16.msra.mxu1 %v16090_v43  ;;  %v16099_v22 = vld [vmem:[#allocation85_spill] sm:$0xff]  ;;  %v16100_v43 = vld [vmem:[#allocation88_spill] sm:$0xff] }
 0x28a   :  { %8670 = vmatprep.subr.bf16.mxu1 %v16091_v13 }
 0x28c   :  { %8608 = vmatpush1.bf16.msra.mxu0 %v16092_v11  ;;  %v16111_v11 = vld [vmem:[#allocation109_spill] sm:$0xff] }
 0x28d   :  { %8610 = vmatprep.subr.bf16.mxu0 %v16093_v50  ;;  %8672 = vmatpush1.bf16.msra.mxu1 %v16094_v8  ;;  %v16101_v50 = vld [vmem:[#allocation89_spill] sm:$0xff]  ;;  %v16102_v8 = vld [vmem:[#allocation92_spill] sm:$0xff] }
 0x28e   :  { %8674 = vmatprep.subr.bf16.mxu1 %v16095_v48  ;;  %v16103_v48 = vld [vmem:[#allocation93_spill] sm:$0xff] }
 0x290   :  { %8612 = vmatpush1.bf16.msra.mxu0 %v16096_v18  ;;  %v16104_v18 = vld [vmem:[#allocation96_spill] sm:$0xff] }
 0x291   :  { %8614 = vmatprep.subr.bf16.mxu0 %v16097_v28  ;;  %8676 = vmatpush1.bf16.msra.mxu1 %v16098_v59  ;;  %v16105_v28 = vld [vmem:[#allocation97_spill] sm:$0xff]  ;;  %v16106_v59 = vld [vmem:[#allocation100_spill] sm:$0xff] }
 0x292   :  { %8678 = vmatprep.subr.bf16.mxu1 %v13034_v42  ;;  %v16107_v42 = vld [vmem:[#allocation101_spill] sm:$0xff] }
 0x294   :  { %8616 = vmatpush1.bf16.msra.mxu0 %v16099_v22  ;;  %v16108_v22 = vld [vmem:[#allocation104_spill] sm:$0xff] }
 0x295   :  { %8618 = vmatprep.subr.bf16.mxu0 %v16100_v43  ;;  %8680 = vmatpush1.bf16.msra.mxu1 %v13037_v45  ;;  %v16109_v43 = vld [vmem:[#allocation105_spill] sm:$0xff]  ;;  %v16110_v45 = vld [vmem:[#allocation108_spill] sm:$0xff] }
 0x296   :  { %8681 = vmatprep.subr.bf16.mxu1 %v16051_v54 }
 0x298   :  { %8620 = vmatpush1.bf16.msra.mxu0 %v16101_v50 }
 0x299   :  { %8622 = vmatprep.subr.bf16.mxu0 %v16102_v8 }
 0x29c   :  { %8624 = vmatpush1.bf16.msra.mxu0 %v16103_v48 }
 0x29d   :  { %8626 = vmatprep.subr.bf16.mxu0 %v16104_v18 }
 0x2a0   :  { %8628 = vmatpush1.bf16.msra.mxu0 %v16105_v28 }
 0x2a1   :  { %8630 = vmatprep.subr.bf16.mxu0 %v16106_v59 }
 0x2a4   :  { %8632 = vmatpush1.bf16.msra.mxu0 %v16107_v42 }
 0x2a5   :  { %8634 = vmatprep.subr.bf16.mxu0 %v16108_v22 }
 0x2a8   :  { %8636 = vmatpush1.bf16.msra.mxu0 %v16109_v43 }
 0x2a9   :  { %8638 = vmatprep.subr.bf16.mxu0 %v16110_v45 }
 0x2ac   :  { %8640 = vmatpush1.bf16.msra.mxu0 %v16111_v11 }
 0x2ad   :  { %8642 = vmatprep.subr.bf16.mxu0 %v13028_v55 }
 0x2b0   :  { %8644 = vmatpush1.bf16.msra.mxu0 %v13031_v63 }
 0x2b1   :  { %8646 = vmatprep.subr.bf16.mxu0 %v13040_v40 }
 0x2b4   :  { %8648 = vmatpush1.bf16.msra.mxu0 %v13043_v51 }
 0x2b5   :  { %8706 = vmatprep.subr.bf16.mxu0 %v12683_v5 }
 0x2b7   :  { %1210 = vmatmul.mubr.f32.vlgmr.msra.gmra.mrb[6].mxu0 %v13138_v60 }
 0x2b8   :  { %8708 = vmatpush1.bf16.msra.mxu0 %v12685_v9 }
 0x2b9   :  { %8710 = vmatprep.subr.bf16.mxu0 %v12687_v10 }
 0x2bc   :  { %8712 = vmatpush1.bf16.msra.mxu0 %v12691_v15  ;;  %v16112_v15 = vld [vmem:[#allocation29_spill] sm:$0xff] }
 0x2bd   :  { %8714 = vmatprep.subr.bf16.mxu0 %v12694_v16  ;;  %v16113_v16 = vld [vmem:[#allocation32_spill] sm:$0xff] }
 0x2c0   :  { %8716 = vmatpush1.bf16.msra.mxu0 %v12697_v21  ;;  %v16114_v21 = vld [vmem:[#allocation33_spill] sm:$0xff] }
 0x2c1   :  { %8718 = vmatprep.subr.bf16.mxu0 %v12700_v23  ;;  %v16115_v23 = vld [vmem:[#allocation36_spill] sm:$0xff] }
 0x2c4   :  { %8720 = vmatpush1.bf16.msra.mxu0 %v12705_v32  ;;  %v16116_v32 = vld [vmem:[#allocation37_spill] sm:$0xff] }
 0x2c5   :  { %8722 = vmatprep.subr.bf16.mxu0 %v12711_v37  ;;  %v16117_v37 = vld [vmem:[#allocation40_spill] sm:$0xff] }
 0x2c8   :  { %8724 = vmatpush1.bf16.msra.mxu0 %v12720_v47  ;;  %v16118_v47 = vld [vmem:[#allocation41_spill] sm:$0xff] }
 0x2c9   :  { %8726 = vmatprep.subr.bf16.mxu0 %v12725_v52  ;;  %v16119_v52 = vld [vmem:[#allocation44_spill] sm:$0xff] }
 0x2cc   :  { %8728 = vmatpush1.bf16.msra.mxu0 %v12734_v62  ;;  %v16120_v62 = vld [vmem:[#allocation45_spill] sm:$0xff] }
 0x2cd   :  { %8730 = vmatprep.subr.bf16.mxu0 %v12737_v2  ;;  %v16121_v2 = vld [vmem:[#allocation48_spill] sm:$0xff] }
 0x2d0   :  { %8732 = vmatpush1.bf16.msra.mxu0 %v12746_v14  ;;  %v16122_v14 = vld [vmem:[#allocation49_spill] sm:$0xff] }
 0x2d1   :  { %8734 = vmatprep.subr.bf16.mxu0 %v16112_v15  ;;  %v16123_v15 = vld [vmem:[#allocation52_spill] sm:$0xff] }
 0x2d4   :  { %8736 = vmatpush1.bf16.msra.mxu0 %v16113_v16  ;;  %v16124_v16 = vld [vmem:[#allocation53_spill] sm:$0xff] }
 0x2d5   :  { %8738 = vmatprep.subr.bf16.mxu0 %v16114_v21  ;;  %v16125_v21 = vld [vmem:[#allocation56_spill] sm:$0xff] }
 0x2d8   :  { %8740 = vmatpush1.bf16.msra.mxu0 %v16115_v23  ;;  %v16126_v23 = vld [vmem:[#allocation57_spill] sm:$0xff] }
 0x2d9   :  { %8742 = vmatprep.subr.bf16.mxu0 %v16116_v32  ;;  %v16127_v32 = vld [vmem:[#allocation60_spill] sm:$0xff] }
 0x2dc   :  { %8744 = vmatpush1.bf16.msra.mxu0 %v16117_v37  ;;  %v16128_v37 = vld [vmem:[#allocation61_spill] sm:$0xff] }
 0x2dd   :  { %8746 = vmatprep.subr.bf16.mxu0 %v16118_v47  ;;  %v16129_v47 = vld [vmem:[#allocation64_spill] sm:$0xff] }
 0x2e0   :  { %8748 = vmatpush1.bf16.msra.mxu0 %v16119_v52  ;;  %v16130_v52 = vld [vmem:[#allocation66_spill] sm:$0xff] }
 0x2e1   :  { %8750 = vmatprep.subr.bf16.mxu0 %v16120_v62  ;;  %v356_v62 = vpop.permute.xlu0 %355 }
 0x2e4   :  { %8752 = vmatpush1.bf16.msra.mxu0 %v16121_v2  ;;  %v16131_v2 = vld [vmem:[#allocation118_spill] sm:$0xff] }
 0x2e5   :  { %8754 = vmatprep.subr.bf16.mxu0 %v16122_v14  ;;  %v447_v10 = vmul.f32 %v16131_v2, %v356_v62  ;;  %v16132_v14 = vld [vmem:[#allocation119_spill] sm:$0xff] }
 0x2e6   :  { %v448_v9 = vmul.f32 %v16132_v14, %v356_v62 }
 0x2e8   :  { %8756 = vmatpush1.bf16.msra.mxu0 %v16123_v15 }
 0x2e9   :  { %8758 = vmatprep.subr.bf16.mxu0 %v16124_v16  ;;  %v511_v16 = vadd.f32 %v13100_v24, %v447_v10  ;;  %v16136_v10 = vld [vmem:[#allocation124_spill] sm:$0xff] }
 0x2ea   :  { %v449_v24 = vmul.f32 %v16136_v10, %v356_v62  ;;  %v16137_v62 = vld [vmem:[#allocation23_spill] sm:$0xff] }
 0x2ec   :  { %8760 = vmatpush1.bf16.msra.mxu0 %v16125_v21  ;;  %v16133_v21 = vld [vmem:[#allocation121_spill] sm:$0xff] }
 0x2ed   :  { %8762 = vmatprep.subr.bf16.mxu0 %v16126_v23 }
 0x2f0   :  { %8764 = vmatpush1.bf16.msra.mxu0 %v16127_v32  ;;  %v16134_v32 = vld [vmem:[#allocation123_spill] sm:$0xff] }
 0x2f1   :  { %8766 = vmatprep.subr.bf16.mxu0 %v16128_v37 }
 0x2f4   :  { %8768 = vmatpush1.bf16.msra.mxu0 %v16129_v47  ;;  %v16135_v47 = vld [vmem:[#allocation122_spill] sm:$0xff] }
 0x2f5   :  { %8834 = vmatprep.subr.bf16.mxu0 %v16130_v52  ;;  %v512_v55 = vadd.f32 %v16135_v47, %v448_v9 }
 0x34a   :  { %v1069_v15 = vpop.f32.mrb[4].mxu0  ;;  %v1140_v5 = vpop.f32.mrb[6].mxu1 }
 0x34b   :  { %v1070_v51 = vadd.f32 %v1069_v15, %v16133_v21  ;;  %v1071_v23 = vpop.f32.mrb[5].mxu0  ;;  %v13327_v40 = vpop.f32.mrb[7].mxu1  ;;  %v1141_v21 = vadd.f32 %v1140_v5, %v13128_v57 }
 0x34c   :  { %v1072_v37 = vadd.f32 %v1071_v23, %v16134_v32  ;;  %v513_v23 = vadd.f32 %v13132_v30, %v449_v24  ;;  %v16138_v24 = vld [vmem:[#allocation26_spill] sm:$0xff] }
 0x34d   :  { %v1220_v63 = vadd.f32 %v1070_v51, %v511_v16 }
 0x34e   :  { %v1227_v11 = vadd.f32 %v1072_v37, %v512_v55  ;;  %v16139_v55 = vld [vmem:[#allocation27_spill] sm:$0xff] }
 0x34f   :  { %v7211_v52 = vmul.f32 -1.442695, %v1220_v63  ;;  %v16140_v63 = vld [vmem:[#allocation30_spill] sm:$0xff] }
 0x350   :  { %v7212_v2 = vmul.f32 -1.442695, %v1227_v11  ;;  %v16143_v11 = vld [vmem:[#allocation35_spill] sm:$0xff] }
 0x351   :  { %12256 = vpow2.f32 %v7211_v52 }
 0x352   :  { %12258 = vpow2.f32 %v7212_v2 }
 0x35b   :  { %v12257_v14 = vpop.eup %12256 }
 0x35c   :  { %v1224_v45 = vadd.f32 1.0, %v12257_v14  ;;  %v12259_v43 = vpop.eup %12258 }
 0x35d   :  { %v1231_v15 = vadd.f32 1.0, %v12259_v43  ;;  %v16142_v43 = vld [vmem:[#allocation34_spill] sm:$0xff] }
 0x35e   :  { %12260 = vrcp.f32 %v1224_v45 }
 0x35f   :  { %12262 = vrcp.f32 %v1231_v15  ;;  %v16145_v15 = vld [vmem:[#allocation39_spill] sm:$0xff] }
 0x368   :  { %v12261_v22 = vpop.eup %12260 }
 0x369   :  { %v1234_v16 = vmul.f32 %v12261_v22, %v1141_v21  ;;  %v12263_v37 = vpop.eup %12262  ;;  %v16144_v22 = vld [vmem:[#allocation38_spill] sm:$0xff] }
 0x36a   :  { %v1237_v52 = vsub.f32 1.0, %v12263_v37  ;;  %v1239_v2 = vmul.f32 %v12263_v37, %v13138_v60  ;;  %v16141_v60 = vld [vmem:[#allocation31_spill] sm:$0xff] }
 0x36b   :  { %v1235_v9 = vadd.f32 %v1234_v16, %v513_v23  ;;  %v16146_v23 = vld [vmem:[#allocation42_spill] sm:$0xff]  ;;  %v16147_v16 = vld [vmem:[#allocation43_spill] sm:$0xff] }
 0x36c   :  { %v16149_v37 = vld [vmem:[#allocation47_spill] sm:$0xff] }
 0x36d   :  { %12264 = vtanh.f32 %v1235_v9  ;;  %v16148_v9 = vld [vmem:[#allocation46_spill] sm:$0xff] }
 0x377   :  { %v12265_v51 = vpop.eup %12264 }
 0x378   :  { %v1238_v14 = vmul.f32 %v12265_v51, %v1237_v52  ;;  %v16150_v52 = vld [vmem:[#allocation50_spill] sm:$0xff]  ;;  %v16151_v51 = vld [vmem:[#allocation51_spill] sm:$0xff] }
 0x37a   :  { %v13335_v45 = vadd.f32 %v1239_v2, %v1238_v14  ;;  %v16152_v2 = vld [vmem:[#allocation54_spill] sm:$0xff]  ;;  %v16153_v14 = vld [vmem:[#allocation55_spill] sm:$0xff] }
 0x37c   :  { %1306 = vmatmul.mubr.f32.vlgmr.msra.gmra.mrb[8].mxu1 %v13335_v45 }
 0x37d   :  { %8683 = vmatpush3.bf16.msra.mxu1 %v13136_v6  ;;  %7646 = vmatprep.mubr.msk.f32.mxu1 %vm12635_vm0, %v15996_v53 }
 0x37e   :  { %8684 = vmatprep.subr.bf16.mxu1 %v16051_v54 }
 0x381   :  { %8686 = vmatpush3.bf16.msra.mxu1 %v13142_v4 }
 0x382   :  { %8687 = vmatprep.subr.bf16.mxu1 %v16051_v54 }
 0x385   :  { %8689 = vmatpush3.bf16.msra.mxu1 %v13148_v0 }
 0x386   :  { %8690 = vmatprep.subr.bf16.mxu1 %v16051_v54 }
 0x389   :  { %8692 = vmatpush3.bf16.msra.mxu1 %v13152_v35 }
 0x38a   :  { %v1211_v5 = vpop.f32.mrb[6].mxu0  ;;  %8693 = vmatprep.subr.bf16.mxu1 %v16051_v54 }
 0x38b   :  { %v13348_v21 = vpop.f32.mrb[7].mxu0 }
 0x38d   :  { %8695 = vmatpush3.bf16.msra.mxu1 %v13156_v7 }
 0x38e   :  { %8696 = vmatprep.subr.bf16.mxu1 %v16051_v54 }
 0x391   :  { %8698 = vmatpush3.bf16.msra.mxu1 %v13160_v33 }
 0x392   :  { %8699 = vmatprep.subr.bf16.mxu1 %v16051_v54 }
 0x395   :  { %8701 = vmatpush3.bf16.msra.mxu1 %v13164_v31 }
 0x396   :  { %8702 = vmatprep.subr.bf16.mxu1 %v16051_v54 }
 0x399   :  { %8704 = vmatpush3.bf16.msra.mxu1 %v13168_v38 }
 0x39a   :  { %8770 = vmatprep.subr.bf16.mxu1 %v12702_v29 }
 0x39c   :  { %7647 = vmatmul.mubr.f32.vlgmr.msra.gmra.mrb[10].mxu1 %v13335_v45 }
 0x39d   :  { %8772 = vmatpush1.bf16.msra.mxu1 %v12708_v34 }
 0x39e   :  { %8774 = vmatprep.subr.bf16.mxu1 %v12713_v39 }
 0x3a1   :  { %8776 = vmatpush1.bf16.msra.mxu1 %v12716_v44 }
 0x3a2   :  { %8778 = vmatprep.subr.bf16.mxu1 %v12722_v49 }
 0x3a5   :  { %8780 = vmatpush1.bf16.msra.mxu1 %v12728_v58 }
 0x3a6   :  { %8782 = vmatprep.subr.bf16.mxu1 %v16137_v62 }
 0x3a9   :  { %8784 = vmatpush1.bf16.msra.mxu1 %v16138_v24 }
 0x3aa   :  { %8786 = vmatprep.subr.bf16.mxu1 %v16139_v55 }
 0x3ad   :  { %8788 = vmatpush1.bf16.msra.mxu1 %v16140_v63 }
 0x3ae   :  { %8790 = vmatprep.subr.bf16.mxu1 %v16141_v60 }
 0x3b1   :  { %8792 = vmatpush1.bf16.msra.mxu1 %v16142_v43 }
 0x3b2   :  { %8794 = vmatprep.subr.bf16.mxu1 %v16143_v11  ;;  %v16154_v11 = vld [vmem:[#allocation58_spill] sm:$0xff] }
 0x3b5   :  { %8796 = vmatpush1.bf16.msra.mxu1 %v16144_v22  ;;  %v16155_v22 = vld [vmem:[#allocation59_spill] sm:$0xff] }
 0x3b6   :  { %8798 = vmatprep.subr.bf16.mxu1 %v16145_v15  ;;  %v16156_v15 = vld [vmem:[#allocation62_spill] sm:$0xff] }
 0x3b9   :  { %8800 = vmatpush1.bf16.msra.mxu1 %v16146_v23  ;;  %v16157_v23 = vld [vmem:[#allocation63_spill] sm:$0xff] }
 0x3ba   :  { %8802 = vmatprep.subr.bf16.mxu1 %v16147_v16  ;;  %v16158_v16 = vld [vmem:[#allocation65_spill] sm:$0xff] }
 0x3bd   :  { %8804 = vmatpush1.bf16.msra.mxu1 %v16148_v9  ;;  %v16159_v9 = vld [vmem:[#allocation67_spill] sm:$0xff] }
 0x3be   :  { %8806 = vmatprep.subr.bf16.mxu1 %v16149_v37  ;;  %v16160_v37 = vld [vmem:[#allocation69_spill] sm:$0xff] }
 0x3c1   :  { %8808 = vmatpush1.bf16.msra.mxu1 %v16150_v52  ;;  %v16161_v52 = vld [vmem:[#allocation71_spill] sm:$0xff] }
 0x3c2   :  { %8810 = vmatprep.subr.bf16.mxu1 %v16151_v51  ;;  %v16162_v51 = vld [vmem:[#allocation73_spill] sm:$0xff] }
 0x3c5   :  { %8812 = vmatpush1.bf16.msra.mxu1 %v16152_v2  ;;  %v16163_v2 = vld [vmem:[#allocation86_spill] sm:$0xff] }
 0x3c6   :  { %8814 = vmatprep.subr.bf16.mxu1 %v16153_v14 }
 0x3c9   :  { %8816 = vmatpush1.bf16.msra.mxu1 %v16154_v11 }
 0x3ca   :  { %8818 = vmatprep.subr.bf16.mxu1 %v16155_v22  ;;  %v334_v22 = vld [vmem:[%s15674_s0 + $0x10] sm:$0xff] }
 0x3cb   :  { %360 = vperm.xlu1 %12235, %v334_v22   ;;  %v343_v22 = vld [vmem:[%s15674_s0 + $0x58] sm:$0xff] }
 0x3cd   :  { %8820 = vmatpush1.bf16.msra.mxu1 %v16156_v15 }
 0x3ce   :  { %8822 = vmatprep.subr.bf16.mxu1 %v16157_v23  ;;  %v335_v23 = vld [vmem:[%s15674_s0 + $0x18] sm:$0xff] }
 0x3cf   :  { %365 = vperm.xlu1 %12235, %v335_v23  }
 0x3d1   :  { %8824 = vmatpush1.bf16.msra.mxu1 %v16158_v16  ;;  %v16164_v16 = vld [vmem:[#allocation125_spill] sm:$0xff] }
 0x3d2   :  { %8826 = vmatprep.subr.bf16.mxu1 %v16159_v9  ;;  %v1212_v15 = vadd.f32 %v1211_v5, %v16164_v16  ;;  %v1214_v5 = vadd.f32 %v13348_v21, %v13227_v12  ;;  %v16166_v21 = vld [vmem:[#allocation75_spill] sm:$0xff] }
 0x3d5   :  { %8828 = vmatpush1.bf16.msra.mxu1 %v16160_v37  ;;  %v337_v37 = vld [vmem:[%s15674_s0 + $0x28] sm:$0xff] }
 0x3d6   :  { %8830 = vmatprep.subr.bf16.mxu1 %v16161_v52  ;;  %375 = vperm.xlu1 %12235, %v337_v37   ;;  %v345_v37 = vld [vmem:[%s15674_s0 + $0x68] sm:$0xff]  ;;  %v1143_v52 = vadd.f32 %v13327_v40, %v13212_v56 }
 0x3d9   :  { %8832 = vmatpush1.bf16.msra.mxu1 %v16162_v51  ;;  %v339_v51 = vld [vmem:[%s15674_s0 + $0x38] sm:$0xff] }
 0x3da   :  { %8898 = vmatprep.subr.bf16.mxu1 %v16163_v2  ;;  %385 = vperm.xlu1 %12235, %v339_v51   ;;  %v341_v2 = vld [vmem:[%s15674_s0 + $0x48] sm:$0xff] }
 0x3de   :  { %395 = vperm.xlu1 %12235, %v341_v2  }
 0x3e2   :  { %405 = vperm.xlu1 %12235, %v343_v22   ;;  %v347_v22 = vld [vmem:[%s15674_s0 + $0x78] sm:$0xff]  ;;  %s12636_s0 = smov [#allocation8]  }
 0x3e3   :  { %s7197_s13 = sshll.u32 %s12636_s0, 4  ;;  %s7198_s13 = int_to_ptr.vmem [resolvable:$true] %s7197_s13 }
 0x3e4   :  { %s12600_s14 = scalar_lea.vmem %s7198_s13, 128  ;;  %p12605_p3 = scmp.lt.s32.totalorder %s7198_s13, %s7198_s13 }
 0x3e5   :  { %p12601_p2 = scmp.ne.s32.totalorder %s7198_s13, %s12600_s14  ;;  %p12606_p4 = scmp.lt.s32.totalorder %s12600_s14, %s12600_s14 }
 0x3e6   :  { %415 = vperm.xlu1 %12235, %v345_v37  }
 0x3e7   :  { %p12607_p5 = por %p12606_p4, %p12605_p3 }
 0x3e9   :  { %p12608_p6 = pnand %p12607_p5, %p12601_p2 }
 0x3ea   :  { %425 = vperm.xlu1 %12235, %v347_v22  }
 0x44f   :  { %v1307_v23 = vpop.f32.mrb[8].mxu1 }
 0x450   :  { %v1308_v51 = vadd.f32 %v1307_v23, %v13215_v1  ;;  %v1309_v9 = vpop.f32.mrb[9].mxu1 }
 0x451   :  { %v1310_v2 = vadd.f32 %v1309_v9, %v13218_v61 }
 0x452   :  { %v1382_v11 = vadd.f32 %v1308_v51, %v1143_v52 }
 0x453   :  { %v1389_v14 = vadd.f32 %v1310_v2, %v1212_v15 }
 0x454   :  { %v7213_v43 = vmul.f32 -1.442695, %v1382_v11 }
 0x455   :  { %v7214_v60 = vmul.f32 -1.442695, %v1389_v14 }
 0x456   :  { %12266 = vpow2.f32 %v7213_v43 }
 0x457   :  { %12268 = vpow2.f32 %v7214_v60 }
 0x460   :  { %v12267_v40 = vpop.eup %12266 }
 0x461   :  { %v1386_v56 = vadd.f32 1.0, %v12267_v40  ;;  %v12269_v23 = vpop.eup %12268 }
 0x462   :  { %v1393_v9 = vadd.f32 1.0, %v12269_v23  ;;  %v16167_v23 = vld [vmem:[#allocation76_spill] sm:$0xff] }
 0x463   :  { %12270 = vrcp.f32 %v1386_v56 }
 0x464   :  { %12272 = vrcp.f32 %v1393_v9  ;;  %v16169_v9 = vld [vmem:[#allocation98_spill] sm:$0xff] }
 0x46d   :  { %v12271_v52 = vpop.eup %12270 }
 0x46e   :  { %v1396_v37 = vmul.f32 %v12271_v52, %v1214_v5  ;;  %v12273_v43 = vpop.eup %12272  ;;  %v16168_v5 = vld [vmem:[#allocation95_spill] sm:$0xff]  ;;  %v16170_v52 = vld [vmem:[#allocation77_spill] sm:$0xff] }
 0x46f   :  { %v1378_v15 = vpop.f32.mrb[10].mxu1  ;;  %v1399_v14 = vsub.f32 1.0, %v12273_v43  ;;  %v1401_v56 = vmul.f32 %v12273_v43, %v13234_v20  ;;  %v16165_v20 = vld [vmem:[#allocation94_spill] sm:$0xff]  ;;  %v16176_v43 = vld [vmem:[#allocation81_spill] sm:$0xff] }
 0x470   :  { %v1379_v51 = vadd.f32 %v1378_v15, %v13231_v46  ;;  %v7648_v2 = vpop.f32.mrb[11].mxu1  ;;  %v16172_v15 = vld [vmem:[#allocation99_spill] sm:$0xff] }
 0x471   :  { %v16174_v2 = vld [vmem:[#allocation80_spill] sm:$0xff] }
 0x472   :  { %v1397_v11 = vadd.f32 %v1396_v37, %v1379_v51  ;;  %v16171_v37 = vld [vmem:[#allocation78_spill] sm:$0xff] }
 0x473   :  { %v16173_v51 = vld [vmem:[#allocation102_spill] sm:$0xff] }
 0x474   :  { %12274 = vtanh.f32 %v1397_v11  ;;  %v16175_v11 = vld [vmem:[#allocation103_spill] sm:$0xff] }
 0x47e   :  { %v12275_v60 = vpop.eup %12274 }
 0x47f   :  { %v1400_v22 = vmul.f32 %v12275_v60, %v1399_v14  ;;  %v16177_v14 = vld [vmem:[#allocation82_spill] sm:$0xff]  ;;  %v16178_v60 = vld [vmem:[#allocation107_spill] sm:$0xff] }
 0x481   :  { %v13424_v40 = vadd.f32 %v1401_v56, %v1400_v22  ;;  %v16179_v22 = vld [vmem:[#allocation110_spill] sm:$0xff]  ;;  %v16180_v56 = vld [vmem:[#allocation83_spill] sm:$0xff] }
 0x483   :  { %1467 = vmatprep.mubr.f32.mxu0 %v13424_v40  ;;  %1538 = vmatprep.mubr.f32.mxu1 %v13424_v40 }
 0x484   :  { %1468 = vmatmul.mubr.f32.vlgmr.msra.gmra.mrb[8].mxu0 %v13335_v45  ;;  %1539 = vmatmul.mubr.f32.vlgmr.msra.gmra.mrb[12].mxu1 %v13335_v45 }
 0x485   :  { %8836 = vmatpush1.bf16.msra.mxu0 %v16072_v26  ;;  %1609 = vmatprep.mubr.f32.mxu0 %v13424_v40 }
 0x486   :  { %8838 = vmatprep.subr.bf16.mxu0 %v16073_v3  ;;  %8900 = vmatpush1.bf16.msra.mxu1 %v16074_v19 }
 0x487   :  { %8902 = vmatprep.subr.bf16.mxu1 %v16075_v25  ;;  %1705 = vmatprep.mubr.f32.mxu1 %v15996_v53 }
 0x489   :  { %8840 = vmatpush1.bf16.msra.mxu0 %v16076_v41 }
 0x48a   :  { %8842 = vmatprep.subr.bf16.mxu0 %v16077_v36  ;;  %8904 = vmatpush1.bf16.msra.mxu1 %v16078_v27 }
 0x48b   :  { %8906 = vmatprep.subr.bf16.mxu1 %v16165_v20 }
 0x48d   :  { %8844 = vmatpush1.bf16.msra.mxu0 %v16166_v21 }
 0x48e   :  { %8846 = vmatprep.subr.bf16.mxu0 %v16167_v23  ;;  %8908 = vmatpush1.bf16.msra.mxu1 %v16168_v5 }
 0x48f   :  { %8910 = vmatprep.subr.bf16.mxu1 %v16169_v9 }
 0x491   :  { %8848 = vmatpush1.bf16.msra.mxu0 %v16170_v52 }
 0x492   :  { %8850 = vmatprep.subr.bf16.mxu0 %v16171_v37  ;;  %8912 = vmatpush1.bf16.msra.mxu1 %v16172_v15  ;;  %v16181_v15 = vld [vmem:[#allocation84_spill] sm:$0xff] }
 0x493   :  { %8914 = vmatprep.subr.bf16.mxu1 %v16173_v51  ;;  %v16182_v51 = vld [vmem:[#allocation111_spill] sm:$0xff] }
 0x495   :  { %8852 = vmatpush1.bf16.msra.mxu0 %v16088_v17  ;;  %v16183_v17 = vld [vmem:[#allocation114_spill] sm:$0xff] }
 0x496   :  { %8854 = vmatprep.subr.bf16.mxu0 %v16174_v2  ;;  %8916 = vmatpush1.bf16.msra.mxu1 %v16175_v11  ;;  %v16184_v2 = vld [vmem:[#allocation85_spill] sm:$0xff]  ;;  %v16185_v11 = vld [vmem:[#allocation88_spill] sm:$0xff] }
 0x497   :  { %8918 = vmatprep.subr.bf16.mxu1 %v16091_v13  ;;  %v16186_v13 = vld [vmem:[#allocation115_spill] sm:$0xff] }
 0x499   :  { %8856 = vmatpush1.bf16.msra.mxu0 %v16176_v43 }
 0x49a   :  { %8858 = vmatprep.subr.bf16.mxu0 %v16177_v14  ;;  %8920 = vmatpush1.bf16.msra.mxu1 %v16178_v60 }
 0x49b   :  { %8922 = vmatprep.subr.bf16.mxu1 %v16179_v22 }
 0x49d   :  { %8860 = vmatpush1.bf16.msra.mxu0 %v16180_v56 }
 0x49e   :  { %8862 = vmatprep.subr.bf16.mxu0 %v16181_v15  ;;  %8924 = vmatpush1.bf16.msra.mxu1 %v16182_v51 }
 0x49f   :  { %8926 = vmatprep.subr.bf16.mxu1 %v16183_v17  ;;  %v16190_v17 = vld [vmem:[#allocation109_spill] sm:$0xff] }
 0x4a1   :  { %8864 = vmatpush1.bf16.msra.mxu0 %v16184_v2  ;;  %v16187_v2 = vld [vmem:[#allocation104_spill] sm:$0xff] }
 0x4a2   :  { %8866 = vmatprep.subr.bf16.mxu0 %v16185_v11  ;;  %8928 = vmatpush1.bf16.msra.mxu1 %v16186_v13  ;;  %v16188_v11 = vld [vmem:[#allocation105_spill] sm:$0xff]  ;;  %v16189_v13 = vld [vmem:[#allocation108_spill] sm:$0xff] }
 0x4a3   :  { %8929 = vmatprep.subr.bf16.mxu1 %v16051_v54 }
 0x4a5   :  { %8868 = vmatpush1.bf16.msra.mxu0 %v16101_v50  ;;  %v16191_v50 = vld [vmem:[#allocation112_spill] sm:$0xff] }
 0x4a6   :  { %8870 = vmatprep.subr.bf16.mxu0 %v16102_v8  ;;  %v16192_v8 = vld [vmem:[#allocation113_spill] sm:$0xff] }
 0x4a9   :  { %8872 = vmatpush1.bf16.msra.mxu0 %v16103_v48  ;;  %v16193_v48 = vld [vmem:[#allocation116_spill] sm:$0xff] }
 0x4aa   :  { %8874 = vmatprep.subr.bf16.mxu0 %v16104_v18  ;;  %v16194_v18 = vld [vmem:[#allocation117_spill] sm:$0xff] }
 0x4ad   :  { %8876 = vmatpush1.bf16.msra.mxu0 %v16105_v28  ;;  %v16195_v28 = vld [vmem:[#allocation12_spill] sm:$0xff] }
 0x4ae   :  { %8878 = vmatprep.subr.bf16.mxu0 %v16106_v59  ;;  %v16206_v59 = vld [vmem:[#allocation24_spill] sm:$0xff] }
 0x4b1   :  { %8880 = vmatpush1.bf16.msra.mxu0 %v16107_v42  ;;  %v16196_v42 = vld [vmem:[#allocation13_spill] sm:$0xff] }
 0x4b2   :  { %8882 = vmatprep.subr.bf16.mxu0 %v16187_v2  ;;  %v16197_v2 = vld [vmem:[#allocation14_spill] sm:$0xff] }
 0x4b5   :  { %8884 = vmatpush1.bf16.msra.mxu0 %v16188_v11  ;;  %v16198_v11 = vld [vmem:[#allocation15_spill] sm:$0xff] }
 0x4b6   :  { %8886 = vmatprep.subr.bf16.mxu0 %v16189_v13  ;;  %v16199_v13 = vld [vmem:[#allocation16_spill] sm:$0xff] }
 0x4b9   :  { %8888 = vmatpush1.bf16.msra.mxu0 %v16190_v17  ;;  %v16200_v17 = vld [vmem:[#allocation17_spill] sm:$0xff] }
 0x4ba   :  { %8890 = vmatprep.subr.bf16.mxu0 %v16191_v50  ;;  %v16201_v50 = vld [vmem:[#allocation18_spill] sm:$0xff] }
 0x4bd   :  { %8892 = vmatpush1.bf16.msra.mxu0 %v16192_v8  ;;  %v16202_v8 = vld [vmem:[#allocation19_spill] sm:$0xff] }
 0x4be   :  { %8894 = vmatprep.subr.bf16.mxu0 %v16193_v48  ;;  %v16203_v48 = vld [vmem:[#allocation20_spill] sm:$0xff] }
 0x4c1   :  { %8896 = vmatpush1.bf16.msra.mxu0 %v16194_v18  ;;  %v16204_v18 = vld [vmem:[#allocation21_spill] sm:$0xff] }
 0x4c2   :  { %8954 = vmatprep.subr.bf16.mxu0 %v16195_v28  ;;  %v16205_v28 = vld [vmem:[#allocation22_spill] sm:$0xff] }
 0x4c4   :  { %1610 = vmatmul.mubr.f32.vlgmr.msra.gmra.mrb[10].mxu0 %v13335_v45 }
 0x4c5   :  { %8956 = vmatpush1.bf16.msra.mxu0 %v16196_v42  ;;  %v16207_v42 = vld [vmem:[#allocation25_spill] sm:$0xff] }
 0x4c6   :  { %8958 = vmatprep.subr.bf16.mxu0 %v16197_v2  ;;  %v16208_v2 = vld [vmem:[#allocation28_spill] sm:$0xff] }
 0x4c9   :  { %8960 = vmatpush1.bf16.msra.mxu0 %v16198_v11  ;;  %v16209_v11 = vld [vmem:[#allocation29_spill] sm:$0xff] }
 0x4ca   :  { %8962 = vmatprep.subr.bf16.mxu0 %v16199_v13  ;;  %v16210_v13 = vld [vmem:[#allocation32_spill] sm:$0xff] }
 0x4cd   :  { %8964 = vmatpush1.bf16.msra.mxu0 %v16200_v17  ;;  %v16211_v17 = vld [vmem:[#allocation33_spill] sm:$0xff] }
 0x4ce   :  { %8966 = vmatprep.subr.bf16.mxu0 %v16201_v50  ;;  %v16212_v50 = vld [vmem:[#allocation36_spill] sm:$0xff] }
 0x4d1   :  { %8968 = vmatpush1.bf16.msra.mxu0 %v16202_v8  ;;  %v16213_v8 = vld [vmem:[#allocation37_spill] sm:$0xff] }
 0x4d2   :  { %8970 = vmatprep.subr.bf16.mxu0 %v16203_v48  ;;  %v16214_v48 = vld [vmem:[#allocation40_spill] sm:$0xff] }
 0x4d5   :  { %8972 = vmatpush1.bf16.msra.mxu0 %v16204_v18  ;;  %v16215_v18 = vld [vmem:[#allocation41_spill] sm:$0xff] }
 0x4d6   :  { %8974 = vmatprep.subr.bf16.mxu0 %v16205_v28  ;;  %v16216_v28 = vld [vmem:[#allocation44_spill] sm:$0xff] }
 0x4d9   :  { %8976 = vmatpush1.bf16.msra.mxu0 %v16206_v59  ;;  %v16217_v59 = vld [vmem:[#allocation45_spill] sm:$0xff] }
 0x4da   :  { %8978 = vmatprep.subr.bf16.mxu0 %v16207_v42  ;;  %v16218_v42 = vld [vmem:[#allocation48_spill] sm:$0xff] }
 0x4dd   :  { %8980 = vmatpush1.bf16.msra.mxu0 %v16208_v2  ;;  %v16219_v2 = vld [vmem:[#allocation49_spill] sm:$0xff] }
 0x4de   :  { %8982 = vmatprep.subr.bf16.mxu0 %v16209_v11  ;;  %v16220_v11 = vld [vmem:[#allocation52_spill] sm:$0xff] }
 0x4e1   :  { %8984 = vmatpush1.bf16.msra.mxu0 %v16210_v13  ;;  %v16221_v13 = vld [vmem:[#allocation53_spill] sm:$0xff] }
 0x4e2   :  { %8986 = vmatprep.subr.bf16.mxu0 %v16211_v17  ;;  %v16222_v17 = vld [vmem:[#allocation56_spill] sm:$0xff] }
 0x4e5   :  { %8988 = vmatpush1.bf16.msra.mxu0 %v16212_v50  ;;  %v16223_v50 = vld [vmem:[#allocation57_spill] sm:$0xff] }
 0x4e6   :  { %8990 = vmatprep.subr.bf16.mxu0 %v16213_v8  ;;  %v16224_v8 = vld [vmem:[#allocation60_spill] sm:$0xff] }
 0x4e9   :  { %8992 = vmatpush1.bf16.msra.mxu0 %v16214_v48  ;;  %v16225_v48 = vld [vmem:[#allocation61_spill] sm:$0xff] }
 0x4ea   :  { %8994 = vmatprep.subr.bf16.mxu0 %v16215_v18  ;;  %v16226_v18 = vld [vmem:[#allocation64_spill] sm:$0xff] }
 0x4ed   :  { %8996 = vmatpush1.bf16.msra.mxu0 %v16216_v28  ;;  %v16227_v28 = vld [vmem:[#allocation66_spill] sm:$0xff] }
 0x4ee   :  { %8998 = vmatprep.subr.bf16.mxu0 %v16217_v59  ;;  %v361_v59 = vpop.permute.xlu1 %360 }
 0x4f1   :  { %9000 = vmatpush1.bf16.msra.mxu0 %v16218_v42  ;;  %v16228_v42 = vld [vmem:[#allocation118_spill] sm:$0xff] }
 0x4f2   :  { %9002 = vmatprep.subr.bf16.mxu0 %v16219_v2  ;;  %v450_v51 = vmul.f32 %v16228_v42, %v361_v59  ;;  %v16229_v2 = vld [vmem:[#allocation119_spill] sm:$0xff] }
 0x4f3   :  { %v451_v15 = vmul.f32 %v16229_v2, %v361_v59 }
 0x4f5   :  { %9004 = vmatpush1.bf16.msra.mxu0 %v16220_v11  ;;  %v16230_v11 = vld [vmem:[#allocation120_spill] sm:$0xff] }
 0x4f6   :  { %9006 = vmatprep.subr.bf16.mxu0 %v16221_v13  ;;  %v514_v56 = vadd.f32 %v16230_v11, %v450_v51  ;;  %v452_v11 = vmul.f32 %v16136_v10, %v361_v59 }
 0x4f9   :  { %9008 = vmatpush1.bf16.msra.mxu0 %v16222_v17  ;;  %v16231_v17 = vld [vmem:[#allocation121_spill] sm:$0xff] }
 0x4fa   :  { %9010 = vmatprep.subr.bf16.mxu0 %v16223_v50 }
 0x4fd   :  { %9012 = vmatpush1.bf16.msra.mxu0 %v16224_v8 }
 0x4fe   :  { %9014 = vmatprep.subr.bf16.mxu0 %v16225_v48  ;;  %v515_v48 = vadd.f32 %v16135_v47, %v451_v15  ;;  %v516_v15 = vadd.f32 %v13132_v30, %v452_v11  ;;  %v16236_v11 = vld [vmem:[#allocation39_spill] sm:$0xff] }
 0x501   :  { %9016 = vmatpush1.bf16.msra.mxu0 %v16226_v18 }
 0x502   :  { %9082 = vmatprep.subr.bf16.mxu0 %v16227_v28 }
 0x557   :  { %v1469_v13 = vpop.f32.mrb[8].mxu0  ;;  %v1540_v22 = vpop.f32.mrb[12].mxu1 }
 0x558   :  { %v1470_v60 = vadd.f32 %v1469_v13, %v16231_v17  ;;  %v1471_v50 = vpop.f32.mrb[9].mxu0  ;;  %v13517_v14 = vpop.f32.mrb[13].mxu1  ;;  %v1541_v17 = vadd.f32 %v1540_v22, %v13128_v57  ;;  %v16239_v22 = vld [vmem:[#allocation46_spill] sm:$0xff] }
 0x559   :  { %v1472_v18 = vadd.f32 %v1471_v50, %v16134_v32 }
 0x55a   :  { %v1620_v8 = vadd.f32 %v1470_v60, %v514_v56  ;;  %v16238_v60 = vld [vmem:[#allocation43_spill] sm:$0xff] }
 0x55b   :  { %v1627_v43 = vadd.f32 %v1472_v18, %v515_v48  ;;  %v16240_v56 = vld [vmem:[#allocation47_spill] sm:$0xff] }
 0x55c   :  { %v7215_v28 = vmul.f32 -1.442695, %v1620_v8 }
 0x55d   :  { %v7216_v42 = vmul.f32 -1.442695, %v1627_v43  ;;  %v16237_v43 = vld [vmem:[#allocation42_spill] sm:$0xff] }
 0x55e   :  { %12276 = vpow2.f32 %v7215_v28 }
 0x55f   :  { %12278 = vpow2.f32 %v7216_v42 }
 0x568   :  { %v12277_v2 = vpop.eup %12276 }
 0x569   :  { %v1624_v37 = vadd.f32 1.0, %v12277_v2  ;;  %v12279_v51 = vpop.eup %12278  ;;  %v16235_v2 = vld [vmem:[#allocation38_spill] sm:$0xff] }
 0x56a   :  { %v1631_v13 = vadd.f32 1.0, %v12279_v51  ;;  %v16241_v51 = vld [vmem:[#allocation50_spill] sm:$0xff] }
 0x56b   :  { %12280 = vrcp.f32 %v1624_v37 }
 0x56c   :  { %12282 = vrcp.f32 %v1631_v13  ;;  %v16242_v13 = vld [vmem:[#allocation51_spill] sm:$0xff] }
 0x575   :  { %v12281_v52 = vpop.eup %12280 }
 0x576   :  { %v1634_v47 = vmul.f32 %v12281_v52, %v1541_v17  ;;  %v12283_v8 = vpop.eup %12282  ;;  %v16232_v17 = vld [vmem:[#allocation31_spill] sm:$0xff] }
 0x577   :  { %v1637_v48 = vsub.f32 1.0, %v12283_v8  ;;  %v1639_v42 = vmul.f32 %v12283_v8, %v13335_v45  ;;  %v16233_v45 = vld [vmem:[#allocation34_spill] sm:$0xff]  ;;  %v16234_v52 = vld [vmem:[#allocation35_spill] sm:$0xff] }
 0x578   :  { %v1635_v50 = vadd.f32 %v1634_v47, %v516_v15  ;;  %v16243_v15 = vld [vmem:[#allocation54_spill] sm:$0xff] }
 0x579   :  { %v16245_v8 = vld [vmem:[#allocation58_spill] sm:$0xff] }
 0x57a   :  { %12284 = vtanh.f32 %v1635_v50  ;;  %v16244_v50 = vld [vmem:[#allocation55_spill] sm:$0xff] }
 0x584   :  { %v12285_v18 = vpop.eup %12284 }
 0x585   :  { %v1638_v28 = vmul.f32 %v12285_v18, %v1637_v48  ;;  %v16246_v48 = vld [vmem:[#allocation59_spill] sm:$0xff]  ;;  %v16247_v18 = vld [vmem:[#allocation62_spill] sm:$0xff] }
 0x587   :  { %v13525_v37 = vadd.f32 %v1639_v42, %v1638_v28  ;;  %v16248_v42 = vld [vmem:[#allocation63_spill] sm:$0xff]  ;;  %v16249_v28 = vld [vmem:[#allocation65_spill] sm:$0xff] }
 0x589   :  { %1706 = vmatmul.mubr.f32.vlgmr.msra.gmra.mrb[14].mxu1 %v13525_v37 }
 0x58a   :  { %8931 = vmatpush3.bf16.msra.mxu1 %v13136_v6  ;;  %7681 = vmatprep.mubr.msk.f32.mxu1 %vm12635_vm0, %v15996_v53 }
 0x58b   :  { %8932 = vmatprep.subr.bf16.mxu1 %v16051_v54 }
 0x58e   :  { %8934 = vmatpush3.bf16.msra.mxu1 %v13142_v4 }
 0x58f   :  { %8935 = vmatprep.subr.bf16.mxu1 %v16051_v54 }
 0x592   :  { %8937 = vmatpush3.bf16.msra.mxu1 %v13148_v0 }
 0x593   :  { %8938 = vmatprep.subr.bf16.mxu1 %v16051_v54 }
 0x596   :  { %8940 = vmatpush3.bf16.msra.mxu1 %v13152_v35 }
 0x597   :  { %v1611_v47 = vpop.f32.mrb[10].mxu0  ;;  %8941 = vmatprep.subr.bf16.mxu1 %v16051_v54 }
 0x598   :  { %v1613_v59 = vpop.f32.mrb[11].mxu0 }
 0x59a   :  { %8943 = vmatpush3.bf16.msra.mxu1 %v13156_v7 }
 0x59b   :  { %8944 = vmatprep.subr.bf16.mxu1 %v16051_v54 }
 0x59e   :  { %8946 = vmatpush3.bf16.msra.mxu1 %v13160_v33 }
 0x59f   :  { %8947 = vmatprep.subr.bf16.mxu1 %v16051_v54 }
 0x5a2   :  { %8949 = vmatpush3.bf16.msra.mxu1 %v13164_v31 }
 0x5a3   :  { %8950 = vmatprep.subr.bf16.mxu1 %v16051_v54 }
 0x5a6   :  { %8952 = vmatpush3.bf16.msra.mxu1 %v13168_v38 }
 0x5a7   :  { %9018 = vmatprep.subr.bf16.mxu1 %v12702_v29 }
 0x5a9   :  { %7682 = vmatmul.mubr.f32.vlgmr.msra.gmra.mrb[16].mxu1 %v13525_v37 }
 0x5aa   :  { %9020 = vmatpush1.bf16.msra.mxu1 %v12708_v34 }
 0x5ab   :  { %9022 = vmatprep.subr.bf16.mxu1 %v12713_v39 }
 0x5ae   :  { %9024 = vmatpush1.bf16.msra.mxu1 %v12716_v44 }
 0x5af   :  { %9026 = vmatprep.subr.bf16.mxu1 %v12722_v49 }
 0x5b2   :  { %9028 = vmatpush1.bf16.msra.mxu1 %v12728_v58 }
 0x5b3   :  { %9030 = vmatprep.subr.bf16.mxu1 %v16137_v62 }
 0x5b6   :  { %9032 = vmatpush1.bf16.msra.mxu1 %v16138_v24 }
 0x5b7   :  { %9034 = vmatprep.subr.bf16.mxu1 %v16139_v55 }
 0x5ba   :  { %9036 = vmatpush1.bf16.msra.mxu1 %v16140_v63 }
 0x5bb   :  { %9038 = vmatprep.subr.bf16.mxu1 %v16232_v17 }
 0x5be   :  { %9040 = vmatpush1.bf16.msra.mxu1 %v16233_v45 }
 0x5bf   :  { %9042 = vmatprep.subr.bf16.mxu1 %v16234_v52 }
 0x5c2   :  { %9044 = vmatpush1.bf16.msra.mxu1 %v16235_v2  ;;  %v1614_v2 = vadd.f32 %v1613_v59, %v13227_v12  ;;  %v16258_v59 = vld [vmem:[#allocation99_spill] sm:$0xff] }
 0x5c3   :  { %9046 = vmatprep.subr.bf16.mxu1 %v16236_v11 }
 0x5c6   :  { %9048 = vmatpush1.bf16.msra.mxu1 %v16237_v43 }
 0x5c7   :  { %9050 = vmatprep.subr.bf16.mxu1 %v16238_v60 }
 0x5ca   :  { %9052 = vmatpush1.bf16.msra.mxu1 %v16239_v22  ;;  %v16250_v22 = vld [vmem:[#allocation67_spill] sm:$0xff] }
 0x5cb   :  { %9054 = vmatprep.subr.bf16.mxu1 %v16240_v56  ;;  %v16251_v56 = vld [vmem:[#allocation69_spill] sm:$0xff] }
 0x5ce   :  { %9056 = vmatpush1.bf16.msra.mxu1 %v16241_v51  ;;  %v16252_v51 = vld [vmem:[#allocation71_spill] sm:$0xff] }
 0x5cf   :  { %9058 = vmatprep.subr.bf16.mxu1 %v16242_v13  ;;  %v16253_v13 = vld [vmem:[#allocation73_spill] sm:$0xff] }
 0x5d2   :  { %9060 = vmatpush1.bf16.msra.mxu1 %v16243_v15  ;;  %v16254_v15 = vld [vmem:[#allocation86_spill] sm:$0xff] }
 0x5d3   :  { %9062 = vmatprep.subr.bf16.mxu1 %v16244_v50 }
 0x5d6   :  { %9064 = vmatpush1.bf16.msra.mxu1 %v16245_v8  ;;  %v16255_v8 = vld [vmem:[#allocation126_spill] sm:$0xff] }
 0x5d7   :  { %9066 = vmatprep.subr.bf16.mxu1 %v16246_v48  ;;  %v1543_v48 = vadd.f32 %v13517_v14, %v16255_v8 }
 0x5da   :  { %9068 = vmatpush1.bf16.msra.mxu1 %v16247_v18 }
 0x5db   :  { %9070 = vmatprep.subr.bf16.mxu1 %v16248_v42  ;;  %v1612_v42 = vadd.f32 %v1611_v47, %v16164_v16 }
 0x5de   :  { %9072 = vmatpush1.bf16.msra.mxu1 %v16249_v28 }
 0x5df   :  { %9074 = vmatprep.subr.bf16.mxu1 %v16250_v22 }
 0x5e2   :  { %9076 = vmatpush1.bf16.msra.mxu1 %v16251_v56 }
 0x5e3   :  { %9078 = vmatprep.subr.bf16.mxu1 %v16252_v51 }
 0x5e6   :  { %9080 = vmatpush1.bf16.msra.mxu1 %v16253_v13 }
 0x5e7   :  { %9146 = vmatprep.subr.bf16.mxu1 %v16254_v15 }
 0x65c   :  { %v1707_v50 = vpop.f32.mrb[14].mxu1 }
 0x65d   :  { %v1708_v18 = vadd.f32 %v1707_v50, %v13215_v1  ;;  %v1709_v60 = vpop.f32.mrb[15].mxu1 }
 0x65e   :  { %v1710_v28 = vadd.f32 %v1709_v60, %v13218_v61 }
 0x65f   :  { %v1782_v22 = vadd.f32 %v1708_v18, %v1543_v48  ;;  %v16262_v18 = vld [vmem:[#allocation103_spill] sm:$0xff] }
 0x660   :  { %v1789_v43 = vadd.f32 %v1710_v28, %v1612_v42  ;;  %v16263_v42 = vld [vmem:[#allocation106_spill] sm:$0xff]  ;;  %v16264_v28 = vld [vmem:[#allocation81_spill] sm:$0xff] }
 0x661   :  { %v7217_v56 = vmul.f32 -1.442695, %v1782_v22 }
 0x662   :  { %v7218_v51 = vmul.f32 -1.442695, %v1789_v43 }
 0x663   :  { %12286 = vpow2.f32 %v7217_v56 }
 0x664   :  { %12288 = vpow2.f32 %v7218_v51 }
 0x66d   :  { %v12287_v13 = vpop.eup %12286 }
 0x66e   :  { %v1786_v11 = vadd.f32 1.0, %v12287_v13  ;;  %v12289_v15 = vpop.eup %12288 }
 0x66f   :  { %v1793_v14 = vadd.f32 1.0, %v12289_v15  ;;  %v16260_v15 = vld [vmem:[#allocation79_spill] sm:$0xff] }
 0x670   :  { %12290 = vrcp.f32 %v1786_v11 }
 0x671   :  { %12292 = vrcp.f32 %v1793_v14  ;;  %v16265_v14 = vld [vmem:[#allocation82_spill] sm:$0xff] }
 0x67a   :  { %v12291_v8 = vpop.eup %12290 }
 0x67b   :  { %v1796_v50 = vmul.f32 %v12291_v8, %v1614_v2  ;;  %v12293_v22 = vpop.eup %12292  ;;  %v16259_v2 = vld [vmem:[#allocation102_spill] sm:$0xff]  ;;  %v16261_v8 = vld [vmem:[#allocation80_spill] sm:$0xff] }
 0x67c   :  { %v1778_v1 = vpop.f32.mrb[16].mxu1  ;;  %v1799_v56 = vsub.f32 1.0, %v12293_v22  ;;  %v1801_v13 = vmul.f32 %v12293_v22, %v13424_v40  ;;  %v16257_v40 = vld [vmem:[#allocation78_spill] sm:$0xff]  ;;  %v16270_v22 = vld [vmem:[#allocation111_spill] sm:$0xff] }
 0x67d   :  { %v1779_v47 = vadd.f32 %v1778_v1, %v13231_v46  ;;  %v7683_v60 = vpop.f32.mrb[17].mxu1  ;;  %v16256_v1 = vld [vmem:[#allocation77_spill] sm:$0xff] }
 0x67e   :  { %v16268_v60 = vld [vmem:[#allocation83_spill] sm:$0xff] }
 0x67f   :  { %v1797_v48 = vadd.f32 %v1796_v50, %v1779_v47  ;;  %v16266_v50 = vld [vmem:[#allocation107_spill] sm:$0xff]  ;;  %v16267_v47 = vld [vmem:[#allocation110_spill] sm:$0xff] }
 0x681   :  { %12294 = vtanh.f32 %v1797_v48  ;;  %v16269_v48 = vld [vmem:[#allocation84_spill] sm:$0xff] }
 0x68b   :  { %v12295_v43 = vpop.eup %12294 }
 0x68c   :  { %v1800_v51 = vmul.f32 %v12295_v43, %v1799_v56  ;;  %v16271_v56 = vld [vmem:[#allocation114_spill] sm:$0xff]  ;;  %v16272_v43 = vld [vmem:[#allocation85_spill] sm:$0xff] }
 0x68e   :  { %v13587_v11 = vadd.f32 %v1801_v13, %v1800_v51  ;;  %v16273_v51 = vld [vmem:[#allocation88_spill] sm:$0xff]  ;;  %v16274_v13 = vld [vmem:[#allocation115_spill] sm:$0xff] }
 0x690   :  { %1867 = vmatprep.mubr.f32.mxu0 %v13587_v11  ;;  %1938 = vmatprep.mubr.f32.mxu1 %v13587_v11 }
 0x691   :  { %1868 = vmatmul.mubr.f32.vlgmr.msra.gmra.mrb[12].mxu0 %v13525_v37  ;;  %1939 = vmatmul.mubr.f32.vlgmr.msra.gmra.mrb[18].mxu1 %v13525_v37 }
 0x692   :  { %9084 = vmatpush1.bf16.msra.mxu0 %v16072_v26  ;;  %2009 = vmatprep.mubr.f32.mxu0 %v13587_v11 }
 0x693   :  { %9086 = vmatprep.subr.bf16.mxu0 %v16073_v3  ;;  %9148 = vmatpush1.bf16.msra.mxu1 %v16074_v19 }
 0x694   :  { %9150 = vmatprep.subr.bf16.mxu1 %v16075_v25  ;;  %2105 = vmatprep.mubr.f32.mxu1 %v15996_v53 }
 0x696   :  { %9088 = vmatpush1.bf16.msra.mxu0 %v16076_v41 }
 0x697   :  { %9090 = vmatprep.subr.bf16.mxu0 %v16077_v36  ;;  %9152 = vmatpush1.bf16.msra.mxu1 %v16078_v27 }
 0x698   :  { %9154 = vmatprep.subr.bf16.mxu1 %v16165_v20 }
 0x69a   :  { %9092 = vmatpush1.bf16.msra.mxu0 %v16166_v21 }
 0x69b   :  { %9094 = vmatprep.subr.bf16.mxu0 %v16167_v23  ;;  %9156 = vmatpush1.bf16.msra.mxu1 %v16168_v5 }
 0x69c   :  { %9158 = vmatprep.subr.bf16.mxu1 %v16169_v9 }
 0x69e   :  { %9096 = vmatpush1.bf16.msra.mxu0 %v16256_v1 }
 0x69f   :  { %9098 = vmatprep.subr.bf16.mxu0 %v16257_v40  ;;  %9160 = vmatpush1.bf16.msra.mxu1 %v16258_v59 }
 0x6a0   :  { %9162 = vmatprep.subr.bf16.mxu1 %v16259_v2 }
 0x6a2   :  { %9100 = vmatpush1.bf16.msra.mxu0 %v16260_v15 }
 0x6a3   :  { %9102 = vmatprep.subr.bf16.mxu0 %v16261_v8  ;;  %9164 = vmatpush1.bf16.msra.mxu1 %v16262_v18 }
 0x6a4   :  { %9166 = vmatprep.subr.bf16.mxu1 %v16263_v42 }
 0x6a6   :  { %9104 = vmatpush1.bf16.msra.mxu0 %v16264_v28  ;;  %v16285_v28 = vld [vmem:[#allocation109_spill] sm:$0xff] }
 0x6a7   :  { %9106 = vmatprep.subr.bf16.mxu0 %v16265_v14  ;;  %9168 = vmatpush1.bf16.msra.mxu1 %v16266_v50  ;;  %v16275_v14 = vld [vmem:[#allocation89_spill] sm:$0xff]  ;;  %v16276_v50 = vld [vmem:[#allocation92_spill] sm:$0xff] }
 0x6a8   :  { %9170 = vmatprep.subr.bf16.mxu1 %v16267_v47  ;;  %v16277_v47 = vld [vmem:[#allocation93_spill] sm:$0xff] }
 0x6aa   :  { %9108 = vmatpush1.bf16.msra.mxu0 %v16268_v60  ;;  %v16278_v60 = vld [vmem:[#allocation96_spill] sm:$0xff] }
 0x6ab   :  { %9110 = vmatprep.subr.bf16.mxu0 %v16269_v48  ;;  %9172 = vmatpush1.bf16.msra.mxu1 %v16270_v22  ;;  %v16279_v48 = vld [vmem:[#allocation97_spill] sm:$0xff]  ;;  %v16280_v22 = vld [vmem:[#allocation100_spill] sm:$0xff] }
 0x6ac   :  { %9174 = vmatprep.subr.bf16.mxu1 %v16271_v56  ;;  %v16281_v56 = vld [vmem:[#allocation101_spill] sm:$0xff] }
 0x6ae   :  { %9112 = vmatpush1.bf16.msra.mxu0 %v16272_v43  ;;  %v16282_v43 = vld [vmem:[#allocation104_spill] sm:$0xff] }
 0x6af   :  { %9114 = vmatprep.subr.bf16.mxu0 %v16273_v51  ;;  %9176 = vmatpush1.bf16.msra.mxu1 %v16274_v13  ;;  %v16283_v51 = vld [vmem:[#allocation105_spill] sm:$0xff]  ;;  %v16284_v13 = vld [vmem:[#allocation108_spill] sm:$0xff] }
 0x6b0   :  { %9177 = vmatprep.subr.bf16.mxu1 %v16051_v54 }
 0x6b2   :  { %9116 = vmatpush1.bf16.msra.mxu0 %v16275_v14  ;;  %v16286_v14 = vld [vmem:[#allocation112_spill] sm:$0xff] }
 0x6b3   :  { %9118 = vmatprep.subr.bf16.mxu0 %v16276_v50  ;;  %v16287_v50 = vld [vmem:[#allocation113_spill] sm:$0xff] }
 0x6b6   :  { %9120 = vmatpush1.bf16.msra.mxu0 %v16277_v47  ;;  %v16288_v47 = vld [vmem:[#allocation116_spill] sm:$0xff] }
 0x6b7   :  { %9122 = vmatprep.subr.bf16.mxu0 %v16278_v60  ;;  %v16289_v60 = vld [vmem:[#allocation117_spill] sm:$0xff] }
 0x6ba   :  { %9124 = vmatpush1.bf16.msra.mxu0 %v16279_v48  ;;  %v16290_v48 = vld [vmem:[#allocation12_spill] sm:$0xff] }
 0x6bb   :  { %9126 = vmatprep.subr.bf16.mxu0 %v16280_v22  ;;  %v16301_v22 = vld [vmem:[#allocation24_spill] sm:$0xff] }
 0x6be   :  { %9128 = vmatpush1.bf16.msra.mxu0 %v16281_v56  ;;  %v16291_v56 = vld [vmem:[#allocation13_spill] sm:$0xff] }
 0x6bf   :  { %9130 = vmatprep.subr.bf16.mxu0 %v16282_v43  ;;  %v16292_v43 = vld [vmem:[#allocation14_spill] sm:$0xff] }
 0x6c2   :  { %9132 = vmatpush1.bf16.msra.mxu0 %v16283_v51  ;;  %v16293_v51 = vld [vmem:[#allocation15_spill] sm:$0xff] }
 0x6c3   :  { %9134 = vmatprep.subr.bf16.mxu0 %v16284_v13  ;;  %v16294_v13 = vld [vmem:[#allocation16_spill] sm:$0xff] }
 0x6c6   :  { %9136 = vmatpush1.bf16.msra.mxu0 %v16285_v28  ;;  %v16295_v28 = vld [vmem:[#allocation17_spill] sm:$0xff] }
 0x6c7   :  { %9138 = vmatprep.subr.bf16.mxu0 %v16286_v14  ;;  %v16296_v14 = vld [vmem:[#allocation18_spill] sm:$0xff] }
 0x6ca   :  { %9140 = vmatpush1.bf16.msra.mxu0 %v16287_v50  ;;  %v16297_v50 = vld [vmem:[#allocation19_spill] sm:$0xff] }
 0x6cb   :  { %9142 = vmatprep.subr.bf16.mxu0 %v16288_v47  ;;  %v16298_v47 = vld [vmem:[#allocation20_spill] sm:$0xff] }
 0x6ce   :  { %9144 = vmatpush1.bf16.msra.mxu0 %v16289_v60  ;;  %v16299_v60 = vld [vmem:[#allocation21_spill] sm:$0xff] }
 0x6cf   :  { %9202 = vmatprep.subr.bf16.mxu0 %v16290_v48  ;;  %v16300_v48 = vld [vmem:[#allocation22_spill] sm:$0xff] }
 0x6d1   :  { %2010 = vmatmul.mubr.f32.vlgmr.msra.gmra.mrb[14].mxu0 %v13525_v37 }
 0x6d2   :  { %9204 = vmatpush1.bf16.msra.mxu0 %v16291_v56  ;;  %v16302_v56 = vld [vmem:[#allocation25_spill] sm:$0xff] }
 0x6d3   :  { %9206 = vmatprep.subr.bf16.mxu0 %v16292_v43  ;;  %v16303_v43 = vld [vmem:[#allocation28_spill] sm:$0xff] }
 0x6d6   :  { %9208 = vmatpush1.bf16.msra.mxu0 %v16293_v51  ;;  %v16304_v51 = vld [vmem:[#allocation29_spill] sm:$0xff] }
 0x6d7   :  { %9210 = vmatprep.subr.bf16.mxu0 %v16294_v13  ;;  %v16305_v13 = vld [vmem:[#allocation32_spill] sm:$0xff] }
 0x6da   :  { %9212 = vmatpush1.bf16.msra.mxu0 %v16295_v28  ;;  %v16306_v28 = vld [vmem:[#allocation33_spill] sm:$0xff] }
 0x6db   :  { %9214 = vmatprep.subr.bf16.mxu0 %v16296_v14  ;;  %v16307_v14 = vld [vmem:[#allocation36_spill] sm:$0xff] }
 0x6de   :  { %9216 = vmatpush1.bf16.msra.mxu0 %v16297_v50  ;;  %v16308_v50 = vld [vmem:[#allocation37_spill] sm:$0xff] }
 0x6df   :  { %9218 = vmatprep.subr.bf16.mxu0 %v16298_v47  ;;  %v16309_v47 = vld [vmem:[#allocation40_spill] sm:$0xff] }
 0x6e2   :  { %9220 = vmatpush1.bf16.msra.mxu0 %v16299_v60  ;;  %v16310_v60 = vld [vmem:[#allocation41_spill] sm:$0xff] }
 0x6e3   :  { %9222 = vmatprep.subr.bf16.mxu0 %v16300_v48  ;;  %v16311_v48 = vld [vmem:[#allocation44_spill] sm:$0xff] }
 0x6e6   :  { %9224 = vmatpush1.bf16.msra.mxu0 %v16301_v22  ;;  %v16312_v22 = vld [vmem:[#allocation45_spill] sm:$0xff] }
 0x6e7   :  { %9226 = vmatprep.subr.bf16.mxu0 %v16302_v56  ;;  %v16313_v56 = vld [vmem:[#allocation48_spill] sm:$0xff] }
 0x6ea   :  { %9228 = vmatpush1.bf16.msra.mxu0 %v16303_v43  ;;  %v16314_v43 = vld [vmem:[#allocation49_spill] sm:$0xff] }
 0x6eb   :  { %9230 = vmatprep.subr.bf16.mxu0 %v16304_v51  ;;  %v16315_v51 = vld [vmem:[#allocation52_spill] sm:$0xff] }
 0x6ee   :  { %9232 = vmatpush1.bf16.msra.mxu0 %v16305_v13  ;;  %v16316_v13 = vld [vmem:[#allocation53_spill] sm:$0xff] }
 0x6ef   :  { %9234 = vmatprep.subr.bf16.mxu0 %v16306_v28  ;;  %v16317_v28 = vld [vmem:[#allocation56_spill] sm:$0xff] }
 0x6f2   :  { %9236 = vmatpush1.bf16.msra.mxu0 %v16307_v14  ;;  %v16318_v14 = vld [vmem:[#allocation57_spill] sm:$0xff] }
 0x6f3   :  { %9238 = vmatprep.subr.bf16.mxu0 %v16308_v50  ;;  %v16319_v50 = vld [vmem:[#allocation60_spill] sm:$0xff] }
 0x6f6   :  { %9240 = vmatpush1.bf16.msra.mxu0 %v16309_v47  ;;  %v16320_v47 = vld [vmem:[#allocation61_spill] sm:$0xff] }
 0x6f7   :  { %9242 = vmatprep.subr.bf16.mxu0 %v16310_v60  ;;  %v16321_v60 = vld [vmem:[#allocation64_spill] sm:$0xff] }
 0x6fa   :  { %9244 = vmatpush1.bf16.msra.mxu0 %v16311_v48  ;;  %v16322_v48 = vld [vmem:[#allocation66_spill] sm:$0xff] }
 0x6fb   :  { %9246 = vmatprep.subr.bf16.mxu0 %v16312_v22  ;;  %v366_v22 = vpop.permute.xlu1 %365 }
 0x6fe   :  { %9248 = vmatpush1.bf16.msra.mxu0 %v16313_v56  ;;  %v16323_v56 = vld [vmem:[#allocation118_spill] sm:$0xff] }
 0x6ff   :  { %9250 = vmatprep.subr.bf16.mxu0 %v16314_v43  ;;  %v453_v42 = vmul.f32 %v16323_v56, %v366_v22  ;;  %v16324_v43 = vld [vmem:[#allocation119_spill] sm:$0xff] }
 0x700   :  { %v454_v18 = vmul.f32 %v16324_v43, %v366_v22 }
 0x702   :  { %9252 = vmatpush1.bf16.msra.mxu0 %v16315_v51 }
 0x703   :  { %9254 = vmatprep.subr.bf16.mxu0 %v16316_v13  ;;  %v16325_v13 = vld [vmem:[#allocation120_spill] sm:$0xff] }
 0x704   :  { %v517_v15 = vadd.f32 %v16325_v13, %v453_v42  ;;  %v455_v42 = vmul.f32 %v16136_v10, %v366_v22  ;;  %v16331_v22 = vld [vmem:[#allocation43_spill] sm:$0xff] }
 0x706   :  { %9256 = vmatpush1.bf16.msra.mxu0 %v16317_v28  ;;  %v16326_v28 = vld [vmem:[#allocation121_spill] sm:$0xff] }
 0x707   :  { %9258 = vmatprep.subr.bf16.mxu0 %v16318_v14 }
 0x70a   :  { %9260 = vmatpush1.bf16.msra.mxu0 %v16319_v50 }
 0x70b   :  { %9262 = vmatprep.subr.bf16.mxu0 %v16320_v47 }
 0x70e   :  { %9264 = vmatpush1.bf16.msra.mxu0 %v16321_v60  ;;  %v16327_v60 = vld [vmem:[#allocation122_spill] sm:$0xff] }
 0x70f   :  { %9330 = vmatprep.subr.bf16.mxu0 %v16322_v48  ;;  %v518_v40 = vadd.f32 %v16327_v60, %v454_v18 }
 0x764   :  { %v1869_v51 = vpop.f32.mrb[12].mxu0  ;;  %v1940_v8 = vpop.f32.mrb[18].mxu1 }
 0x765   :  { %v1870_v2 = vadd.f32 %v1869_v51, %v16326_v28  ;;  %v1871_v14 = vpop.f32.mrb[13].mxu0  ;;  %v13680_v59 = vpop.f32.mrb[19].mxu1  ;;  %v1941_v28 = vadd.f32 %v1940_v8, %v13128_v57  ;;  %v16328_v8 = vld [vmem:[#allocation38_spill] sm:$0xff] }
 0x766   :  { %v1872_v47 = vadd.f32 %v1871_v14, %v16134_v32  ;;  %v519_v14 = vadd.f32 %v13132_v30, %v455_v42  ;;  %v16335_v42 = vld [vmem:[#allocation51_spill] sm:$0xff] }
 0x767   :  { %v2020_v50 = vadd.f32 %v1870_v2, %v517_v15 }
 0x768   :  { %v2027_v1 = vadd.f32 %v1872_v47, %v518_v40 }
 0x769   :  { %v7219_v48 = vmul.f32 -1.442695, %v2020_v50 }
 0x76a   :  { %v7220_v56 = vmul.f32 -1.442695, %v2027_v1 }
 0x76b   :  { %12296 = vpow2.f32 %v7219_v48  ;;  %v16330_v48 = vld [vmem:[#allocation42_spill] sm:$0xff] }
 0x76c   :  { %12298 = vpow2.f32 %v7220_v56  ;;  %v16332_v56 = vld [vmem:[#allocation46_spill] sm:$0xff] }
 0x775   :  { %v12297_v43 = vpop.eup %12296 }
 0x776   :  { %v2024_v9 = vadd.f32 1.0, %v12297_v43  ;;  %v12299_v5 = vpop.eup %12298  ;;  %v16333_v43 = vld [vmem:[#allocation47_spill] sm:$0xff] }
 0x777   :  { %v2031_v51 = vadd.f32 1.0, %v12299_v5 }
 0x778   :  { %12300 = vrcp.f32 %v2024_v9 }
 0x779   :  { %12302 = vrcp.f32 %v2031_v51  ;;  %v16336_v51 = vld [vmem:[#allocation54_spill] sm:$0xff] }
 0x782   :  { %v12301_v13 = vpop.eup %12300 }
 0x783   :  { %v2034_v2 = vmul.f32 %v12301_v13, %v1941_v28  ;;  %v12303_v40 = vpop.eup %12302  ;;  %v16329_v28 = vld [vmem:[#allocation39_spill] sm:$0xff]  ;;  %v16334_v13 = vld [vmem:[#allocation50_spill] sm:$0xff] }
 0x784   :  { %v2037_v18 = vsub.f32 1.0, %v12303_v40  ;;  %v2039_v50 = vmul.f32 %v12303_v40, %v13525_v37  ;;  %v16340_v40 = vld [vmem:[#allocation62_spill] sm:$0xff] }
 0x785   :  { %v2035_v15 = vadd.f32 %v2034_v2, %v519_v14  ;;  %v16337_v14 = vld [vmem:[#allocation55_spill] sm:$0xff]  ;;  %v16338_v2 = vld [vmem:[#allocation58_spill] sm:$0xff] }
 0x787   :  { %12304 = vtanh.f32 %v2035_v15  ;;  %v16339_v15 = vld [vmem:[#allocation59_spill] sm:$0xff] }
 0x791   :  { %v12305_v1 = vpop.eup %12304 }
 0x792   :  { %v2038_v47 = vmul.f32 %v12305_v1, %v2037_v18  ;;  %v16341_v18 = vld [vmem:[#allocation63_spill] sm:$0xff]  ;;  %v16342_v1 = vld [vmem:[#allocation65_spill] sm:$0xff] }
 0x794   :  { %v13688_v9 = vadd.f32 %v2039_v50, %v2038_v47  ;;  %v16343_v50 = vld [vmem:[#allocation67_spill] sm:$0xff]  ;;  %v16344_v47 = vld [vmem:[#allocation69_spill] sm:$0xff] }
 0x796   :  { %2106 = vmatmul.mubr.f32.vlgmr.msra.gmra.mrb[20].mxu1 %v13688_v9 }
 0x797   :  { %9179 = vmatpush3.bf16.msra.mxu1 %v13136_v6  ;;  %7716 = vmatprep.mubr.msk.f32.mxu1 %vm12635_vm0, %v15996_v53 }
 0x798   :  { %9180 = vmatprep.subr.bf16.mxu1 %v16051_v54 }
 0x79b   :  { %9182 = vmatpush3.bf16.msra.mxu1 %v13142_v4 }
 0x79c   :  { %9183 = vmatprep.subr.bf16.mxu1 %v16051_v54 }
 0x79f   :  { %9185 = vmatpush3.bf16.msra.mxu1 %v13148_v0 }
 0x7a0   :  { %9186 = vmatprep.subr.bf16.mxu1 %v16051_v54 }
 0x7a3   :  { %9188 = vmatpush3.bf16.msra.mxu1 %v13152_v35 }
 0x7a4   :  { %v2011_v5 = vpop.f32.mrb[14].mxu0  ;;  %9189 = vmatprep.subr.bf16.mxu1 %v16051_v54 }
 0x7a5   :  { %v2013_v37 = vpop.f32.mrb[15].mxu0 }
 0x7a7   :  { %9191 = vmatpush3.bf16.msra.mxu1 %v13156_v7 }
 0x7a8   :  { %9192 = vmatprep.subr.bf16.mxu1 %v16051_v54 }
 0x7ab   :  { %9194 = vmatpush3.bf16.msra.mxu1 %v13160_v33 }
 0x7ac   :  { %9195 = vmatprep.subr.bf16.mxu1 %v16051_v54 }
 0x7af   :  { %9197 = vmatpush3.bf16.msra.mxu1 %v13164_v31 }
 0x7b0   :  { %9198 = vmatprep.subr.bf16.mxu1 %v16051_v54 }
 0x7b3   :  { %9200 = vmatpush3.bf16.msra.mxu1 %v13168_v38 }
 0x7b4   :  { %9266 = vmatprep.subr.bf16.mxu1 %v12702_v29 }
 0x7b6   :  { %7717 = vmatmul.mubr.f32.vlgmr.msra.gmra.mrb[22].mxu1 %v13688_v9 }
 0x7b7   :  { %9268 = vmatpush1.bf16.msra.mxu1 %v12708_v34 }
 0x7b8   :  { %9270 = vmatprep.subr.bf16.mxu1 %v12713_v39 }
 0x7bb   :  { %9272 = vmatpush1.bf16.msra.mxu1 %v12716_v44 }
 0x7bc   :  { %9274 = vmatprep.subr.bf16.mxu1 %v12722_v49 }
 0x7bf   :  { %9276 = vmatpush1.bf16.msra.mxu1 %v12728_v58 }
 0x7c0   :  { %9278 = vmatprep.subr.bf16.mxu1 %v16137_v62 }
 0x7c3   :  { %9280 = vmatpush1.bf16.msra.mxu1 %v16138_v24 }
 0x7c4   :  { %9282 = vmatprep.subr.bf16.mxu1 %v16139_v55 }
 0x7c7   :  { %9284 = vmatpush1.bf16.msra.mxu1 %v16140_v63 }
 0x7c8   :  { %9286 = vmatprep.subr.bf16.mxu1 %v16232_v17 }
 0x7cb   :  { %9288 = vmatpush1.bf16.msra.mxu1 %v16233_v45 }
 0x7cc   :  { %9290 = vmatprep.subr.bf16.mxu1 %v16234_v52 }
 0x7cf   :  { %9292 = vmatpush1.bf16.msra.mxu1 %v16328_v8 }
 0x7d0   :  { %9294 = vmatprep.subr.bf16.mxu1 %v16329_v28  ;;  %v2014_v28 = vadd.f32 %v2013_v37, %v13227_v12  ;;  %v16351_v37 = vld [vmem:[#allocation98_spill] sm:$0xff] }
 0x7d3   :  { %9296 = vmatpush1.bf16.msra.mxu1 %v16330_v48 }
 0x7d4   :  { %9298 = vmatprep.subr.bf16.mxu1 %v16331_v22 }
 0x7d7   :  { %9300 = vmatpush1.bf16.msra.mxu1 %v16332_v56 }
 0x7d8   :  { %9302 = vmatprep.subr.bf16.mxu1 %v16333_v43  ;;  %v16349_v43 = vld [vmem:[#allocation127_spill] sm:$0xff] }
 0x7db   :  { %9304 = vmatpush1.bf16.msra.mxu1 %v16334_v13  ;;  %v16345_v13 = vld [vmem:[#allocation71_spill] sm:$0xff] }
 0x7dc   :  { %9306 = vmatprep.subr.bf16.mxu1 %v16335_v42  ;;  %v16346_v42 = vld [vmem:[#allocation73_spill] sm:$0xff] }
 0x7df   :  { %9308 = vmatpush1.bf16.msra.mxu1 %v16336_v51  ;;  %v16347_v51 = vld [vmem:[#allocation86_spill] sm:$0xff] }
 0x7e0   :  { %9310 = vmatprep.subr.bf16.mxu1 %v16337_v14 }
 0x7e3   :  { %9312 = vmatpush1.bf16.msra.mxu1 %v16338_v2  ;;  %v16348_v2 = vld [vmem:[#allocation126_spill] sm:$0xff] }
 0x7e4   :  { %9314 = vmatprep.subr.bf16.mxu1 %v16339_v15  ;;  %v1943_v15 = vadd.f32 %v13680_v59, %v16348_v2 }
 0x7e7   :  { %9316 = vmatpush1.bf16.msra.mxu1 %v16340_v40 }
 0x7e8   :  { %9318 = vmatprep.subr.bf16.mxu1 %v16341_v18  ;;  %v2012_v18 = vadd.f32 %v2011_v5, %v16164_v16 }
 0x7eb   :  { %9320 = vmatpush1.bf16.msra.mxu1 %v16342_v1 }
 0x7ec   :  { %9322 = vmatprep.subr.bf16.mxu1 %v16343_v50 }
 0x7ef   :  { %9324 = vmatpush1.bf16.msra.mxu1 %v16344_v47 }
 0x7f0   :  { %9326 = vmatprep.subr.bf16.mxu1 %v16345_v13 }
 0x7f3   :  { %9328 = vmatpush1.bf16.msra.mxu1 %v16346_v42 }
 0x7f4   :  { %9394 = vmatprep.subr.bf16.mxu1 %v16347_v51 }
 0x869   :  { %v2107_v14 = vpop.f32.mrb[20].mxu1 }
 0x86a   :  { %v2108_v40 = vadd.f32 %v2107_v14, %v16349_v43  ;;  %v2109_v56 = vpop.f32.mrb[21].mxu1 }
 0x86b   :  { %v2110_v1 = vadd.f32 %v2109_v56, %v13218_v61 }
 0x86c   :  { %v2182_v50 = vadd.f32 %v2108_v40, %v1943_v15 }
 0x86d   :  { %v2189_v22 = vadd.f32 %v2110_v1, %v2012_v18  ;;  %v16356_v1 = vld [vmem:[#allocation79_spill] sm:$0xff] }
 0x86e   :  { %v7221_v47 = vmul.f32 -1.442695, %v2182_v50  ;;  %v16357_v50 = vld [vmem:[#allocation80_spill] sm:$0xff] }
 0x86f   :  { %v7222_v13 = vmul.f32 -1.442695, %v2189_v22 }
 0x870   :  { %12306 = vpow2.f32 %v7221_v47  ;;  %v16358_v47 = vld [vmem:[#allocation103_spill] sm:$0xff] }
 0x871   :  { %12308 = vpow2.f32 %v7222_v13 }
 0x87a   :  { %v12307_v42 = vpop.eup %12306 }
 0x87b   :  { %v2186_v48 = vadd.f32 1.0, %v12307_v42  ;;  %v12309_v51 = vpop.eup %12308 }
 0x87c   :  { %v2193_v59 = vadd.f32 1.0, %v12309_v51  ;;  %v16354_v51 = vld [vmem:[#allocation99_spill] sm:$0xff] }
 0x87d   :  { %12310 = vrcp.f32 %v2186_v48 }
 0x87e   :  { %12312 = vrcp.f32 %v2193_v59  ;;  %v16359_v59 = vld [vmem:[#allocation106_spill] sm:$0xff] }
 0x887   :  { %v12311_v2 = vpop.eup %12310 }
 0x888   :  { %v2196_v14 = vmul.f32 %v12311_v2, %v2014_v28  ;;  %v12313_v40 = vpop.eup %12312  ;;  %v16352_v28 = vld [vmem:[#allocation77_spill] sm:$0xff]  ;;  %v16355_v2 = vld [vmem:[#allocation102_spill] sm:$0xff] }
 0x889   :  { %v2178_v43 = vpop.f32.mrb[22].mxu1  ;;  %v2199_v18 = vsub.f32 1.0, %v12313_v40  ;;  %v2201_v42 = vmul.f32 %v12313_v40, %v13587_v11  ;;  %v16350_v11 = vld [vmem:[#allocation95_spill] sm:$0xff] }
 0x88a   :  { %v2179_v5 = vadd.f32 %v2178_v43, %v13231_v46  ;;  %v7718_v56 = vpop.f32.mrb[23].mxu1  ;;  %v16353_v43 = vld [vmem:[#allocation78_spill] sm:$0xff]  ;;  %v16364_v40 = vld [vmem:[#allocation83_spill] sm:$0xff] }
 0x88b   :  { %v16362_v56 = vld [vmem:[#allocation107_spill] sm:$0xff] }
 0x88c   :  { %v2197_v15 = vadd.f32 %v2196_v14, %v2179_v5  ;;  %v16360_v14 = vld [vmem:[#allocation81_spill] sm:$0xff]  ;;  %v16361_v5 = vld [vmem:[#allocation82_spill] sm:$0xff] }
 0x88e   :  { %12314 = vtanh.f32 %v2197_v15  ;;  %v16363_v15 = vld [vmem:[#allocation110_spill] sm:$0xff] }
 0x898   :  { %v12315_v22 = vpop.eup %12314 }
 0x899   :  { %v2200_v13 = vmul.f32 %v12315_v22, %v2199_v18  ;;  %v16365_v18 = vld [vmem:[#allocation84_spill] sm:$0xff]  ;;  %v16366_v22 = vld [vmem:[#allocation111_spill] sm:$0xff] }
 0x89b   :  { %v13750_v48 = vadd.f32 %v2201_v42, %v2200_v13  ;;  %v16367_v13 = vld [vmem:[#allocation114_spill] sm:$0xff]  ;;  %v16368_v42 = vld [vmem:[#allocation85_spill] sm:$0xff] }
 0x89d   :  { %2267 = vmatprep.mubr.f32.mxu0 %v13750_v48  ;;  %2338 = vmatprep.mubr.f32.mxu1 %v13750_v48 }
 0x89e   :  { %2268 = vmatmul.mubr.f32.vlgmr.msra.gmra.mrb[16].mxu0 %v13688_v9  ;;  %2339 = vmatmul.mubr.f32.vlgmr.msra.gmra.mrb[24].mxu1 %v13688_v9 }
 0x89f   :  { %9332 = vmatpush1.bf16.msra.mxu0 %v16072_v26  ;;  %2409 = vmatprep.mubr.f32.mxu0 %v13750_v48 }
 0x8a0   :  { %9334 = vmatprep.subr.bf16.mxu0 %v16073_v3  ;;  %9396 = vmatpush1.bf16.msra.mxu1 %v16074_v19 }
 0x8a1   :  { %9398 = vmatprep.subr.bf16.mxu1 %v16075_v25  ;;  %2505 = vmatprep.mubr.f32.mxu1 %v15996_v53 }
 0x8a3   :  { %9336 = vmatpush1.bf16.msra.mxu0 %v16076_v41 }
 0x8a4   :  { %9338 = vmatprep.subr.bf16.mxu0 %v16077_v36  ;;  %9400 = vmatpush1.bf16.msra.mxu1 %v16078_v27 }
 0x8a5   :  { %9402 = vmatprep.subr.bf16.mxu1 %v16165_v20 }
 0x8a7   :  { %9340 = vmatpush1.bf16.msra.mxu0 %v16166_v21 }
 0x8a8   :  { %9342 = vmatprep.subr.bf16.mxu0 %v16167_v23  ;;  %9404 = vmatpush1.bf16.msra.mxu1 %v16350_v11 }
 0x8a9   :  { %9406 = vmatprep.subr.bf16.mxu1 %v16351_v37 }
 0x8ab   :  { %9344 = vmatpush1.bf16.msra.mxu0 %v16352_v28 }
 0x8ac   :  { %9346 = vmatprep.subr.bf16.mxu0 %v16353_v43  ;;  %9408 = vmatpush1.bf16.msra.mxu1 %v16354_v51 }
 0x8ad   :  { %9410 = vmatprep.subr.bf16.mxu1 %v16355_v2 }
 0x8af   :  { %9348 = vmatpush1.bf16.msra.mxu0 %v16356_v1 }
 0x8b0   :  { %9350 = vmatprep.subr.bf16.mxu0 %v16357_v50  ;;  %9412 = vmatpush1.bf16.msra.mxu1 %v16358_v47  ;;  %v16369_v47 = vld [vmem:[#allocation88_spill] sm:$0xff] }
 0x8b1   :  { %9414 = vmatprep.subr.bf16.mxu1 %v16359_v59  ;;  %v16370_v59 = vld [vmem:[#allocation115_spill] sm:$0xff] }
 0x8b3   :  { %9352 = vmatpush1.bf16.msra.mxu0 %v16360_v14  ;;  %v16381_v14 = vld [vmem:[#allocation109_spill] sm:$0xff] }
 0x8b4   :  { %9354 = vmatprep.subr.bf16.mxu0 %v16361_v5  ;;  %9416 = vmatpush1.bf16.msra.mxu1 %v16362_v56  ;;  %v16371_v5 = vld [vmem:[#allocation89_spill] sm:$0xff]  ;;  %v16372_v56 = vld [vmem:[#allocation92_spill] sm:$0xff] }
 0x8b5   :  { %9418 = vmatprep.subr.bf16.mxu1 %v16363_v15  ;;  %v16373_v15 = vld [vmem:[#allocation93_spill] sm:$0xff] }
 0x8b7   :  { %9356 = vmatpush1.bf16.msra.mxu0 %v16364_v40  ;;  %v16374_v40 = vld [vmem:[#allocation96_spill] sm:$0xff] }
 0x8b8   :  { %9358 = vmatprep.subr.bf16.mxu0 %v16365_v18  ;;  %9420 = vmatpush1.bf16.msra.mxu1 %v16366_v22  ;;  %v16375_v18 = vld [vmem:[#allocation97_spill] sm:$0xff]  ;;  %v16376_v22 = vld [vmem:[#allocation100_spill] sm:$0xff] }
 0x8b9   :  { %9422 = vmatprep.subr.bf16.mxu1 %v16367_v13  ;;  %v16377_v13 = vld [vmem:[#allocation101_spill] sm:$0xff] }
 0x8bb   :  { %9360 = vmatpush1.bf16.msra.mxu0 %v16368_v42  ;;  %v16378_v42 = vld [vmem:[#allocation104_spill] sm:$0xff] }
 0x8bc   :  { %9362 = vmatprep.subr.bf16.mxu0 %v16369_v47  ;;  %9424 = vmatpush1.bf16.msra.mxu1 %v16370_v59  ;;  %v16379_v47 = vld [vmem:[#allocation105_spill] sm:$0xff]  ;;  %v16380_v59 = vld [vmem:[#allocation108_spill] sm:$0xff] }
 0x8bd   :  { %9425 = vmatprep.subr.bf16.mxu1 %v16051_v54 }
 0x8bf   :  { %9364 = vmatpush1.bf16.msra.mxu0 %v16371_v5  ;;  %v16382_v5 = vld [vmem:[#allocation112_spill] sm:$0xff] }
 0x8c0   :  { %9366 = vmatprep.subr.bf16.mxu0 %v16372_v56  ;;  %v16383_v56 = vld [vmem:[#allocation113_spill] sm:$0xff] }
 0x8c3   :  { %9368 = vmatpush1.bf16.msra.mxu0 %v16373_v15  ;;  %v16384_v15 = vld [vmem:[#allocation116_spill] sm:$0xff] }
 0x8c4   :  { %9370 = vmatprep.subr.bf16.mxu0 %v16374_v40  ;;  %v16385_v40 = vld [vmem:[#allocation117_spill] sm:$0xff] }
 0x8c7   :  { %9372 = vmatpush1.bf16.msra.mxu0 %v16375_v18  ;;  %v16386_v18 = vld [vmem:[#allocation12_spill] sm:$0xff] }
 0x8c8   :  { %9374 = vmatprep.subr.bf16.mxu0 %v16376_v22  ;;  %v16397_v22 = vld [vmem:[#allocation24_spill] sm:$0xff] }
 0x8cb   :  { %9376 = vmatpush1.bf16.msra.mxu0 %v16377_v13  ;;  %v16387_v13 = vld [vmem:[#allocation13_spill] sm:$0xff] }
 0x8cc   :  { %9378 = vmatprep.subr.bf16.mxu0 %v16378_v42  ;;  %v16388_v42 = vld [vmem:[#allocation14_spill] sm:$0xff] }
 0x8cf   :  { %9380 = vmatpush1.bf16.msra.mxu0 %v16379_v47  ;;  %v16389_v47 = vld [vmem:[#allocation15_spill] sm:$0xff] }
 0x8d0   :  { %9382 = vmatprep.subr.bf16.mxu0 %v16380_v59  ;;  %v16390_v59 = vld [vmem:[#allocation16_spill] sm:$0xff] }
 0x8d3   :  { %9384 = vmatpush1.bf16.msra.mxu0 %v16381_v14  ;;  %v16391_v14 = vld [vmem:[#allocation17_spill] sm:$0xff] }
 0x8d4   :  { %9386 = vmatprep.subr.bf16.mxu0 %v16382_v5  ;;  %v16392_v5 = vld [vmem:[#allocation18_spill] sm:$0xff] }
 0x8d7   :  { %9388 = vmatpush1.bf16.msra.mxu0 %v16383_v56  ;;  %v16393_v56 = vld [vmem:[#allocation19_spill] sm:$0xff] }
 0x8d8   :  { %9390 = vmatprep.subr.bf16.mxu0 %v16384_v15  ;;  %v16394_v15 = vld [vmem:[#allocation20_spill] sm:$0xff] }
 0x8db   :  { %9392 = vmatpush1.bf16.msra.mxu0 %v16385_v40  ;;  %v16395_v40 = vld [vmem:[#allocation21_spill] sm:$0xff] }
 0x8dc   :  { %9450 = vmatprep.subr.bf16.mxu0 %v16386_v18  ;;  %v16396_v18 = vld [vmem:[#allocation22_spill] sm:$0xff] }
 0x8de   :  { %2410 = vmatmul.mubr.f32.vlgmr.msra.gmra.mrb[18].mxu0 %v13688_v9 }
 0x8df   :  { %9452 = vmatpush1.bf16.msra.mxu0 %v16387_v13  ;;  %v16398_v13 = vld [vmem:[#allocation25_spill] sm:$0xff] }
 0x8e0   :  { %9454 = vmatprep.subr.bf16.mxu0 %v16388_v42  ;;  %v16399_v42 = vld [vmem:[#allocation28_spill] sm:$0xff] }
 0x8e3   :  { %9456 = vmatpush1.bf16.msra.mxu0 %v16389_v47  ;;  %v16400_v47 = vld [vmem:[#allocation29_spill] sm:$0xff] }
 0x8e4   :  { %9458 = vmatprep.subr.bf16.mxu0 %v16390_v59  ;;  %v16401_v59 = vld [vmem:[#allocation32_spill] sm:$0xff] }
 0x8e7   :  { %9460 = vmatpush1.bf16.msra.mxu0 %v16391_v14  ;;  %v16402_v14 = vld [vmem:[#allocation33_spill] sm:$0xff] }
 0x8e8   :  { %9462 = vmatprep.subr.bf16.mxu0 %v16392_v5  ;;  %v16403_v5 = vld [vmem:[#allocation36_spill] sm:$0xff] }
 0x8eb   :  { %9464 = vmatpush1.bf16.msra.mxu0 %v16393_v56  ;;  %v16404_v56 = vld [vmem:[#allocation37_spill] sm:$0xff] }
 0x8ec   :  { %9466 = vmatprep.subr.bf16.mxu0 %v16394_v15  ;;  %v16405_v15 = vld [vmem:[#allocation40_spill] sm:$0xff] }
 0x8ef   :  { %9468 = vmatpush1.bf16.msra.mxu0 %v16395_v40  ;;  %v16406_v40 = vld [vmem:[#allocation41_spill] sm:$0xff] }
 0x8f0   :  { %9470 = vmatprep.subr.bf16.mxu0 %v16396_v18  ;;  %v16407_v18 = vld [vmem:[#allocation44_spill] sm:$0xff] }
 0x8f3   :  { %9472 = vmatpush1.bf16.msra.mxu0 %v16397_v22  ;;  %v16408_v22 = vld [vmem:[#allocation45_spill] sm:$0xff] }
 0x8f4   :  { %9474 = vmatprep.subr.bf16.mxu0 %v16398_v13  ;;  %v16409_v13 = vld [vmem:[#allocation48_spill] sm:$0xff] }
 0x8f7   :  { %9476 = vmatpush1.bf16.msra.mxu0 %v16399_v42  ;;  %v16410_v42 = vld [vmem:[#allocation49_spill] sm:$0xff] }
 0x8f8   :  { %9478 = vmatprep.subr.bf16.mxu0 %v16400_v47  ;;  %v16411_v47 = vld [vmem:[#allocation52_spill] sm:$0xff] }
 0x8fb   :  { %9480 = vmatpush1.bf16.msra.mxu0 %v16401_v59  ;;  %v16412_v59 = vld [vmem:[#allocation53_spill] sm:$0xff] }
 0x8fc   :  { %9482 = vmatprep.subr.bf16.mxu0 %v16402_v14  ;;  %v16413_v14 = vld [vmem:[#allocation56_spill] sm:$0xff] }
 0x8ff   :  { %9484 = vmatpush1.bf16.msra.mxu0 %v16403_v5  ;;  %v16414_v5 = vld [vmem:[#allocation57_spill] sm:$0xff] }
 0x900   :  { %9486 = vmatprep.subr.bf16.mxu0 %v16404_v56  ;;  %v16415_v56 = vld [vmem:[#allocation60_spill] sm:$0xff] }
 0x903   :  { %9488 = vmatpush1.bf16.msra.mxu0 %v16405_v15  ;;  %v16416_v15 = vld [vmem:[#allocation61_spill] sm:$0xff] }
 0x904   :  { %9490 = vmatprep.subr.bf16.mxu0 %v16406_v40  ;;  %v16417_v40 = vld [vmem:[#allocation64_spill] sm:$0xff] }
 0x907   :  { %9492 = vmatpush1.bf16.msra.mxu0 %v16407_v18  ;;  %v16418_v18 = vld [vmem:[#allocation66_spill] sm:$0xff] }
 0x908   :  { %9494 = vmatprep.subr.bf16.mxu0 %v16408_v22  ;;  %v371_v22 = vpop.permute.xlu0 %370 }
 0x90b   :  { %9496 = vmatpush1.bf16.msra.mxu0 %v16409_v13  ;;  %v16419_v13 = vld [vmem:[#allocation118_spill] sm:$0xff] }
 0x90c   :  { %9498 = vmatprep.subr.bf16.mxu0 %v16410_v42  ;;  %v456_v50 = vmul.f32 %v16419_v13, %v371_v22  ;;  %v16420_v42 = vld [vmem:[#allocation119_spill] sm:$0xff] }
 0x90d   :  { %v457_v1 = vmul.f32 %v16420_v42, %v371_v22 }
 0x90f   :  { %9500 = vmatpush1.bf16.msra.mxu0 %v16411_v47 }
 0x910   :  { %9502 = vmatprep.subr.bf16.mxu0 %v16412_v59  ;;  %v16421_v59 = vld [vmem:[#allocation120_spill] sm:$0xff] }
 0x911   :  { %v520_v51 = vadd.f32 %v16421_v59, %v456_v50  ;;  %v458_v50 = vmul.f32 %v16136_v10, %v371_v22  ;;  %v16427_v22 = vld [vmem:[#allocation47_spill] sm:$0xff] }
 0x913   :  { %9504 = vmatpush1.bf16.msra.mxu0 %v16413_v14  ;;  %v16422_v14 = vld [vmem:[#allocation121_spill] sm:$0xff] }
 0x914   :  { %9506 = vmatprep.subr.bf16.mxu0 %v16414_v5 }
 0x917   :  { %9508 = vmatpush1.bf16.msra.mxu0 %v16415_v56 }
 0x918   :  { %9510 = vmatprep.subr.bf16.mxu0 %v16416_v15 }
 0x91b   :  { %9512 = vmatpush1.bf16.msra.mxu0 %v16417_v40  ;;  %v521_v40 = vadd.f32 %v16327_v60, %v457_v1 }
 0x91c   :  { %9578 = vmatprep.subr.bf16.mxu0 %v16418_v18 }
 0x971   :  { %v2269_v47 = vpop.f32.mrb[16].mxu0  ;;  %v2340_v2 = vpop.f32.mrb[24].mxu1 }
 0x972   :  { %v2270_v43 = vadd.f32 %v2269_v47, %v16422_v14  ;;  %v2271_v5 = vpop.f32.mrb[17].mxu0  ;;  %v13843_v28 = vpop.f32.mrb[25].mxu1  ;;  %v2341_v14 = vadd.f32 %v2340_v2, %v13128_v57  ;;  %v16423_v2 = vld [vmem:[#allocation39_spill] sm:$0xff] }
 0x973   :  { %v2272_v15 = vadd.f32 %v2271_v5, %v16134_v32  ;;  %v522_v5 = vadd.f32 %v13132_v30, %v458_v50  ;;  %v16430_v50 = vld [vmem:[#allocation54_spill] sm:$0xff] }
 0x974   :  { %v2420_v56 = vadd.f32 %v2270_v43, %v520_v51 }
 0x975   :  { %v2427_v37 = vadd.f32 %v2272_v15, %v521_v40 }
 0x976   :  { %v7223_v18 = vmul.f32 -1.442695, %v2420_v56 }
 0x977   :  { %v7224_v13 = vmul.f32 -1.442695, %v2427_v37 }
 0x978   :  { %12316 = vpow2.f32 %v7223_v18  ;;  %v16426_v18 = vld [vmem:[#allocation46_spill] sm:$0xff] }
 0x979   :  { %12318 = vpow2.f32 %v7224_v13  ;;  %v16428_v13 = vld [vmem:[#allocation50_spill] sm:$0xff] }
 0x982   :  { %v12317_v42 = vpop.eup %12316 }
 0x983   :  { %v2424_v11 = vadd.f32 1.0, %v12317_v42  ;;  %v12319_v23 = vpop.eup %12318  ;;  %v16429_v42 = vld [vmem:[#allocation51_spill] sm:$0xff] }
 0x984   :  { %v2431_v47 = vadd.f32 1.0, %v12319_v23 }
 0x985   :  { %12320 = vrcp.f32 %v2424_v11 }
 0x986   :  { %12322 = vrcp.f32 %v2431_v47  ;;  %v16431_v47 = vld [vmem:[#allocation55_spill] sm:$0xff] }
 0x98f   :  { %v12321_v59 = vpop.eup %12320 }
 0x990   :  { %v2434_v43 = vmul.f32 %v12321_v59, %v2341_v14  ;;  %v12323_v1 = vpop.eup %12322  ;;  %v16424_v59 = vld [vmem:[#allocation42_spill] sm:$0xff]  ;;  %v16425_v14 = vld [vmem:[#allocation43_spill] sm:$0xff] }
 0x991   :  { %v2437_v56 = vsub.f32 1.0, %v12323_v1  ;;  %v2439_v15 = vmul.f32 %v12323_v1, %v13688_v9  ;;  %v16435_v1 = vld [vmem:[#allocation63_spill] sm:$0xff] }
 0x992   :  { %v2435_v51 = vadd.f32 %v2434_v43, %v522_v5  ;;  %v16432_v5 = vld [vmem:[#allocation58_spill] sm:$0xff]  ;;  %v16433_v43 = vld [vmem:[#allocation59_spill] sm:$0xff] }
 0x994   :  { %12324 = vtanh.f32 %v2435_v51  ;;  %v16434_v51 = vld [vmem:[#allocation62_spill] sm:$0xff] }
 0x99e   :  { %v12325_v37 = vpop.eup %12324 }
 0x99f   :  { %v2438_v40 = vmul.f32 %v12325_v37, %v2437_v56  ;;  %v16436_v56 = vld [vmem:[#allocation65_spill] sm:$0xff]  ;;  %v16437_v37 = vld [vmem:[#allocation67_spill] sm:$0xff] }
 0x9a1   :  { %v13851_v11 = vadd.f32 %v2439_v15, %v2438_v40  ;;  %v16438_v15 = vld [vmem:[#allocation69_spill] sm:$0xff]  ;;  %v16439_v40 = vld [vmem:[#allocation71_spill] sm:$0xff] }
 0x9a3   :  { %2506 = vmatmul.mubr.f32.vlgmr.msra.gmra.mrb[26].mxu1 %v13851_v11 }
 0x9a4   :  { %9427 = vmatpush3.bf16.msra.mxu1 %v13136_v6  ;;  %7751 = vmatprep.mubr.msk.f32.mxu1 %vm12635_vm0, %v15996_v53 }
 0x9a5   :  { %9428 = vmatprep.subr.bf16.mxu1 %v16051_v54 }
 0x9a8   :  { %9430 = vmatpush3.bf16.msra.mxu1 %v13142_v4 }
 0x9a9   :  { %9431 = vmatprep.subr.bf16.mxu1 %v16051_v54 }
 0x9ac   :  { %9433 = vmatpush3.bf16.msra.mxu1 %v13148_v0 }
 0x9ad   :  { %9434 = vmatprep.subr.bf16.mxu1 %v16051_v54 }
 0x9b0   :  { %9436 = vmatpush3.bf16.msra.mxu1 %v13152_v35 }
 0x9b1   :  { %v2411_v23 = vpop.f32.mrb[18].mxu0  ;;  %9437 = vmatprep.subr.bf16.mxu1 %v16051_v54 }
 0x9b2   :  { %v2413_v9 = vpop.f32.mrb[19].mxu0 }
 0x9b4   :  { %9439 = vmatpush3.bf16.msra.mxu1 %v13156_v7 }
 0x9b5   :  { %9440 = vmatprep.subr.bf16.mxu1 %v16051_v54 }
 0x9b8   :  { %9442 = vmatpush3.bf16.msra.mxu1 %v13160_v33 }
 0x9b9   :  { %9443 = vmatprep.subr.bf16.mxu1 %v16051_v54 }
 0x9bc   :  { %9445 = vmatpush3.bf16.msra.mxu1 %v13164_v31 }
 0x9bd   :  { %9446 = vmatprep.subr.bf16.mxu1 %v16051_v54 }
 0x9c0   :  { %9448 = vmatpush3.bf16.msra.mxu1 %v13168_v38 }
 0x9c1   :  { %9514 = vmatprep.subr.bf16.mxu1 %v12702_v29 }
 0x9c3   :  { %7752 = vmatmul.mubr.f32.vlgmr.msra.gmra.mrb[28].mxu1 %v13851_v11 }
 0x9c4   :  { %9516 = vmatpush1.bf16.msra.mxu1 %v12708_v34 }
 0x9c5   :  { %9518 = vmatprep.subr.bf16.mxu1 %v12713_v39 }
 0x9c8   :  { %9520 = vmatpush1.bf16.msra.mxu1 %v12716_v44 }
 0x9c9   :  { %9522 = vmatprep.subr.bf16.mxu1 %v12722_v49 }
 0x9cc   :  { %9524 = vmatpush1.bf16.msra.mxu1 %v12728_v58 }
 0x9cd   :  { %9526 = vmatprep.subr.bf16.mxu1 %v16137_v62 }
 0x9d0   :  { %9528 = vmatpush1.bf16.msra.mxu1 %v16138_v24 }
 0x9d1   :  { %9530 = vmatprep.subr.bf16.mxu1 %v16139_v55 }
 0x9d4   :  { %9532 = vmatpush1.bf16.msra.mxu1 %v16140_v63 }
 0x9d5   :  { %9534 = vmatprep.subr.bf16.mxu1 %v16232_v17 }
 0x9d8   :  { %9536 = vmatpush1.bf16.msra.mxu1 %v16233_v45 }
 0x9d9   :  { %9538 = vmatprep.subr.bf16.mxu1 %v16234_v52 }
 0x9dc   :  { %9540 = vmatpush1.bf16.msra.mxu1 %v16328_v8 }
 0x9dd   :  { %9542 = vmatprep.subr.bf16.mxu1 %v16423_v2 }
 0x9e0   :  { %9544 = vmatpush1.bf16.msra.mxu1 %v16424_v59  ;;  %v2414_v59 = vadd.f32 %v2413_v9, %v13227_v12  ;;  %v16445_v9 = vld [vmem:[#allocation95_spill] sm:$0xff] }
 0x9e1   :  { %9546 = vmatprep.subr.bf16.mxu1 %v16425_v14 }
 0x9e4   :  { %9548 = vmatpush1.bf16.msra.mxu1 %v16426_v18 }
 0x9e5   :  { %9550 = vmatprep.subr.bf16.mxu1 %v16427_v22 }
 0x9e8   :  { %9552 = vmatpush1.bf16.msra.mxu1 %v16428_v13  ;;  %v16443_v13 = vld [vmem:[#allocation127_spill] sm:$0xff] }
 0x9e9   :  { %9554 = vmatprep.subr.bf16.mxu1 %v16429_v42  ;;  %v16440_v42 = vld [vmem:[#allocation73_spill] sm:$0xff] }
 0x9ec   :  { %9556 = vmatpush1.bf16.msra.mxu1 %v16430_v50  ;;  %v16441_v50 = vld [vmem:[#allocation86_spill] sm:$0xff] }
 0x9ed   :  { %9558 = vmatprep.subr.bf16.mxu1 %v16431_v47 }
 0x9f0   :  { %9560 = vmatpush1.bf16.msra.mxu1 %v16432_v5  ;;  %v16442_v5 = vld [vmem:[#allocation126_spill] sm:$0xff] }
 0x9f1   :  { %9562 = vmatprep.subr.bf16.mxu1 %v16433_v43  ;;  %v2343_v43 = vadd.f32 %v13843_v28, %v16442_v5 }
 0x9f4   :  { %9564 = vmatpush1.bf16.msra.mxu1 %v16434_v51 }
 0x9f5   :  { %9566 = vmatprep.subr.bf16.mxu1 %v16435_v1  ;;  %v2412_v1 = vadd.f32 %v2411_v23, %v16164_v16 }
 0x9f8   :  { %9568 = vmatpush1.bf16.msra.mxu1 %v16436_v56 }
 0x9f9   :  { %9570 = vmatprep.subr.bf16.mxu1 %v16437_v37 }
 0x9fc   :  { %9572 = vmatpush1.bf16.msra.mxu1 %v16438_v15 }
 0x9fd   :  { %9574 = vmatprep.subr.bf16.mxu1 %v16439_v40 }
 0xa00   :  { %9576 = vmatpush1.bf16.msra.mxu1 %v16440_v42 }
 0xa01   :  { %9642 = vmatprep.subr.bf16.mxu1 %v16441_v50 }
 0xa76   :  { %v2507_v47 = vpop.f32.mrb[26].mxu1 }
 0xa77   :  { %v2508_v51 = vadd.f32 %v2507_v47, %v16443_v13  ;;  %v2509_v22 = vpop.f32.mrb[27].mxu1 }
 0xa78   :  { %v2510_v56 = vadd.f32 %v2509_v22, %v13218_v61 }
 0xa79   :  { %v2582_v37 = vadd.f32 %v2508_v51, %v2343_v43 }
 0xa7a   :  { %v2589_v18 = vadd.f32 %v2510_v56, %v2412_v1 }
 0xa7b   :  { %v7225_v15 = vmul.f32 -1.442695, %v2582_v37  ;;  %v16450_v37 = vld [vmem:[#allocation102_spill] sm:$0xff] }
 0xa7c   :  { %v7226_v40 = vmul.f32 -1.442695, %v2589_v18 }
 0xa7d   :  { %12326 = vpow2.f32 %v7225_v15  ;;  %v16451_v15 = vld [vmem:[#allocation79_spill] sm:$0xff] }
 0xa7e   :  { %12328 = vpow2.f32 %v7226_v40  ;;  %v16452_v40 = vld [vmem:[#allocation80_spill] sm:$0xff] }
 0xa87   :  { %v12327_v42 = vpop.eup %12326 }
 0xa88   :  { %v2586_v14 = vadd.f32 1.0, %v12327_v42  ;;  %v12329_v50 = vpop.eup %12328 }
 0xa89   :  { %v2593_v28 = vadd.f32 1.0, %v12329_v50  ;;  %v16448_v50 = vld [vmem:[#allocation78_spill] sm:$0xff] }
 0xa8a   :  { %12330 = vrcp.f32 %v2586_v14 }
 0xa8b   :  { %12332 = vrcp.f32 %v2593_v28  ;;  %v16453_v28 = vld [vmem:[#allocation103_spill] sm:$0xff] }
 0xa94   :  { %v12331_v5 = vpop.eup %12330 }
 0xa95   :  { %v2596_v47 = vmul.f32 %v12331_v5, %v2414_v59  ;;  %v12333_v51 = vpop.eup %12332  ;;  %v16446_v59 = vld [vmem:[#allocation98_spill] sm:$0xff]  ;;  %v16449_v5 = vld [vmem:[#allocation99_spill] sm:$0xff] }
 0xa96   :  { %v2578_v13 = vpop.f32.mrb[28].mxu1  ;;  %v2599_v1 = vsub.f32 1.0, %v12333_v51  ;;  %v2601_v42 = vmul.f32 %v12333_v51, %v13750_v48  ;;  %v16444_v48 = vld [vmem:[#allocation76_spill] sm:$0xff]  ;;  %v16458_v51 = vld [vmem:[#allocation110_spill] sm:$0xff] }
 0xa97   :  { %v2579_v23 = vadd.f32 %v2578_v13, %v13231_v46  ;;  %v7753_v22 = vpop.f32.mrb[29].mxu1  ;;  %v16447_v13 = vld [vmem:[#allocation77_spill] sm:$0xff] }
 0xa98   :  { %v16456_v22 = vld [vmem:[#allocation82_spill] sm:$0xff] }
 0xa99   :  { %v2597_v43 = vadd.f32 %v2596_v47, %v2579_v23  ;;  %v16454_v47 = vld [vmem:[#allocation106_spill] sm:$0xff]  ;;  %v16455_v23 = vld [vmem:[#allocation81_spill] sm:$0xff] }
 0xa9b   :  { %12334 = vtanh.f32 %v2597_v43  ;;  %v16457_v43 = vld [vmem:[#allocation107_spill] sm:$0xff] }
 0xaa5   :  { %v12335_v18 = vpop.eup %12334 }
 0xaa6   :  { %v2600_v56 = vmul.f32 %v12335_v18, %v2599_v1  ;;  %v16459_v1 = vld [vmem:[#allocation83_spill] sm:$0xff]  ;;  %v16460_v18 = vld [vmem:[#allocation84_spill] sm:$0xff] }
 0xaa8   :  { %v13913_v14 = vadd.f32 %v2601_v42, %v2600_v56  ;;  %v16461_v56 = vld [vmem:[#allocation111_spill] sm:$0xff]  ;;  %v16462_v42 = vld [vmem:[#allocation114_spill] sm:$0xff] }
 0xaaa   :  { %2667 = vmatprep.mubr.f32.mxu0 %v13913_v14  ;;  %2738 = vmatprep.mubr.f32.mxu1 %v13913_v14 }
 0xaab   :  { %2668 = vmatmul.mubr.f32.vlgmr.msra.gmra.mrb[20].mxu0 %v13851_v11  ;;  %2739 = vmatmul.mubr.f32.vlgmr.msra.gmra.mrb[30].mxu1 %v13851_v11 }
 0xaac   :  { %9580 = vmatpush1.bf16.msra.mxu0 %v16072_v26  ;;  %2809 = vmatprep.mubr.f32.mxu0 %v13913_v14 }
 0xaad   :  { %9582 = vmatprep.subr.bf16.mxu0 %v16073_v3  ;;  %9644 = vmatpush1.bf16.msra.mxu1 %v16074_v19 }
 0xaae   :  { %9646 = vmatprep.subr.bf16.mxu1 %v16075_v25  ;;  %2905 = vmatprep.mubr.f32.mxu1 %v15996_v53 }
 0xab0   :  { %9584 = vmatpush1.bf16.msra.mxu0 %v16076_v41 }
 0xab1   :  { %9586 = vmatprep.subr.bf16.mxu0 %v16077_v36  ;;  %9648 = vmatpush1.bf16.msra.mxu1 %v16078_v27 }
 0xab2   :  { %9650 = vmatprep.subr.bf16.mxu1 %v16165_v20 }
 0xab4   :  { %9588 = vmatpush1.bf16.msra.mxu0 %v16166_v21 }
 0xab5   :  { %9590 = vmatprep.subr.bf16.mxu0 %v16444_v48  ;;  %9652 = vmatpush1.bf16.msra.mxu1 %v16445_v9 }
 0xab6   :  { %9654 = vmatprep.subr.bf16.mxu1 %v16446_v59 }
 0xab8   :  { %9592 = vmatpush1.bf16.msra.mxu0 %v16447_v13 }
 0xab9   :  { %9594 = vmatprep.subr.bf16.mxu0 %v16448_v50  ;;  %9656 = vmatpush1.bf16.msra.mxu1 %v16449_v5 }
 0xaba   :  { %9658 = vmatprep.subr.bf16.mxu1 %v16450_v37 }
 0xabc   :  { %9596 = vmatpush1.bf16.msra.mxu0 %v16451_v15 }
 0xabd   :  { %9598 = vmatprep.subr.bf16.mxu0 %v16452_v40  ;;  %9660 = vmatpush1.bf16.msra.mxu1 %v16453_v28  ;;  %v16463_v40 = vld [vmem:[#allocation85_spill] sm:$0xff]  ;;  %v16464_v28 = vld [vmem:[#allocation88_spill] sm:$0xff] }
 0xabe   :  { %9662 = vmatprep.subr.bf16.mxu1 %v16454_v47  ;;  %v16465_v47 = vld [vmem:[#allocation115_spill] sm:$0xff] }
 0xac0   :  { %9600 = vmatpush1.bf16.msra.mxu0 %v16455_v23  ;;  %v16476_v23 = vld [vmem:[#allocation109_spill] sm:$0xff] }
 0xac1   :  { %9602 = vmatprep.subr.bf16.mxu0 %v16456_v22  ;;  %9664 = vmatpush1.bf16.msra.mxu1 %v16457_v43  ;;  %v16466_v22 = vld [vmem:[#allocation89_spill] sm:$0xff]  ;;  %v16467_v43 = vld [vmem:[#allocation92_spill] sm:$0xff] }
 0xac2   :  { %9666 = vmatprep.subr.bf16.mxu1 %v16458_v51  ;;  %v16468_v51 = vld [vmem:[#allocation93_spill] sm:$0xff] }
 0xac4   :  { %9604 = vmatpush1.bf16.msra.mxu0 %v16459_v1  ;;  %v16469_v1 = vld [vmem:[#allocation96_spill] sm:$0xff] }
 0xac5   :  { %9606 = vmatprep.subr.bf16.mxu0 %v16460_v18  ;;  %9668 = vmatpush1.bf16.msra.mxu1 %v16461_v56  ;;  %v16470_v18 = vld [vmem:[#allocation97_spill] sm:$0xff]  ;;  %v16471_v56 = vld [vmem:[#allocation100_spill] sm:$0xff] }
 0xac6   :  { %9670 = vmatprep.subr.bf16.mxu1 %v16462_v42  ;;  %v16472_v42 = vld [vmem:[#allocation101_spill] sm:$0xff] }
 0xac8   :  { %9608 = vmatpush1.bf16.msra.mxu0 %v16463_v40  ;;  %v16473_v40 = vld [vmem:[#allocation104_spill] sm:$0xff] }
 0xac9   :  { %9610 = vmatprep.subr.bf16.mxu0 %v16464_v28  ;;  %9672 = vmatpush1.bf16.msra.mxu1 %v16465_v47  ;;  %v16474_v28 = vld [vmem:[#allocation105_spill] sm:$0xff]  ;;  %v16475_v47 = vld [vmem:[#allocation108_spill] sm:$0xff] }
 0xaca   :  { %9673 = vmatprep.subr.bf16.mxu1 %v16051_v54 }
 0xacc   :  { %9612 = vmatpush1.bf16.msra.mxu0 %v16466_v22  ;;  %v16477_v22 = vld [vmem:[#allocation112_spill] sm:$0xff] }
 0xacd   :  { %9614 = vmatprep.subr.bf16.mxu0 %v16467_v43  ;;  %v16478_v43 = vld [vmem:[#allocation113_spill] sm:$0xff] }
 0xad0   :  { %9616 = vmatpush1.bf16.msra.mxu0 %v16468_v51  ;;  %v16479_v51 = vld [vmem:[#allocation116_spill] sm:$0xff] }
 0xad1   :  { %9618 = vmatprep.subr.bf16.mxu0 %v16469_v1  ;;  %v16480_v1 = vld [vmem:[#allocation117_spill] sm:$0xff] }
 0xad4   :  { %9620 = vmatpush1.bf16.msra.mxu0 %v16470_v18  ;;  %v16481_v18 = vld [vmem:[#allocation12_spill] sm:$0xff] }
 0xad5   :  { %9622 = vmatprep.subr.bf16.mxu0 %v16471_v56  ;;  %v16492_v56 = vld [vmem:[#allocation24_spill] sm:$0xff] }
 0xad8   :  { %9624 = vmatpush1.bf16.msra.mxu0 %v16472_v42  ;;  %v16482_v42 = vld [vmem:[#allocation13_spill] sm:$0xff] }
 0xad9   :  { %9626 = vmatprep.subr.bf16.mxu0 %v16473_v40  ;;  %v16483_v40 = vld [vmem:[#allocation14_spill] sm:$0xff] }
 0xadc   :  { %9628 = vmatpush1.bf16.msra.mxu0 %v16474_v28  ;;  %v16484_v28 = vld [vmem:[#allocation15_spill] sm:$0xff] }
 0xadd   :  { %9630 = vmatprep.subr.bf16.mxu0 %v16475_v47  ;;  %v16485_v47 = vld [vmem:[#allocation16_spill] sm:$0xff] }
 0xae0   :  { %9632 = vmatpush1.bf16.msra.mxu0 %v16476_v23  ;;  %v16486_v23 = vld [vmem:[#allocation17_spill] sm:$0xff] }
 0xae1   :  { %9634 = vmatprep.subr.bf16.mxu0 %v16477_v22  ;;  %v16487_v22 = vld [vmem:[#allocation18_spill] sm:$0xff] }
 0xae4   :  { %9636 = vmatpush1.bf16.msra.mxu0 %v16478_v43  ;;  %v16488_v43 = vld [vmem:[#allocation19_spill] sm:$0xff] }
 0xae5   :  { %9638 = vmatprep.subr.bf16.mxu0 %v16479_v51  ;;  %v16489_v51 = vld [vmem:[#allocation20_spill] sm:$0xff] }
 0xae8   :  { %9640 = vmatpush1.bf16.msra.mxu0 %v16480_v1  ;;  %v16490_v1 = vld [vmem:[#allocation21_spill] sm:$0xff] }
 0xae9   :  { %9698 = vmatprep.subr.bf16.mxu0 %v16481_v18  ;;  %v16491_v18 = vld [vmem:[#allocation22_spill] sm:$0xff] }
 0xaeb   :  { %2810 = vmatmul.mubr.f32.vlgmr.msra.gmra.mrb[22].mxu0 %v13851_v11 }
 0xaec   :  { %9700 = vmatpush1.bf16.msra.mxu0 %v16482_v42  ;;  %v16493_v42 = vld [vmem:[#allocation25_spill] sm:$0xff] }
 0xaed   :  { %9702 = vmatprep.subr.bf16.mxu0 %v16483_v40  ;;  %v16494_v40 = vld [vmem:[#allocation28_spill] sm:$0xff] }
 0xaf0   :  { %9704 = vmatpush1.bf16.msra.mxu0 %v16484_v28  ;;  %v16495_v28 = vld [vmem:[#allocation29_spill] sm:$0xff] }
 0xaf1   :  { %9706 = vmatprep.subr.bf16.mxu0 %v16485_v47  ;;  %v16496_v47 = vld [vmem:[#allocation32_spill] sm:$0xff] }
 0xaf4   :  { %9708 = vmatpush1.bf16.msra.mxu0 %v16486_v23  ;;  %v16497_v23 = vld [vmem:[#allocation33_spill] sm:$0xff] }
 0xaf5   :  { %9710 = vmatprep.subr.bf16.mxu0 %v16487_v22  ;;  %v16498_v22 = vld [vmem:[#allocation36_spill] sm:$0xff] }
 0xaf8   :  { %9712 = vmatpush1.bf16.msra.mxu0 %v16488_v43  ;;  %v16499_v43 = vld [vmem:[#allocation37_spill] sm:$0xff] }
 0xaf9   :  { %9714 = vmatprep.subr.bf16.mxu0 %v16489_v51  ;;  %v16500_v51 = vld [vmem:[#allocation40_spill] sm:$0xff] }
 0xafc   :  { %9716 = vmatpush1.bf16.msra.mxu0 %v16490_v1  ;;  %v16501_v1 = vld [vmem:[#allocation41_spill] sm:$0xff] }
 0xafd   :  { %9718 = vmatprep.subr.bf16.mxu0 %v16491_v18  ;;  %v16502_v18 = vld [vmem:[#allocation44_spill] sm:$0xff] }
 0xb00   :  { %9720 = vmatpush1.bf16.msra.mxu0 %v16492_v56  ;;  %v16503_v56 = vld [vmem:[#allocation45_spill] sm:$0xff] }
 0xb01   :  { %9722 = vmatprep.subr.bf16.mxu0 %v16493_v42  ;;  %v16504_v42 = vld [vmem:[#allocation48_spill] sm:$0xff] }
 0xb04   :  { %9724 = vmatpush1.bf16.msra.mxu0 %v16494_v40  ;;  %v16505_v40 = vld [vmem:[#allocation49_spill] sm:$0xff] }
 0xb05   :  { %9726 = vmatprep.subr.bf16.mxu0 %v16495_v28  ;;  %v16506_v28 = vld [vmem:[#allocation52_spill] sm:$0xff] }
 0xb08   :  { %9728 = vmatpush1.bf16.msra.mxu0 %v16496_v47  ;;  %v16507_v47 = vld [vmem:[#allocation53_spill] sm:$0xff] }
 0xb09   :  { %9730 = vmatprep.subr.bf16.mxu0 %v16497_v23  ;;  %v16508_v23 = vld [vmem:[#allocation56_spill] sm:$0xff] }
 0xb0c   :  { %9732 = vmatpush1.bf16.msra.mxu0 %v16498_v22  ;;  %v16509_v22 = vld [vmem:[#allocation57_spill] sm:$0xff] }
 0xb0d   :  { %9734 = vmatprep.subr.bf16.mxu0 %v16499_v43  ;;  %v16510_v43 = vld [vmem:[#allocation60_spill] sm:$0xff] }
 0xb10   :  { %9736 = vmatpush1.bf16.msra.mxu0 %v16500_v51  ;;  %v16511_v51 = vld [vmem:[#allocation61_spill] sm:$0xff] }
 0xb11   :  { %9738 = vmatprep.subr.bf16.mxu0 %v16501_v1  ;;  %v16512_v1 = vld [vmem:[#allocation64_spill] sm:$0xff] }
 0xb14   :  { %9740 = vmatpush1.bf16.msra.mxu0 %v16502_v18  ;;  %v16513_v18 = vld [vmem:[#allocation66_spill] sm:$0xff] }
 0xb15   :  { %9742 = vmatprep.subr.bf16.mxu0 %v16503_v56  ;;  %v376_v56 = vpop.permute.xlu1 %375 }
 0xb18   :  { %9744 = vmatpush1.bf16.msra.mxu0 %v16504_v42  ;;  %v16514_v42 = vld [vmem:[#allocation118_spill] sm:$0xff] }
 0xb19   :  { %9746 = vmatprep.subr.bf16.mxu0 %v16505_v40  ;;  %v459_v15 = vmul.f32 %v16514_v42, %v376_v56  ;;  %v16515_v40 = vld [vmem:[#allocation119_spill] sm:$0xff] }
 0xb1a   :  { %v460_v37 = vmul.f32 %v16515_v40, %v376_v56 }
 0xb1c   :  { %9748 = vmatpush1.bf16.msra.mxu0 %v16506_v28 }
 0xb1d   :  { %9750 = vmatprep.subr.bf16.mxu0 %v16507_v47  ;;  %v16516_v47 = vld [vmem:[#allocation120_spill] sm:$0xff] }
 0xb1e   :  { %v523_v50 = vadd.f32 %v16516_v47, %v459_v15  ;;  %v461_v15 = vmul.f32 %v16136_v10, %v376_v56  ;;  %v16523_v56 = vld [vmem:[#allocation51_spill] sm:$0xff] }
 0xb20   :  { %9752 = vmatpush1.bf16.msra.mxu0 %v16508_v23  ;;  %v16517_v23 = vld [vmem:[#allocation121_spill] sm:$0xff] }
 0xb21   :  { %9754 = vmatprep.subr.bf16.mxu0 %v16509_v22 }
 0xb24   :  { %9756 = vmatpush1.bf16.msra.mxu0 %v16510_v43 }
 0xb25   :  { %9758 = vmatprep.subr.bf16.mxu0 %v16511_v51 }
 0xb28   :  { %9760 = vmatpush1.bf16.msra.mxu0 %v16512_v1  ;;  %v524_v1 = vadd.f32 %v16327_v60, %v460_v37 }
 0xb29   :  { %9826 = vmatprep.subr.bf16.mxu0 %v16513_v18 }
 0xb7e   :  { %v2669_v28 = vpop.f32.mrb[20].mxu0  ;;  %v2740_v5 = vpop.f32.mrb[30].mxu1 }
 0xb7f   :  { %v2670_v13 = vadd.f32 %v2669_v28, %v16517_v23  ;;  %v2671_v22 = vpop.f32.mrb[21].mxu0  ;;  %v14006_v59 = vpop.f32.mrb[31].mxu1  ;;  %v2741_v23 = vadd.f32 %v2740_v5, %v13128_v57  ;;  %v16518_v5 = vld [vmem:[#allocation42_spill] sm:$0xff] }
 0xb80   :  { %v2672_v51 = vadd.f32 %v2671_v22, %v16134_v32  ;;  %v525_v22 = vadd.f32 %v13132_v30, %v461_v15  ;;  %v16525_v15 = vld [vmem:[#allocation55_spill] sm:$0xff] }
 0xb81   :  { %v2820_v43 = vadd.f32 %v2670_v13, %v523_v50 }
 0xb82   :  { %v2827_v9 = vadd.f32 %v2672_v51, %v524_v1  ;;  %v16521_v1 = vld [vmem:[#allocation47_spill] sm:$0xff] }
 0xb83   :  { %v7227_v18 = vmul.f32 -1.442695, %v2820_v43 }
 0xb84   :  { %v7228_v42 = vmul.f32 -1.442695, %v2827_v9 }
 0xb85   :  { %12336 = vpow2.f32 %v7227_v18  ;;  %v16522_v18 = vld [vmem:[#allocation50_spill] sm:$0xff] }
 0xb86   :  { %12338 = vpow2.f32 %v7228_v42  ;;  %v16524_v42 = vld [vmem:[#allocation54_spill] sm:$0xff] }
 0xb8f   :  { %v12337_v40 = vpop.eup %12336 }
 0xb90   :  { %v2824_v48 = vadd.f32 1.0, %v12337_v40  ;;  %v12339_v21 = vpop.eup %12338 }
 0xb91   :  { %v2831_v28 = vadd.f32 1.0, %v12339_v21 }
 0xb92   :  { %12340 = vrcp.f32 %v2824_v48 }
 0xb93   :  { %12342 = vrcp.f32 %v2831_v28  ;;  %v16526_v28 = vld [vmem:[#allocation58_spill] sm:$0xff] }
 0xb9c   :  { %v12341_v47 = vpop.eup %12340 }
 0xb9d   :  { %v2834_v13 = vmul.f32 %v12341_v47, %v2741_v23  ;;  %v12343_v37 = vpop.eup %12342  ;;  %v16519_v47 = vld [vmem:[#allocation43_spill] sm:$0xff]  ;;  %v16520_v23 = vld [vmem:[#allocation46_spill] sm:$0xff] }
 0xb9e   :  { %v2837_v43 = vsub.f32 1.0, %v12343_v37  ;;  %v2839_v51 = vmul.f32 %v12343_v37, %v13851_v11  ;;  %v16530_v37 = vld [vmem:[#allocation65_spill] sm:$0xff] }
 0xb9f   :  { %v2835_v50 = vadd.f32 %v2834_v13, %v525_v22  ;;  %v16527_v22 = vld [vmem:[#allocation59_spill] sm:$0xff]  ;;  %v16528_v13 = vld [vmem:[#allocation62_spill] sm:$0xff] }
 0xba1   :  { %12344 = vtanh.f32 %v2835_v50  ;;  %v16529_v50 = vld [vmem:[#allocation63_spill] sm:$0xff] }
 0xbab   :  { %v12345_v9 = vpop.eup %12344 }
 0xbac   :  { %v2838_v40 = vmul.f32 %v12345_v9, %v2837_v43  ;;  %v16531_v43 = vld [vmem:[#allocation67_spill] sm:$0xff]  ;;  %v16532_v9 = vld [vmem:[#allocation69_spill] sm:$0xff] }
 0xbae   :  { %v14014_v48 = vadd.f32 %v2839_v51, %v2838_v40  ;;  %v16533_v51 = vld [vmem:[#allocation71_spill] sm:$0xff]  ;;  %v16534_v40 = vld [vmem:[#allocation73_spill] sm:$0xff] }
 0xbb0   :  { %2906 = vmatmul.mubr.f32.vlgmr.msra.gmra.mrb[32].mxu1 %v14014_v48 }
 0xbb1   :  { %9675 = vmatpush3.bf16.msra.mxu1 %v13136_v6  ;;  %7786 = vmatprep.mubr.msk.f32.mxu1 %vm12635_vm0, %v15996_v53 }
 0xbb2   :  { %9676 = vmatprep.subr.bf16.mxu1 %v16051_v54 }
 0xbb5   :  { %9678 = vmatpush3.bf16.msra.mxu1 %v13142_v4 }
 0xbb6   :  { %9679 = vmatprep.subr.bf16.mxu1 %v16051_v54 }
 0xbb9   :  { %9681 = vmatpush3.bf16.msra.mxu1 %v13148_v0 }
 0xbba   :  { %9682 = vmatprep.subr.bf16.mxu1 %v16051_v54 }
 0xbbd   :  { %9684 = vmatpush3.bf16.msra.mxu1 %v13152_v35 }
 0xbbe   :  { %v2811_v21 = vpop.f32.mrb[22].mxu0  ;;  %9685 = vmatprep.subr.bf16.mxu1 %v16051_v54 }
 0xbbf   :  { %v2813_v11 = vpop.f32.mrb[23].mxu0 }
 0xbc1   :  { %9687 = vmatpush3.bf16.msra.mxu1 %v13156_v7 }
 0xbc2   :  { %9688 = vmatprep.subr.bf16.mxu1 %v16051_v54 }
 0xbc5   :  { %9690 = vmatpush3.bf16.msra.mxu1 %v13160_v33 }
 0xbc6   :  { %9691 = vmatprep.subr.bf16.mxu1 %v16051_v54 }
 0xbc9   :  { %9693 = vmatpush3.bf16.msra.mxu1 %v13164_v31 }
 0xbca   :  { %9694 = vmatprep.subr.bf16.mxu1 %v16051_v54 }
 0xbcd   :  { %9696 = vmatpush3.bf16.msra.mxu1 %v13168_v38 }
 0xbce   :  { %9762 = vmatprep.subr.bf16.mxu1 %v12702_v29 }
 0xbd0   :  { %7787 = vmatmul.mubr.f32.vlgmr.msra.gmra.mrb[34].mxu1 %v14014_v48 }
 0xbd1   :  { %9764 = vmatpush1.bf16.msra.mxu1 %v12708_v34 }
 0xbd2   :  { %9766 = vmatprep.subr.bf16.mxu1 %v12713_v39 }
 0xbd5   :  { %9768 = vmatpush1.bf16.msra.mxu1 %v12716_v44 }
 0xbd6   :  { %9770 = vmatprep.subr.bf16.mxu1 %v12722_v49 }
 0xbd9   :  { %9772 = vmatpush1.bf16.msra.mxu1 %v12728_v58 }
 0xbda   :  { %9774 = vmatprep.subr.bf16.mxu1 %v16137_v62 }
 0xbdd   :  { %9776 = vmatpush1.bf16.msra.mxu1 %v16138_v24 }
 0xbde   :  { %9778 = vmatprep.subr.bf16.mxu1 %v16139_v55 }
 0xbe1   :  { %9780 = vmatpush1.bf16.msra.mxu1 %v16140_v63 }
 0xbe2   :  { %9782 = vmatprep.subr.bf16.mxu1 %v16232_v17 }
 0xbe5   :  { %9784 = vmatpush1.bf16.msra.mxu1 %v16233_v45 }
 0xbe6   :  { %9786 = vmatprep.subr.bf16.mxu1 %v16234_v52 }
 0xbe9   :  { %9788 = vmatpush1.bf16.msra.mxu1 %v16328_v8 }
 0xbea   :  { %9790 = vmatprep.subr.bf16.mxu1 %v16423_v2 }
 0xbed   :  { %9792 = vmatpush1.bf16.msra.mxu1 %v16518_v5 }
 0xbee   :  { %9794 = vmatprep.subr.bf16.mxu1 %v16519_v47  ;;  %v2814_v47 = vadd.f32 %v2813_v11, %v13227_v12  ;;  %v16539_v11 = vld [vmem:[#allocation76_spill] sm:$0xff] }
 0xbf1   :  { %9796 = vmatpush1.bf16.msra.mxu1 %v16520_v23 }
 0xbf2   :  { %9798 = vmatprep.subr.bf16.mxu1 %v16521_v1 }
 0xbf5   :  { %9800 = vmatpush1.bf16.msra.mxu1 %v16522_v18 }
 0xbf6   :  { %9802 = vmatprep.subr.bf16.mxu1 %v16523_v56  ;;  %v16537_v56 = vld [vmem:[#allocation127_spill] sm:$0xff] }
 0xbf9   :  { %9804 = vmatpush1.bf16.msra.mxu1 %v16524_v42  ;;  %v16535_v42 = vld [vmem:[#allocation86_spill] sm:$0xff] }
 0xbfa   :  { %9806 = vmatprep.subr.bf16.mxu1 %v16525_v15 }
 0xbfd   :  { %9808 = vmatpush1.bf16.msra.mxu1 %v16526_v28  ;;  %v16536_v28 = vld [vmem:[#allocation126_spill] sm:$0xff] }
 0xbfe   :  { %9810 = vmatprep.subr.bf16.mxu1 %v16527_v22  ;;  %v2743_v22 = vadd.f32 %v14006_v59, %v16536_v28 }
 0xc01   :  { %9812 = vmatpush1.bf16.msra.mxu1 %v16528_v13 }
 0xc02   :  { %9814 = vmatprep.subr.bf16.mxu1 %v16529_v50  ;;  %v2812_v50 = vadd.f32 %v2811_v21, %v16164_v16 }
 0xc05   :  { %9816 = vmatpush1.bf16.msra.mxu1 %v16530_v37 }
 0xc06   :  { %9818 = vmatprep.subr.bf16.mxu1 %v16531_v43 }
 0xc09   :  { %9820 = vmatpush1.bf16.msra.mxu1 %v16532_v9 }
 0xc0a   :  { %9822 = vmatprep.subr.bf16.mxu1 %v16533_v51 }
 0xc0d   :  { %9824 = vmatpush1.bf16.msra.mxu1 %v16534_v40 }
 0xc0e   :  { %9890 = vmatprep.subr.bf16.mxu1 %v16535_v42 }
 0xc83   :  { %v2907_v15 = vpop.f32.mrb[32].mxu1 }
 0xc84   :  { %v2908_v13 = vadd.f32 %v2907_v15, %v16537_v56  ;;  %v2909_v18 = vpop.f32.mrb[33].mxu1 }
 0xc85   :  { %v2910_v37 = vadd.f32 %v2909_v18, %v13218_v61 }
 0xc86   :  { %v2982_v43 = vadd.f32 %v2908_v13, %v2743_v22 }
 0xc87   :  { %v2989_v1 = vadd.f32 %v2910_v37, %v2812_v50 }
 0xc88   :  { %v7229_v9 = vmul.f32 -1.442695, %v2982_v43 }
 0xc89   :  { %v7230_v51 = vmul.f32 -1.442695, %v2989_v1 }
 0xc8a   :  { %12346 = vpow2.f32 %v7229_v9  ;;  %v16544_v9 = vld [vmem:[#allocation99_spill] sm:$0xff] }
 0xc8b   :  { %12348 = vpow2.f32 %v7230_v51  ;;  %v16545_v51 = vld [vmem:[#allocation102_spill] sm:$0xff] }
 0xc94   :  { %v12347_v40 = vpop.eup %12346 }
 0xc95   :  { %v2986_v23 = vadd.f32 1.0, %v12347_v40  ;;  %v12349_v42 = vpop.eup %12348  ;;  %v16546_v40 = vld [vmem:[#allocation79_spill] sm:$0xff] }
 0xc96   :  { %v2993_v59 = vadd.f32 1.0, %v12349_v42  ;;  %v16542_v42 = vld [vmem:[#allocation77_spill] sm:$0xff] }
 0xc97   :  { %12350 = vrcp.f32 %v2986_v23 }
 0xc98   :  { %12352 = vrcp.f32 %v2993_v59  ;;  %v16547_v59 = vld [vmem:[#allocation80_spill] sm:$0xff] }
 0xca1   :  { %v12351_v28 = vpop.eup %12350 }
 0xca2   :  { %v2996_v15 = vmul.f32 %v12351_v28, %v2814_v47  ;;  %v12353_v13 = vpop.eup %12352  ;;  %v16540_v47 = vld [vmem:[#allocation95_spill] sm:$0xff]  ;;  %v16543_v28 = vld [vmem:[#allocation78_spill] sm:$0xff] }
 0xca3   :  { %v2978_v56 = vpop.f32.mrb[34].mxu1  ;;  %v2999_v50 = vsub.f32 1.0, %v12353_v13  ;;  %v3001_v43 = vmul.f32 %v12353_v13, %v13913_v14  ;;  %v16538_v14 = vld [vmem:[#allocation75_spill] sm:$0xff] }
 0xca4   :  { %v2979_v21 = vadd.f32 %v2978_v56, %v13231_v46  ;;  %v7788_v18 = vpop.f32.mrb[35].mxu1  ;;  %v16541_v56 = vld [vmem:[#allocation98_spill] sm:$0xff]  ;;  %v16552_v13 = vld [vmem:[#allocation107_spill] sm:$0xff] }
 0xca5   :  { %v16550_v18 = vld [vmem:[#allocation81_spill] sm:$0xff] }
 0xca6   :  { %v2997_v22 = vadd.f32 %v2996_v15, %v2979_v21  ;;  %v16548_v15 = vld [vmem:[#allocation103_spill] sm:$0xff]  ;;  %v16549_v21 = vld [vmem:[#allocation106_spill] sm:$0xff] }
 0xca8   :  { %12354 = vtanh.f32 %v2997_v22  ;;  %v16551_v22 = vld [vmem:[#allocation82_spill] sm:$0xff] }
 0xcb2   :  { %v12355_v1 = vpop.eup %12354 }
 0xcb3   :  { %v3000_v37 = vmul.f32 %v12355_v1, %v2999_v50  ;;  %v16553_v50 = vld [vmem:[#allocation110_spill] sm:$0xff]  ;;  %v16554_v1 = vld [vmem:[#allocation83_spill] sm:$0xff] }
 0xcb5   :  { %v14076_v23 = vadd.f32 %v3001_v43, %v3000_v37  ;;  %v16555_v37 = vld [vmem:[#allocation84_spill] sm:$0xff]  ;;  %v16556_v43 = vld [vmem:[#allocation111_spill] sm:$0xff] }
 0xcb7   :  { %3067 = vmatprep.mubr.f32.mxu0 %v14076_v23  ;;  %3138 = vmatprep.mubr.f32.mxu1 %v14076_v23 }
 0xcb8   :  { %3068 = vmatmul.mubr.f32.vlgmr.msra.gmra.mrb[24].mxu0 %v14014_v48  ;;  %3139 = vmatmul.mubr.f32.vlgmr.msra.gmra.mrb[36].mxu1 %v14014_v48 }
 0xcb9   :  { %9828 = vmatpush1.bf16.msra.mxu0 %v16072_v26  ;;  %3209 = vmatprep.mubr.f32.mxu0 %v14076_v23 }
 0xcba   :  { %9830 = vmatprep.subr.bf16.mxu0 %v16073_v3  ;;  %9892 = vmatpush1.bf16.msra.mxu1 %v16074_v19 }
 0xcbb   :  { %9894 = vmatprep.subr.bf16.mxu1 %v16075_v25  ;;  %3305 = vmatprep.mubr.f32.mxu1 %v15996_v53 }
 0xcbd   :  { %9832 = vmatpush1.bf16.msra.mxu0 %v16076_v41 }
 0xcbe   :  { %9834 = vmatprep.subr.bf16.mxu0 %v16077_v36  ;;  %9896 = vmatpush1.bf16.msra.mxu1 %v16078_v27 }
 0xcbf   :  { %9898 = vmatprep.subr.bf16.mxu1 %v16165_v20 }
 0xcc1   :  { %9836 = vmatpush1.bf16.msra.mxu0 %v16538_v14 }
 0xcc2   :  { %9838 = vmatprep.subr.bf16.mxu0 %v16539_v11  ;;  %9900 = vmatpush1.bf16.msra.mxu1 %v16540_v47 }
 0xcc3   :  { %9902 = vmatprep.subr.bf16.mxu1 %v16541_v56 }
 0xcc5   :  { %9840 = vmatpush1.bf16.msra.mxu0 %v16542_v42 }
 0xcc6   :  { %9842 = vmatprep.subr.bf16.mxu0 %v16543_v28  ;;  %9904 = vmatpush1.bf16.msra.mxu1 %v16544_v9 }
 0xcc7   :  { %9906 = vmatprep.subr.bf16.mxu1 %v16545_v51 }
 0xcc9   :  { %9844 = vmatpush1.bf16.msra.mxu0 %v16546_v40  ;;  %v16557_v40 = vld [vmem:[#allocation114_spill] sm:$0xff] }
 0xcca   :  { %9846 = vmatprep.subr.bf16.mxu0 %v16547_v59  ;;  %9908 = vmatpush1.bf16.msra.mxu1 %v16548_v15  ;;  %v16558_v59 = vld [vmem:[#allocation85_spill] sm:$0xff]  ;;  %v16559_v15 = vld [vmem:[#allocation88_spill] sm:$0xff] }
 0xccb   :  { %9910 = vmatprep.subr.bf16.mxu1 %v16549_v21  ;;  %v16560_v21 = vld [vmem:[#allocation115_spill] sm:$0xff] }
 0xccd   :  { %9848 = vmatpush1.bf16.msra.mxu0 %v16550_v18  ;;  %v16571_v18 = vld [vmem:[#allocation109_spill] sm:$0xff] }
 0xcce   :  { %9850 = vmatprep.subr.bf16.mxu0 %v16551_v22  ;;  %9912 = vmatpush1.bf16.msra.mxu1 %v16552_v13  ;;  %v16561_v22 = vld [vmem:[#allocation89_spill] sm:$0xff]  ;;  %v16562_v13 = vld [vmem:[#allocation92_spill] sm:$0xff] }
 0xccf   :  { %9914 = vmatprep.subr.bf16.mxu1 %v16553_v50  ;;  %v16563_v50 = vld [vmem:[#allocation93_spill] sm:$0xff] }
 0xcd1   :  { %9852 = vmatpush1.bf16.msra.mxu0 %v16554_v1  ;;  %v16564_v1 = vld [vmem:[#allocation96_spill] sm:$0xff] }
 0xcd2   :  { %9854 = vmatprep.subr.bf16.mxu0 %v16555_v37  ;;  %9916 = vmatpush1.bf16.msra.mxu1 %v16556_v43  ;;  %v16565_v37 = vld [vmem:[#allocation97_spill] sm:$0xff]  ;;  %v16566_v43 = vld [vmem:[#allocation100_spill] sm:$0xff] }
 0xcd3   :  { %9918 = vmatprep.subr.bf16.mxu1 %v16557_v40  ;;  %v16567_v40 = vld [vmem:[#allocation101_spill] sm:$0xff] }
 0xcd5   :  { %9856 = vmatpush1.bf16.msra.mxu0 %v16558_v59  ;;  %v16568_v59 = vld [vmem:[#allocation104_spill] sm:$0xff] }
 0xcd6   :  { %9858 = vmatprep.subr.bf16.mxu0 %v16559_v15  ;;  %9920 = vmatpush1.bf16.msra.mxu1 %v16560_v21  ;;  %v16569_v15 = vld [vmem:[#allocation105_spill] sm:$0xff]  ;;  %v16570_v21 = vld [vmem:[#allocation108_spill] sm:$0xff] }
 0xcd7   :  { %9921 = vmatprep.subr.bf16.mxu1 %v16051_v54 }
 0xcd9   :  { %9860 = vmatpush1.bf16.msra.mxu0 %v16561_v22  ;;  %v16572_v22 = vld [vmem:[#allocation112_spill] sm:$0xff] }
 0xcda   :  { %9862 = vmatprep.subr.bf16.mxu0 %v16562_v13  ;;  %v16573_v13 = vld [vmem:[#allocation113_spill] sm:$0xff] }
 0xcdd   :  { %9864 = vmatpush1.bf16.msra.mxu0 %v16563_v50  ;;  %v16574_v50 = vld [vmem:[#allocation116_spill] sm:$0xff] }
 0xcde   :  { %9866 = vmatprep.subr.bf16.mxu0 %v16564_v1  ;;  %v16575_v1 = vld [vmem:[#allocation117_spill] sm:$0xff] }
 0xce1   :  { %9868 = vmatpush1.bf16.msra.mxu0 %v16565_v37  ;;  %v16576_v37 = vld [vmem:[#allocation12_spill] sm:$0xff] }
 0xce2   :  { %9870 = vmatprep.subr.bf16.mxu0 %v16566_v43  ;;  %v16587_v43 = vld [vmem:[#allocation24_spill] sm:$0xff] }
 0xce5   :  { %9872 = vmatpush1.bf16.msra.mxu0 %v16567_v40  ;;  %v16577_v40 = vld [vmem:[#allocation13_spill] sm:$0xff] }
 0xce6   :  { %9874 = vmatprep.subr.bf16.mxu0 %v16568_v59  ;;  %v16578_v59 = vld [vmem:[#allocation14_spill] sm:$0xff] }
 0xce9   :  { %9876 = vmatpush1.bf16.msra.mxu0 %v16569_v15  ;;  %v16579_v15 = vld [vmem:[#allocation15_spill] sm:$0xff] }
 0xcea   :  { %9878 = vmatprep.subr.bf16.mxu0 %v16570_v21  ;;  %v16580_v21 = vld [vmem:[#allocation16_spill] sm:$0xff] }
 0xced   :  { %9880 = vmatpush1.bf16.msra.mxu0 %v16571_v18  ;;  %v16581_v18 = vld [vmem:[#allocation17_spill] sm:$0xff] }
 0xcee   :  { %9882 = vmatprep.subr.bf16.mxu0 %v16572_v22  ;;  %v16582_v22 = vld [vmem:[#allocation18_spill] sm:$0xff] }
 0xcf1   :  { %9884 = vmatpush1.bf16.msra.mxu0 %v16573_v13  ;;  %v16583_v13 = vld [vmem:[#allocation19_spill] sm:$0xff] }
 0xcf2   :  { %9886 = vmatprep.subr.bf16.mxu0 %v16574_v50  ;;  %v16584_v50 = vld [vmem:[#allocation20_spill] sm:$0xff] }
 0xcf5   :  { %9888 = vmatpush1.bf16.msra.mxu0 %v16575_v1  ;;  %v16585_v1 = vld [vmem:[#allocation21_spill] sm:$0xff] }
 0xcf6   :  { %9946 = vmatprep.subr.bf16.mxu0 %v16576_v37  ;;  %v16586_v37 = vld [vmem:[#allocation22_spill] sm:$0xff] }
 0xcf8   :  { %3210 = vmatmul.mubr.f32.vlgmr.msra.gmra.mrb[26].mxu0 %v14014_v48 }
 0xcf9   :  { %9948 = vmatpush1.bf16.msra.mxu0 %v16577_v40  ;;  %v16588_v40 = vld [vmem:[#allocation25_spill] sm:$0xff] }
 0xcfa   :  { %9950 = vmatprep.subr.bf16.mxu0 %v16578_v59  ;;  %v16589_v59 = vld [vmem:[#allocation28_spill] sm:$0xff] }
 0xcfd   :  { %9952 = vmatpush1.bf16.msra.mxu0 %v16579_v15  ;;  %v16590_v15 = vld [vmem:[#allocation29_spill] sm:$0xff] }
 0xcfe   :  { %9954 = vmatprep.subr.bf16.mxu0 %v16580_v21  ;;  %v16591_v21 = vld [vmem:[#allocation32_spill] sm:$0xff] }
 0xd01   :  { %9956 = vmatpush1.bf16.msra.mxu0 %v16581_v18  ;;  %v16592_v18 = vld [vmem:[#allocation33_spill] sm:$0xff] }
 0xd02   :  { %9958 = vmatprep.subr.bf16.mxu0 %v16582_v22  ;;  %v16593_v22 = vld [vmem:[#allocation36_spill] sm:$0xff] }
 0xd05   :  { %9960 = vmatpush1.bf16.msra.mxu0 %v16583_v13  ;;  %v16594_v13 = vld [vmem:[#allocation37_spill] sm:$0xff] }
 0xd06   :  { %9962 = vmatprep.subr.bf16.mxu0 %v16584_v50  ;;  %v16595_v50 = vld [vmem:[#allocation40_spill] sm:$0xff] }
 0xd09   :  { %9964 = vmatpush1.bf16.msra.mxu0 %v16585_v1  ;;  %v16596_v1 = vld [vmem:[#allocation41_spill] sm:$0xff] }
 0xd0a   :  { %9966 = vmatprep.subr.bf16.mxu0 %v16586_v37  ;;  %v16597_v37 = vld [vmem:[#allocation44_spill] sm:$0xff] }
 0xd0d   :  { %9968 = vmatpush1.bf16.msra.mxu0 %v16587_v43  ;;  %v16598_v43 = vld [vmem:[#allocation45_spill] sm:$0xff] }
 0xd0e   :  { %9970 = vmatprep.subr.bf16.mxu0 %v16588_v40  ;;  %v16599_v40 = vld [vmem:[#allocation48_spill] sm:$0xff] }
 0xd11   :  { %9972 = vmatpush1.bf16.msra.mxu0 %v16589_v59  ;;  %v16600_v59 = vld [vmem:[#allocation49_spill] sm:$0xff] }
 0xd12   :  { %9974 = vmatprep.subr.bf16.mxu0 %v16590_v15  ;;  %v16601_v15 = vld [vmem:[#allocation52_spill] sm:$0xff] }
 0xd15   :  { %9976 = vmatpush1.bf16.msra.mxu0 %v16591_v21  ;;  %v16602_v21 = vld [vmem:[#allocation53_spill] sm:$0xff] }
 0xd16   :  { %9978 = vmatprep.subr.bf16.mxu0 %v16592_v18  ;;  %v16603_v18 = vld [vmem:[#allocation56_spill] sm:$0xff] }
 0xd19   :  { %9980 = vmatpush1.bf16.msra.mxu0 %v16593_v22  ;;  %v16604_v22 = vld [vmem:[#allocation57_spill] sm:$0xff] }
 0xd1a   :  { %9982 = vmatprep.subr.bf16.mxu0 %v16594_v13  ;;  %v16605_v13 = vld [vmem:[#allocation60_spill] sm:$0xff] }
 0xd1d   :  { %9984 = vmatpush1.bf16.msra.mxu0 %v16595_v50  ;;  %v16606_v50 = vld [vmem:[#allocation61_spill] sm:$0xff] }
 0xd1e   :  { %9986 = vmatprep.subr.bf16.mxu0 %v16596_v1  ;;  %v16607_v1 = vld [vmem:[#allocation64_spill] sm:$0xff] }
 0xd21   :  { %9988 = vmatpush1.bf16.msra.mxu0 %v16597_v37  ;;  %v16608_v37 = vld [vmem:[#allocation66_spill] sm:$0xff] }
 0xd22   :  { %9990 = vmatprep.subr.bf16.mxu0 %v16598_v43  ;;  %v381_v43 = vpop.permute.xlu0 %380 }
 0xd25   :  { %9992 = vmatpush1.bf16.msra.mxu0 %v16599_v40  ;;  %v16609_v40 = vld [vmem:[#allocation118_spill] sm:$0xff] }
 0xd26   :  { %9994 = vmatprep.subr.bf16.mxu0 %v16600_v59  ;;  %v462_v51 = vmul.f32 %v16609_v40, %v381_v43  ;;  %v16610_v59 = vld [vmem:[#allocation119_spill] sm:$0xff] }
 0xd27   :  { %v463_v9 = vmul.f32 %v16610_v59, %v381_v43 }
 0xd29   :  { %9996 = vmatpush1.bf16.msra.mxu0 %v16601_v15 }
 0xd2a   :  { %9998 = vmatprep.subr.bf16.mxu0 %v16602_v21  ;;  %v16611_v21 = vld [vmem:[#allocation120_spill] sm:$0xff] }
 0xd2b   :  { %v526_v42 = vadd.f32 %v16611_v21, %v462_v51  ;;  %v464_v51 = vmul.f32 %v16136_v10, %v381_v43  ;;  %v16619_v43 = vld [vmem:[#allocation55_spill] sm:$0xff] }
 0xd2d   :  { %10000 = vmatpush1.bf16.msra.mxu0 %v16603_v18  ;;  %v16612_v18 = vld [vmem:[#allocation121_spill] sm:$0xff] }
 0xd2e   :  { %10002 = vmatprep.subr.bf16.mxu0 %v16604_v22 }
 0xd31   :  { %10004 = vmatpush1.bf16.msra.mxu0 %v16605_v13 }
 0xd32   :  { %10006 = vmatprep.subr.bf16.mxu0 %v16606_v50 }
 0xd35   :  { %10008 = vmatpush1.bf16.msra.mxu0 %v16607_v1  ;;  %v527_v1 = vadd.f32 %v16327_v60, %v463_v9 }
 0xd36   :  { %10074 = vmatprep.subr.bf16.mxu0 %v16608_v37 }
 0xd8b   :  { %v3069_v15 = vpop.f32.mrb[24].mxu0  ;;  %v3140_v28 = vpop.f32.mrb[36].mxu1 }
 0xd8c   :  { %v3070_v56 = vadd.f32 %v3069_v15, %v16612_v18  ;;  %v3071_v22 = vpop.f32.mrb[25].mxu0  ;;  %v14169_v47 = vpop.f32.mrb[37].mxu1  ;;  %v3141_v18 = vadd.f32 %v3140_v28, %v13128_v57  ;;  %v16613_v28 = vld [vmem:[#allocation43_spill] sm:$0xff] }
 0xd8d   :  { %v3072_v50 = vadd.f32 %v3071_v22, %v16134_v32  ;;  %v528_v22 = vadd.f32 %v13132_v30, %v464_v51  ;;  %v16620_v51 = vld [vmem:[#allocation58_spill] sm:$0xff] }
 0xd8e   :  { %v3220_v13 = vadd.f32 %v3070_v56, %v526_v42 }
 0xd8f   :  { %v3227_v11 = vadd.f32 %v3072_v50, %v527_v1  ;;  %v16616_v50 = vld [vmem:[#allocation50_spill] sm:$0xff]  ;;  %v16617_v1 = vld [vmem:[#allocation51_spill] sm:$0xff] }
 0xd90   :  { %v7231_v37 = vmul.f32 -1.442695, %v3220_v13 }
 0xd91   :  { %v7232_v40 = vmul.f32 -1.442695, %v3227_v11 }
 0xd92   :  { %12356 = vpow2.f32 %v7231_v37  ;;  %v16618_v37 = vld [vmem:[#allocation54_spill] sm:$0xff] }
 0xd93   :  { %12358 = vpow2.f32 %v7232_v40 }
 0xd9c   :  { %v12357_v59 = vpop.eup %12356 }
 0xd9d   :  { %v3224_v14 = vadd.f32 1.0, %v12357_v59  ;;  %v12359_v20 = vpop.eup %12358 }
 0xd9e   :  { %v3231_v15 = vadd.f32 1.0, %v12359_v20 }
 0xd9f   :  { %12360 = vrcp.f32 %v3224_v14 }
 0xda0   :  { %12362 = vrcp.f32 %v3231_v15  ;;  %v16621_v15 = vld [vmem:[#allocation59_spill] sm:$0xff] }
 0xda9   :  { %v12361_v21 = vpop.eup %12360 }
 0xdaa   :  { %v3234_v56 = vmul.f32 %v12361_v21, %v3141_v18  ;;  %v12363_v9 = vpop.eup %12362  ;;  %v16614_v21 = vld [vmem:[#allocation46_spill] sm:$0xff]  ;;  %v16615_v18 = vld [vmem:[#allocation47_spill] sm:$0xff] }
 0xdab   :  { %v3237_v13 = vsub.f32 1.0, %v12363_v9  ;;  %v3239_v40 = vmul.f32 %v12363_v9, %v14014_v48  ;;  %v16625_v9 = vld [vmem:[#allocation67_spill] sm:$0xff] }
 0xdac   :  { %v3235_v42 = vadd.f32 %v3234_v56, %v528_v22  ;;  %v16622_v22 = vld [vmem:[#allocation62_spill] sm:$0xff]  ;;  %v16623_v56 = vld [vmem:[#allocation63_spill] sm:$0xff] }
 0xdae   :  { %12364 = vtanh.f32 %v3235_v42  ;;  %v16624_v42 = vld [vmem:[#allocation65_spill] sm:$0xff] }
 0xdb8   :  { %v12365_v11 = vpop.eup %12364 }
 0xdb9   :  { %v3238_v59 = vmul.f32 %v12365_v11, %v3237_v13  ;;  %v16626_v13 = vld [vmem:[#allocation69_spill] sm:$0xff]  ;;  %v16627_v11 = vld [vmem:[#allocation71_spill] sm:$0xff] }
 0xdbb   :  { %v14177_v14 = vadd.f32 %v3239_v40, %v3238_v59  ;;  %v16628_v40 = vld [vmem:[#allocation73_spill] sm:$0xff]  ;;  %v16629_v59 = vld [vmem:[#allocation86_spill] sm:$0xff] }
 0xdbd   :  { %3306 = vmatmul.mubr.f32.vlgmr.msra.gmra.mrb[38].mxu1 %v14177_v14 }
 0xdbe   :  { %9923 = vmatpush3.bf16.msra.mxu1 %v13136_v6  ;;  %7821 = vmatprep.mubr.msk.f32.mxu1 %vm12635_vm0, %v15996_v53 }
 0xdbf   :  { %9924 = vmatprep.subr.bf16.mxu1 %v16051_v54 }
 0xdc2   :  { %9926 = vmatpush3.bf16.msra.mxu1 %v13142_v4 }
 0xdc3   :  { %9927 = vmatprep.subr.bf16.mxu1 %v16051_v54 }
 0xdc6   :  { %9929 = vmatpush3.bf16.msra.mxu1 %v13148_v0 }
 0xdc7   :  { %9930 = vmatprep.subr.bf16.mxu1 %v16051_v54 }
 0xdca   :  { %9932 = vmatpush3.bf16.msra.mxu1 %v13152_v35 }
 0xdcb   :  { %v3211_v20 = vpop.f32.mrb[26].mxu0  ;;  %9933 = vmatprep.subr.bf16.mxu1 %v16051_v54 }
 0xdcc   :  { %v3213_v48 = vpop.f32.mrb[27].mxu0 }
 0xdce   :  { %9935 = vmatpush3.bf16.msra.mxu1 %v13156_v7 }
 0xdcf   :  { %9936 = vmatprep.subr.bf16.mxu1 %v16051_v54 }
 0xdd2   :  { %9938 = vmatpush3.bf16.msra.mxu1 %v13160_v33 }
 0xdd3   :  { %9939 = vmatprep.subr.bf16.mxu1 %v16051_v54 }
 0xdd6   :  { %9941 = vmatpush3.bf16.msra.mxu1 %v13164_v31 }
 0xdd7   :  { %9942 = vmatprep.subr.bf16.mxu1 %v16051_v54 }
 0xdda   :  { %9944 = vmatpush3.bf16.msra.mxu1 %v13168_v38 }
 0xddb   :  { %10010 = vmatprep.subr.bf16.mxu1 %v12702_v29 }
 0xddd   :  { %7822 = vmatmul.mubr.f32.vlgmr.msra.gmra.mrb[40].mxu1 %v14177_v14 }
 0xdde   :  { %10012 = vmatpush1.bf16.msra.mxu1 %v12708_v34 }
 0xddf   :  { %10014 = vmatprep.subr.bf16.mxu1 %v12713_v39 }
 0xde2   :  { %10016 = vmatpush1.bf16.msra.mxu1 %v12716_v44 }
 0xde3   :  { %10018 = vmatprep.subr.bf16.mxu1 %v12722_v49 }
 0xde6   :  { %10020 = vmatpush1.bf16.msra.mxu1 %v12728_v58 }
 0xde7   :  { %10022 = vmatprep.subr.bf16.mxu1 %v16137_v62 }
 0xdea   :  { %10024 = vmatpush1.bf16.msra.mxu1 %v16138_v24 }
 0xdeb   :  { %10026 = vmatprep.subr.bf16.mxu1 %v16139_v55 }
 0xdee   :  { %10028 = vmatpush1.bf16.msra.mxu1 %v16140_v63 }
 0xdef   :  { %10030 = vmatprep.subr.bf16.mxu1 %v16232_v17 }
 0xdf2   :  { %10032 = vmatpush1.bf16.msra.mxu1 %v16233_v45 }
 0xdf3   :  { %10034 = vmatprep.subr.bf16.mxu1 %v16234_v52 }
 0xdf6   :  { %10036 = vmatpush1.bf16.msra.mxu1 %v16328_v8 }
 0xdf7   :  { %10038 = vmatprep.subr.bf16.mxu1 %v16423_v2 }
 0xdfa   :  { %10040 = vmatpush1.bf16.msra.mxu1 %v16518_v5 }
 0xdfb   :  { %10042 = vmatprep.subr.bf16.mxu1 %v16613_v28 }
 0xdfe   :  { %10044 = vmatpush1.bf16.msra.mxu1 %v16614_v21  ;;  %v3214_v21 = vadd.f32 %v3213_v48, %v13227_v12  ;;  %v16633_v48 = vld [vmem:[#allocation75_spill] sm:$0xff] }
 0xdff   :  { %10046 = vmatprep.subr.bf16.mxu1 %v16615_v18 }
 0xe02   :  { %10048 = vmatpush1.bf16.msra.mxu1 %v16616_v50 }
 0xe03   :  { %10050 = vmatprep.subr.bf16.mxu1 %v16617_v1 }
 0xe06   :  { %10052 = vmatpush1.bf16.msra.mxu1 %v16618_v37  ;;  %v16631_v37 = vld [vmem:[#allocation127_spill] sm:$0xff] }
 0xe07   :  { %10054 = vmatprep.subr.bf16.mxu1 %v16619_v43 }
 0xe0a   :  { %10056 = vmatpush1.bf16.msra.mxu1 %v16620_v51  ;;  %v16630_v51 = vld [vmem:[#allocation126_spill] sm:$0xff] }
 0xe0b   :  { %10058 = vmatprep.subr.bf16.mxu1 %v16621_v15  ;;  %v3143_v15 = vadd.f32 %v14169_v47, %v16630_v51 }
 0xe0e   :  { %10060 = vmatpush1.bf16.msra.mxu1 %v16622_v22 }
 0xe0f   :  { %10062 = vmatprep.subr.bf16.mxu1 %v16623_v56  ;;  %v3212_v56 = vadd.f32 %v3211_v20, %v16164_v16 }
 0xe12   :  { %10064 = vmatpush1.bf16.msra.mxu1 %v16624_v42 }
 0xe13   :  { %10066 = vmatprep.subr.bf16.mxu1 %v16625_v9 }
 0xe16   :  { %10068 = vmatpush1.bf16.msra.mxu1 %v16626_v13 }
 0xe17   :  { %10070 = vmatprep.subr.bf16.mxu1 %v16627_v11 }
 0xe1a   :  { %10072 = vmatpush1.bf16.msra.mxu1 %v16628_v40 }
 0xe1b   :  { %10138 = vmatprep.subr.bf16.mxu1 %v16629_v59 }
 0xe90   :  { %v3307_v43 = vpop.f32.mrb[38].mxu1 }
 0xe91   :  { %v3308_v22 = vadd.f32 %v3307_v43, %v16631_v37  ;;  %v3309_v1 = vpop.f32.mrb[39].mxu1 }
 0xe92   :  { %v3310_v42 = vadd.f32 %v3309_v1, %v13218_v61 }
 0xe93   :  { %v3382_v9 = vadd.f32 %v3308_v22, %v3143_v15 }
 0xe94   :  { %v3389_v50 = vadd.f32 %v3310_v42, %v3212_v56 }
 0xe95   :  { %v7233_v13 = vmul.f32 -1.442695, %v3382_v9 }
 0xe96   :  { %v7234_v11 = vmul.f32 -1.442695, %v3389_v50 }
 0xe97   :  { %12366 = vpow2.f32 %v7233_v13  ;;  %v16637_v13 = vld [vmem:[#allocation77_spill] sm:$0xff] }
 0xe98   :  { %12368 = vpow2.f32 %v7234_v11  ;;  %v16638_v11 = vld [vmem:[#allocation78_spill] sm:$0xff] }
 0xea1   :  { %v12367_v40 = vpop.eup %12366 }
 0xea2   :  { %v3386_v18 = vadd.f32 1.0, %v12367_v40  ;;  %v12369_v59 = vpop.eup %12368  ;;  %v16639_v40 = vld [vmem:[#allocation99_spill] sm:$0xff] }
 0xea3   :  { %v3393_v47 = vadd.f32 1.0, %v12369_v59  ;;  %v16640_v59 = vld [vmem:[#allocation102_spill] sm:$0xff] }
 0xea4   :  { %12370 = vrcp.f32 %v3386_v18 }
 0xea5   :  { %12372 = vrcp.f32 %v3393_v47  ;;  %v16641_v47 = vld [vmem:[#allocation79_spill] sm:$0xff] }
 0xeae   :  { %v12371_v51 = vpop.eup %12370 }
 0xeaf   :  { %v3396_v43 = vmul.f32 %v12371_v51, %v3214_v21  ;;  %v12373_v22 = vpop.eup %12372  ;;  %v16634_v21 = vld [vmem:[#allocation76_spill] sm:$0xff]  ;;  %v16636_v51 = vld [vmem:[#allocation98_spill] sm:$0xff] }
 0xeb0   :  { %v3378_v37 = vpop.f32.mrb[40].mxu1  ;;  %v3399_v56 = vsub.f32 1.0, %v12373_v22  ;;  %v3401_v9 = vmul.f32 %v12373_v22, %v14076_v23  ;;  %v16632_v23 = vld [vmem:[#allocation94_spill] sm:$0xff] }
 0xeb1   :  { %v3379_v20 = vadd.f32 %v3378_v37, %v13231_v46  ;;  %v7823_v1 = vpop.f32.mrb[41].mxu1  ;;  %v16635_v37 = vld [vmem:[#allocation95_spill] sm:$0xff]  ;;  %v16646_v22 = vld [vmem:[#allocation82_spill] sm:$0xff] }
 0xeb2   :  { %v16644_v1 = vld [vmem:[#allocation106_spill] sm:$0xff] }
 0xeb3   :  { %v3397_v15 = vadd.f32 %v3396_v43, %v3379_v20  ;;  %v16642_v43 = vld [vmem:[#allocation80_spill] sm:$0xff]  ;;  %v16643_v20 = vld [vmem:[#allocation103_spill] sm:$0xff] }
 0xeb5   :  { %12374 = vtanh.f32 %v3397_v15  ;;  %v16645_v15 = vld [vmem:[#allocation81_spill] sm:$0xff] }
 0xebf   :  { %v12375_v50 = vpop.eup %12374 }
 0xec0   :  { %v3400_v42 = vmul.f32 %v12375_v50, %v3399_v56  ;;  %v16647_v56 = vld [vmem:[#allocation107_spill] sm:$0xff]  ;;  %v16648_v50 = vld [vmem:[#allocation110_spill] sm:$0xff] }
 0xec2   :  { %v14239_v18 = vadd.f32 %v3401_v9, %v3400_v42  ;;  %v16649_v42 = vld [vmem:[#allocation83_spill] sm:$0xff]  ;;  %v16650_v9 = vld [vmem:[#allocation84_spill] sm:$0xff] }
 0xec4   :  { %3467 = vmatprep.mubr.f32.mxu0 %v14239_v18  ;;  %3538 = vmatprep.mubr.f32.mxu1 %v14239_v18 }
 0xec5   :  { %3468 = vmatmul.mubr.f32.vlgmr.msra.gmra.mrb[28].mxu0 %v14177_v14  ;;  %3539 = vmatmul.mubr.f32.vlgmr.msra.gmra.mrb[42].mxu1 %v14177_v14 }
 0xec6   :  { %10076 = vmatpush1.bf16.msra.mxu0 %v16072_v26  ;;  %3609 = vmatprep.mubr.f32.mxu0 %v14239_v18 }
 0xec7   :  { %10078 = vmatprep.subr.bf16.mxu0 %v16073_v3  ;;  %10140 = vmatpush1.bf16.msra.mxu1 %v16074_v19 }
 0xec8   :  { %10142 = vmatprep.subr.bf16.mxu1 %v16075_v25  ;;  %3705 = vmatprep.mubr.f32.mxu1 %v15996_v53 }
 0xeca   :  { %10080 = vmatpush1.bf16.msra.mxu0 %v16076_v41 }
 0xecb   :  { %10082 = vmatprep.subr.bf16.mxu0 %v16077_v36  ;;  %10144 = vmatpush1.bf16.msra.mxu1 %v16078_v27 }
 0xecc   :  { %10146 = vmatprep.subr.bf16.mxu1 %v16632_v23 }
 0xece   :  { %10084 = vmatpush1.bf16.msra.mxu0 %v16633_v48 }
 0xecf   :  { %10086 = vmatprep.subr.bf16.mxu0 %v16634_v21  ;;  %10148 = vmatpush1.bf16.msra.mxu1 %v16635_v37 }
 0xed0   :  { %10150 = vmatprep.subr.bf16.mxu1 %v16636_v51 }
 0xed2   :  { %10088 = vmatpush1.bf16.msra.mxu0 %v16637_v13 }
 0xed3   :  { %10090 = vmatprep.subr.bf16.mxu0 %v16638_v11  ;;  %10152 = vmatpush1.bf16.msra.mxu1 %v16639_v40 }
 0xed4   :  { %10154 = vmatprep.subr.bf16.mxu1 %v16640_v59  ;;  %v16651_v59 = vld [vmem:[#allocation111_spill] sm:$0xff] }
 0xed6   :  { %10092 = vmatpush1.bf16.msra.mxu0 %v16641_v47  ;;  %v16652_v47 = vld [vmem:[#allocation114_spill] sm:$0xff] }
 0xed7   :  { %10094 = vmatprep.subr.bf16.mxu0 %v16642_v43  ;;  %10156 = vmatpush1.bf16.msra.mxu1 %v16643_v20  ;;  %v16653_v43 = vld [vmem:[#allocation85_spill] sm:$0xff]  ;;  %v16654_v20 = vld [vmem:[#allocation88_spill] sm:$0xff] }
 0xed8   :  { %10158 = vmatprep.subr.bf16.mxu1 %v16644_v1  ;;  %v16655_v1 = vld [vmem:[#allocation115_spill] sm:$0xff] }
 0xeda   :  { %10096 = vmatpush1.bf16.msra.mxu0 %v16645_v15  ;;  %v16666_v15 = vld [vmem:[#allocation109_spill] sm:$0xff] }
 0xedb   :  { %10098 = vmatprep.subr.bf16.mxu0 %v16646_v22  ;;  %10160 = vmatpush1.bf16.msra.mxu1 %v16647_v56  ;;  %v16656_v22 = vld [vmem:[#allocation89_spill] sm:$0xff]  ;;  %v16657_v56 = vld [vmem:[#allocation92_spill] sm:$0xff] }
 0xedc   :  { %10162 = vmatprep.subr.bf16.mxu1 %v16648_v50  ;;  %v16658_v50 = vld [vmem:[#allocation93_spill] sm:$0xff] }
 0xede   :  { %10100 = vmatpush1.bf16.msra.mxu0 %v16649_v42  ;;  %v16659_v42 = vld [vmem:[#allocation96_spill] sm:$0xff] }
 0xedf   :  { %10102 = vmatprep.subr.bf16.mxu0 %v16650_v9  ;;  %10164 = vmatpush1.bf16.msra.mxu1 %v16651_v59  ;;  %v16660_v9 = vld [vmem:[#allocation97_spill] sm:$0xff]  ;;  %v16661_v59 = vld [vmem:[#allocation100_spill] sm:$0xff] }
 0xee0   :  { %10166 = vmatprep.subr.bf16.mxu1 %v16652_v47  ;;  %v16662_v47 = vld [vmem:[#allocation101_spill] sm:$0xff] }
 0xee2   :  { %10104 = vmatpush1.bf16.msra.mxu0 %v16653_v43  ;;  %v16663_v43 = vld [vmem:[#allocation104_spill] sm:$0xff] }
 0xee3   :  { %10106 = vmatprep.subr.bf16.mxu0 %v16654_v20  ;;  %10168 = vmatpush1.bf16.msra.mxu1 %v16655_v1  ;;  %v16664_v20 = vld [vmem:[#allocation105_spill] sm:$0xff]  ;;  %v16665_v1 = vld [vmem:[#allocation108_spill] sm:$0xff] }
 0xee4   :  { %10169 = vmatprep.subr.bf16.mxu1 %v16051_v54 }
 0xee6   :  { %10108 = vmatpush1.bf16.msra.mxu0 %v16656_v22  ;;  %v16667_v22 = vld [vmem:[#allocation112_spill] sm:$0xff] }
 0xee7   :  { %10110 = vmatprep.subr.bf16.mxu0 %v16657_v56  ;;  %v16668_v56 = vld [vmem:[#allocation113_spill] sm:$0xff] }
 0xeea   :  { %10112 = vmatpush1.bf16.msra.mxu0 %v16658_v50  ;;  %v16669_v50 = vld [vmem:[#allocation116_spill] sm:$0xff] }
 0xeeb   :  { %10114 = vmatprep.subr.bf16.mxu0 %v16659_v42  ;;  %v16670_v42 = vld [vmem:[#allocation117_spill] sm:$0xff] }
 0xeee   :  { %10116 = vmatpush1.bf16.msra.mxu0 %v16660_v9  ;;  %v16671_v9 = vld [vmem:[#allocation12_spill] sm:$0xff] }
 0xeef   :  { %10118 = vmatprep.subr.bf16.mxu0 %v16661_v59  ;;  %v16682_v59 = vld [vmem:[#allocation24_spill] sm:$0xff] }
 0xef2   :  { %10120 = vmatpush1.bf16.msra.mxu0 %v16662_v47  ;;  %v16672_v47 = vld [vmem:[#allocation13_spill] sm:$0xff] }
 0xef3   :  { %10122 = vmatprep.subr.bf16.mxu0 %v16663_v43  ;;  %v16673_v43 = vld [vmem:[#allocation14_spill] sm:$0xff] }
 0xef6   :  { %10124 = vmatpush1.bf16.msra.mxu0 %v16664_v20  ;;  %v16674_v20 = vld [vmem:[#allocation15_spill] sm:$0xff] }
 0xef7   :  { %10126 = vmatprep.subr.bf16.mxu0 %v16665_v1  ;;  %v16675_v1 = vld [vmem:[#allocation16_spill] sm:$0xff] }
 0xefa   :  { %10128 = vmatpush1.bf16.msra.mxu0 %v16666_v15  ;;  %v16676_v15 = vld [vmem:[#allocation17_spill] sm:$0xff] }
 0xefb   :  { %10130 = vmatprep.subr.bf16.mxu0 %v16667_v22  ;;  %v16677_v22 = vld [vmem:[#allocation18_spill] sm:$0xff] }
 0xefe   :  { %10132 = vmatpush1.bf16.msra.mxu0 %v16668_v56  ;;  %v16678_v56 = vld [vmem:[#allocation19_spill] sm:$0xff] }
 0xeff   :  { %10134 = vmatprep.subr.bf16.mxu0 %v16669_v50  ;;  %v16679_v50 = vld [vmem:[#allocation20_spill] sm:$0xff] }
 0xf02   :  { %10136 = vmatpush1.bf16.msra.mxu0 %v16670_v42  ;;  %v16680_v42 = vld [vmem:[#allocation21_spill] sm:$0xff] }
 0xf03   :  { %10194 = vmatprep.subr.bf16.mxu0 %v16671_v9  ;;  %v16681_v9 = vld [vmem:[#allocation22_spill] sm:$0xff] }
 0xf05   :  { %3610 = vmatmul.mubr.f32.vlgmr.msra.gmra.mrb[30].mxu0 %v14177_v14 }
 0xf06   :  { %10196 = vmatpush1.bf16.msra.mxu0 %v16672_v47  ;;  %v16683_v47 = vld [vmem:[#allocation25_spill] sm:$0xff] }
 0xf07   :  { %10198 = vmatprep.subr.bf16.mxu0 %v16673_v43  ;;  %v16684_v43 = vld [vmem:[#allocation28_spill] sm:$0xff] }
 0xf0a   :  { %10200 = vmatpush1.bf16.msra.mxu0 %v16674_v20  ;;  %v16685_v20 = vld [vmem:[#allocation29_spill] sm:$0xff] }
 0xf0b   :  { %10202 = vmatprep.subr.bf16.mxu0 %v16675_v1  ;;  %v16686_v1 = vld [vmem:[#allocation32_spill] sm:$0xff] }
 0xf0e   :  { %10204 = vmatpush1.bf16.msra.mxu0 %v16676_v15  ;;  %v16687_v15 = vld [vmem:[#allocation33_spill] sm:$0xff] }
 0xf0f   :  { %10206 = vmatprep.subr.bf16.mxu0 %v16677_v22  ;;  %v16688_v22 = vld [vmem:[#allocation36_spill] sm:$0xff] }
 0xf12   :  { %10208 = vmatpush1.bf16.msra.mxu0 %v16678_v56  ;;  %v16689_v56 = vld [vmem:[#allocation37_spill] sm:$0xff] }
 0xf13   :  { %10210 = vmatprep.subr.bf16.mxu0 %v16679_v50  ;;  %v16690_v50 = vld [vmem:[#allocation40_spill] sm:$0xff] }
 0xf16   :  { %10212 = vmatpush1.bf16.msra.mxu0 %v16680_v42  ;;  %v16691_v42 = vld [vmem:[#allocation41_spill] sm:$0xff] }
 0xf17   :  { %10214 = vmatprep.subr.bf16.mxu0 %v16681_v9  ;;  %v16692_v9 = vld [vmem:[#allocation44_spill] sm:$0xff] }
 0xf1a   :  { %10216 = vmatpush1.bf16.msra.mxu0 %v16682_v59  ;;  %v16693_v59 = vld [vmem:[#allocation45_spill] sm:$0xff] }
 0xf1b   :  { %10218 = vmatprep.subr.bf16.mxu0 %v16683_v47  ;;  %v16694_v47 = vld [vmem:[#allocation48_spill] sm:$0xff] }
 0xf1e   :  { %10220 = vmatpush1.bf16.msra.mxu0 %v16684_v43  ;;  %v16695_v43 = vld [vmem:[#allocation49_spill] sm:$0xff] }
 0xf1f   :  { %10222 = vmatprep.subr.bf16.mxu0 %v16685_v20  ;;  %v16696_v20 = vld [vmem:[#allocation52_spill] sm:$0xff] }
 0xf22   :  { %10224 = vmatpush1.bf16.msra.mxu0 %v16686_v1  ;;  %v16697_v1 = vld [vmem:[#allocation53_spill] sm:$0xff] }
 0xf23   :  { %10226 = vmatprep.subr.bf16.mxu0 %v16687_v15  ;;  %v16698_v15 = vld [vmem:[#allocation56_spill] sm:$0xff] }
 0xf26   :  { %10228 = vmatpush1.bf16.msra.mxu0 %v16688_v22  ;;  %v16699_v22 = vld [vmem:[#allocation57_spill] sm:$0xff] }
 0xf27   :  { %10230 = vmatprep.subr.bf16.mxu0 %v16689_v56  ;;  %v16700_v56 = vld [vmem:[#allocation60_spill] sm:$0xff] }
 0xf2a   :  { %10232 = vmatpush1.bf16.msra.mxu0 %v16690_v50  ;;  %v16701_v50 = vld [vmem:[#allocation61_spill] sm:$0xff] }
 0xf2b   :  { %10234 = vmatprep.subr.bf16.mxu0 %v16691_v42  ;;  %v16702_v42 = vld [vmem:[#allocation64_spill] sm:$0xff] }
 0xf2e   :  { %10236 = vmatpush1.bf16.msra.mxu0 %v16692_v9  ;;  %v16703_v9 = vld [vmem:[#allocation66_spill] sm:$0xff] }
 0xf2f   :  { %10238 = vmatprep.subr.bf16.mxu0 %v16693_v59  ;;  %v386_v59 = vpop.permute.xlu1 %385 }
 0xf32   :  { %10240 = vmatpush1.bf16.msra.mxu0 %v16694_v47  ;;  %v16704_v47 = vld [vmem:[#allocation118_spill] sm:$0xff] }
 0xf33   :  { %10242 = vmatprep.subr.bf16.mxu0 %v16695_v43  ;;  %v465_v40 = vmul.f32 %v16704_v47, %v386_v59  ;;  %v16705_v43 = vld [vmem:[#allocation119_spill] sm:$0xff] }
 0xf34   :  { %v466_v11 = vmul.f32 %v16705_v43, %v386_v59 }
 0xf36   :  { %10244 = vmatpush1.bf16.msra.mxu0 %v16696_v20 }
 0xf37   :  { %10246 = vmatprep.subr.bf16.mxu0 %v16697_v1  ;;  %v16706_v1 = vld [vmem:[#allocation120_spill] sm:$0xff] }
 0xf38   :  { %v529_v51 = vadd.f32 %v16706_v1, %v465_v40  ;;  %v467_v40 = vmul.f32 %v16136_v10, %v386_v59  ;;  %v16709_v59 = vld [vmem:[#allocation47_spill] sm:$0xff] }
 0xf3a   :  { %10248 = vmatpush1.bf16.msra.mxu0 %v16698_v15  ;;  %v16707_v15 = vld [vmem:[#allocation121_spill] sm:$0xff] }
 0xf3b   :  { %10250 = vmatprep.subr.bf16.mxu0 %v16699_v22 }
 0xf3e   :  { %10252 = vmatpush1.bf16.msra.mxu0 %v16700_v56 }
 0xf3f   :  { %10254 = vmatprep.subr.bf16.mxu0 %v16701_v50 }
 0xf42   :  { %10256 = vmatpush1.bf16.msra.mxu0 %v16702_v42  ;;  %v530_v42 = vadd.f32 %v16327_v60, %v466_v11 }
 0xf43   :  { %10322 = vmatprep.subr.bf16.mxu0 %v16703_v9 }
 0xf98   :  { %v3469_v20 = vpop.f32.mrb[28].mxu0  ;;  %v3540_v13 = vpop.f32.mrb[42].mxu1 }
 0xf99   :  { %v3470_v37 = vadd.f32 %v3469_v20, %v16707_v15  ;;  %v3471_v22 = vpop.f32.mrb[29].mxu0  ;;  %v14332_v21 = vpop.f32.mrb[43].mxu1  ;;  %v3541_v15 = vadd.f32 %v3540_v13, %v13128_v57  ;;  %v16708_v13 = vld [vmem:[#allocation46_spill] sm:$0xff] }
 0xf9a   :  { %v3472_v50 = vadd.f32 %v3471_v22, %v16134_v32  ;;  %v531_v22 = vadd.f32 %v13132_v30, %v467_v40  ;;  %v16715_v40 = vld [vmem:[#allocation59_spill] sm:$0xff] }
 0xf9b   :  { %v3620_v56 = vadd.f32 %v3470_v37, %v529_v51 }
 0xf9c   :  { %v3627_v48 = vadd.f32 %v3472_v50, %v530_v42  ;;  %v16712_v50 = vld [vmem:[#allocation54_spill] sm:$0xff]  ;;  %v16713_v42 = vld [vmem:[#allocation55_spill] sm:$0xff] }
 0xf9d   :  { %v7235_v9 = vmul.f32 -1.442695, %v3620_v56 }
 0xf9e   :  { %v7236_v47 = vmul.f32 -1.442695, %v3627_v48 }
 0xf9f   :  { %12376 = vpow2.f32 %v7235_v9  ;;  %v16714_v9 = vld [vmem:[#allocation58_spill] sm:$0xff] }
 0xfa0   :  { %12378 = vpow2.f32 %v7236_v47 }
 0xfa9   :  { %v12377_v43 = vpop.eup %12376 }
 0xfaa   :  { %v3624_v23 = vadd.f32 1.0, %v12377_v43  ;;  %v12379_v27 = vpop.eup %12378 }
 0xfab   :  { %v3631_v20 = vadd.f32 1.0, %v12379_v27 }
 0xfac   :  { %12380 = vrcp.f32 %v3624_v23 }
 0xfad   :  { %12382 = vrcp.f32 %v3631_v20  ;;  %v16716_v20 = vld [vmem:[#allocation62_spill] sm:$0xff] }
 0xfb6   :  { %v12381_v1 = vpop.eup %12380 }
 0xfb7   :  { %v3634_v37 = vmul.f32 %v12381_v1, %v3541_v15  ;;  %v12383_v11 = vpop.eup %12382  ;;  %v16710_v1 = vld [vmem:[#allocation50_spill] sm:$0xff]  ;;  %v16711_v15 = vld [vmem:[#allocation51_spill] sm:$0xff] }
 0xfb8   :  { %v3637_v56 = vsub.f32 1.0, %v12383_v11  ;;  %v3639_v47 = vmul.f32 %v12383_v11, %v14177_v14  ;;  %v16720_v11 = vld [vmem:[#allocation69_spill] sm:$0xff] }
 0xfb9   :  { %v3635_v51 = vadd.f32 %v3634_v37, %v531_v22  ;;  %v16717_v22 = vld [vmem:[#allocation63_spill] sm:$0xff]  ;;  %v16718_v37 = vld [vmem:[#allocation65_spill] sm:$0xff] }
 0xfbb   :  { %12384 = vtanh.f32 %v3635_v51  ;;  %v16719_v51 = vld [vmem:[#allocation67_spill] sm:$0xff] }
 0xfc5   :  { %v12385_v48 = vpop.eup %12384 }
 0xfc6   :  { %v3638_v43 = vmul.f32 %v12385_v48, %v3637_v56  ;;  %v16721_v56 = vld [vmem:[#allocation71_spill] sm:$0xff]  ;;  %v16722_v48 = vld [vmem:[#allocation73_spill] sm:$0xff] }
 0xfc8   :  { %v14340_v23 = vadd.f32 %v3639_v47, %v3638_v43  ;;  %v16723_v47 = vld [vmem:[#allocation86_spill] sm:$0xff] }
 0xfca   :  { %3706 = vmatmul.mubr.f32.vlgmr.msra.gmra.mrb[44].mxu1 %v14340_v23 }
 0xfcb   :  { %10171 = vmatpush3.bf16.msra.mxu1 %v13136_v6  ;;  %7856 = vmatprep.mubr.msk.f32.mxu1 %vm12635_vm0, %v15996_v53 }
 0xfcc   :  { %10172 = vmatprep.subr.bf16.mxu1 %v16051_v54 }
 0xfcf   :  { %10174 = vmatpush3.bf16.msra.mxu1 %v13142_v4 }
 0xfd0   :  { %10175 = vmatprep.subr.bf16.mxu1 %v16051_v54 }
 0xfd3   :  { %10177 = vmatpush3.bf16.msra.mxu1 %v13148_v0 }
 0xfd4   :  { %10178 = vmatprep.subr.bf16.mxu1 %v16051_v54 }
 0xfd7   :  { %10180 = vmatpush3.bf16.msra.mxu1 %v13152_v35 }
 0xfd8   :  { %v3611_v27 = vpop.f32.mrb[30].mxu0  ;;  %10181 = vmatprep.subr.bf16.mxu1 %v16051_v54 }
 0xfd9   :  { %v3613_v14 = vpop.f32.mrb[31].mxu0 }
 0xfdb   :  { %10183 = vmatpush3.bf16.msra.mxu1 %v13156_v7 }
 0xfdc   :  { %10184 = vmatprep.subr.bf16.mxu1 %v16051_v54 }
 0xfdf   :  { %10186 = vmatpush3.bf16.msra.mxu1 %v13160_v33 }
 0xfe0   :  { %10187 = vmatprep.subr.bf16.mxu1 %v16051_v54 }
 0xfe3   :  { %10189 = vmatpush3.bf16.msra.mxu1 %v13164_v31 }
 0xfe4   :  { %10190 = vmatprep.subr.bf16.mxu1 %v16051_v54 }
 0xfe7   :  { %10192 = vmatpush3.bf16.msra.mxu1 %v13168_v38 }
 0xfe8   :  { %10258 = vmatprep.subr.bf16.mxu1 %v12702_v29 }
 0xfea   :  { %7857 = vmatmul.mubr.f32.vlgmr.msra.gmra.mrb[46].mxu1 %v14340_v23 }
 0xfeb   :  { %10260 = vmatpush1.bf16.msra.mxu1 %v12708_v34 }
 0xfec   :  { %10262 = vmatprep.subr.bf16.mxu1 %v12713_v39 }
 0xfef   :  { %10264 = vmatpush1.bf16.msra.mxu1 %v12716_v44 }
 0xff0   :  { %10266 = vmatprep.subr.bf16.mxu1 %v12722_v49 }
 0xff3   :  { %10268 = vmatpush1.bf16.msra.mxu1 %v12728_v58 }
 0xff4   :  { %10270 = vmatprep.subr.bf16.mxu1 %v16137_v62 }
 0xff7   :  { %10272 = vmatpush1.bf16.msra.mxu1 %v16138_v24 }
 0xff8   :  { %10274 = vmatprep.subr.bf16.mxu1 %v16139_v55 }
 0xffb   :  { %10276 = vmatpush1.bf16.msra.mxu1 %v16140_v63 }
 0xffc   :  { %10278 = vmatprep.subr.bf16.mxu1 %v16232_v17 }
 0xfff   :  { %10280 = vmatpush1.bf16.msra.mxu1 %v16233_v45 }
0x1000   :  { %10282 = vmatprep.subr.bf16.mxu1 %v16234_v52 }
0x1003   :  { %10284 = vmatpush1.bf16.msra.mxu1 %v16328_v8 }
0x1004   :  { %10286 = vmatprep.subr.bf16.mxu1 %v16423_v2 }
0x1007   :  { %10288 = vmatpush1.bf16.msra.mxu1 %v16518_v5 }
0x1008   :  { %10290 = vmatprep.subr.bf16.mxu1 %v16613_v28 }
0x100b   :  { %10292 = vmatpush1.bf16.msra.mxu1 %v16708_v13 }
0x100c   :  { %10294 = vmatprep.subr.bf16.mxu1 %v16709_v59  ;;  %v3614_v59 = vadd.f32 %v3613_v14, %v13227_v12  ;;  %v16727_v14 = vld [vmem:[#allocation94_spill] sm:$0xff] }
0x100f   :  { %10296 = vmatpush1.bf16.msra.mxu1 %v16710_v1 }
0x1010   :  { %10298 = vmatprep.subr.bf16.mxu1 %v16711_v15 }
0x1013   :  { %10300 = vmatpush1.bf16.msra.mxu1 %v16712_v50 }
0x1014   :  { %10302 = vmatprep.subr.bf16.mxu1 %v16713_v42  ;;  %v16725_v42 = vld [vmem:[#allocation127_spill] sm:$0xff] }
0x1017   :  { %10304 = vmatpush1.bf16.msra.mxu1 %v16714_v9  ;;  %v16724_v9 = vld [vmem:[#allocation126_spill] sm:$0xff] }
0x1018   :  { %10306 = vmatprep.subr.bf16.mxu1 %v16715_v40  ;;  %v3543_v40 = vadd.f32 %v14332_v21, %v16724_v9 }
0x101b   :  { %10308 = vmatpush1.bf16.msra.mxu1 %v16716_v20 }
0x101c   :  { %10310 = vmatprep.subr.bf16.mxu1 %v16717_v22  ;;  %v3612_v22 = vadd.f32 %v3611_v27, %v16164_v16 }
0x101f   :  { %10312 = vmatpush1.bf16.msra.mxu1 %v16718_v37 }
0x1020   :  { %10314 = vmatprep.subr.bf16.mxu1 %v16719_v51 }
0x1023   :  { %10316 = vmatpush1.bf16.msra.mxu1 %v16720_v11 }
0x1024   :  { %10318 = vmatprep.subr.bf16.mxu1 %v16721_v56 }
0x1027   :  { %10320 = vmatpush1.bf16.msra.mxu1 %v16722_v48 }
0x1028   :  { %10386 = vmatprep.subr.bf16.mxu1 %v16723_v47 }
0x109d   :  { %v3707_v43 = vpop.f32.mrb[44].mxu1 }
0x109e   :  { %v3708_v20 = vadd.f32 %v3707_v43, %v16725_v42  ;;  %v3709_v50 = vpop.f32.mrb[45].mxu1 }
0x109f   :  { %v3710_v37 = vadd.f32 %v3709_v50, %v13218_v61 }
0x10a0   :  { %v3782_v51 = vadd.f32 %v3708_v20, %v3543_v40 }
0x10a1   :  { %v3789_v15 = vadd.f32 %v3710_v37, %v3612_v22 }
0x10a2   :  { %v7237_v11 = vmul.f32 -1.442695, %v3782_v51 }
0x10a3   :  { %v7238_v56 = vmul.f32 -1.442695, %v3789_v15 }
0x10a4   :  { %12386 = vpow2.f32 %v7237_v11  ;;  %v16731_v11 = vld [vmem:[#allocation98_spill] sm:$0xff] }
0x10a5   :  { %12388 = vpow2.f32 %v7238_v56  ;;  %v16732_v56 = vld [vmem:[#allocation77_spill] sm:$0xff] }
0x10ae   :  { %v12387_v48 = vpop.eup %12386 }
0x10af   :  { %v3786_v1 = vadd.f32 1.0, %v12387_v48  ;;  %v12389_v47 = vpop.eup %12388  ;;  %v16733_v48 = vld [vmem:[#allocation78_spill] sm:$0xff] }
0x10b0   :  { %v3793_v21 = vadd.f32 1.0, %v12389_v47  ;;  %v16734_v47 = vld [vmem:[#allocation99_spill] sm:$0xff] }
0x10b1   :  { %12390 = vrcp.f32 %v3786_v1 }
0x10b2   :  { %12392 = vrcp.f32 %v3793_v21  ;;  %v16735_v21 = vld [vmem:[#allocation102_spill] sm:$0xff] }
0x10bb   :  { %v12391_v9 = vpop.eup %12390 }
0x10bc   :  { %v3796_v43 = vmul.f32 %v12391_v9, %v3614_v59  ;;  %v12393_v20 = vpop.eup %12392  ;;  %v16728_v59 = vld [vmem:[#allocation75_spill] sm:$0xff] }
0x10bd   :  { %v3778_v42 = vpop.f32.mrb[46].mxu1  ;;  %v3799_v22 = vsub.f32 1.0, %v12393_v20  ;;  %v3801_v51 = vmul.f32 %v12393_v20, %v14239_v18  ;;  %v16726_v18 = vld [vmem:[#allocation91_spill] sm:$0xff]  ;;  %v16740_v20 = vld [vmem:[#allocation81_spill] sm:$0xff] }
0x10be   :  { %v3779_v27 = vadd.f32 %v3778_v42, %v13231_v46  ;;  %v7858_v50 = vpop.f32.mrb[47].mxu1  ;;  %v16729_v42 = vld [vmem:[#allocation76_spill] sm:$0xff]  ;;  %v16730_v9 = vld [vmem:[#allocation95_spill] sm:$0xff] }
0x10bf   :  { %v16738_v50 = vld [vmem:[#allocation103_spill] sm:$0xff] }
0x10c0   :  { %v3797_v40 = vadd.f32 %v3796_v43, %v3779_v27  ;;  %v16736_v43 = vld [vmem:[#allocation79_spill] sm:$0xff]  ;;  %v16737_v27 = vld [vmem:[#allocation80_spill] sm:$0xff] }
0x10c2   :  { %12394 = vtanh.f32 %v3797_v40  ;;  %v16739_v40 = vld [vmem:[#allocation106_spill] sm:$0xff] }
0x10cc   :  { %v12395_v15 = vpop.eup %12394 }
0x10cd   :  { %v3800_v37 = vmul.f32 %v12395_v15, %v3799_v22  ;;  %v16741_v22 = vld [vmem:[#allocation82_spill] sm:$0xff]  ;;  %v16742_v15 = vld [vmem:[#allocation107_spill] sm:$0xff] }
0x10cf   :  { %v14402_v1 = vadd.f32 %v3801_v51, %v3800_v37  ;;  %v16743_v37 = vld [vmem:[#allocation110_spill] sm:$0xff]  ;;  %v16744_v51 = vld [vmem:[#allocation83_spill] sm:$0xff] }
0x10d1   :  { %3867 = vmatprep.mubr.f32.mxu0 %v14402_v1  ;;  %3938 = vmatprep.mubr.f32.mxu1 %v14402_v1 }
0x10d2   :  { %3868 = vmatmul.mubr.f32.vlgmr.msra.gmra.mrb[32].mxu0 %v14340_v23  ;;  %3939 = vmatmul.mubr.f32.vlgmr.msra.gmra.mrb[48].mxu1 %v14340_v23 }
0x10d3   :  { %10324 = vmatpush1.bf16.msra.mxu0 %v16072_v26  ;;  %4009 = vmatprep.mubr.f32.mxu0 %v14402_v1 }
0x10d4   :  { %10326 = vmatprep.subr.bf16.mxu0 %v16073_v3  ;;  %10388 = vmatpush1.bf16.msra.mxu1 %v16074_v19 }
0x10d5   :  { %10390 = vmatprep.subr.bf16.mxu1 %v16075_v25  ;;  %4105 = vmatprep.mubr.f32.mxu1 %v15996_v53 }
0x10d7   :  { %10328 = vmatpush1.bf16.msra.mxu0 %v16076_v41 }
0x10d8   :  { %10330 = vmatprep.subr.bf16.mxu0 %v16077_v36  ;;  %10392 = vmatpush1.bf16.msra.mxu1 %v16726_v18 }
0x10d9   :  { %10394 = vmatprep.subr.bf16.mxu1 %v16727_v14 }
0x10db   :  { %10332 = vmatpush1.bf16.msra.mxu0 %v16728_v59 }
0x10dc   :  { %10334 = vmatprep.subr.bf16.mxu0 %v16729_v42  ;;  %10396 = vmatpush1.bf16.msra.mxu1 %v16730_v9 }
0x10dd   :  { %10398 = vmatprep.subr.bf16.mxu1 %v16731_v11 }
0x10df   :  { %10336 = vmatpush1.bf16.msra.mxu0 %v16732_v56 }
0x10e0   :  { %10338 = vmatprep.subr.bf16.mxu0 %v16733_v48  ;;  %10400 = vmatpush1.bf16.msra.mxu1 %v16734_v47  ;;  %v16745_v47 = vld [vmem:[#allocation84_spill] sm:$0xff] }
0x10e1   :  { %10402 = vmatprep.subr.bf16.mxu1 %v16735_v21  ;;  %v16746_v21 = vld [vmem:[#allocation111_spill] sm:$0xff] }
0x10e3   :  { %10340 = vmatpush1.bf16.msra.mxu0 %v16736_v43  ;;  %v16747_v43 = vld [vmem:[#allocation114_spill] sm:$0xff] }
0x10e4   :  { %10342 = vmatprep.subr.bf16.mxu0 %v16737_v27  ;;  %10404 = vmatpush1.bf16.msra.mxu1 %v16738_v50  ;;  %v16748_v27 = vld [vmem:[#allocation85_spill] sm:$0xff]  ;;  %v16749_v50 = vld [vmem:[#allocation88_spill] sm:$0xff] }
0x10e5   :  { %10406 = vmatprep.subr.bf16.mxu1 %v16739_v40  ;;  %v16750_v40 = vld [vmem:[#allocation115_spill] sm:$0xff] }
0x10e7   :  { %10344 = vmatpush1.bf16.msra.mxu0 %v16740_v20  ;;  %v16761_v20 = vld [vmem:[#allocation109_spill] sm:$0xff] }
0x10e8   :  { %10346 = vmatprep.subr.bf16.mxu0 %v16741_v22  ;;  %10408 = vmatpush1.bf16.msra.mxu1 %v16742_v15  ;;  %v16751_v22 = vld [vmem:[#allocation89_spill] sm:$0xff]  ;;  %v16752_v15 = vld [vmem:[#allocation92_spill] sm:$0xff] }
0x10e9   :  { %10410 = vmatprep.subr.bf16.mxu1 %v16743_v37  ;;  %v16753_v37 = vld [vmem:[#allocation93_spill] sm:$0xff] }
0x10eb   :  { %10348 = vmatpush1.bf16.msra.mxu0 %v16744_v51  ;;  %v16754_v51 = vld [vmem:[#allocation96_spill] sm:$0xff] }
0x10ec   :  { %10350 = vmatprep.subr.bf16.mxu0 %v16745_v47  ;;  %10412 = vmatpush1.bf16.msra.mxu1 %v16746_v21  ;;  %v16755_v47 = vld [vmem:[#allocation97_spill] sm:$0xff]  ;;  %v16756_v21 = vld [vmem:[#allocation100_spill] sm:$0xff] }
0x10ed   :  { %10414 = vmatprep.subr.bf16.mxu1 %v16747_v43  ;;  %v16757_v43 = vld [vmem:[#allocation101_spill] sm:$0xff] }
0x10ef   :  { %10352 = vmatpush1.bf16.msra.mxu0 %v16748_v27  ;;  %v16758_v27 = vld [vmem:[#allocation104_spill] sm:$0xff] }
0x10f0   :  { %10354 = vmatprep.subr.bf16.mxu0 %v16749_v50  ;;  %10416 = vmatpush1.bf16.msra.mxu1 %v16750_v40  ;;  %v16759_v50 = vld [vmem:[#allocation105_spill] sm:$0xff]  ;;  %v16760_v40 = vld [vmem:[#allocation108_spill] sm:$0xff] }
0x10f1   :  { %10417 = vmatprep.subr.bf16.mxu1 %v16051_v54 }
0x10f3   :  { %10356 = vmatpush1.bf16.msra.mxu0 %v16751_v22  ;;  %v16762_v22 = vld [vmem:[#allocation112_spill] sm:$0xff] }
0x10f4   :  { %10358 = vmatprep.subr.bf16.mxu0 %v16752_v15  ;;  %v16763_v15 = vld [vmem:[#allocation113_spill] sm:$0xff] }
0x10f7   :  { %10360 = vmatpush1.bf16.msra.mxu0 %v16753_v37  ;;  %v16764_v37 = vld [vmem:[#allocation116_spill] sm:$0xff] }
0x10f8   :  { %10362 = vmatprep.subr.bf16.mxu0 %v16754_v51  ;;  %v16765_v51 = vld [vmem:[#allocation117_spill] sm:$0xff] }
0x10fb   :  { %10364 = vmatpush1.bf16.msra.mxu0 %v16755_v47  ;;  %v16766_v47 = vld [vmem:[#allocation12_spill] sm:$0xff] }
0x10fc   :  { %10366 = vmatprep.subr.bf16.mxu0 %v16756_v21  ;;  %v16777_v21 = vld [vmem:[#allocation24_spill] sm:$0xff] }
0x10ff   :  { %10368 = vmatpush1.bf16.msra.mxu0 %v16757_v43  ;;  %v16767_v43 = vld [vmem:[#allocation13_spill] sm:$0xff] }
0x1100   :  { %10370 = vmatprep.subr.bf16.mxu0 %v16758_v27  ;;  %v16768_v27 = vld [vmem:[#allocation14_spill] sm:$0xff] }
0x1103   :  { %10372 = vmatpush1.bf16.msra.mxu0 %v16759_v50  ;;  %v16769_v50 = vld [vmem:[#allocation15_spill] sm:$0xff] }
0x1104   :  { %10374 = vmatprep.subr.bf16.mxu0 %v16760_v40  ;;  %v16770_v40 = vld [vmem:[#allocation16_spill] sm:$0xff] }
0x1107   :  { %10376 = vmatpush1.bf16.msra.mxu0 %v16761_v20  ;;  %v16771_v20 = vld [vmem:[#allocation17_spill] sm:$0xff] }
0x1108   :  { %10378 = vmatprep.subr.bf16.mxu0 %v16762_v22  ;;  %v16772_v22 = vld [vmem:[#allocation18_spill] sm:$0xff] }
0x110b   :  { %10380 = vmatpush1.bf16.msra.mxu0 %v16763_v15  ;;  %v16773_v15 = vld [vmem:[#allocation19_spill] sm:$0xff] }
0x110c   :  { %10382 = vmatprep.subr.bf16.mxu0 %v16764_v37  ;;  %v16774_v37 = vld [vmem:[#allocation20_spill] sm:$0xff] }
0x110f   :  { %10384 = vmatpush1.bf16.msra.mxu0 %v16765_v51  ;;  %v16775_v51 = vld [vmem:[#allocation21_spill] sm:$0xff] }
0x1110   :  { %10442 = vmatprep.subr.bf16.mxu0 %v16766_v47  ;;  %v16776_v47 = vld [vmem:[#allocation22_spill] sm:$0xff] }
0x1112   :  { %4010 = vmatmul.mubr.f32.vlgmr.msra.gmra.mrb[34].mxu0 %v14340_v23 }
0x1113   :  { %10444 = vmatpush1.bf16.msra.mxu0 %v16767_v43  ;;  %v16778_v43 = vld [vmem:[#allocation25_spill] sm:$0xff] }
0x1114   :  { %10446 = vmatprep.subr.bf16.mxu0 %v16768_v27  ;;  %v16779_v27 = vld [vmem:[#allocation28_spill] sm:$0xff] }
0x1117   :  { %10448 = vmatpush1.bf16.msra.mxu0 %v16769_v50  ;;  %v16780_v50 = vld [vmem:[#allocation29_spill] sm:$0xff] }
0x1118   :  { %10450 = vmatprep.subr.bf16.mxu0 %v16770_v40  ;;  %v16781_v40 = vld [vmem:[#allocation32_spill] sm:$0xff] }
0x111b   :  { %10452 = vmatpush1.bf16.msra.mxu0 %v16771_v20  ;;  %v16782_v20 = vld [vmem:[#allocation33_spill] sm:$0xff] }
0x111c   :  { %10454 = vmatprep.subr.bf16.mxu0 %v16772_v22  ;;  %v16783_v22 = vld [vmem:[#allocation36_spill] sm:$0xff] }
0x111f   :  { %10456 = vmatpush1.bf16.msra.mxu0 %v16773_v15  ;;  %v16784_v15 = vld [vmem:[#allocation37_spill] sm:$0xff] }
0x1120   :  { %10458 = vmatprep.subr.bf16.mxu0 %v16774_v37  ;;  %v16785_v37 = vld [vmem:[#allocation40_spill] sm:$0xff] }
0x1123   :  { %10460 = vmatpush1.bf16.msra.mxu0 %v16775_v51  ;;  %v16786_v51 = vld [vmem:[#allocation41_spill] sm:$0xff] }
0x1124   :  { %10462 = vmatprep.subr.bf16.mxu0 %v16776_v47  ;;  %v16787_v47 = vld [vmem:[#allocation44_spill] sm:$0xff] }
0x1127   :  { %10464 = vmatpush1.bf16.msra.mxu0 %v16777_v21  ;;  %v16788_v21 = vld [vmem:[#allocation45_spill] sm:$0xff] }
0x1128   :  { %10466 = vmatprep.subr.bf16.mxu0 %v16778_v43  ;;  %v16789_v43 = vld [vmem:[#allocation48_spill] sm:$0xff] }
0x112b   :  { %10468 = vmatpush1.bf16.msra.mxu0 %v16779_v27  ;;  %v16790_v27 = vld [vmem:[#allocation49_spill] sm:$0xff] }
0x112c   :  { %10470 = vmatprep.subr.bf16.mxu0 %v16780_v50  ;;  %v16791_v50 = vld [vmem:[#allocation52_spill] sm:$0xff] }
0x112f   :  { %10472 = vmatpush1.bf16.msra.mxu0 %v16781_v40  ;;  %v16792_v40 = vld [vmem:[#allocation53_spill] sm:$0xff] }
0x1130   :  { %10474 = vmatprep.subr.bf16.mxu0 %v16782_v20  ;;  %v16793_v20 = vld [vmem:[#allocation56_spill] sm:$0xff] }
0x1133   :  { %10476 = vmatpush1.bf16.msra.mxu0 %v16783_v22  ;;  %v16794_v22 = vld [vmem:[#allocation57_spill] sm:$0xff] }
0x1134   :  { %10478 = vmatprep.subr.bf16.mxu0 %v16784_v15  ;;  %v16795_v15 = vld [vmem:[#allocation60_spill] sm:$0xff] }
0x1137   :  { %10480 = vmatpush1.bf16.msra.mxu0 %v16785_v37  ;;  %v16796_v37 = vld [vmem:[#allocation61_spill] sm:$0xff] }
0x1138   :  { %10482 = vmatprep.subr.bf16.mxu0 %v16786_v51  ;;  %v16797_v51 = vld [vmem:[#allocation64_spill] sm:$0xff] }
0x113b   :  { %10484 = vmatpush1.bf16.msra.mxu0 %v16787_v47  ;;  %v16798_v47 = vld [vmem:[#allocation66_spill] sm:$0xff] }
0x113c   :  { %10486 = vmatprep.subr.bf16.mxu0 %v16788_v21  ;;  %v391_v21 = vpop.permute.xlu0 %390 }
0x113f   :  { %10488 = vmatpush1.bf16.msra.mxu0 %v16789_v43  ;;  %v16799_v43 = vld [vmem:[#allocation118_spill] sm:$0xff] }
0x1140   :  { %10490 = vmatprep.subr.bf16.mxu0 %v16790_v27  ;;  %v468_v48 = vmul.f32 %v16799_v43, %v391_v21  ;;  %v16800_v27 = vld [vmem:[#allocation119_spill] sm:$0xff] }
0x1141   :  { %v469_v56 = vmul.f32 %v16800_v27, %v391_v21 }
0x1143   :  { %10492 = vmatpush1.bf16.msra.mxu0 %v16791_v50 }
0x1144   :  { %10494 = vmatprep.subr.bf16.mxu0 %v16792_v40  ;;  %v16801_v40 = vld [vmem:[#allocation120_spill] sm:$0xff] }
0x1145   :  { %v532_v9 = vadd.f32 %v16801_v40, %v468_v48  ;;  %v470_v48 = vmul.f32 %v16136_v10, %v391_v21  ;;  %v16804_v21 = vld [vmem:[#allocation50_spill] sm:$0xff] }
0x1147   :  { %10496 = vmatpush1.bf16.msra.mxu0 %v16793_v20  ;;  %v16802_v20 = vld [vmem:[#allocation121_spill] sm:$0xff] }
0x1148   :  { %10498 = vmatprep.subr.bf16.mxu0 %v16794_v22 }
0x114b   :  { %10500 = vmatpush1.bf16.msra.mxu0 %v16795_v15 }
0x114c   :  { %10502 = vmatprep.subr.bf16.mxu0 %v16796_v37 }
0x114f   :  { %10504 = vmatpush1.bf16.msra.mxu0 %v16797_v51  ;;  %v533_v51 = vadd.f32 %v16327_v60, %v469_v56 }
0x1150   :  { %10570 = vmatprep.subr.bf16.mxu0 %v16798_v47 }
0x11a5   :  { %v3869_v50 = vpop.f32.mrb[32].mxu0  ;;  %v3940_v11 = vpop.f32.mrb[48].mxu1 }
0x11a6   :  { %v3870_v42 = vadd.f32 %v3869_v50, %v16802_v20  ;;  %v3871_v22 = vpop.f32.mrb[33].mxu0  ;;  %v14495_v59 = vpop.f32.mrb[49].mxu1  ;;  %v3941_v20 = vadd.f32 %v3940_v11, %v13128_v57  ;;  %v16803_v11 = vld [vmem:[#allocation47_spill] sm:$0xff] }
0x11a7   :  { %v3872_v37 = vadd.f32 %v3871_v22, %v16134_v32  ;;  %v534_v22 = vadd.f32 %v13132_v30, %v470_v48  ;;  %v16810_v48 = vld [vmem:[#allocation62_spill] sm:$0xff] }
0x11a8   :  { %v4020_v15 = vadd.f32 %v3870_v42, %v532_v9 }
0x11a9   :  { %v4027_v14 = vadd.f32 %v3872_v37, %v533_v51  ;;  %v16808_v37 = vld [vmem:[#allocation58_spill] sm:$0xff]  ;;  %v16809_v51 = vld [vmem:[#allocation59_spill] sm:$0xff] }
0x11aa   :  { %v7239_v47 = vmul.f32 -1.442695, %v4020_v15  ;;  %v16807_v15 = vld [vmem:[#allocation55_spill] sm:$0xff] }
0x11ab   :  { %v7240_v43 = vmul.f32 -1.442695, %v4027_v14 }
0x11ac   :  { %12396 = vpow2.f32 %v7239_v47 }
0x11ad   :  { %12398 = vpow2.f32 %v7240_v43 }
0x11b6   :  { %v12397_v27 = vpop.eup %12396 }
0x11b7   :  { %v4024_v18 = vadd.f32 1.0, %v12397_v27  ;;  %v12399_v36 = vpop.eup %12398 }
0x11b8   :  { %v4031_v50 = vadd.f32 1.0, %v12399_v36 }
0x11b9   :  { %12400 = vrcp.f32 %v4024_v18 }
0x11ba   :  { %12402 = vrcp.f32 %v4031_v50  ;;  %v16811_v50 = vld [vmem:[#allocation63_spill] sm:$0xff] }
0x11c3   :  { %v12401_v40 = vpop.eup %12400 }
0x11c4   :  { %v4034_v42 = vmul.f32 %v12401_v40, %v3941_v20  ;;  %v12403_v56 = vpop.eup %12402  ;;  %v16805_v40 = vld [vmem:[#allocation51_spill] sm:$0xff]  ;;  %v16806_v20 = vld [vmem:[#allocation54_spill] sm:$0xff] }
0x11c5   :  { %v4037_v47 = vsub.f32 1.0, %v12403_v56  ;;  %v4039_v43 = vmul.f32 %v12403_v56, %v14340_v23  ;;  %v16815_v56 = vld [vmem:[#allocation71_spill] sm:$0xff] }
0x11c6   :  { %v4035_v9 = vadd.f32 %v4034_v42, %v534_v22  ;;  %v16812_v22 = vld [vmem:[#allocation65_spill] sm:$0xff]  ;;  %v16813_v42 = vld [vmem:[#allocation67_spill] sm:$0xff] }
0x11c8   :  { %12404 = vtanh.f32 %v4035_v9  ;;  %v16814_v9 = vld [vmem:[#allocation69_spill] sm:$0xff] }
0x11d2   :  { %v12405_v14 = vpop.eup %12404 }
0x11d3   :  { %v4038_v27 = vmul.f32 %v12405_v14, %v4037_v47  ;;  %v16816_v47 = vld [vmem:[#allocation73_spill] sm:$0xff]  ;;  %v16817_v14 = vld [vmem:[#allocation86_spill] sm:$0xff] }
0x11d5   :  { %v14503_v18 = vadd.f32 %v4039_v43, %v4038_v27  ;;  %v16818_v27 = vld [vmem:[#allocation126_spill] sm:$0xff] }
0x11d7   :  { %4106 = vmatmul.mubr.f32.vlgmr.msra.gmra.mrb[50].mxu1 %v14503_v18 }
0x11d8   :  { %10419 = vmatpush3.bf16.msra.mxu1 %v13136_v6  ;;  %7891 = vmatprep.mubr.msk.f32.mxu1 %vm12635_vm0, %v15996_v53 }
0x11d9   :  { %10420 = vmatprep.subr.bf16.mxu1 %v16051_v54 }
0x11dc   :  { %10422 = vmatpush3.bf16.msra.mxu1 %v13142_v4 }
0x11dd   :  { %10423 = vmatprep.subr.bf16.mxu1 %v16051_v54 }
0x11e0   :  { %10425 = vmatpush3.bf16.msra.mxu1 %v13148_v0 }
0x11e1   :  { %10426 = vmatprep.subr.bf16.mxu1 %v16051_v54 }
0x11e4   :  { %10428 = vmatpush3.bf16.msra.mxu1 %v13152_v35 }
0x11e5   :  { %v4011_v36 = vpop.f32.mrb[34].mxu0  ;;  %10429 = vmatprep.subr.bf16.mxu1 %v16051_v54 }
0x11e6   :  { %v4013_v23 = vpop.f32.mrb[35].mxu0 }
0x11e8   :  { %10431 = vmatpush3.bf16.msra.mxu1 %v13156_v7 }
0x11e9   :  { %10432 = vmatprep.subr.bf16.mxu1 %v16051_v54 }
0x11ec   :  { %10434 = vmatpush3.bf16.msra.mxu1 %v13160_v33 }
0x11ed   :  { %10435 = vmatprep.subr.bf16.mxu1 %v16051_v54 }
0x11f0   :  { %10437 = vmatpush3.bf16.msra.mxu1 %v13164_v31 }
0x11f1   :  { %10438 = vmatprep.subr.bf16.mxu1 %v16051_v54 }
0x11f4   :  { %10440 = vmatpush3.bf16.msra.mxu1 %v13168_v38 }
0x11f5   :  { %10506 = vmatprep.subr.bf16.mxu1 %v12702_v29 }
0x11f7   :  { %7892 = vmatmul.mubr.f32.vlgmr.msra.gmra.mrb[52].mxu1 %v14503_v18 }
0x11f8   :  { %10508 = vmatpush1.bf16.msra.mxu1 %v12708_v34 }
0x11f9   :  { %10510 = vmatprep.subr.bf16.mxu1 %v12713_v39 }
0x11fc   :  { %10512 = vmatpush1.bf16.msra.mxu1 %v12716_v44 }
0x11fd   :  { %10514 = vmatprep.subr.bf16.mxu1 %v12722_v49 }
0x1200   :  { %10516 = vmatpush1.bf16.msra.mxu1 %v12728_v58 }
0x1201   :  { %10518 = vmatprep.subr.bf16.mxu1 %v16137_v62 }
0x1204   :  { %10520 = vmatpush1.bf16.msra.mxu1 %v16138_v24 }
0x1205   :  { %10522 = vmatprep.subr.bf16.mxu1 %v16139_v55 }
0x1208   :  { %10524 = vmatpush1.bf16.msra.mxu1 %v16140_v63 }
0x1209   :  { %10526 = vmatprep.subr.bf16.mxu1 %v16232_v17 }
0x120c   :  { %10528 = vmatpush1.bf16.msra.mxu1 %v16233_v45 }
0x120d   :  { %10530 = vmatprep.subr.bf16.mxu1 %v16234_v52 }
0x1210   :  { %10532 = vmatpush1.bf16.msra.mxu1 %v16328_v8 }
0x1211   :  { %10534 = vmatprep.subr.bf16.mxu1 %v16423_v2 }
0x1214   :  { %10536 = vmatpush1.bf16.msra.mxu1 %v16518_v5 }
0x1215   :  { %10538 = vmatprep.subr.bf16.mxu1 %v16613_v28 }
0x1218   :  { %10540 = vmatpush1.bf16.msra.mxu1 %v16708_v13 }
0x1219   :  { %10542 = vmatprep.subr.bf16.mxu1 %v16803_v11 }
0x121c   :  { %10544 = vmatpush1.bf16.msra.mxu1 %v16804_v21  ;;  %v4014_v21 = vadd.f32 %v4013_v23, %v13227_v12  ;;  %v16821_v23 = vld [vmem:[#allocation91_spill] sm:$0xff] }
0x121d   :  { %10546 = vmatprep.subr.bf16.mxu1 %v16805_v40 }
0x1220   :  { %10548 = vmatpush1.bf16.msra.mxu1 %v16806_v20 }
0x1221   :  { %10550 = vmatprep.subr.bf16.mxu1 %v16807_v15 }
0x1224   :  { %10552 = vmatpush1.bf16.msra.mxu1 %v16808_v37  ;;  %v16819_v37 = vld [vmem:[#allocation127_spill] sm:$0xff] }
0x1225   :  { %10554 = vmatprep.subr.bf16.mxu1 %v16809_v51  ;;  %v3943_v51 = vadd.f32 %v14495_v59, %v16818_v27 }
0x1228   :  { %10556 = vmatpush1.bf16.msra.mxu1 %v16810_v48 }
0x1229   :  { %10558 = vmatprep.subr.bf16.mxu1 %v16811_v50  ;;  %v4012_v50 = vadd.f32 %v4011_v36, %v16164_v16 }
0x122c   :  { %10560 = vmatpush1.bf16.msra.mxu1 %v16812_v22 }
0x122d   :  { %10562 = vmatprep.subr.bf16.mxu1 %v16813_v42 }
0x1230   :  { %10564 = vmatpush1.bf16.msra.mxu1 %v16814_v9 }
0x1231   :  { %10566 = vmatprep.subr.bf16.mxu1 %v16815_v56 }
0x1234   :  { %10568 = vmatpush1.bf16.msra.mxu1 %v16816_v47 }
0x1235   :  { %10634 = vmatprep.subr.bf16.mxu1 %v16817_v14 }
0x12aa   :  { %v4107_v43 = vpop.f32.mrb[50].mxu1 }
0x12ab   :  { %v4108_v48 = vadd.f32 %v4107_v43, %v16819_v37  ;;  %v4109_v15 = vpop.f32.mrb[51].mxu1 }
0x12ac   :  { %v4110_v22 = vadd.f32 %v4109_v15, %v13218_v61 }
0x12ad   :  { %v4182_v42 = vadd.f32 %v4108_v48, %v3943_v51 }
0x12ae   :  { %v4189_v20 = vadd.f32 %v4110_v22, %v4012_v50 }
0x12af   :  { %v7241_v9 = vmul.f32 -1.442695, %v4182_v42 }
0x12b0   :  { %v7242_v56 = vmul.f32 -1.442695, %v4189_v20 }
0x12b1   :  { %12406 = vpow2.f32 %v7241_v9  ;;  %v16824_v9 = vld [vmem:[#allocation76_spill] sm:$0xff] }
0x12b2   :  { %12408 = vpow2.f32 %v7242_v56  ;;  %v16825_v56 = vld [vmem:[#allocation95_spill] sm:$0xff] }
0x12bb   :  { %v12407_v47 = vpop.eup %12406 }
0x12bc   :  { %v4186_v40 = vadd.f32 1.0, %v12407_v47  ;;  %v12409_v14 = vpop.eup %12408  ;;  %v16826_v47 = vld [vmem:[#allocation98_spill] sm:$0xff] }
0x12bd   :  { %v4193_v59 = vadd.f32 1.0, %v12409_v14  ;;  %v16827_v14 = vld [vmem:[#allocation77_spill] sm:$0xff] }
0x12be   :  { %12410 = vrcp.f32 %v4186_v40 }
0x12bf   :  { %12412 = vrcp.f32 %v4193_v59  ;;  %v16829_v59 = vld [vmem:[#allocation99_spill] sm:$0xff] }
0x12c8   :  { %v12411_v27 = vpop.eup %12410 }
0x12c9   :  { %v4196_v43 = vmul.f32 %v12411_v27, %v4014_v21  ;;  %v12413_v48 = vpop.eup %12412  ;;  %v16822_v21 = vld [vmem:[#allocation94_spill] sm:$0xff] }
0x12ca   :  { %v4178_v37 = vpop.f32.mrb[52].mxu1  ;;  %v4199_v50 = vsub.f32 1.0, %v12413_v48  ;;  %v4201_v42 = vmul.f32 %v12413_v48, %v14402_v1  ;;  %v16820_v1 = vld [vmem:[#allocation74_spill] sm:$0xff] }
0x12cb   :  { %v4179_v36 = vadd.f32 %v4178_v37, %v13231_v46  ;;  %v7893_v15 = vpop.f32.mrb[53].mxu1  ;;  %v16823_v37 = vld [vmem:[#allocation75_spill] sm:$0xff]  ;;  %v16828_v27 = vld [vmem:[#allocation78_spill] sm:$0xff] }
0x12cc   :  { %v16832_v15 = vld [vmem:[#allocation80_spill] sm:$0xff]  ;;  %v16834_v48 = vld [vmem:[#allocation106_spill] sm:$0xff] }
0x12cd   :  { %v4197_v51 = vadd.f32 %v4196_v43, %v4179_v36  ;;  %v16830_v43 = vld [vmem:[#allocation102_spill] sm:$0xff]  ;;  %v16831_v36 = vld [vmem:[#allocation79_spill] sm:$0xff] }
0x12cf   :  { %12414 = vtanh.f32 %v4197_v51  ;;  %v16833_v51 = vld [vmem:[#allocation103_spill] sm:$0xff] }
0x12d9   :  { %v12415_v20 = vpop.eup %12414 }
0x12da   :  { %v4200_v22 = vmul.f32 %v12415_v20, %v4199_v50  ;;  %v16835_v50 = vld [vmem:[#allocation81_spill] sm:$0xff]  ;;  %v16836_v20 = vld [vmem:[#allocation82_spill] sm:$0xff] }
0x12dc   :  { %v14565_v40 = vadd.f32 %v4201_v42, %v4200_v22  ;;  %v16837_v22 = vld [vmem:[#allocation107_spill] sm:$0xff]  ;;  %v16838_v42 = vld [vmem:[#allocation110_spill] sm:$0xff] }
0x12de   :  { %4267 = vmatprep.mubr.f32.mxu0 %v14565_v40  ;;  %4338 = vmatprep.mubr.f32.mxu1 %v14565_v40 }
0x12df   :  { %4268 = vmatmul.mubr.f32.vlgmr.msra.gmra.mrb[36].mxu0 %v14503_v18  ;;  %4339 = vmatmul.mubr.f32.vlgmr.msra.gmra.mrb[54].mxu1 %v14503_v18 }
0x12e0   :  { %10572 = vmatpush1.bf16.msra.mxu0 %v16072_v26  ;;  %4409 = vmatprep.mubr.f32.mxu0 %v14565_v40 }
0x12e1   :  { %10574 = vmatprep.subr.bf16.mxu0 %v16073_v3  ;;  %10636 = vmatpush1.bf16.msra.mxu1 %v16074_v19 }
0x12e2   :  { %10638 = vmatprep.subr.bf16.mxu1 %v16075_v25  ;;  %4505 = vmatprep.mubr.f32.mxu1 %v15996_v53 }
0x12e4   :  { %10576 = vmatpush1.bf16.msra.mxu0 %v16076_v41 }
0x12e5   :  { %10578 = vmatprep.subr.bf16.mxu0 %v16820_v1  ;;  %10640 = vmatpush1.bf16.msra.mxu1 %v16821_v23 }
0x12e6   :  { %10642 = vmatprep.subr.bf16.mxu1 %v16822_v21 }
0x12e8   :  { %10580 = vmatpush1.bf16.msra.mxu0 %v16823_v37 }
0x12e9   :  { %10582 = vmatprep.subr.bf16.mxu0 %v16824_v9  ;;  %10644 = vmatpush1.bf16.msra.mxu1 %v16825_v56 }
0x12ea   :  { %10646 = vmatprep.subr.bf16.mxu1 %v16826_v47 }
0x12ec   :  { %10584 = vmatpush1.bf16.msra.mxu0 %v16827_v14 }
0x12ed   :  { %10586 = vmatprep.subr.bf16.mxu0 %v16828_v27  ;;  %10648 = vmatpush1.bf16.msra.mxu1 %v16829_v59  ;;  %v16839_v27 = vld [vmem:[#allocation83_spill] sm:$0xff]  ;;  %v16840_v59 = vld [vmem:[#allocation84_spill] sm:$0xff] }
0x12ee   :  { %10650 = vmatprep.subr.bf16.mxu1 %v16830_v43  ;;  %v16841_v43 = vld [vmem:[#allocation111_spill] sm:$0xff] }
0x12f0   :  { %10588 = vmatpush1.bf16.msra.mxu0 %v16831_v36  ;;  %v16842_v36 = vld [vmem:[#allocation114_spill] sm:$0xff] }
0x12f1   :  { %10590 = vmatprep.subr.bf16.mxu0 %v16832_v15  ;;  %10652 = vmatpush1.bf16.msra.mxu1 %v16833_v51  ;;  %v16843_v15 = vld [vmem:[#allocation85_spill] sm:$0xff]  ;;  %v16844_v51 = vld [vmem:[#allocation88_spill] sm:$0xff] }
0x12f2   :  { %10654 = vmatprep.subr.bf16.mxu1 %v16834_v48  ;;  %v16845_v48 = vld [vmem:[#allocation115_spill] sm:$0xff] }
0x12f4   :  { %10592 = vmatpush1.bf16.msra.mxu0 %v16835_v50  ;;  %v16856_v50 = vld [vmem:[#allocation109_spill] sm:$0xff] }
0x12f5   :  { %10594 = vmatprep.subr.bf16.mxu0 %v16836_v20  ;;  %10656 = vmatpush1.bf16.msra.mxu1 %v16837_v22  ;;  %v16846_v20 = vld [vmem:[#allocation89_spill] sm:$0xff]  ;;  %v16847_v22 = vld [vmem:[#allocation92_spill] sm:$0xff] }
0x12f6   :  { %10658 = vmatprep.subr.bf16.mxu1 %v16838_v42  ;;  %v16848_v42 = vld [vmem:[#allocation93_spill] sm:$0xff] }
0x12f8   :  { %10596 = vmatpush1.bf16.msra.mxu0 %v16839_v27  ;;  %v16849_v27 = vld [vmem:[#allocation96_spill] sm:$0xff] }
0x12f9   :  { %10598 = vmatprep.subr.bf16.mxu0 %v16840_v59  ;;  %10660 = vmatpush1.bf16.msra.mxu1 %v16841_v43  ;;  %v16850_v59 = vld [vmem:[#allocation97_spill] sm:$0xff]  ;;  %v16851_v43 = vld [vmem:[#allocation100_spill] sm:$0xff] }
0x12fa   :  { %10662 = vmatprep.subr.bf16.mxu1 %v16842_v36  ;;  %v16852_v36 = vld [vmem:[#allocation101_spill] sm:$0xff] }
0x12fc   :  { %10600 = vmatpush1.bf16.msra.mxu0 %v16843_v15  ;;  %v16853_v15 = vld [vmem:[#allocation104_spill] sm:$0xff] }
0x12fd   :  { %10602 = vmatprep.subr.bf16.mxu0 %v16844_v51  ;;  %10664 = vmatpush1.bf16.msra.mxu1 %v16845_v48  ;;  %v16854_v51 = vld [vmem:[#allocation105_spill] sm:$0xff]  ;;  %v16855_v48 = vld [vmem:[#allocation108_spill] sm:$0xff] }
0x12fe   :  { %10665 = vmatprep.subr.bf16.mxu1 %v16051_v54 }
0x1300   :  { %10604 = vmatpush1.bf16.msra.mxu0 %v16846_v20  ;;  %v16857_v20 = vld [vmem:[#allocation112_spill] sm:$0xff] }
0x1301   :  { %10606 = vmatprep.subr.bf16.mxu0 %v16847_v22  ;;  %v16858_v22 = vld [vmem:[#allocation113_spill] sm:$0xff] }
0x1304   :  { %10608 = vmatpush1.bf16.msra.mxu0 %v16848_v42  ;;  %v16859_v42 = vld [vmem:[#allocation116_spill] sm:$0xff] }
0x1305   :  { %10610 = vmatprep.subr.bf16.mxu0 %v16849_v27  ;;  %v16860_v27 = vld [vmem:[#allocation117_spill] sm:$0xff] }
0x1308   :  { %10612 = vmatpush1.bf16.msra.mxu0 %v16850_v59  ;;  %v16861_v59 = vld [vmem:[#allocation12_spill] sm:$0xff] }
0x1309   :  { %10614 = vmatprep.subr.bf16.mxu0 %v16851_v43  ;;  %v16872_v43 = vld [vmem:[#allocation24_spill] sm:$0xff] }
0x130c   :  { %10616 = vmatpush1.bf16.msra.mxu0 %v16852_v36  ;;  %v16862_v36 = vld [vmem:[#allocation13_spill] sm:$0xff] }
0x130d   :  { %10618 = vmatprep.subr.bf16.mxu0 %v16853_v15  ;;  %v16863_v15 = vld [vmem:[#allocation14_spill] sm:$0xff] }
0x1310   :  { %10620 = vmatpush1.bf16.msra.mxu0 %v16854_v51  ;;  %v16864_v51 = vld [vmem:[#allocation15_spill] sm:$0xff] }
0x1311   :  { %10622 = vmatprep.subr.bf16.mxu0 %v16855_v48  ;;  %v16865_v48 = vld [vmem:[#allocation16_spill] sm:$0xff] }
0x1314   :  { %10624 = vmatpush1.bf16.msra.mxu0 %v16856_v50  ;;  %v16866_v50 = vld [vmem:[#allocation17_spill] sm:$0xff] }
0x1315   :  { %10626 = vmatprep.subr.bf16.mxu0 %v16857_v20  ;;  %v16867_v20 = vld [vmem:[#allocation18_spill] sm:$0xff] }
0x1318   :  { %10628 = vmatpush1.bf16.msra.mxu0 %v16858_v22  ;;  %v16868_v22 = vld [vmem:[#allocation19_spill] sm:$0xff] }
0x1319   :  { %10630 = vmatprep.subr.bf16.mxu0 %v16859_v42  ;;  %v16869_v42 = vld [vmem:[#allocation20_spill] sm:$0xff] }
0x131c   :  { %10632 = vmatpush1.bf16.msra.mxu0 %v16860_v27  ;;  %v16870_v27 = vld [vmem:[#allocation21_spill] sm:$0xff] }
0x131d   :  { %10690 = vmatprep.subr.bf16.mxu0 %v16861_v59  ;;  %v16871_v59 = vld [vmem:[#allocation22_spill] sm:$0xff] }
0x131f   :  { %4410 = vmatmul.mubr.f32.vlgmr.msra.gmra.mrb[38].mxu0 %v14503_v18 }
0x1320   :  { %10692 = vmatpush1.bf16.msra.mxu0 %v16862_v36  ;;  %v16873_v36 = vld [vmem:[#allocation25_spill] sm:$0xff] }
0x1321   :  { %10694 = vmatprep.subr.bf16.mxu0 %v16863_v15  ;;  %v16874_v15 = vld [vmem:[#allocation28_spill] sm:$0xff] }
0x1324   :  { %10696 = vmatpush1.bf16.msra.mxu0 %v16864_v51  ;;  %v16875_v51 = vld [vmem:[#allocation29_spill] sm:$0xff] }
0x1325   :  { %10698 = vmatprep.subr.bf16.mxu0 %v16865_v48  ;;  %v16876_v48 = vld [vmem:[#allocation32_spill] sm:$0xff] }
0x1328   :  { %10700 = vmatpush1.bf16.msra.mxu0 %v16866_v50  ;;  %v16877_v50 = vld [vmem:[#allocation33_spill] sm:$0xff] }
0x1329   :  { %10702 = vmatprep.subr.bf16.mxu0 %v16867_v20  ;;  %v16878_v20 = vld [vmem:[#allocation36_spill] sm:$0xff] }
0x132c   :  { %10704 = vmatpush1.bf16.msra.mxu0 %v16868_v22  ;;  %v16879_v22 = vld [vmem:[#allocation37_spill] sm:$0xff] }
0x132d   :  { %10706 = vmatprep.subr.bf16.mxu0 %v16869_v42  ;;  %v16880_v42 = vld [vmem:[#allocation40_spill] sm:$0xff] }
0x1330   :  { %10708 = vmatpush1.bf16.msra.mxu0 %v16870_v27  ;;  %v16881_v27 = vld [vmem:[#allocation41_spill] sm:$0xff] }
0x1331   :  { %10710 = vmatprep.subr.bf16.mxu0 %v16871_v59  ;;  %v16882_v59 = vld [vmem:[#allocation44_spill] sm:$0xff] }
0x1334   :  { %10712 = vmatpush1.bf16.msra.mxu0 %v16872_v43  ;;  %v16883_v43 = vld [vmem:[#allocation45_spill] sm:$0xff] }
0x1335   :  { %10714 = vmatprep.subr.bf16.mxu0 %v16873_v36  ;;  %v16884_v36 = vld [vmem:[#allocation48_spill] sm:$0xff] }
0x1338   :  { %10716 = vmatpush1.bf16.msra.mxu0 %v16874_v15  ;;  %v16885_v15 = vld [vmem:[#allocation49_spill] sm:$0xff] }
0x1339   :  { %10718 = vmatprep.subr.bf16.mxu0 %v16875_v51  ;;  %v16886_v51 = vld [vmem:[#allocation52_spill] sm:$0xff] }
0x133c   :  { %10720 = vmatpush1.bf16.msra.mxu0 %v16876_v48  ;;  %v16887_v48 = vld [vmem:[#allocation53_spill] sm:$0xff] }
0x133d   :  { %10722 = vmatprep.subr.bf16.mxu0 %v16877_v50  ;;  %v16888_v50 = vld [vmem:[#allocation56_spill] sm:$0xff] }
0x1340   :  { %10724 = vmatpush1.bf16.msra.mxu0 %v16878_v20  ;;  %v16889_v20 = vld [vmem:[#allocation57_spill] sm:$0xff] }
0x1341   :  { %10726 = vmatprep.subr.bf16.mxu0 %v16879_v22  ;;  %v16890_v22 = vld [vmem:[#allocation60_spill] sm:$0xff] }
0x1344   :  { %10728 = vmatpush1.bf16.msra.mxu0 %v16880_v42  ;;  %v16891_v42 = vld [vmem:[#allocation61_spill] sm:$0xff] }
0x1345   :  { %10730 = vmatprep.subr.bf16.mxu0 %v16881_v27  ;;  %v16892_v27 = vld [vmem:[#allocation64_spill] sm:$0xff] }
0x1348   :  { %10732 = vmatpush1.bf16.msra.mxu0 %v16882_v59  ;;  %v16893_v59 = vld [vmem:[#allocation66_spill] sm:$0xff] }
0x1349   :  { %10734 = vmatprep.subr.bf16.mxu0 %v16883_v43  ;;  %v396_v43 = vpop.permute.xlu1 %395 }
0x134c   :  { %10736 = vmatpush1.bf16.msra.mxu0 %v16884_v36  ;;  %v16894_v36 = vld [vmem:[#allocation118_spill] sm:$0xff] }
0x134d   :  { %10738 = vmatprep.subr.bf16.mxu0 %v16885_v15  ;;  %v471_v14 = vmul.f32 %v16894_v36, %v396_v43  ;;  %v16895_v15 = vld [vmem:[#allocation119_spill] sm:$0xff] }
0x134e   :  { %v472_v47 = vmul.f32 %v16895_v15, %v396_v43 }
0x1350   :  { %10740 = vmatpush1.bf16.msra.mxu0 %v16886_v51 }
0x1351   :  { %10742 = vmatprep.subr.bf16.mxu0 %v16887_v48  ;;  %v16896_v48 = vld [vmem:[#allocation120_spill] sm:$0xff] }
0x1352   :  { %v535_v9 = vadd.f32 %v16896_v48, %v471_v14  ;;  %v473_v14 = vmul.f32 %v16136_v10, %v396_v43  ;;  %v16899_v43 = vld [vmem:[#allocation51_spill] sm:$0xff] }
0x1354   :  { %10744 = vmatpush1.bf16.msra.mxu0 %v16888_v50  ;;  %v16897_v50 = vld [vmem:[#allocation121_spill] sm:$0xff] }
0x1355   :  { %10746 = vmatprep.subr.bf16.mxu0 %v16889_v20 }
0x1358   :  { %10748 = vmatpush1.bf16.msra.mxu0 %v16890_v22 }
0x1359   :  { %10750 = vmatprep.subr.bf16.mxu0 %v16891_v42 }
0x135c   :  { %10752 = vmatpush1.bf16.msra.mxu0 %v16892_v27  ;;  %v536_v27 = vadd.f32 %v16327_v60, %v472_v47 }
0x135d   :  { %10818 = vmatprep.subr.bf16.mxu0 %v16893_v59 }
0x13b2   :  { %v4269_v51 = vpop.f32.mrb[36].mxu0  ;;  %v4340_v56 = vpop.f32.mrb[54].mxu1 }
0x13b3   :  { %v4270_v37 = vadd.f32 %v4269_v51, %v16897_v50  ;;  %v4271_v20 = vpop.f32.mrb[37].mxu0  ;;  %v14658_v21 = vpop.f32.mrb[55].mxu1  ;;  %v4341_v50 = vadd.f32 %v4340_v56, %v13128_v57  ;;  %v16898_v56 = vld [vmem:[#allocation50_spill] sm:$0xff] }
0x13b4   :  { %v4272_v42 = vadd.f32 %v4271_v20, %v16134_v32  ;;  %v537_v20 = vadd.f32 %v13132_v30, %v473_v14  ;;  %v16905_v14 = vld [vmem:[#allocation63_spill] sm:$0xff] }
0x13b5   :  { %v4420_v22 = vadd.f32 %v4270_v37, %v535_v9 }
0x13b6   :  { %v4427_v23 = vadd.f32 %v4272_v42, %v536_v27  ;;  %v16904_v42 = vld [vmem:[#allocation62_spill] sm:$0xff] }
0x13b7   :  { %v7243_v59 = vmul.f32 -1.442695, %v4420_v22  ;;  %v16903_v22 = vld [vmem:[#allocation59_spill] sm:$0xff] }
0x13b8   :  { %v7244_v36 = vmul.f32 -1.442695, %v4427_v23 }
0x13b9   :  { %12416 = vpow2.f32 %v7243_v59 }
0x13ba   :  { %12418 = vpow2.f32 %v7244_v36 }
0x13c3   :  { %v12417_v15 = vpop.eup %12416 }
0x13c4   :  { %v4424_v1 = vadd.f32 1.0, %v12417_v15  ;;  %v12419_v41 = vpop.eup %12418  ;;  %v16900_v15 = vld [vmem:[#allocation54_spill] sm:$0xff] }
0x13c5   :  { %v4431_v51 = vadd.f32 1.0, %v12419_v41 }
0x13c6   :  { %12420 = vrcp.f32 %v4424_v1 }
0x13c7   :  { %12422 = vrcp.f32 %v4431_v51  ;;  %v16906_v51 = vld [vmem:[#allocation65_spill] sm:$0xff] }
0x13d0   :  { %v12421_v48 = vpop.eup %12420 }
0x13d1   :  { %v4434_v37 = vmul.f32 %v12421_v48, %v4341_v50  ;;  %v12423_v47 = vpop.eup %12422  ;;  %v16901_v48 = vld [vmem:[#allocation55_spill] sm:$0xff]  ;;  %v16902_v50 = vld [vmem:[#allocation58_spill] sm:$0xff] }
0x13d2   :  { %v4437_v27 = vsub.f32 1.0, %v12423_v47  ;;  %v4439_v59 = vmul.f32 %v12423_v47, %v14503_v18  ;;  %v16910_v47 = vld [vmem:[#allocation73_spill] sm:$0xff] }
0x13d3   :  { %v4435_v9 = vadd.f32 %v4434_v37, %v537_v20  ;;  %v16907_v20 = vld [vmem:[#allocation67_spill] sm:$0xff]  ;;  %v16908_v37 = vld [vmem:[#allocation69_spill] sm:$0xff] }
0x13d5   :  { %12424 = vtanh.f32 %v4435_v9  ;;  %v16909_v9 = vld [vmem:[#allocation71_spill] sm:$0xff] }
0x13df   :  { %v12425_v23 = vpop.eup %12424 }
0x13e0   :  { %v4438_v36 = vmul.f32 %v12425_v23, %v4437_v27  ;;  %v16911_v27 = vld [vmem:[#allocation86_spill] sm:$0xff] }
0x13e2   :  { %v14666_v1 = vadd.f32 %v4439_v59, %v4438_v36  ;;  %v16912_v59 = vld [vmem:[#allocation126_spill] sm:$0xff] }
0x13e3   :  { %v4343_v36 = vadd.f32 %v14658_v21, %v16912_v59 }
0x13e4   :  { %4506 = vmatmul.mubr.f32.vlgmr.msra.gmra.mrb[56].mxu1 %v14666_v1 }
0x13e5   :  { %10667 = vmatpush3.bf16.msra.mxu1 %v13136_v6  ;;  %7926 = vmatprep.mubr.msk.f32.mxu1 %vm12635_vm0, %v15996_v53 }
0x13e6   :  { %10668 = vmatprep.subr.bf16.mxu1 %v16051_v54 }
0x13e9   :  { %10670 = vmatpush3.bf16.msra.mxu1 %v13142_v4 }
0x13ea   :  { %10671 = vmatprep.subr.bf16.mxu1 %v16051_v54 }
0x13ed   :  { %10673 = vmatpush3.bf16.msra.mxu1 %v13148_v0 }
0x13ee   :  { %10674 = vmatprep.subr.bf16.mxu1 %v16051_v54 }
0x13f1   :  { %10676 = vmatpush3.bf16.msra.mxu1 %v13152_v35 }
0x13f2   :  { %v4411_v41 = vpop.f32.mrb[38].mxu0  ;;  %10677 = vmatprep.subr.bf16.mxu1 %v16051_v54 }
0x13f3   :  { %v4413_v18 = vpop.f32.mrb[39].mxu0 }
0x13f5   :  { %10679 = vmatpush3.bf16.msra.mxu1 %v13156_v7 }
0x13f6   :  { %10680 = vmatprep.subr.bf16.mxu1 %v16051_v54 }
0x13f9   :  { %10682 = vmatpush3.bf16.msra.mxu1 %v13160_v33 }
0x13fa   :  { %10683 = vmatprep.subr.bf16.mxu1 %v16051_v54 }
0x13fd   :  { %10685 = vmatpush3.bf16.msra.mxu1 %v13164_v31 }
0x13fe   :  { %10686 = vmatprep.subr.bf16.mxu1 %v16051_v54 }
0x1401   :  { %10688 = vmatpush3.bf16.msra.mxu1 %v13168_v38 }
0x1402   :  { %10754 = vmatprep.subr.bf16.mxu1 %v12702_v29 }
0x1404   :  { %7927 = vmatmul.mubr.f32.vlgmr.msra.gmra.mrb[58].mxu1 %v14666_v1 }
0x1405   :  { %10756 = vmatpush1.bf16.msra.mxu1 %v12708_v34 }
0x1406   :  { %10758 = vmatprep.subr.bf16.mxu1 %v12713_v39 }
0x1409   :  { %10760 = vmatpush1.bf16.msra.mxu1 %v12716_v44 }
0x140a   :  { %10762 = vmatprep.subr.bf16.mxu1 %v12722_v49 }
0x140d   :  { %10764 = vmatpush1.bf16.msra.mxu1 %v12728_v58 }
0x140e   :  { %10766 = vmatprep.subr.bf16.mxu1 %v16137_v62 }
0x1411   :  { %10768 = vmatpush1.bf16.msra.mxu1 %v16138_v24 }
0x1412   :  { %10770 = vmatprep.subr.bf16.mxu1 %v16139_v55 }
0x1415   :  { %10772 = vmatpush1.bf16.msra.mxu1 %v16140_v63 }
0x1416   :  { %10774 = vmatprep.subr.bf16.mxu1 %v16232_v17 }
0x1419   :  { %10776 = vmatpush1.bf16.msra.mxu1 %v16233_v45 }
0x141a   :  { %10778 = vmatprep.subr.bf16.mxu1 %v16234_v52 }
0x141d   :  { %10780 = vmatpush1.bf16.msra.mxu1 %v16328_v8 }
0x141e   :  { %10782 = vmatprep.subr.bf16.mxu1 %v16423_v2 }
0x1421   :  { %10784 = vmatpush1.bf16.msra.mxu1 %v16518_v5 }
0x1422   :  { %10786 = vmatprep.subr.bf16.mxu1 %v16613_v28 }
0x1425   :  { %10788 = vmatpush1.bf16.msra.mxu1 %v16708_v13 }
0x1426   :  { %10790 = vmatprep.subr.bf16.mxu1 %v16803_v11 }
0x1429   :  { %10792 = vmatpush1.bf16.msra.mxu1 %v16898_v56 }
0x142a   :  { %10794 = vmatprep.subr.bf16.mxu1 %v16899_v43  ;;  %v4414_v43 = vadd.f32 %v4413_v18, %v13227_v12  ;;  %v16915_v18 = vld [vmem:[#allocation74_spill] sm:$0xff] }
0x142d   :  { %10796 = vmatpush1.bf16.msra.mxu1 %v16900_v15 }
0x142e   :  { %10798 = vmatprep.subr.bf16.mxu1 %v16901_v48 }
0x1431   :  { %10800 = vmatpush1.bf16.msra.mxu1 %v16902_v50 }
0x1432   :  { %10802 = vmatprep.subr.bf16.mxu1 %v16903_v22  ;;  %v16913_v22 = vld [vmem:[#allocation127_spill] sm:$0xff] }
0x1435   :  { %10804 = vmatpush1.bf16.msra.mxu1 %v16904_v42 }
0x1436   :  { %10806 = vmatprep.subr.bf16.mxu1 %v16905_v14  ;;  %v4412_v14 = vadd.f32 %v4411_v41, %v16164_v16 }
0x1439   :  { %10808 = vmatpush1.bf16.msra.mxu1 %v16906_v51 }
0x143a   :  { %10810 = vmatprep.subr.bf16.mxu1 %v16907_v20 }
0x143d   :  { %10812 = vmatpush1.bf16.msra.mxu1 %v16908_v37 }
0x143e   :  { %10814 = vmatprep.subr.bf16.mxu1 %v16909_v9 }
0x1441   :  { %10816 = vmatpush1.bf16.msra.mxu1 %v16910_v47 }
0x1442   :  { %10882 = vmatprep.subr.bf16.mxu1 %v16911_v27 }
0x14b7   :  { %v4507_v23 = vpop.f32.mrb[56].mxu1 }
0x14b8   :  { %v4508_v42 = vadd.f32 %v4507_v23, %v16913_v22  ;;  %v4509_v50 = vpop.f32.mrb[57].mxu1 }
0x14b9   :  { %v4510_v51 = vadd.f32 %v4509_v50, %v13218_v61 }
0x14ba   :  { %v4582_v20 = vadd.f32 %v4508_v42, %v4343_v36  ;;  %v16922_v36 = vld [vmem:[#allocation77_spill] sm:$0xff] }
0x14bb   :  { %v4589_v48 = vadd.f32 %v4510_v51, %v4412_v14 }
0x14bc   :  { %v7245_v37 = vmul.f32 -1.442695, %v4582_v20 }
0x14bd   :  { %v7246_v9 = vmul.f32 -1.442695, %v4589_v48 }
0x14be   :  { %12426 = vpow2.f32 %v7245_v37 }
0x14bf   :  { %12428 = vpow2.f32 %v7246_v9  ;;  %v16918_v9 = vld [vmem:[#allocation75_spill] sm:$0xff] }
0x14c8   :  { %v12427_v47 = vpop.eup %12426 }
0x14c9   :  { %v4586_v15 = vadd.f32 1.0, %v12427_v47  ;;  %v12429_v27 = vpop.eup %12428  ;;  %v16919_v47 = vld [vmem:[#allocation76_spill] sm:$0xff] }
0x14ca   :  { %v4593_v21 = vadd.f32 1.0, %v12429_v27  ;;  %v16920_v27 = vld [vmem:[#allocation95_spill] sm:$0xff] }
0x14cb   :  { %12430 = vrcp.f32 %v4586_v15 }
0x14cc   :  { %12432 = vrcp.f32 %v4593_v21  ;;  %v16923_v21 = vld [vmem:[#allocation78_spill] sm:$0xff] }
0x14d5   :  { %v12431_v59 = vpop.eup %12430 }
0x14d6   :  { %v4596_v23 = vmul.f32 %v12431_v59, %v4414_v43  ;;  %v12433_v14 = vpop.eup %12432  ;;  %v16916_v43 = vld [vmem:[#allocation91_spill] sm:$0xff]  ;;  %v16921_v59 = vld [vmem:[#allocation98_spill] sm:$0xff] }
0x14d7   :  { %v4578_v22 = vpop.f32.mrb[58].mxu1  ;;  %v4599_v51 = vsub.f32 1.0, %v12433_v14  ;;  %v4601_v37 = vmul.f32 %v12433_v14, %v14565_v40  ;;  %v16914_v40 = vld [vmem:[#allocation72_spill] sm:$0xff]  ;;  %v16928_v14 = vld [vmem:[#allocation103_spill] sm:$0xff] }
0x14d8   :  { %v4579_v41 = vadd.f32 %v4578_v22, %v13231_v46  ;;  %v7928_v50 = vpop.f32.mrb[59].mxu1  ;;  %v16917_v22 = vld [vmem:[#allocation94_spill] sm:$0xff] }
0x14d9   :  { %v16926_v50 = vld [vmem:[#allocation79_spill] sm:$0xff] }
0x14da   :  { %v4597_v42 = vadd.f32 %v4596_v23, %v4579_v41  ;;  %v16924_v23 = vld [vmem:[#allocation99_spill] sm:$0xff]  ;;  %v16925_v41 = vld [vmem:[#allocation102_spill] sm:$0xff] }
0x14dc   :  { %12434 = vtanh.f32 %v4597_v42  ;;  %v16927_v42 = vld [vmem:[#allocation80_spill] sm:$0xff] }
0x14e6   :  { %v12435_v48 = vpop.eup %12434 }
0x14e7   :  { %v4600_v20 = vmul.f32 %v12435_v48, %v4599_v51  ;;  %v16929_v51 = vld [vmem:[#allocation106_spill] sm:$0xff]  ;;  %v16930_v48 = vld [vmem:[#allocation81_spill] sm:$0xff] }
0x14e9   :  { %v14728_v15 = vadd.f32 %v4601_v37, %v4600_v20  ;;  %v16931_v20 = vld [vmem:[#allocation82_spill] sm:$0xff]  ;;  %v16932_v37 = vld [vmem:[#allocation107_spill] sm:$0xff] }
0x14eb   :  { %4667 = vmatprep.mubr.f32.mxu0 %v14728_v15  ;;  %4738 = vmatprep.mubr.f32.mxu1 %v14728_v15 }
0x14ec   :  { %4668 = vmatmul.mubr.f32.vlgmr.msra.gmra.mrb[40].mxu0 %v14666_v1  ;;  %4739 = vmatmul.mubr.f32.vlgmr.msra.gmra.mrb[60].mxu1 %v14666_v1 }
0x14ed   :  { %10820 = vmatpush1.bf16.msra.mxu0 %v16072_v26  ;;  %4809 = vmatprep.mubr.f32.mxu0 %v14728_v15 }
0x14ee   :  { %10822 = vmatprep.subr.bf16.mxu0 %v16073_v3  ;;  %10884 = vmatpush1.bf16.msra.mxu1 %v16074_v19 }
0x14ef   :  { %10886 = vmatprep.subr.bf16.mxu1 %v16075_v25  ;;  %4905 = vmatprep.mubr.f32.mxu1 %v15996_v53 }
0x14f1   :  { %10824 = vmatpush1.bf16.msra.mxu0 %v16914_v40 }
0x14f2   :  { %10826 = vmatprep.subr.bf16.mxu0 %v16915_v18  ;;  %10888 = vmatpush1.bf16.msra.mxu1 %v16916_v43 }
0x14f3   :  { %10890 = vmatprep.subr.bf16.mxu1 %v16917_v22 }
0x14f5   :  { %10828 = vmatpush1.bf16.msra.mxu0 %v16918_v9 }
0x14f6   :  { %10830 = vmatprep.subr.bf16.mxu0 %v16919_v47  ;;  %10892 = vmatpush1.bf16.msra.mxu1 %v16920_v27 }
0x14f7   :  { %10894 = vmatprep.subr.bf16.mxu1 %v16921_v59 }
0x14f9   :  { %10832 = vmatpush1.bf16.msra.mxu0 %v16922_v36  ;;  %v16933_v36 = vld [vmem:[#allocation110_spill] sm:$0xff] }
0x14fa   :  { %10834 = vmatprep.subr.bf16.mxu0 %v16923_v21  ;;  %10896 = vmatpush1.bf16.msra.mxu1 %v16924_v23  ;;  %v16934_v21 = vld [vmem:[#allocation83_spill] sm:$0xff]  ;;  %v16935_v23 = vld [vmem:[#allocation84_spill] sm:$0xff] }
0x14fb   :  { %10898 = vmatprep.subr.bf16.mxu1 %v16925_v41  ;;  %v16936_v41 = vld [vmem:[#allocation111_spill] sm:$0xff] }
0x14fd   :  { %10836 = vmatpush1.bf16.msra.mxu0 %v16926_v50  ;;  %v16937_v50 = vld [vmem:[#allocation114_spill] sm:$0xff] }
0x14fe   :  { %10838 = vmatprep.subr.bf16.mxu0 %v16927_v42  ;;  %10900 = vmatpush1.bf16.msra.mxu1 %v16928_v14  ;;  %v16938_v42 = vld [vmem:[#allocation85_spill] sm:$0xff]  ;;  %v16939_v14 = vld [vmem:[#allocation88_spill] sm:$0xff] }
0x14ff   :  { %10902 = vmatprep.subr.bf16.mxu1 %v16929_v51  ;;  %v16940_v51 = vld [vmem:[#allocation115_spill] sm:$0xff] }
0x1501   :  { %10840 = vmatpush1.bf16.msra.mxu0 %v16930_v48  ;;  %v16951_v48 = vld [vmem:[#allocation109_spill] sm:$0xff] }
0x1502   :  { %10842 = vmatprep.subr.bf16.mxu0 %v16931_v20  ;;  %10904 = vmatpush1.bf16.msra.mxu1 %v16932_v37  ;;  %v16941_v20 = vld [vmem:[#allocation89_spill] sm:$0xff]  ;;  %v16942_v37 = vld [vmem:[#allocation92_spill] sm:$0xff] }
0x1503   :  { %10906 = vmatprep.subr.bf16.mxu1 %v16933_v36  ;;  %v16943_v36 = vld [vmem:[#allocation93_spill] sm:$0xff] }
0x1505   :  { %10844 = vmatpush1.bf16.msra.mxu0 %v16934_v21  ;;  %v16944_v21 = vld [vmem:[#allocation96_spill] sm:$0xff] }
0x1506   :  { %10846 = vmatprep.subr.bf16.mxu0 %v16935_v23  ;;  %10908 = vmatpush1.bf16.msra.mxu1 %v16936_v41  ;;  %v16945_v23 = vld [vmem:[#allocation97_spill] sm:$0xff]  ;;  %v16946_v41 = vld [vmem:[#allocation100_spill] sm:$0xff] }
0x1507   :  { %10910 = vmatprep.subr.bf16.mxu1 %v16937_v50  ;;  %v16947_v50 = vld [vmem:[#allocation101_spill] sm:$0xff] }
0x1509   :  { %10848 = vmatpush1.bf16.msra.mxu0 %v16938_v42  ;;  %v16948_v42 = vld [vmem:[#allocation104_spill] sm:$0xff] }
0x150a   :  { %10850 = vmatprep.subr.bf16.mxu0 %v16939_v14  ;;  %10912 = vmatpush1.bf16.msra.mxu1 %v16940_v51  ;;  %v16949_v14 = vld [vmem:[#allocation105_spill] sm:$0xff]  ;;  %v16950_v51 = vld [vmem:[#allocation108_spill] sm:$0xff] }
0x150b   :  { %10913 = vmatprep.subr.bf16.mxu1 %v16051_v54 }
0x150d   :  { %10852 = vmatpush1.bf16.msra.mxu0 %v16941_v20  ;;  %v16952_v20 = vld [vmem:[#allocation112_spill] sm:$0xff] }
0x150e   :  { %10854 = vmatprep.subr.bf16.mxu0 %v16942_v37  ;;  %v16953_v37 = vld [vmem:[#allocation113_spill] sm:$0xff] }
0x1511   :  { %10856 = vmatpush1.bf16.msra.mxu0 %v16943_v36  ;;  %v16954_v36 = vld [vmem:[#allocation116_spill] sm:$0xff] }
0x1512   :  { %10858 = vmatprep.subr.bf16.mxu0 %v16944_v21  ;;  %v16955_v21 = vld [vmem:[#allocation117_spill] sm:$0xff] }
0x1515   :  { %10860 = vmatpush1.bf16.msra.mxu0 %v16945_v23  ;;  %v16956_v23 = vld [vmem:[#allocation12_spill] sm:$0xff] }
0x1516   :  { %10862 = vmatprep.subr.bf16.mxu0 %v16946_v41  ;;  %v16967_v41 = vld [vmem:[#allocation24_spill] sm:$0xff] }
0x1519   :  { %10864 = vmatpush1.bf16.msra.mxu0 %v16947_v50  ;;  %v16957_v50 = vld [vmem:[#allocation13_spill] sm:$0xff] }
0x151a   :  { %10866 = vmatprep.subr.bf16.mxu0 %v16948_v42  ;;  %v16958_v42 = vld [vmem:[#allocation14_spill] sm:$0xff] }
0x151d   :  { %10868 = vmatpush1.bf16.msra.mxu0 %v16949_v14  ;;  %v16959_v14 = vld [vmem:[#allocation15_spill] sm:$0xff] }
0x151e   :  { %10870 = vmatprep.subr.bf16.mxu0 %v16950_v51  ;;  %v16960_v51 = vld [vmem:[#allocation16_spill] sm:$0xff] }
0x1521   :  { %10872 = vmatpush1.bf16.msra.mxu0 %v16951_v48  ;;  %v16961_v48 = vld [vmem:[#allocation17_spill] sm:$0xff] }
0x1522   :  { %10874 = vmatprep.subr.bf16.mxu0 %v16952_v20  ;;  %v16962_v20 = vld [vmem:[#allocation18_spill] sm:$0xff] }
0x1525   :  { %10876 = vmatpush1.bf16.msra.mxu0 %v16953_v37  ;;  %v16963_v37 = vld [vmem:[#allocation19_spill] sm:$0xff] }
0x1526   :  { %10878 = vmatprep.subr.bf16.mxu0 %v16954_v36  ;;  %v16964_v36 = vld [vmem:[#allocation20_spill] sm:$0xff] }
0x1529   :  { %10880 = vmatpush1.bf16.msra.mxu0 %v16955_v21  ;;  %v16965_v21 = vld [vmem:[#allocation21_spill] sm:$0xff] }
0x152a   :  { %10938 = vmatprep.subr.bf16.mxu0 %v16956_v23  ;;  %v16966_v23 = vld [vmem:[#allocation22_spill] sm:$0xff] }
0x152c   :  { %4810 = vmatmul.mubr.f32.vlgmr.msra.gmra.mrb[42].mxu0 %v14666_v1 }
0x152d   :  { %10940 = vmatpush1.bf16.msra.mxu0 %v16957_v50  ;;  %v16968_v50 = vld [vmem:[#allocation25_spill] sm:$0xff] }
0x152e   :  { %10942 = vmatprep.subr.bf16.mxu0 %v16958_v42  ;;  %v16969_v42 = vld [vmem:[#allocation28_spill] sm:$0xff] }
0x1531   :  { %10944 = vmatpush1.bf16.msra.mxu0 %v16959_v14  ;;  %v16970_v14 = vld [vmem:[#allocation29_spill] sm:$0xff] }
0x1532   :  { %10946 = vmatprep.subr.bf16.mxu0 %v16960_v51  ;;  %v16971_v51 = vld [vmem:[#allocation32_spill] sm:$0xff] }
0x1535   :  { %10948 = vmatpush1.bf16.msra.mxu0 %v16961_v48  ;;  %v16972_v48 = vld [vmem:[#allocation33_spill] sm:$0xff] }
0x1536   :  { %10950 = vmatprep.subr.bf16.mxu0 %v16962_v20  ;;  %v16973_v20 = vld [vmem:[#allocation36_spill] sm:$0xff] }
0x1539   :  { %10952 = vmatpush1.bf16.msra.mxu0 %v16963_v37  ;;  %v16974_v37 = vld [vmem:[#allocation37_spill] sm:$0xff] }
0x153a   :  { %10954 = vmatprep.subr.bf16.mxu0 %v16964_v36  ;;  %v16975_v36 = vld [vmem:[#allocation40_spill] sm:$0xff] }
0x153d   :  { %10956 = vmatpush1.bf16.msra.mxu0 %v16965_v21  ;;  %v16976_v21 = vld [vmem:[#allocation41_spill] sm:$0xff] }
0x153e   :  { %10958 = vmatprep.subr.bf16.mxu0 %v16966_v23  ;;  %v16977_v23 = vld [vmem:[#allocation44_spill] sm:$0xff] }
0x1541   :  { %10960 = vmatpush1.bf16.msra.mxu0 %v16967_v41  ;;  %v16978_v41 = vld [vmem:[#allocation45_spill] sm:$0xff] }
0x1542   :  { %10962 = vmatprep.subr.bf16.mxu0 %v16968_v50  ;;  %v16979_v50 = vld [vmem:[#allocation48_spill] sm:$0xff] }
0x1545   :  { %10964 = vmatpush1.bf16.msra.mxu0 %v16969_v42  ;;  %v16980_v42 = vld [vmem:[#allocation49_spill] sm:$0xff] }
0x1546   :  { %10966 = vmatprep.subr.bf16.mxu0 %v16970_v14  ;;  %v16981_v14 = vld [vmem:[#allocation52_spill] sm:$0xff] }
0x1549   :  { %10968 = vmatpush1.bf16.msra.mxu0 %v16971_v51  ;;  %v16982_v51 = vld [vmem:[#allocation53_spill] sm:$0xff] }
0x154a   :  { %10970 = vmatprep.subr.bf16.mxu0 %v16972_v48  ;;  %v16983_v48 = vld [vmem:[#allocation56_spill] sm:$0xff] }
0x154d   :  { %10972 = vmatpush1.bf16.msra.mxu0 %v16973_v20  ;;  %v16984_v20 = vld [vmem:[#allocation57_spill] sm:$0xff] }
0x154e   :  { %10974 = vmatprep.subr.bf16.mxu0 %v16974_v37  ;;  %v16985_v37 = vld [vmem:[#allocation60_spill] sm:$0xff] }
0x1551   :  { %10976 = vmatpush1.bf16.msra.mxu0 %v16975_v36  ;;  %v16986_v36 = vld [vmem:[#allocation61_spill] sm:$0xff] }
0x1552   :  { %10978 = vmatprep.subr.bf16.mxu0 %v16976_v21  ;;  %v16987_v21 = vld [vmem:[#allocation64_spill] sm:$0xff] }
0x1555   :  { %10980 = vmatpush1.bf16.msra.mxu0 %v16977_v23  ;;  %v16988_v23 = vld [vmem:[#allocation66_spill] sm:$0xff] }
0x1556   :  { %10982 = vmatprep.subr.bf16.mxu0 %v16978_v41  ;;  %v401_v41 = vpop.permute.xlu0 %400 }
0x1559   :  { %10984 = vmatpush1.bf16.msra.mxu0 %v16979_v50  ;;  %v16989_v50 = vld [vmem:[#allocation118_spill] sm:$0xff] }
0x155a   :  { %10986 = vmatprep.subr.bf16.mxu0 %v16980_v42  ;;  %v474_v59 = vmul.f32 %v16989_v50, %v401_v41  ;;  %v16990_v42 = vld [vmem:[#allocation119_spill] sm:$0xff] }
0x155b   :  { %v475_v27 = vmul.f32 %v16990_v42, %v401_v41 }
0x155d   :  { %10988 = vmatpush1.bf16.msra.mxu0 %v16981_v14 }
0x155e   :  { %10990 = vmatprep.subr.bf16.mxu0 %v16982_v51  ;;  %v16991_v51 = vld [vmem:[#allocation120_spill] sm:$0xff] }
0x155f   :  { %v538_v9 = vadd.f32 %v16991_v51, %v474_v59  ;;  %v476_v59 = vmul.f32 %v16136_v10, %v401_v41  ;;  %v16994_v41 = vld [vmem:[#allocation54_spill] sm:$0xff] }
0x1561   :  { %10992 = vmatpush1.bf16.msra.mxu0 %v16983_v48  ;;  %v16992_v48 = vld [vmem:[#allocation121_spill] sm:$0xff] }
0x1562   :  { %10994 = vmatprep.subr.bf16.mxu0 %v16984_v20 }
0x1565   :  { %10996 = vmatpush1.bf16.msra.mxu0 %v16985_v37 }
0x1566   :  { %10998 = vmatprep.subr.bf16.mxu0 %v16986_v36 }
0x1569   :  { %11000 = vmatpush1.bf16.msra.mxu0 %v16987_v21  ;;  %v539_v21 = vadd.f32 %v16327_v60, %v475_v27 }
0x156a   :  { %11066 = vmatprep.subr.bf16.mxu0 %v16988_v23 }
0x15bf   :  { %v4669_v14 = vpop.f32.mrb[40].mxu0  ;;  %v4740_v47 = vpop.f32.mrb[60].mxu1 }
0x15c0   :  { %v4670_v22 = vadd.f32 %v4669_v14, %v16992_v48  ;;  %v4671_v20 = vpop.f32.mrb[41].mxu0  ;;  %v14821_v43 = vpop.f32.mrb[61].mxu1  ;;  %v4741_v48 = vadd.f32 %v4740_v47, %v13128_v57  ;;  %v16993_v47 = vld [vmem:[#allocation51_spill] sm:$0xff] }
0x15c1   :  { %v4672_v36 = vadd.f32 %v4671_v20, %v16134_v32  ;;  %v540_v20 = vadd.f32 %v13132_v30, %v476_v59  ;;  %v17000_v59 = vld [vmem:[#allocation65_spill] sm:$0xff] }
0x15c2   :  { %v4820_v37 = vadd.f32 %v4670_v22, %v538_v9 }
0x15c3   :  { %v4827_v18 = vadd.f32 %v4672_v36, %v539_v21 }
0x15c4   :  { %v7247_v23 = vmul.f32 -1.442695, %v4820_v37  ;;  %v16999_v37 = vld [vmem:[#allocation63_spill] sm:$0xff] }
0x15c5   :  { %v7248_v50 = vmul.f32 -1.442695, %v4827_v18 }
0x15c6   :  { %12436 = vpow2.f32 %v7247_v23 }
0x15c7   :  { %12438 = vpow2.f32 %v7248_v50  ;;  %v16995_v50 = vld [vmem:[#allocation55_spill] sm:$0xff] }
0x15d0   :  { %v12437_v42 = vpop.eup %12436 }
0x15d1   :  { %v4824_v40 = vadd.f32 1.0, %v12437_v42  ;;  %v12439_v25 = vpop.eup %12438  ;;  %v16996_v42 = vld [vmem:[#allocation58_spill] sm:$0xff] }
0x15d2   :  { %v4831_v14 = vadd.f32 1.0, %v12439_v25 }
0x15d3   :  { %12440 = vrcp.f32 %v4824_v40 }
0x15d4   :  { %12442 = vrcp.f32 %v4831_v14  ;;  %v17001_v14 = vld [vmem:[#allocation67_spill] sm:$0xff] }
0x15dd   :  { %v12441_v51 = vpop.eup %12440 }
0x15de   :  { %v4834_v22 = vmul.f32 %v12441_v51, %v4741_v48  ;;  %v12443_v27 = vpop.eup %12442  ;;  %v16997_v51 = vld [vmem:[#allocation59_spill] sm:$0xff]  ;;  %v16998_v48 = vld [vmem:[#allocation62_spill] sm:$0xff] }
0x15df   :  { %v4837_v36 = vsub.f32 1.0, %v12443_v27  ;;  %v4839_v21 = vmul.f32 %v12443_v27, %v14666_v1  ;;  %v17005_v27 = vld [vmem:[#allocation86_spill] sm:$0xff] }
0x15e0   :  { %v4835_v9 = vadd.f32 %v4834_v22, %v540_v20  ;;  %v17002_v20 = vld [vmem:[#allocation69_spill] sm:$0xff]  ;;  %v17003_v22 = vld [vmem:[#allocation71_spill] sm:$0xff] }
0x15e2   :  { %12444 = vtanh.f32 %v4835_v9  ;;  %v17004_v9 = vld [vmem:[#allocation73_spill] sm:$0xff] }
0x15ec   :  { %v12445_v18 = vpop.eup %12444 }
0x15ed   :  { %v4838_v23 = vmul.f32 %v12445_v18, %v4837_v36  ;;  %v17006_v18 = vld [vmem:[#allocation126_spill] sm:$0xff] }
0x15ef   :  { %v14829_v40 = vadd.f32 %v4839_v21, %v4838_v23  ;;  %v4743_v21 = vadd.f32 %v14821_v43, %v17006_v18  ;;  %v17007_v23 = vld [vmem:[#allocation127_spill] sm:$0xff] }
0x15f1   :  { %4906 = vmatmul.mubr.f32.vlgmr.msra.gmra.mrb[62].mxu1 %v14829_v40 }
0x15f2   :  { %10915 = vmatpush3.bf16.msra.mxu1 %v13136_v6  ;;  %7961 = vmatprep.mubr.msk.f32.mxu1 %vm12635_vm0, %v15996_v53 }
0x15f3   :  { %10916 = vmatprep.subr.bf16.mxu1 %v16051_v54 }
0x15f6   :  { %10918 = vmatpush3.bf16.msra.mxu1 %v13142_v4 }
0x15f7   :  { %10919 = vmatprep.subr.bf16.mxu1 %v16051_v54 }
0x15fa   :  { %10921 = vmatpush3.bf16.msra.mxu1 %v13148_v0 }
0x15fb   :  { %10922 = vmatprep.subr.bf16.mxu1 %v16051_v54 }
0x15fe   :  { %10924 = vmatpush3.bf16.msra.mxu1 %v13152_v35 }
0x15ff   :  { %v4811_v25 = vpop.f32.mrb[42].mxu0  ;;  %10925 = vmatprep.subr.bf16.mxu1 %v16051_v54 }
0x1600   :  { %v4813_v1 = vpop.f32.mrb[43].mxu0 }
0x1602   :  { %10927 = vmatpush3.bf16.msra.mxu1 %v13156_v7 }
0x1603   :  { %10928 = vmatprep.subr.bf16.mxu1 %v16051_v54 }
0x1606   :  { %10930 = vmatpush3.bf16.msra.mxu1 %v13160_v33 }
0x1607   :  { %10931 = vmatprep.subr.bf16.mxu1 %v16051_v54 }
0x160a   :  { %10933 = vmatpush3.bf16.msra.mxu1 %v13164_v31 }
0x160b   :  { %10934 = vmatprep.subr.bf16.mxu1 %v16051_v54 }
0x160e   :  { %10936 = vmatpush3.bf16.msra.mxu1 %v13168_v38 }
0x160f   :  { %11002 = vmatprep.subr.bf16.mxu1 %v12702_v29 }
0x1611   :  { %7962 = vmatmul.mubr.f32.vlgmr.msra.gmra.mrb[64].mxu1 %v14829_v40 }
0x1612   :  { %11004 = vmatpush1.bf16.msra.mxu1 %v12708_v34 }
0x1613   :  { %11006 = vmatprep.subr.bf16.mxu1 %v12713_v39 }
0x1616   :  { %11008 = vmatpush1.bf16.msra.mxu1 %v12716_v44 }
0x1617   :  { %11010 = vmatprep.subr.bf16.mxu1 %v12722_v49 }
0x161a   :  { %11012 = vmatpush1.bf16.msra.mxu1 %v12728_v58 }
0x161b   :  { %11014 = vmatprep.subr.bf16.mxu1 %v16137_v62 }
0x161e   :  { %11016 = vmatpush1.bf16.msra.mxu1 %v16138_v24 }
0x161f   :  { %11018 = vmatprep.subr.bf16.mxu1 %v16139_v55 }
0x1622   :  { %11020 = vmatpush1.bf16.msra.mxu1 %v16140_v63 }
0x1623   :  { %11022 = vmatprep.subr.bf16.mxu1 %v16232_v17 }
0x1626   :  { %11024 = vmatpush1.bf16.msra.mxu1 %v16233_v45 }
0x1627   :  { %11026 = vmatprep.subr.bf16.mxu1 %v16234_v52 }
0x162a   :  { %11028 = vmatpush1.bf16.msra.mxu1 %v16328_v8 }
0x162b   :  { %11030 = vmatprep.subr.bf16.mxu1 %v16423_v2 }
0x162e   :  { %11032 = vmatpush1.bf16.msra.mxu1 %v16518_v5 }
0x162f   :  { %11034 = vmatprep.subr.bf16.mxu1 %v16613_v28 }
0x1632   :  { %11036 = vmatpush1.bf16.msra.mxu1 %v16708_v13 }
0x1633   :  { %11038 = vmatprep.subr.bf16.mxu1 %v16803_v11 }
0x1636   :  { %11040 = vmatpush1.bf16.msra.mxu1 %v16898_v56 }
0x1637   :  { %11042 = vmatprep.subr.bf16.mxu1 %v16993_v47 }
0x163a   :  { %11044 = vmatpush1.bf16.msra.mxu1 %v16994_v41  ;;  %v4814_v41 = vadd.f32 %v4813_v1, %v13227_v12  ;;  %v17008_v1 = vld [vmem:[#allocation90_spill] sm:$0xff] }
0x163b   :  { %11046 = vmatprep.subr.bf16.mxu1 %v16995_v50 }
0x163e   :  { %11048 = vmatpush1.bf16.msra.mxu1 %v16996_v42 }
0x163f   :  { %11050 = vmatprep.subr.bf16.mxu1 %v16997_v51 }
0x1642   :  { %11052 = vmatpush1.bf16.msra.mxu1 %v16998_v48 }
0x1643   :  { %11054 = vmatprep.subr.bf16.mxu1 %v16999_v37  ;;  %v4812_v37 = vadd.f32 %v4811_v25, %v16164_v16 }
0x1646   :  { %11056 = vmatpush1.bf16.msra.mxu1 %v17000_v59 }
0x1647   :  { %11058 = vmatprep.subr.bf16.mxu1 %v17001_v14 }
0x164a   :  { %11060 = vmatpush1.bf16.msra.mxu1 %v17002_v20 }
0x164b   :  { %11062 = vmatprep.subr.bf16.mxu1 %v17003_v22 }
0x164e   :  { %11064 = vmatpush1.bf16.msra.mxu1 %v17004_v9 }
0x164f   :  { %11130 = vmatprep.subr.bf16.mxu1 %v17005_v27 }
0x16c4   :  { %v4907_v36 = vpop.f32.mrb[62].mxu1 }
0x16c5   :  { %v4908_v48 = vadd.f32 %v4907_v36, %v17007_v23  ;;  %v4909_v51 = vpop.f32.mrb[63].mxu1 }
0x16c6   :  { %v4910_v59 = vadd.f32 %v4909_v51, %v13218_v61 }
0x16c7   :  { %v4982_v14 = vadd.f32 %v4908_v48, %v4743_v21  ;;  %v17015_v21 = vld [vmem:[#allocation95_spill] sm:$0xff] }
0x16c8   :  { %v4989_v42 = vadd.f32 %v4910_v59, %v4812_v37 }
0x16c9   :  { %v7249_v20 = vmul.f32 -1.442695, %v4982_v14 }
0x16ca   :  { %v7250_v22 = vmul.f32 -1.442695, %v4989_v42 }
0x16cb   :  { %12446 = vpow2.f32 %v7249_v20 }
0x16cc   :  { %12448 = vpow2.f32 %v7250_v22  ;;  %v17011_v22 = vld [vmem:[#allocation91_spill] sm:$0xff] }
0x16d5   :  { %v12447_v9 = vpop.eup %12446 }
0x16d6   :  { %v4986_v50 = vadd.f32 1.0, %v12447_v9  ;;  %v12449_v27 = vpop.eup %12448  ;;  %v17012_v9 = vld [vmem:[#allocation94_spill] sm:$0xff] }
0x16d7   :  { %v4993_v43 = vadd.f32 1.0, %v12449_v27  ;;  %v17013_v27 = vld [vmem:[#allocation75_spill] sm:$0xff] }
0x16d8   :  { %12450 = vrcp.f32 %v4986_v50 }
0x16d9   :  { %12452 = vrcp.f32 %v4993_v43  ;;  %v17017_v43 = vld [vmem:[#allocation77_spill] sm:$0xff] }
0x16e2   :  { %v12451_v18 = vpop.eup %12450 }
0x16e3   :  { %v4996_v36 = vmul.f32 %v12451_v18, %v4814_v41  ;;  %v12453_v37 = vpop.eup %12452  ;;  %v17010_v41 = vld [vmem:[#allocation74_spill] sm:$0xff]  ;;  %v17014_v18 = vld [vmem:[#allocation76_spill] sm:$0xff] }
0x16e4   :  { %v4978_v23 = vpop.f32.mrb[64].mxu1  ;;  %v4999_v59 = vsub.f32 1.0, %v12453_v37  ;;  %v5001_v20 = vmul.f32 %v12453_v37, %v14728_v15  ;;  %v17009_v15 = vld [vmem:[#allocation72_spill] sm:$0xff] }
0x16e5   :  { %v4979_v25 = vadd.f32 %v4978_v23, %v13231_v46  ;;  %v7963_v51 = vpop.f32.mrb[65].mxu1  ;;  %v17016_v23 = vld [vmem:[#allocation98_spill] sm:$0xff]  ;;  %v17022_v37 = vld [vmem:[#allocation80_spill] sm:$0xff] }
0x16e6   :  { %v17020_v51 = vld [vmem:[#allocation102_spill] sm:$0xff] }
0x16e7   :  { %v4997_v48 = vadd.f32 %v4996_v36, %v4979_v25  ;;  %v17018_v36 = vld [vmem:[#allocation78_spill] sm:$0xff]  ;;  %v17019_v25 = vld [vmem:[#allocation99_spill] sm:$0xff] }
0x16e9   :  { %12454 = vtanh.f32 %v4997_v48  ;;  %v17021_v48 = vld [vmem:[#allocation79_spill] sm:$0xff] }
0x16f3   :  { %v12455_v42 = vpop.eup %12454 }
0x16f4   :  { %v5000_v14 = vmul.f32 %v12455_v42, %v4999_v59  ;;  %v17023_v59 = vld [vmem:[#allocation103_spill] sm:$0xff]  ;;  %v17024_v42 = vld [vmem:[#allocation106_spill] sm:$0xff] }
0x16f6   :  { %v14891_v50 = vadd.f32 %v5001_v20, %v5000_v14  ;;  %v17025_v14 = vld [vmem:[#allocation81_spill] sm:$0xff]  ;;  %v17026_v20 = vld [vmem:[#allocation82_spill] sm:$0xff] }
0x16f8   :  { %5067 = vmatprep.mubr.f32.mxu0 %v14891_v50  ;;  %5138 = vmatprep.mubr.f32.mxu1 %v14891_v50 }
0x16f9   :  { %5068 = vmatmul.mubr.f32.vlgmr.msra.gmra.mrb[44].mxu0 %v14829_v40  ;;  %5139 = vmatmul.mubr.f32.vlgmr.msra.gmra.mrb[66].mxu1 %v14829_v40 }
0x16fa   :  { %11068 = vmatpush1.bf16.msra.mxu0 %v16072_v26  ;;  %5209 = vmatprep.mubr.f32.mxu0 %v14891_v50 }
0x16fb   :  { %11070 = vmatprep.subr.bf16.mxu0 %v16073_v3  ;;  %11132 = vmatpush1.bf16.msra.mxu1 %v16074_v19 }
0x16fc   :  { %11134 = vmatprep.subr.bf16.mxu1 %v17008_v1  ;;  %5305 = vmatprep.mubr.f32.mxu1 %v15996_v53 }
0x16fe   :  { %11072 = vmatpush1.bf16.msra.mxu0 %v17009_v15 }
0x16ff   :  { %11074 = vmatprep.subr.bf16.mxu0 %v17010_v41  ;;  %11136 = vmatpush1.bf16.msra.mxu1 %v17011_v22 }
0x1700   :  { %11138 = vmatprep.subr.bf16.mxu1 %v17012_v9 }
0x1702   :  { %11076 = vmatpush1.bf16.msra.mxu0 %v17013_v27 }
0x1703   :  { %11078 = vmatprep.subr.bf16.mxu0 %v17014_v18  ;;  %11140 = vmatpush1.bf16.msra.mxu1 %v17015_v21 }
0x1704   :  { %11142 = vmatprep.subr.bf16.mxu1 %v17016_v23  ;;  %v17027_v23 = vld [vmem:[#allocation107_spill] sm:$0xff] }
0x1706   :  { %11080 = vmatpush1.bf16.msra.mxu0 %v17017_v43  ;;  %v17028_v43 = vld [vmem:[#allocation110_spill] sm:$0xff] }
0x1707   :  { %11082 = vmatprep.subr.bf16.mxu0 %v17018_v36  ;;  %11144 = vmatpush1.bf16.msra.mxu1 %v17019_v25  ;;  %v17029_v36 = vld [vmem:[#allocation83_spill] sm:$0xff]  ;;  %v17030_v25 = vld [vmem:[#allocation84_spill] sm:$0xff] }
0x1708   :  { %11146 = vmatprep.subr.bf16.mxu1 %v17020_v51  ;;  %v17031_v51 = vld [vmem:[#allocation111_spill] sm:$0xff] }
0x170a   :  { %11084 = vmatpush1.bf16.msra.mxu0 %v17021_v48  ;;  %v17032_v48 = vld [vmem:[#allocation114_spill] sm:$0xff] }
0x170b   :  { %11086 = vmatprep.subr.bf16.mxu0 %v17022_v37  ;;  %11148 = vmatpush1.bf16.msra.mxu1 %v17023_v59  ;;  %v17033_v37 = vld [vmem:[#allocation85_spill] sm:$0xff]  ;;  %v17034_v59 = vld [vmem:[#allocation88_spill] sm:$0xff] }
0x170c   :  { %11150 = vmatprep.subr.bf16.mxu1 %v17024_v42  ;;  %v17035_v42 = vld [vmem:[#allocation115_spill] sm:$0xff] }
0x170e   :  { %11088 = vmatpush1.bf16.msra.mxu0 %v17025_v14  ;;  %v17046_v14 = vld [vmem:[#allocation109_spill] sm:$0xff] }
0x170f   :  { %11090 = vmatprep.subr.bf16.mxu0 %v17026_v20  ;;  %11152 = vmatpush1.bf16.msra.mxu1 %v17027_v23  ;;  %v17036_v20 = vld [vmem:[#allocation89_spill] sm:$0xff]  ;;  %v17037_v23 = vld [vmem:[#allocation92_spill] sm:$0xff] }
0x1710   :  { %11154 = vmatprep.subr.bf16.mxu1 %v17028_v43  ;;  %v17038_v43 = vld [vmem:[#allocation93_spill] sm:$0xff] }
0x1712   :  { %11092 = vmatpush1.bf16.msra.mxu0 %v17029_v36  ;;  %v17039_v36 = vld [vmem:[#allocation96_spill] sm:$0xff] }
0x1713   :  { %11094 = vmatprep.subr.bf16.mxu0 %v17030_v25  ;;  %11156 = vmatpush1.bf16.msra.mxu1 %v17031_v51  ;;  %v17040_v25 = vld [vmem:[#allocation97_spill] sm:$0xff]  ;;  %v17041_v51 = vld [vmem:[#allocation100_spill] sm:$0xff] }
0x1714   :  { %11158 = vmatprep.subr.bf16.mxu1 %v17032_v48  ;;  %v17042_v48 = vld [vmem:[#allocation101_spill] sm:$0xff] }
0x1716   :  { %11096 = vmatpush1.bf16.msra.mxu0 %v17033_v37  ;;  %v17043_v37 = vld [vmem:[#allocation104_spill] sm:$0xff] }
0x1717   :  { %11098 = vmatprep.subr.bf16.mxu0 %v17034_v59  ;;  %11160 = vmatpush1.bf16.msra.mxu1 %v17035_v42  ;;  %v17044_v59 = vld [vmem:[#allocation105_spill] sm:$0xff]  ;;  %v17045_v42 = vld [vmem:[#allocation108_spill] sm:$0xff] }
0x1718   :  { %11161 = vmatprep.subr.bf16.mxu1 %v16051_v54 }
0x171a   :  { %11100 = vmatpush1.bf16.msra.mxu0 %v17036_v20  ;;  %v17047_v20 = vld [vmem:[#allocation112_spill] sm:$0xff] }
0x171b   :  { %11102 = vmatprep.subr.bf16.mxu0 %v17037_v23  ;;  %v17048_v23 = vld [vmem:[#allocation113_spill] sm:$0xff] }
0x171e   :  { %11104 = vmatpush1.bf16.msra.mxu0 %v17038_v43  ;;  %v17049_v43 = vld [vmem:[#allocation116_spill] sm:$0xff] }
0x171f   :  { %11106 = vmatprep.subr.bf16.mxu0 %v17039_v36  ;;  %v17050_v36 = vld [vmem:[#allocation117_spill] sm:$0xff] }
0x1722   :  { %11108 = vmatpush1.bf16.msra.mxu0 %v17040_v25  ;;  %v17051_v25 = vld [vmem:[#allocation12_spill] sm:$0xff] }
0x1723   :  { %11110 = vmatprep.subr.bf16.mxu0 %v17041_v51  ;;  %v17062_v51 = vld [vmem:[#allocation24_spill] sm:$0xff] }
0x1726   :  { %11112 = vmatpush1.bf16.msra.mxu0 %v17042_v48  ;;  %v17052_v48 = vld [vmem:[#allocation13_spill] sm:$0xff] }
0x1727   :  { %11114 = vmatprep.subr.bf16.mxu0 %v17043_v37  ;;  %v17053_v37 = vld [vmem:[#allocation14_spill] sm:$0xff] }
0x172a   :  { %11116 = vmatpush1.bf16.msra.mxu0 %v17044_v59  ;;  %v17054_v59 = vld [vmem:[#allocation15_spill] sm:$0xff] }
0x172b   :  { %11118 = vmatprep.subr.bf16.mxu0 %v17045_v42  ;;  %v17055_v42 = vld [vmem:[#allocation16_spill] sm:$0xff] }
0x172e   :  { %11120 = vmatpush1.bf16.msra.mxu0 %v17046_v14  ;;  %v17056_v14 = vld [vmem:[#allocation17_spill] sm:$0xff] }
0x172f   :  { %11122 = vmatprep.subr.bf16.mxu0 %v17047_v20  ;;  %v17057_v20 = vld [vmem:[#allocation18_spill] sm:$0xff] }
0x1732   :  { %11124 = vmatpush1.bf16.msra.mxu0 %v17048_v23  ;;  %v17058_v23 = vld [vmem:[#allocation19_spill] sm:$0xff] }
0x1733   :  { %11126 = vmatprep.subr.bf16.mxu0 %v17049_v43  ;;  %v17059_v43 = vld [vmem:[#allocation20_spill] sm:$0xff] }
0x1736   :  { %11128 = vmatpush1.bf16.msra.mxu0 %v17050_v36  ;;  %v17060_v36 = vld [vmem:[#allocation21_spill] sm:$0xff] }
0x1737   :  { %11186 = vmatprep.subr.bf16.mxu0 %v17051_v25  ;;  %v17061_v25 = vld [vmem:[#allocation22_spill] sm:$0xff] }
0x1739   :  { %5210 = vmatmul.mubr.f32.vlgmr.msra.gmra.mrb[46].mxu0 %v14829_v40 }
0x173a   :  { %11188 = vmatpush1.bf16.msra.mxu0 %v17052_v48  ;;  %v17063_v48 = vld [vmem:[#allocation25_spill] sm:$0xff] }
0x173b   :  { %11190 = vmatprep.subr.bf16.mxu0 %v17053_v37  ;;  %v17064_v37 = vld [vmem:[#allocation28_spill] sm:$0xff] }
0x173e   :  { %11192 = vmatpush1.bf16.msra.mxu0 %v17054_v59  ;;  %v17065_v59 = vld [vmem:[#allocation29_spill] sm:$0xff] }
0x173f   :  { %11194 = vmatprep.subr.bf16.mxu0 %v17055_v42  ;;  %v17066_v42 = vld [vmem:[#allocation32_spill] sm:$0xff] }
0x1742   :  { %11196 = vmatpush1.bf16.msra.mxu0 %v17056_v14  ;;  %v17067_v14 = vld [vmem:[#allocation33_spill] sm:$0xff] }
0x1743   :  { %11198 = vmatprep.subr.bf16.mxu0 %v17057_v20  ;;  %v17068_v20 = vld [vmem:[#allocation36_spill] sm:$0xff] }
0x1746   :  { %11200 = vmatpush1.bf16.msra.mxu0 %v17058_v23  ;;  %v17069_v23 = vld [vmem:[#allocation37_spill] sm:$0xff] }
0x1747   :  { %11202 = vmatprep.subr.bf16.mxu0 %v17059_v43  ;;  %v17070_v43 = vld [vmem:[#allocation40_spill] sm:$0xff] }
0x174a   :  { %11204 = vmatpush1.bf16.msra.mxu0 %v17060_v36  ;;  %v17071_v36 = vld [vmem:[#allocation41_spill] sm:$0xff] }
0x174b   :  { %11206 = vmatprep.subr.bf16.mxu0 %v17061_v25  ;;  %v17072_v25 = vld [vmem:[#allocation44_spill] sm:$0xff] }
0x174e   :  { %11208 = vmatpush1.bf16.msra.mxu0 %v17062_v51  ;;  %v17073_v51 = vld [vmem:[#allocation45_spill] sm:$0xff] }
0x174f   :  { %11210 = vmatprep.subr.bf16.mxu0 %v17063_v48  ;;  %v17074_v48 = vld [vmem:[#allocation48_spill] sm:$0xff] }
0x1752   :  { %11212 = vmatpush1.bf16.msra.mxu0 %v17064_v37  ;;  %v17075_v37 = vld [vmem:[#allocation49_spill] sm:$0xff] }
0x1753   :  { %11214 = vmatprep.subr.bf16.mxu0 %v17065_v59  ;;  %v17076_v59 = vld [vmem:[#allocation52_spill] sm:$0xff] }
0x1756   :  { %11216 = vmatpush1.bf16.msra.mxu0 %v17066_v42  ;;  %v17077_v42 = vld [vmem:[#allocation53_spill] sm:$0xff] }
0x1757   :  { %11218 = vmatprep.subr.bf16.mxu0 %v17067_v14  ;;  %v17078_v14 = vld [vmem:[#allocation56_spill] sm:$0xff] }
0x175a   :  { %11220 = vmatpush1.bf16.msra.mxu0 %v17068_v20  ;;  %v17079_v20 = vld [vmem:[#allocation57_spill] sm:$0xff] }
0x175b   :  { %11222 = vmatprep.subr.bf16.mxu0 %v17069_v23  ;;  %v17080_v23 = vld [vmem:[#allocation60_spill] sm:$0xff] }
0x175e   :  { %11224 = vmatpush1.bf16.msra.mxu0 %v17070_v43  ;;  %v17081_v43 = vld [vmem:[#allocation61_spill] sm:$0xff] }
0x175f   :  { %11226 = vmatprep.subr.bf16.mxu0 %v17071_v36  ;;  %v17082_v36 = vld [vmem:[#allocation64_spill] sm:$0xff] }
0x1762   :  { %11228 = vmatpush1.bf16.msra.mxu0 %v17072_v25  ;;  %v17083_v25 = vld [vmem:[#allocation66_spill] sm:$0xff] }
0x1763   :  { %11230 = vmatprep.subr.bf16.mxu0 %v17073_v51  ;;  %v406_v51 = vpop.permute.xlu1 %405 }
0x1766   :  { %11232 = vmatpush1.bf16.msra.mxu0 %v17074_v48  ;;  %v17084_v48 = vld [vmem:[#allocation118_spill] sm:$0xff] }
0x1767   :  { %11234 = vmatprep.subr.bf16.mxu0 %v17075_v37  ;;  %v477_v21 = vmul.f32 %v17084_v48, %v406_v51  ;;  %v17085_v37 = vld [vmem:[#allocation119_spill] sm:$0xff] }
0x1768   :  { %v478_v18 = vmul.f32 %v17085_v37, %v406_v51 }
0x176a   :  { %11236 = vmatpush1.bf16.msra.mxu0 %v17076_v59 }
0x176b   :  { %11238 = vmatprep.subr.bf16.mxu0 %v17077_v42  ;;  %v17086_v42 = vld [vmem:[#allocation120_spill] sm:$0xff] }
0x176c   :  { %v541_v9 = vadd.f32 %v17086_v42, %v477_v21  ;;  %v479_v21 = vmul.f32 %v16136_v10, %v406_v51  ;;  %v17090_v51 = vld [vmem:[#allocation58_spill] sm:$0xff] }
0x176e   :  { %11240 = vmatpush1.bf16.msra.mxu0 %v17078_v14  ;;  %v17087_v14 = vld [vmem:[#allocation121_spill] sm:$0xff] }
0x176f   :  { %11242 = vmatprep.subr.bf16.mxu0 %v17079_v20 }
0x1772   :  { %11244 = vmatpush1.bf16.msra.mxu0 %v17080_v23 }
0x1773   :  { %11246 = vmatprep.subr.bf16.mxu0 %v17081_v43 }
0x1776   :  { %11248 = vmatpush1.bf16.msra.mxu0 %v17082_v36  ;;  %v542_v36 = vadd.f32 %v16327_v60, %v478_v18 }
0x1777   :  { %11314 = vmatprep.subr.bf16.mxu0 %v17083_v25 }
0x17cc   :  { %v5069_v59 = vpop.f32.mrb[44].mxu0  ;;  %v5140_v27 = vpop.f32.mrb[66].mxu1 }
0x17cd   :  { %v5070_v22 = vadd.f32 %v5069_v59, %v17087_v14  ;;  %v5071_v20 = vpop.f32.mrb[45].mxu0  ;;  %v14984_v41 = vpop.f32.mrb[67].mxu1  ;;  %v5141_v14 = vadd.f32 %v5140_v27, %v13128_v57  ;;  %v17088_v27 = vld [vmem:[#allocation54_spill] sm:$0xff] }
0x17ce   :  { %v5072_v43 = vadd.f32 %v5071_v20, %v16134_v32  ;;  %v543_v20 = vadd.f32 %v13132_v30, %v479_v21  ;;  %v17095_v21 = vld [vmem:[#allocation67_spill] sm:$0xff] }
0x17cf   :  { %v5220_v23 = vadd.f32 %v5070_v22, %v541_v9 }
0x17d0   :  { %v5227_v15 = vadd.f32 %v5072_v43, %v542_v36 }
0x17d1   :  { %v7251_v25 = vmul.f32 -1.442695, %v5220_v23 }
0x17d2   :  { %v7252_v48 = vmul.f32 -1.442695, %v5227_v15 }
0x17d3   :  { %12456 = vpow2.f32 %v7251_v25  ;;  %v17089_v25 = vld [vmem:[#allocation55_spill] sm:$0xff] }
0x17d4   :  { %12458 = vpow2.f32 %v7252_v48  ;;  %v17091_v48 = vld [vmem:[#allocation59_spill] sm:$0xff] }
0x17dd   :  { %v12457_v37 = vpop.eup %12456 }
0x17de   :  { %v5224_v1 = vadd.f32 1.0, %v12457_v37  ;;  %v12459_v19 = vpop.eup %12458  ;;  %v17092_v37 = vld [vmem:[#allocation62_spill] sm:$0xff] }
0x17df   :  { %v5231_v59 = vadd.f32 1.0, %v12459_v19 }
0x17e0   :  { %12460 = vrcp.f32 %v5224_v1 }
0x17e1   :  { %12462 = vrcp.f32 %v5231_v59  ;;  %v17096_v59 = vld [vmem:[#allocation69_spill] sm:$0xff] }
0x17ea   :  { %v12461_v42 = vpop.eup %12460 }
0x17eb   :  { %v5234_v22 = vmul.f32 %v12461_v42, %v5141_v14  ;;  %v12463_v18 = vpop.eup %12462  ;;  %v17093_v42 = vld [vmem:[#allocation63_spill] sm:$0xff]  ;;  %v17094_v14 = vld [vmem:[#allocation65_spill] sm:$0xff] }
0x17ec   :  { %v5237_v23 = vsub.f32 1.0, %v12463_v18  ;;  %v5239_v43 = vmul.f32 %v12463_v18, %v14829_v40 }
0x17ed   :  { %v5235_v9 = vadd.f32 %v5234_v22, %v543_v20  ;;  %v17097_v20 = vld [vmem:[#allocation71_spill] sm:$0xff]  ;;  %v17098_v22 = vld [vmem:[#allocation73_spill] sm:$0xff] }
0x17ef   :  { %12464 = vtanh.f32 %v5235_v9  ;;  %v17099_v9 = vld [vmem:[#allocation86_spill] sm:$0xff] }
0x17f9   :  { %v12465_v15 = vpop.eup %12464 }
0x17fa   :  { %v5238_v36 = vmul.f32 %v12465_v15, %v5237_v23  ;;  %v17100_v23 = vld [vmem:[#allocation126_spill] sm:$0xff] }
0x17fb   :  { %v5143_v15 = vadd.f32 %v14984_v41, %v17100_v23 }
0x17fc   :  { %v14992_v1 = vadd.f32 %v5239_v43, %v5238_v36  ;;  %v17101_v43 = vld [vmem:[#allocation127_spill] sm:$0xff] }
0x17fe   :  { %5306 = vmatmul.mubr.f32.vlgmr.msra.gmra.mrb[68].mxu1 %v14992_v1 }
0x17ff   :  { %11163 = vmatpush3.bf16.msra.mxu1 %v13136_v6  ;;  %7996 = vmatprep.mubr.msk.f32.mxu1 %vm12635_vm0, %v15996_v53 }
0x1800   :  { %11164 = vmatprep.subr.bf16.mxu1 %v16051_v54 }
0x1803   :  { %11166 = vmatpush3.bf16.msra.mxu1 %v13142_v4 }
0x1804   :  { %11167 = vmatprep.subr.bf16.mxu1 %v16051_v54 }
0x1807   :  { %11169 = vmatpush3.bf16.msra.mxu1 %v13148_v0 }
0x1808   :  { %11170 = vmatprep.subr.bf16.mxu1 %v16051_v54 }
0x180b   :  { %11172 = vmatpush3.bf16.msra.mxu1 %v13152_v35 }
0x180c   :  { %v5211_v19 = vpop.f32.mrb[46].mxu0  ;;  %11173 = vmatprep.subr.bf16.mxu1 %v16051_v54 }
0x180d   :  { %v5213_v40 = vpop.f32.mrb[47].mxu0 }
0x180f   :  { %11175 = vmatpush3.bf16.msra.mxu1 %v13156_v7 }
0x1810   :  { %11176 = vmatprep.subr.bf16.mxu1 %v16051_v54 }
0x1813   :  { %11178 = vmatpush3.bf16.msra.mxu1 %v13160_v33 }
0x1814   :  { %11179 = vmatprep.subr.bf16.mxu1 %v16051_v54 }
0x1817   :  { %11181 = vmatpush3.bf16.msra.mxu1 %v13164_v31 }
0x1818   :  { %11182 = vmatprep.subr.bf16.mxu1 %v16051_v54 }
0x181b   :  { %11184 = vmatpush3.bf16.msra.mxu1 %v13168_v38 }
0x181c   :  { %11250 = vmatprep.subr.bf16.mxu1 %v12702_v29 }
0x181e   :  { %7997 = vmatmul.mubr.f32.vlgmr.msra.gmra.mrb[70].mxu1 %v14992_v1 }
0x181f   :  { %11252 = vmatpush1.bf16.msra.mxu1 %v12708_v34 }
0x1820   :  { %11254 = vmatprep.subr.bf16.mxu1 %v12713_v39 }
0x1823   :  { %11256 = vmatpush1.bf16.msra.mxu1 %v12716_v44 }
0x1824   :  { %11258 = vmatprep.subr.bf16.mxu1 %v12722_v49 }
0x1827   :  { %11260 = vmatpush1.bf16.msra.mxu1 %v12728_v58 }
0x1828   :  { %11262 = vmatprep.subr.bf16.mxu1 %v16137_v62 }
0x182b   :  { %11264 = vmatpush1.bf16.msra.mxu1 %v16138_v24 }
0x182c   :  { %11266 = vmatprep.subr.bf16.mxu1 %v16139_v55 }
0x182f   :  { %11268 = vmatpush1.bf16.msra.mxu1 %v16140_v63 }
0x1830   :  { %11270 = vmatprep.subr.bf16.mxu1 %v16232_v17 }
0x1833   :  { %11272 = vmatpush1.bf16.msra.mxu1 %v16233_v45 }
0x1834   :  { %11274 = vmatprep.subr.bf16.mxu1 %v16234_v52 }
0x1837   :  { %11276 = vmatpush1.bf16.msra.mxu1 %v16328_v8 }
0x1838   :  { %11278 = vmatprep.subr.bf16.mxu1 %v16423_v2 }
0x183b   :  { %11280 = vmatpush1.bf16.msra.mxu1 %v16518_v5 }
0x183c   :  { %11282 = vmatprep.subr.bf16.mxu1 %v16613_v28 }
0x183f   :  { %11284 = vmatpush1.bf16.msra.mxu1 %v16708_v13 }
0x1840   :  { %11286 = vmatprep.subr.bf16.mxu1 %v16803_v11 }
0x1843   :  { %11288 = vmatpush1.bf16.msra.mxu1 %v16898_v56 }
0x1844   :  { %11290 = vmatprep.subr.bf16.mxu1 %v16993_v47 }
0x1847   :  { %11292 = vmatpush1.bf16.msra.mxu1 %v17088_v27 }
0x1848   :  { %11294 = vmatprep.subr.bf16.mxu1 %v17089_v25  ;;  %v5214_v25 = vadd.f32 %v5213_v40, %v13227_v12  ;;  %v17102_v40 = vld [vmem:[#allocation87_spill] sm:$0xff] }
0x184b   :  { %11296 = vmatpush1.bf16.msra.mxu1 %v17090_v51 }
0x184c   :  { %11298 = vmatprep.subr.bf16.mxu1 %v17091_v48 }
0x184f   :  { %11300 = vmatpush1.bf16.msra.mxu1 %v17092_v37 }
0x1850   :  { %11302 = vmatprep.subr.bf16.mxu1 %v17093_v42  ;;  %v5212_v42 = vadd.f32 %v5211_v19, %v16164_v16 }
0x1853   :  { %11304 = vmatpush1.bf16.msra.mxu1 %v17094_v14 }
0x1854   :  { %11306 = vmatprep.subr.bf16.mxu1 %v17095_v21 }
0x1857   :  { %11308 = vmatpush1.bf16.msra.mxu1 %v17096_v59 }
0x1858   :  { %11310 = vmatprep.subr.bf16.mxu1 %v17097_v20 }
0x185b   :  { %11312 = vmatpush1.bf16.msra.mxu1 %v17098_v22 }
0x185c   :  { %11378 = vmatprep.subr.bf16.mxu1 %v17099_v9 }
0x18d1   :  { %v5307_v18 = vpop.f32.mrb[68].mxu1 }
0x18d2   :  { %v5308_v36 = vadd.f32 %v5307_v18, %v17101_v43  ;;  %v5309_v37 = vpop.f32.mrb[69].mxu1 }
0x18d3   :  { %v5310_v14 = vadd.f32 %v5309_v37, %v13218_v61 }
0x18d4   :  { %v5382_v21 = vadd.f32 %v5308_v36, %v5143_v15  ;;  %v17110_v36 = vld [vmem:[#allocation95_spill] sm:$0xff] }
0x18d5   :  { %v5389_v48 = vadd.f32 %v5310_v14, %v5212_v42 }
0x18d6   :  { %v7253_v59 = vmul.f32 -1.442695, %v5382_v21 }
0x18d7   :  { %v7254_v20 = vmul.f32 -1.442695, %v5389_v48 }
0x18d8   :  { %12466 = vpow2.f32 %v7253_v59 }
0x18d9   :  { %12468 = vpow2.f32 %v7254_v20  ;;  %v17105_v20 = vld [vmem:[#allocation74_spill] sm:$0xff] }
0x18e2   :  { %v12467_v22 = vpop.eup %12466 }
0x18e3   :  { %v5386_v51 = vadd.f32 1.0, %v12467_v22  ;;  %v12469_v9 = vpop.eup %12468  ;;  %v17106_v22 = vld [vmem:[#allocation91_spill] sm:$0xff] }
0x18e4   :  { %v5393_v41 = vadd.f32 1.0, %v12469_v9  ;;  %v17107_v9 = vld [vmem:[#allocation94_spill] sm:$0xff] }
0x18e5   :  { %12470 = vrcp.f32 %v5386_v51 }
0x18e6   :  { %12472 = vrcp.f32 %v5393_v41  ;;  %v17111_v41 = vld [vmem:[#allocation98_spill] sm:$0xff] }
0x18ef   :  { %v12471_v23 = vpop.eup %12470 }
0x18f0   :  { %v5396_v18 = vmul.f32 %v12471_v23, %v5214_v25  ;;  %v12473_v42 = vpop.eup %12472  ;;  %v17103_v25 = vld [vmem:[#allocation90_spill] sm:$0xff]  ;;  %v17108_v23 = vld [vmem:[#allocation75_spill] sm:$0xff] }
0x18f1   :  { %v5378_v43 = vpop.f32.mrb[70].mxu1  ;;  %v5399_v14 = vsub.f32 1.0, %v12473_v42  ;;  %v5401_v59 = vmul.f32 %v12473_v42, %v14891_v50  ;;  %v17104_v50 = vld [vmem:[#allocation72_spill] sm:$0xff]  ;;  %v17116_v42 = vld [vmem:[#allocation79_spill] sm:$0xff] }
0x18f2   :  { %v5379_v19 = vadd.f32 %v5378_v43, %v13231_v46  ;;  %v7998_v37 = vpop.f32.mrb[71].mxu1  ;;  %v17109_v43 = vld [vmem:[#allocation76_spill] sm:$0xff] }
0x18f3   :  { %v17114_v37 = vld [vmem:[#allocation99_spill] sm:$0xff] }
0x18f4   :  { %v5397_v15 = vadd.f32 %v5396_v18, %v5379_v19  ;;  %v17112_v18 = vld [vmem:[#allocation77_spill] sm:$0xff]  ;;  %v17113_v19 = vld [vmem:[#allocation78_spill] sm:$0xff] }
0x18f6   :  { %12474 = vtanh.f32 %v5397_v15  ;;  %v17115_v15 = vld [vmem:[#allocation102_spill] sm:$0xff] }
0x1900   :  { %v12475_v48 = vpop.eup %12474 }
0x1901   :  { %v5400_v21 = vmul.f32 %v12475_v48, %v5399_v14  ;;  %v17117_v14 = vld [vmem:[#allocation80_spill] sm:$0xff]  ;;  %v17118_v48 = vld [vmem:[#allocation103_spill] sm:$0xff] }
0x1903   :  { %v15054_v51 = vadd.f32 %v5401_v59, %v5400_v21  ;;  %v17119_v21 = vld [vmem:[#allocation106_spill] sm:$0xff]  ;;  %v17120_v59 = vld [vmem:[#allocation81_spill] sm:$0xff] }
0x1905   :  { %5467 = vmatprep.mubr.f32.mxu0 %v15054_v51  ;;  %5538 = vmatprep.mubr.f32.mxu1 %v15054_v51 }
0x1906   :  { %5468 = vmatmul.mubr.f32.vlgmr.msra.gmra.mrb[48].mxu0 %v14992_v1  ;;  %5539 = vmatmul.mubr.f32.vlgmr.msra.gmra.mrb[72].mxu1 %v14992_v1 }
0x1907   :  { %11316 = vmatpush1.bf16.msra.mxu0 %v16072_v26  ;;  %5609 = vmatprep.mubr.f32.mxu0 %v15054_v51 }
0x1908   :  { %11318 = vmatprep.subr.bf16.mxu0 %v16073_v3  ;;  %11380 = vmatpush1.bf16.msra.mxu1 %v17102_v40 }
0x1909   :  { %11382 = vmatprep.subr.bf16.mxu1 %v17103_v25  ;;  %5705 = vmatprep.mubr.f32.mxu1 %v15996_v53 }
0x190b   :  { %11320 = vmatpush1.bf16.msra.mxu0 %v17104_v50 }
0x190c   :  { %11322 = vmatprep.subr.bf16.mxu0 %v17105_v20  ;;  %11384 = vmatpush1.bf16.msra.mxu1 %v17106_v22 }
0x190d   :  { %11386 = vmatprep.subr.bf16.mxu1 %v17107_v9 }
0x190f   :  { %11324 = vmatpush1.bf16.msra.mxu0 %v17108_v23 }
0x1910   :  { %11326 = vmatprep.subr.bf16.mxu0 %v17109_v43  ;;  %11388 = vmatpush1.bf16.msra.mxu1 %v17110_v36  ;;  %v17121_v36 = vld [vmem:[#allocation82_spill] sm:$0xff] }
0x1911   :  { %11390 = vmatprep.subr.bf16.mxu1 %v17111_v41  ;;  %v17122_v41 = vld [vmem:[#allocation107_spill] sm:$0xff] }
0x1913   :  { %11328 = vmatpush1.bf16.msra.mxu0 %v17112_v18  ;;  %v17123_v18 = vld [vmem:[#allocation110_spill] sm:$0xff] }
0x1914   :  { %11330 = vmatprep.subr.bf16.mxu0 %v17113_v19  ;;  %11392 = vmatpush1.bf16.msra.mxu1 %v17114_v37  ;;  %v17124_v19 = vld [vmem:[#allocation83_spill] sm:$0xff]  ;;  %v17125_v37 = vld [vmem:[#allocation84_spill] sm:$0xff] }
0x1915   :  { %11394 = vmatprep.subr.bf16.mxu1 %v17115_v15  ;;  %v17126_v15 = vld [vmem:[#allocation111_spill] sm:$0xff] }
0x1917   :  { %11332 = vmatpush1.bf16.msra.mxu0 %v17116_v42  ;;  %v17127_v42 = vld [vmem:[#allocation114_spill] sm:$0xff] }
0x1918   :  { %11334 = vmatprep.subr.bf16.mxu0 %v17117_v14  ;;  %11396 = vmatpush1.bf16.msra.mxu1 %v17118_v48  ;;  %v17128_v14 = vld [vmem:[#allocation85_spill] sm:$0xff]  ;;  %v17129_v48 = vld [vmem:[#allocation88_spill] sm:$0xff] }
0x1919   :  { %11398 = vmatprep.subr.bf16.mxu1 %v17119_v21  ;;  %v17130_v21 = vld [vmem:[#allocation115_spill] sm:$0xff] }
0x191b   :  { %11336 = vmatpush1.bf16.msra.mxu0 %v17120_v59  ;;  %v17141_v59 = vld [vmem:[#allocation109_spill] sm:$0xff] }
0x191c   :  { %11338 = vmatprep.subr.bf16.mxu0 %v17121_v36  ;;  %11400 = vmatpush1.bf16.msra.mxu1 %v17122_v41  ;;  %v17131_v36 = vld [vmem:[#allocation89_spill] sm:$0xff]  ;;  %v17132_v41 = vld [vmem:[#allocation92_spill] sm:$0xff] }
0x191d   :  { %11402 = vmatprep.subr.bf16.mxu1 %v17123_v18  ;;  %v17133_v18 = vld [vmem:[#allocation93_spill] sm:$0xff] }
0x191f   :  { %11340 = vmatpush1.bf16.msra.mxu0 %v17124_v19  ;;  %v17134_v19 = vld [vmem:[#allocation96_spill] sm:$0xff] }
0x1920   :  { %11342 = vmatprep.subr.bf16.mxu0 %v17125_v37  ;;  %11404 = vmatpush1.bf16.msra.mxu1 %v17126_v15  ;;  %v17135_v37 = vld [vmem:[#allocation97_spill] sm:$0xff]  ;;  %v17136_v15 = vld [vmem:[#allocation100_spill] sm:$0xff] }
0x1921   :  { %11406 = vmatprep.subr.bf16.mxu1 %v17127_v42  ;;  %v17137_v42 = vld [vmem:[#allocation101_spill] sm:$0xff] }
0x1923   :  { %11344 = vmatpush1.bf16.msra.mxu0 %v17128_v14  ;;  %v17138_v14 = vld [vmem:[#allocation104_spill] sm:$0xff] }
0x1924   :  { %11346 = vmatprep.subr.bf16.mxu0 %v17129_v48  ;;  %11408 = vmatpush1.bf16.msra.mxu1 %v17130_v21  ;;  %v17139_v48 = vld [vmem:[#allocation105_spill] sm:$0xff]  ;;  %v17140_v21 = vld [vmem:[#allocation108_spill] sm:$0xff] }
0x1925   :  { %11409 = vmatprep.subr.bf16.mxu1 %v16051_v54 }
0x1927   :  { %11348 = vmatpush1.bf16.msra.mxu0 %v17131_v36  ;;  %v17142_v36 = vld [vmem:[#allocation112_spill] sm:$0xff] }
0x1928   :  { %11350 = vmatprep.subr.bf16.mxu0 %v17132_v41  ;;  %v17143_v41 = vld [vmem:[#allocation113_spill] sm:$0xff] }
0x192b   :  { %11352 = vmatpush1.bf16.msra.mxu0 %v17133_v18  ;;  %v17144_v18 = vld [vmem:[#allocation116_spill] sm:$0xff] }
0x192c   :  { %11354 = vmatprep.subr.bf16.mxu0 %v17134_v19  ;;  %v17145_v19 = vld [vmem:[#allocation117_spill] sm:$0xff] }
0x192f   :  { %11356 = vmatpush1.bf16.msra.mxu0 %v17135_v37  ;;  %v17146_v37 = vld [vmem:[#allocation12_spill] sm:$0xff] }
0x1930   :  { %11358 = vmatprep.subr.bf16.mxu0 %v17136_v15  ;;  %v17157_v15 = vld [vmem:[#allocation24_spill] sm:$0xff] }
0x1933   :  { %11360 = vmatpush1.bf16.msra.mxu0 %v17137_v42  ;;  %v17147_v42 = vld [vmem:[#allocation13_spill] sm:$0xff] }
0x1934   :  { %11362 = vmatprep.subr.bf16.mxu0 %v17138_v14  ;;  %v17148_v14 = vld [vmem:[#allocation14_spill] sm:$0xff] }
0x1937   :  { %11364 = vmatpush1.bf16.msra.mxu0 %v17139_v48  ;;  %v17149_v48 = vld [vmem:[#allocation15_spill] sm:$0xff] }
0x1938   :  { %11366 = vmatprep.subr.bf16.mxu0 %v17140_v21  ;;  %v17150_v21 = vld [vmem:[#allocation16_spill] sm:$0xff] }
0x193b   :  { %11368 = vmatpush1.bf16.msra.mxu0 %v17141_v59  ;;  %v17151_v59 = vld [vmem:[#allocation17_spill] sm:$0xff] }
0x193c   :  { %11370 = vmatprep.subr.bf16.mxu0 %v17142_v36  ;;  %v17152_v36 = vld [vmem:[#allocation18_spill] sm:$0xff] }
0x193f   :  { %11372 = vmatpush1.bf16.msra.mxu0 %v17143_v41  ;;  %v17153_v41 = vld [vmem:[#allocation19_spill] sm:$0xff] }
0x1940   :  { %11374 = vmatprep.subr.bf16.mxu0 %v17144_v18  ;;  %v17154_v18 = vld [vmem:[#allocation20_spill] sm:$0xff] }
0x1943   :  { %11376 = vmatpush1.bf16.msra.mxu0 %v17145_v19  ;;  %v17155_v19 = vld [vmem:[#allocation21_spill] sm:$0xff] }
0x1944   :  { %11434 = vmatprep.subr.bf16.mxu0 %v17146_v37  ;;  %v17156_v37 = vld [vmem:[#allocation22_spill] sm:$0xff] }
0x1946   :  { %5610 = vmatmul.mubr.f32.vlgmr.msra.gmra.mrb[50].mxu0 %v14992_v1 }
0x1947   :  { %11436 = vmatpush1.bf16.msra.mxu0 %v17147_v42  ;;  %v17158_v42 = vld [vmem:[#allocation25_spill] sm:$0xff] }
0x1948   :  { %11438 = vmatprep.subr.bf16.mxu0 %v17148_v14  ;;  %v17159_v14 = vld [vmem:[#allocation28_spill] sm:$0xff] }
0x194b   :  { %11440 = vmatpush1.bf16.msra.mxu0 %v17149_v48  ;;  %v17160_v48 = vld [vmem:[#allocation29_spill] sm:$0xff] }
0x194c   :  { %11442 = vmatprep.subr.bf16.mxu0 %v17150_v21  ;;  %v17161_v21 = vld [vmem:[#allocation32_spill] sm:$0xff] }
0x194f   :  { %11444 = vmatpush1.bf16.msra.mxu0 %v17151_v59  ;;  %v17162_v59 = vld [vmem:[#allocation33_spill] sm:$0xff] }
0x1950   :  { %11446 = vmatprep.subr.bf16.mxu0 %v17152_v36  ;;  %v17163_v36 = vld [vmem:[#allocation36_spill] sm:$0xff] }
0x1953   :  { %11448 = vmatpush1.bf16.msra.mxu0 %v17153_v41  ;;  %v17164_v41 = vld [vmem:[#allocation37_spill] sm:$0xff] }
0x1954   :  { %11450 = vmatprep.subr.bf16.mxu0 %v17154_v18  ;;  %v17165_v18 = vld [vmem:[#allocation40_spill] sm:$0xff] }
0x1957   :  { %11452 = vmatpush1.bf16.msra.mxu0 %v17155_v19  ;;  %v17166_v19 = vld [vmem:[#allocation41_spill] sm:$0xff] }
0x1958   :  { %11454 = vmatprep.subr.bf16.mxu0 %v17156_v37  ;;  %v17167_v37 = vld [vmem:[#allocation44_spill] sm:$0xff] }
0x195b   :  { %11456 = vmatpush1.bf16.msra.mxu0 %v17157_v15  ;;  %v17168_v15 = vld [vmem:[#allocation45_spill] sm:$0xff] }
0x195c   :  { %11458 = vmatprep.subr.bf16.mxu0 %v17158_v42  ;;  %v17169_v42 = vld [vmem:[#allocation48_spill] sm:$0xff] }
0x195f   :  { %11460 = vmatpush1.bf16.msra.mxu0 %v17159_v14  ;;  %v17170_v14 = vld [vmem:[#allocation49_spill] sm:$0xff] }
0x1960   :  { %11462 = vmatprep.subr.bf16.mxu0 %v17160_v48  ;;  %v17171_v48 = vld [vmem:[#allocation52_spill] sm:$0xff] }
0x1963   :  { %11464 = vmatpush1.bf16.msra.mxu0 %v17161_v21  ;;  %v17172_v21 = vld [vmem:[#allocation53_spill] sm:$0xff] }
0x1964   :  { %11466 = vmatprep.subr.bf16.mxu0 %v17162_v59  ;;  %v17173_v59 = vld [vmem:[#allocation56_spill] sm:$0xff] }
0x1967   :  { %11468 = vmatpush1.bf16.msra.mxu0 %v17163_v36  ;;  %v17174_v36 = vld [vmem:[#allocation57_spill] sm:$0xff] }
0x1968   :  { %11470 = vmatprep.subr.bf16.mxu0 %v17164_v41  ;;  %v17175_v41 = vld [vmem:[#allocation60_spill] sm:$0xff] }
0x196b   :  { %11472 = vmatpush1.bf16.msra.mxu0 %v17165_v18  ;;  %v17176_v18 = vld [vmem:[#allocation61_spill] sm:$0xff] }
0x196c   :  { %11474 = vmatprep.subr.bf16.mxu0 %v17166_v19  ;;  %v17177_v19 = vld [vmem:[#allocation64_spill] sm:$0xff] }
0x196f   :  { %11476 = vmatpush1.bf16.msra.mxu0 %v17167_v37  ;;  %v17178_v37 = vld [vmem:[#allocation66_spill] sm:$0xff] }
0x1970   :  { %11478 = vmatprep.subr.bf16.mxu0 %v17168_v15  ;;  %v411_v15 = vpop.permute.xlu0 %410 }
0x1973   :  { %11480 = vmatpush1.bf16.msra.mxu0 %v17169_v42  ;;  %v17179_v42 = vld [vmem:[#allocation118_spill] sm:$0xff] }
0x1974   :  { %11482 = vmatprep.subr.bf16.mxu0 %v17170_v14  ;;  %v480_v43 = vmul.f32 %v17179_v42, %v411_v15  ;;  %v17180_v14 = vld [vmem:[#allocation119_spill] sm:$0xff] }
0x1975   :  { %v481_v23 = vmul.f32 %v17180_v14, %v411_v15 }
0x1977   :  { %11484 = vmatpush1.bf16.msra.mxu0 %v17171_v48 }
0x1978   :  { %11486 = vmatprep.subr.bf16.mxu0 %v17172_v21  ;;  %v17181_v21 = vld [vmem:[#allocation120_spill] sm:$0xff] }
0x1979   :  { %v544_v22 = vadd.f32 %v17181_v21, %v480_v43  ;;  %v482_v43 = vmul.f32 %v16136_v10, %v411_v15  ;;  %v17185_v15 = vld [vmem:[#allocation59_spill] sm:$0xff] }
0x197b   :  { %11488 = vmatpush1.bf16.msra.mxu0 %v17173_v59  ;;  %v17182_v59 = vld [vmem:[#allocation121_spill] sm:$0xff] }
0x197c   :  { %11490 = vmatprep.subr.bf16.mxu0 %v17174_v36 }
0x197f   :  { %11492 = vmatpush1.bf16.msra.mxu0 %v17175_v41 }
0x1980   :  { %11494 = vmatprep.subr.bf16.mxu0 %v17176_v18 }
0x1983   :  { %11496 = vmatpush1.bf16.msra.mxu0 %v17177_v19  ;;  %v545_v19 = vadd.f32 %v16327_v60, %v481_v23 }
0x1984   :  { %11562 = vmatprep.subr.bf16.mxu0 %v17178_v37 }
0x19d9   :  { %v5469_v48 = vpop.f32.mrb[48].mxu0  ;;  %v5540_v9 = vpop.f32.mrb[72].mxu1 }
0x19da   :  { %v5470_v20 = vadd.f32 %v5469_v48, %v17182_v59  ;;  %v5471_v36 = vpop.f32.mrb[49].mxu0  ;;  %v15147_v50 = vpop.f32.mrb[73].mxu1  ;;  %v5541_v59 = vadd.f32 %v5540_v9, %v13128_v57  ;;  %v17183_v9 = vld [vmem:[#allocation55_spill] sm:$0xff] }
0x19db   :  { %v5472_v18 = vadd.f32 %v5471_v36, %v16134_v32  ;;  %v546_v36 = vadd.f32 %v13132_v30, %v482_v43  ;;  %v17190_v43 = vld [vmem:[#allocation69_spill] sm:$0xff] }
0x19dc   :  { %v5620_v41 = vadd.f32 %v5470_v20, %v544_v22 }
0x19dd   :  { %v5627_v25 = vadd.f32 %v5472_v18, %v545_v19 }
0x19de   :  { %v7255_v37 = vmul.f32 -1.442695, %v5620_v41 }
0x19df   :  { %v7256_v42 = vmul.f32 -1.442695, %v5627_v25 }
0x19e0   :  { %12476 = vpow2.f32 %v7255_v37  ;;  %v17184_v37 = vld [vmem:[#allocation58_spill] sm:$0xff] }
0x19e1   :  { %12478 = vpow2.f32 %v7256_v42  ;;  %v17186_v42 = vld [vmem:[#allocation62_spill] sm:$0xff] }
0x19ea   :  { %v12477_v14 = vpop.eup %12476 }
0x19eb   :  { %v5624_v40 = vadd.f32 1.0, %v12477_v14  ;;  %v12479_v3 = vpop.eup %12478  ;;  %v17187_v14 = vld [vmem:[#allocation63_spill] sm:$0xff] }
0x19ec   :  { %v5631_v48 = vadd.f32 1.0, %v12479_v3 }
0x19ed   :  { %12480 = vrcp.f32 %v5624_v40 }
0x19ee   :  { %12482 = vrcp.f32 %v5631_v48  ;;  %v17191_v48 = vld [vmem:[#allocation71_spill] sm:$0xff] }
0x19f7   :  { %v12481_v21 = vpop.eup %12480 }
0x19f8   :  { %v5634_v20 = vmul.f32 %v12481_v21, %v5541_v59  ;;  %v12483_v23 = vpop.eup %12482  ;;  %v17188_v21 = vld [vmem:[#allocation65_spill] sm:$0xff]  ;;  %v17189_v59 = vld [vmem:[#allocation67_spill] sm:$0xff] }
0x19f9   :  { %v5637_v41 = vsub.f32 1.0, %v12483_v23  ;;  %v5639_v18 = vmul.f32 %v12483_v23, %v14992_v1  ;;  %v17194_v23 = vld [vmem:[#allocation126_spill] sm:$0xff] }
0x19fa   :  { %v5635_v22 = vadd.f32 %v5634_v20, %v546_v36  ;;  %v17192_v36 = vld [vmem:[#allocation73_spill] sm:$0xff]  ;;  %v17193_v20 = vld [vmem:[#allocation86_spill] sm:$0xff] }
0x19fc   :  { %12484 = vtanh.f32 %v5635_v22 }
0x1a06   :  { %v12485_v25 = vpop.eup %12484 }
0x1a07   :  { %v5638_v19 = vmul.f32 %v12485_v25, %v5637_v41  ;;  %v5543_v41 = vadd.f32 %v15147_v50, %v17194_v23  ;;  %v17195_v25 = vld [vmem:[#allocation127_spill] sm:$0xff] }
0x1a09   :  { %v15155_v40 = vadd.f32 %v5639_v18, %v5638_v19 }
0x1a0b   :  { %5706 = vmatmul.mubr.f32.vlgmr.msra.gmra.mrb[74].mxu1 %v15155_v40 }
0x1a0c   :  { %11411 = vmatpush3.bf16.msra.mxu1 %v13136_v6  ;;  %8031 = vmatprep.mubr.msk.f32.mxu1 %vm12635_vm0, %v15996_v53 }
0x1a0d   :  { %11412 = vmatprep.subr.bf16.mxu1 %v16051_v54 }
0x1a10   :  { %11414 = vmatpush3.bf16.msra.mxu1 %v13142_v4 }
0x1a11   :  { %11415 = vmatprep.subr.bf16.mxu1 %v16051_v54 }
0x1a14   :  { %11417 = vmatpush3.bf16.msra.mxu1 %v13148_v0 }
0x1a15   :  { %11418 = vmatprep.subr.bf16.mxu1 %v16051_v54 }
0x1a18   :  { %11420 = vmatpush3.bf16.msra.mxu1 %v13152_v35 }
0x1a19   :  { %v5611_v3 = vpop.f32.mrb[50].mxu0  ;;  %11421 = vmatprep.subr.bf16.mxu1 %v16051_v54 }
0x1a1a   :  { %v5613_v1 = vpop.f32.mrb[51].mxu0 }
0x1a1c   :  { %11423 = vmatpush3.bf16.msra.mxu1 %v13156_v7 }
0x1a1d   :  { %11424 = vmatprep.subr.bf16.mxu1 %v16051_v54 }
0x1a20   :  { %11426 = vmatpush3.bf16.msra.mxu1 %v13160_v33 }
0x1a21   :  { %11427 = vmatprep.subr.bf16.mxu1 %v16051_v54 }
0x1a24   :  { %11429 = vmatpush3.bf16.msra.mxu1 %v13164_v31 }
0x1a25   :  { %11430 = vmatprep.subr.bf16.mxu1 %v16051_v54 }
0x1a28   :  { %11432 = vmatpush3.bf16.msra.mxu1 %v13168_v38 }
0x1a29   :  { %11498 = vmatprep.subr.bf16.mxu1 %v12702_v29 }
0x1a2b   :  { %8032 = vmatmul.mubr.f32.vlgmr.msra.gmra.mrb[76].mxu1 %v15155_v40 }
0x1a2c   :  { %11500 = vmatpush1.bf16.msra.mxu1 %v12708_v34 }
0x1a2d   :  { %11502 = vmatprep.subr.bf16.mxu1 %v12713_v39 }
0x1a30   :  { %11504 = vmatpush1.bf16.msra.mxu1 %v12716_v44 }
0x1a31   :  { %11506 = vmatprep.subr.bf16.mxu1 %v12722_v49 }
0x1a34   :  { %11508 = vmatpush1.bf16.msra.mxu1 %v12728_v58 }
0x1a35   :  { %11510 = vmatprep.subr.bf16.mxu1 %v16137_v62 }
0x1a38   :  { %11512 = vmatpush1.bf16.msra.mxu1 %v16138_v24 }
0x1a39   :  { %11514 = vmatprep.subr.bf16.mxu1 %v16139_v55 }
0x1a3c   :  { %11516 = vmatpush1.bf16.msra.mxu1 %v16140_v63 }
0x1a3d   :  { %11518 = vmatprep.subr.bf16.mxu1 %v16232_v17 }
0x1a40   :  { %11520 = vmatpush1.bf16.msra.mxu1 %v16233_v45 }
0x1a41   :  { %11522 = vmatprep.subr.bf16.mxu1 %v16234_v52 }
0x1a44   :  { %11524 = vmatpush1.bf16.msra.mxu1 %v16328_v8 }
0x1a45   :  { %11526 = vmatprep.subr.bf16.mxu1 %v16423_v2 }
0x1a48   :  { %11528 = vmatpush1.bf16.msra.mxu1 %v16518_v5 }
0x1a49   :  { %11530 = vmatprep.subr.bf16.mxu1 %v16613_v28 }
0x1a4c   :  { %11532 = vmatpush1.bf16.msra.mxu1 %v16708_v13 }
0x1a4d   :  { %11534 = vmatprep.subr.bf16.mxu1 %v16803_v11 }
0x1a50   :  { %11536 = vmatpush1.bf16.msra.mxu1 %v16898_v56 }
0x1a51   :  { %11538 = vmatprep.subr.bf16.mxu1 %v16993_v47 }
0x1a54   :  { %11540 = vmatpush1.bf16.msra.mxu1 %v17088_v27 }
0x1a55   :  { %11542 = vmatprep.subr.bf16.mxu1 %v17183_v9 }
0x1a58   :  { %11544 = vmatpush1.bf16.msra.mxu1 %v17184_v37  ;;  %v5614_v37 = vadd.f32 %v5613_v1, %v13227_v12  ;;  %v17196_v1 = vld [vmem:[#allocation70_spill] sm:$0xff] }
0x1a59   :  { %11546 = vmatprep.subr.bf16.mxu1 %v17185_v15 }
0x1a5c   :  { %11548 = vmatpush1.bf16.msra.mxu1 %v17186_v42 }
0x1a5d   :  { %11550 = vmatprep.subr.bf16.mxu1 %v17187_v14  ;;  %v5612_v14 = vadd.f32 %v5611_v3, %v16164_v16 }
0x1a60   :  { %11552 = vmatpush1.bf16.msra.mxu1 %v17188_v21 }
0x1a61   :  { %11554 = vmatprep.subr.bf16.mxu1 %v17189_v59 }
0x1a64   :  { %11556 = vmatpush1.bf16.msra.mxu1 %v17190_v43 }
0x1a65   :  { %11558 = vmatprep.subr.bf16.mxu1 %v17191_v48 }
0x1a68   :  { %11560 = vmatpush1.bf16.msra.mxu1 %v17192_v36 }
0x1a69   :  { %11626 = vmatprep.subr.bf16.mxu1 %v17193_v20 }
0x1ade   :  { %v5707_v22 = vpop.f32.mrb[74].mxu1 }
0x1adf   :  { %v5708_v18 = vadd.f32 %v5707_v22, %v17195_v25  ;;  %v5709_v19 = vpop.f32.mrb[75].mxu1 }
0x1ae0   :  { %v5710_v21 = vadd.f32 %v5709_v19, %v13218_v61 }
0x1ae1   :  { %v5782_v59 = vadd.f32 %v5708_v18, %v5543_v41  ;;  %v17204_v18 = vld [vmem:[#allocation76_spill] sm:$0xff] }
0x1ae2   :  { %v5789_v42 = vadd.f32 %v5710_v21, %v5612_v14 }
0x1ae3   :  { %v7257_v43 = vmul.f32 -1.442695, %v5782_v59 }
0x1ae4   :  { %v7258_v48 = vmul.f32 -1.442695, %v5789_v42 }
0x1ae5   :  { %12486 = vpow2.f32 %v7257_v43 }
0x1ae6   :  { %12488 = vpow2.f32 %v7258_v48  ;;  %v17198_v48 = vld [vmem:[#allocation90_spill] sm:$0xff] }
0x1aef   :  { %v12487_v36 = vpop.eup %12486 }
0x1af0   :  { %v5786_v15 = vadd.f32 1.0, %v12487_v36  ;;  %v12489_v20 = vpop.eup %12488  ;;  %v17200_v36 = vld [vmem:[#allocation74_spill] sm:$0xff] }
0x1af1   :  { %v5793_v50 = vadd.f32 1.0, %v12489_v20  ;;  %v17201_v20 = vld [vmem:[#allocation91_spill] sm:$0xff] }
0x1af2   :  { %12490 = vrcp.f32 %v5786_v15 }
0x1af3   :  { %12492 = vrcp.f32 %v5793_v50  ;;  %v17205_v50 = vld [vmem:[#allocation95_spill] sm:$0xff] }
0x1afc   :  { %v12491_v23 = vpop.eup %12490 }
0x1afd   :  { %v5796_v22 = vmul.f32 %v12491_v23, %v5614_v37  ;;  %v12493_v14 = vpop.eup %12492  ;;  %v17197_v37 = vld [vmem:[#allocation87_spill] sm:$0xff]  ;;  %v17202_v23 = vld [vmem:[#allocation94_spill] sm:$0xff] }
0x1afe   :  { %v5778_v25 = vpop.f32.mrb[76].mxu1  ;;  %v5799_v21 = vsub.f32 1.0, %v12493_v14  ;;  %v5801_v43 = vmul.f32 %v12493_v14, %v15054_v51  ;;  %v17199_v51 = vld [vmem:[#allocation72_spill] sm:$0xff]  ;;  %v17210_v14 = vld [vmem:[#allocation102_spill] sm:$0xff] }
0x1aff   :  { %v5779_v3 = vadd.f32 %v5778_v25, %v13231_v46  ;;  %v8033_v19 = vpop.f32.mrb[77].mxu1  ;;  %v17203_v25 = vld [vmem:[#allocation75_spill] sm:$0xff] }
0x1b00   :  { %v17208_v19 = vld [vmem:[#allocation78_spill] sm:$0xff] }
0x1b01   :  { %v5797_v41 = vadd.f32 %v5796_v22, %v5779_v3  ;;  %v17206_v22 = vld [vmem:[#allocation98_spill] sm:$0xff]  ;;  %v17207_v3 = vld [vmem:[#allocation77_spill] sm:$0xff] }
0x1b03   :  { %12494 = vtanh.f32 %v5797_v41  ;;  %v17209_v41 = vld [vmem:[#allocation99_spill] sm:$0xff] }
0x1b0d   :  { %v12495_v42 = vpop.eup %12494 }
0x1b0e   :  { %v5800_v59 = vmul.f32 %v12495_v42, %v5799_v21  ;;  %v17211_v21 = vld [vmem:[#allocation79_spill] sm:$0xff]  ;;  %v17212_v42 = vld [vmem:[#allocation80_spill] sm:$0xff] }
0x1b10   :  { %v15217_v15 = vadd.f32 %v5801_v43, %v5800_v59  ;;  %v17213_v59 = vld [vmem:[#allocation103_spill] sm:$0xff]  ;;  %v17214_v43 = vld [vmem:[#allocation106_spill] sm:$0xff] }
0x1b12   :  { %5867 = vmatprep.mubr.f32.mxu0 %v15217_v15  ;;  %5938 = vmatprep.mubr.f32.mxu1 %v15217_v15 }
0x1b13   :  { %5868 = vmatmul.mubr.f32.vlgmr.msra.gmra.mrb[52].mxu0 %v15155_v40  ;;  %5939 = vmatmul.mubr.f32.vlgmr.msra.gmra.mrb[78].mxu1 %v15155_v40 }
0x1b14   :  { %11564 = vmatpush1.bf16.msra.mxu0 %v16072_v26  ;;  %6009 = vmatprep.mubr.f32.mxu0 %v15217_v15 }
0x1b15   :  { %11566 = vmatprep.subr.bf16.mxu0 %v17196_v1  ;;  %11628 = vmatpush1.bf16.msra.mxu1 %v17197_v37 }
0x1b16   :  { %11630 = vmatprep.subr.bf16.mxu1 %v17198_v48  ;;  %6105 = vmatprep.mubr.f32.mxu1 %v15996_v53 }
0x1b18   :  { %11568 = vmatpush1.bf16.msra.mxu0 %v17199_v51 }
0x1b19   :  { %11570 = vmatprep.subr.bf16.mxu0 %v17200_v36  ;;  %11632 = vmatpush1.bf16.msra.mxu1 %v17201_v20 }
0x1b1a   :  { %11634 = vmatprep.subr.bf16.mxu1 %v17202_v23 }
0x1b1c   :  { %11572 = vmatpush1.bf16.msra.mxu0 %v17203_v25 }
0x1b1d   :  { %11574 = vmatprep.subr.bf16.mxu0 %v17204_v18  ;;  %11636 = vmatpush1.bf16.msra.mxu1 %v17205_v50  ;;  %v17215_v18 = vld [vmem:[#allocation81_spill] sm:$0xff]  ;;  %v17216_v50 = vld [vmem:[#allocation82_spill] sm:$0xff] }
0x1b1e   :  { %11638 = vmatprep.subr.bf16.mxu1 %v17206_v22  ;;  %v17217_v22 = vld [vmem:[#allocation107_spill] sm:$0xff] }
0x1b20   :  { %11576 = vmatpush1.bf16.msra.mxu0 %v17207_v3  ;;  %v17218_v3 = vld [vmem:[#allocation110_spill] sm:$0xff] }
0x1b21   :  { %11578 = vmatprep.subr.bf16.mxu0 %v17208_v19  ;;  %11640 = vmatpush1.bf16.msra.mxu1 %v17209_v41  ;;  %v17219_v19 = vld [vmem:[#allocation83_spill] sm:$0xff]  ;;  %v17220_v41 = vld [vmem:[#allocation84_spill] sm:$0xff] }
0x1b22   :  { %11642 = vmatprep.subr.bf16.mxu1 %v17210_v14  ;;  %v17221_v14 = vld [vmem:[#allocation111_spill] sm:$0xff] }
0x1b24   :  { %11580 = vmatpush1.bf16.msra.mxu0 %v17211_v21  ;;  %v17222_v21 = vld [vmem:[#allocation114_spill] sm:$0xff] }
0x1b25   :  { %11582 = vmatprep.subr.bf16.mxu0 %v17212_v42  ;;  %11644 = vmatpush1.bf16.msra.mxu1 %v17213_v59  ;;  %v17223_v42 = vld [vmem:[#allocation85_spill] sm:$0xff]  ;;  %v17224_v59 = vld [vmem:[#allocation88_spill] sm:$0xff] }
0x1b26   :  { %11646 = vmatprep.subr.bf16.mxu1 %v17214_v43  ;;  %v17225_v43 = vld [vmem:[#allocation115_spill] sm:$0xff] }
0x1b28   :  { %11584 = vmatpush1.bf16.msra.mxu0 %v17215_v18  ;;  %v17236_v18 = vld [vmem:[#allocation109_spill] sm:$0xff] }
0x1b29   :  { %11586 = vmatprep.subr.bf16.mxu0 %v17216_v50  ;;  %11648 = vmatpush1.bf16.msra.mxu1 %v17217_v22  ;;  %v17226_v50 = vld [vmem:[#allocation89_spill] sm:$0xff]  ;;  %v17227_v22 = vld [vmem:[#allocation92_spill] sm:$0xff] }
0x1b2a   :  { %11650 = vmatprep.subr.bf16.mxu1 %v17218_v3  ;;  %v17228_v3 = vld [vmem:[#allocation93_spill] sm:$0xff] }
0x1b2c   :  { %11588 = vmatpush1.bf16.msra.mxu0 %v17219_v19  ;;  %v17229_v19 = vld [vmem:[#allocation96_spill] sm:$0xff] }
0x1b2d   :  { %11590 = vmatprep.subr.bf16.mxu0 %v17220_v41  ;;  %11652 = vmatpush1.bf16.msra.mxu1 %v17221_v14  ;;  %v17230_v41 = vld [vmem:[#allocation97_spill] sm:$0xff]  ;;  %v17231_v14 = vld [vmem:[#allocation100_spill] sm:$0xff] }
0x1b2e   :  { %11654 = vmatprep.subr.bf16.mxu1 %v17222_v21  ;;  %v17232_v21 = vld [vmem:[#allocation101_spill] sm:$0xff] }
0x1b30   :  { %11592 = vmatpush1.bf16.msra.mxu0 %v17223_v42  ;;  %v17233_v42 = vld [vmem:[#allocation104_spill] sm:$0xff] }
0x1b31   :  { %11594 = vmatprep.subr.bf16.mxu0 %v17224_v59  ;;  %11656 = vmatpush1.bf16.msra.mxu1 %v17225_v43  ;;  %v17234_v59 = vld [vmem:[#allocation105_spill] sm:$0xff]  ;;  %v17235_v43 = vld [vmem:[#allocation108_spill] sm:$0xff] }
0x1b32   :  { %11657 = vmatprep.subr.bf16.mxu1 %v16051_v54 }
0x1b34   :  { %11596 = vmatpush1.bf16.msra.mxu0 %v17226_v50  ;;  %v17237_v50 = vld [vmem:[#allocation112_spill] sm:$0xff] }
0x1b35   :  { %11598 = vmatprep.subr.bf16.mxu0 %v17227_v22  ;;  %v17238_v22 = vld [vmem:[#allocation113_spill] sm:$0xff] }
0x1b38   :  { %11600 = vmatpush1.bf16.msra.mxu0 %v17228_v3  ;;  %v17239_v3 = vld [vmem:[#allocation116_spill] sm:$0xff] }
0x1b39   :  { %11602 = vmatprep.subr.bf16.mxu0 %v17229_v19  ;;  %v17240_v19 = vld [vmem:[#allocation117_spill] sm:$0xff] }
0x1b3c   :  { %11604 = vmatpush1.bf16.msra.mxu0 %v17230_v41  ;;  %v17241_v41 = vld [vmem:[#allocation12_spill] sm:$0xff] }
0x1b3d   :  { %11606 = vmatprep.subr.bf16.mxu0 %v17231_v14  ;;  %v17252_v14 = vld [vmem:[#allocation24_spill] sm:$0xff] }
0x1b40   :  { %11608 = vmatpush1.bf16.msra.mxu0 %v17232_v21  ;;  %v17242_v21 = vld [vmem:[#allocation13_spill] sm:$0xff] }
0x1b41   :  { %11610 = vmatprep.subr.bf16.mxu0 %v17233_v42  ;;  %v17243_v42 = vld [vmem:[#allocation14_spill] sm:$0xff] }
0x1b44   :  { %11612 = vmatpush1.bf16.msra.mxu0 %v17234_v59  ;;  %v17244_v59 = vld [vmem:[#allocation15_spill] sm:$0xff] }
0x1b45   :  { %11614 = vmatprep.subr.bf16.mxu0 %v17235_v43  ;;  %v17245_v43 = vld [vmem:[#allocation16_spill] sm:$0xff] }
0x1b48   :  { %11616 = vmatpush1.bf16.msra.mxu0 %v17236_v18  ;;  %v17246_v18 = vld [vmem:[#allocation17_spill] sm:$0xff] }
0x1b49   :  { %11618 = vmatprep.subr.bf16.mxu0 %v17237_v50  ;;  %v17247_v50 = vld [vmem:[#allocation18_spill] sm:$0xff] }
0x1b4c   :  { %11620 = vmatpush1.bf16.msra.mxu0 %v17238_v22  ;;  %v17248_v22 = vld [vmem:[#allocation19_spill] sm:$0xff] }
0x1b4d   :  { %11622 = vmatprep.subr.bf16.mxu0 %v17239_v3  ;;  %v17249_v3 = vld [vmem:[#allocation20_spill] sm:$0xff] }
0x1b50   :  { %11624 = vmatpush1.bf16.msra.mxu0 %v17240_v19  ;;  %v17250_v19 = vld [vmem:[#allocation21_spill] sm:$0xff] }
0x1b51   :  { %11682 = vmatprep.subr.bf16.mxu0 %v17241_v41  ;;  %v17251_v41 = vld [vmem:[#allocation22_spill] sm:$0xff] }
0x1b53   :  { %6010 = vmatmul.mubr.f32.vlgmr.msra.gmra.mrb[54].mxu0 %v15155_v40 }
0x1b54   :  { %11684 = vmatpush1.bf16.msra.mxu0 %v17242_v21  ;;  %v17253_v21 = vld [vmem:[#allocation25_spill] sm:$0xff] }
0x1b55   :  { %11686 = vmatprep.subr.bf16.mxu0 %v17243_v42  ;;  %v17254_v42 = vld [vmem:[#allocation28_spill] sm:$0xff] }
0x1b58   :  { %11688 = vmatpush1.bf16.msra.mxu0 %v17244_v59  ;;  %v17255_v59 = vld [vmem:[#allocation29_spill] sm:$0xff] }
0x1b59   :  { %11690 = vmatprep.subr.bf16.mxu0 %v17245_v43  ;;  %v17256_v43 = vld [vmem:[#allocation32_spill] sm:$0xff] }
0x1b5c   :  { %11692 = vmatpush1.bf16.msra.mxu0 %v17246_v18  ;;  %v17257_v18 = vld [vmem:[#allocation33_spill] sm:$0xff] }
0x1b5d   :  { %11694 = vmatprep.subr.bf16.mxu0 %v17247_v50  ;;  %v17258_v50 = vld [vmem:[#allocation36_spill] sm:$0xff] }
0x1b60   :  { %11696 = vmatpush1.bf16.msra.mxu0 %v17248_v22  ;;  %v17259_v22 = vld [vmem:[#allocation37_spill] sm:$0xff] }
0x1b61   :  { %11698 = vmatprep.subr.bf16.mxu0 %v17249_v3  ;;  %v17260_v3 = vld [vmem:[#allocation40_spill] sm:$0xff] }
0x1b64   :  { %11700 = vmatpush1.bf16.msra.mxu0 %v17250_v19  ;;  %v17261_v19 = vld [vmem:[#allocation41_spill] sm:$0xff] }
0x1b65   :  { %11702 = vmatprep.subr.bf16.mxu0 %v17251_v41  ;;  %v17262_v41 = vld [vmem:[#allocation44_spill] sm:$0xff] }
0x1b68   :  { %11704 = vmatpush1.bf16.msra.mxu0 %v17252_v14  ;;  %v17263_v14 = vld [vmem:[#allocation45_spill] sm:$0xff] }
0x1b69   :  { %11706 = vmatprep.subr.bf16.mxu0 %v17253_v21  ;;  %v17264_v21 = vld [vmem:[#allocation48_spill] sm:$0xff] }
0x1b6c   :  { %11708 = vmatpush1.bf16.msra.mxu0 %v17254_v42  ;;  %v17265_v42 = vld [vmem:[#allocation49_spill] sm:$0xff] }
0x1b6d   :  { %11710 = vmatprep.subr.bf16.mxu0 %v17255_v59  ;;  %v17266_v59 = vld [vmem:[#allocation52_spill] sm:$0xff] }
0x1b70   :  { %11712 = vmatpush1.bf16.msra.mxu0 %v17256_v43  ;;  %v17267_v43 = vld [vmem:[#allocation53_spill] sm:$0xff] }
0x1b71   :  { %11714 = vmatprep.subr.bf16.mxu0 %v17257_v18  ;;  %v17268_v18 = vld [vmem:[#allocation56_spill] sm:$0xff] }
0x1b74   :  { %11716 = vmatpush1.bf16.msra.mxu0 %v17258_v50  ;;  %v17269_v50 = vld [vmem:[#allocation57_spill] sm:$0xff] }
0x1b75   :  { %11718 = vmatprep.subr.bf16.mxu0 %v17259_v22  ;;  %v17270_v22 = vld [vmem:[#allocation60_spill] sm:$0xff] }
0x1b78   :  { %11720 = vmatpush1.bf16.msra.mxu0 %v17260_v3  ;;  %v17271_v3 = vld [vmem:[#allocation61_spill] sm:$0xff] }
0x1b79   :  { %11722 = vmatprep.subr.bf16.mxu0 %v17261_v19  ;;  %v17272_v19 = vld [vmem:[#allocation64_spill] sm:$0xff] }
0x1b7c   :  { %11724 = vmatpush1.bf16.msra.mxu0 %v17262_v41  ;;  %v17273_v41 = vld [vmem:[#allocation66_spill] sm:$0xff] }
0x1b7d   :  { %11726 = vmatprep.subr.bf16.mxu0 %v17263_v14  ;;  %v416_v14 = vpop.permute.xlu1 %415 }
0x1b80   :  { %11728 = vmatpush1.bf16.msra.mxu0 %v17264_v21  ;;  %v17274_v21 = vld [vmem:[#allocation118_spill] sm:$0xff] }
0x1b81   :  { %11730 = vmatprep.subr.bf16.mxu0 %v17265_v42  ;;  %v483_v25 = vmul.f32 %v17274_v21, %v416_v14  ;;  %v17275_v42 = vld [vmem:[#allocation119_spill] sm:$0xff] }
0x1b82   :  { %v484_v23 = vmul.f32 %v17275_v42, %v416_v14 }
0x1b84   :  { %11732 = vmatpush1.bf16.msra.mxu0 %v17266_v59 }
0x1b85   :  { %11734 = vmatprep.subr.bf16.mxu0 %v17267_v43  ;;  %v17276_v43 = vld [vmem:[#allocation120_spill] sm:$0xff] }
0x1b86   :  { %v547_v36 = vadd.f32 %v17276_v43, %v483_v25  ;;  %v485_v25 = vmul.f32 %v16136_v10, %v416_v14  ;;  %v17281_v14 = vld [vmem:[#allocation63_spill] sm:$0xff] }
0x1b88   :  { %11736 = vmatpush1.bf16.msra.mxu0 %v17268_v18  ;;  %v17277_v18 = vld [vmem:[#allocation121_spill] sm:$0xff] }
0x1b89   :  { %11738 = vmatprep.subr.bf16.mxu0 %v17269_v50 }
0x1b8c   :  { %11740 = vmatpush1.bf16.msra.mxu0 %v17270_v22 }
0x1b8d   :  { %11742 = vmatprep.subr.bf16.mxu0 %v17271_v3 }
0x1b90   :  { %11744 = vmatpush1.bf16.msra.mxu0 %v17272_v19  ;;  %v548_v19 = vadd.f32 %v16327_v60, %v484_v23 }
0x1b91   :  { %11810 = vmatprep.subr.bf16.mxu0 %v17273_v41 }
0x1be6   :  { %v5869_v59 = vpop.f32.mrb[52].mxu0  ;;  %v5940_v20 = vpop.f32.mrb[78].mxu1 }
0x1be7   :  { %v5870_v51 = vadd.f32 %v5869_v59, %v17277_v18  ;;  %v5871_v50 = vpop.f32.mrb[53].mxu0  ;;  %v15310_v48 = vpop.f32.mrb[79].mxu1  ;;  %v5941_v18 = vadd.f32 %v5940_v20, %v13128_v57  ;;  %v17278_v20 = vld [vmem:[#allocation58_spill] sm:$0xff] }
0x1be8   :  { %v5872_v3 = vadd.f32 %v5871_v50, %v16134_v32  ;;  %v549_v50 = vadd.f32 %v13132_v30, %v485_v25  ;;  %v17285_v25 = vld [vmem:[#allocation71_spill] sm:$0xff] }
0x1be9   :  { %v6020_v22 = vadd.f32 %v5870_v51, %v547_v36 }
0x1bea   :  { %v6027_v37 = vadd.f32 %v5872_v3, %v548_v19 }
0x1beb   :  { %v7259_v41 = vmul.f32 -1.442695, %v6020_v22 }
0x1bec   :  { %v7260_v21 = vmul.f32 -1.442695, %v6027_v37 }
0x1bed   :  { %12496 = vpow2.f32 %v7259_v41  ;;  %v17280_v41 = vld [vmem:[#allocation62_spill] sm:$0xff] }
0x1bee   :  { %12498 = vpow2.f32 %v7260_v21  ;;  %v17282_v21 = vld [vmem:[#allocation65_spill] sm:$0xff] }
0x1bf7   :  { %v12497_v42 = vpop.eup %12496 }
0x1bf8   :  { %v6024_v1 = vadd.f32 1.0, %v12497_v42  ;;  %v12499_v26 = vpop.eup %12498  ;;  %v17283_v42 = vld [vmem:[#allocation67_spill] sm:$0xff] }
0x1bf9   :  { %v6031_v59 = vadd.f32 1.0, %v12499_v26 }
0x1bfa   :  { %12500 = vrcp.f32 %v6024_v1 }
0x1bfb   :  { %12502 = vrcp.f32 %v6031_v59  ;;  %v17286_v59 = vld [vmem:[#allocation73_spill] sm:$0xff] }
0x1c04   :  { %v12501_v43 = vpop.eup %12500 }
0x1c05   :  { %v6034_v51 = vmul.f32 %v12501_v43, %v5941_v18  ;;  %v12503_v23 = vpop.eup %12502  ;;  %v17279_v18 = vld [vmem:[#allocation59_spill] sm:$0xff]  ;;  %v17284_v43 = vld [vmem:[#allocation69_spill] sm:$0xff] }
0x1c06   :  { %v6037_v22 = vsub.f32 1.0, %v12503_v23  ;;  %v6039_v3 = vmul.f32 %v12503_v23, %v15155_v40 }
0x1c07   :  { %v6035_v36 = vadd.f32 %v6034_v51, %v549_v50  ;;  %v17287_v50 = vld [vmem:[#allocation86_spill] sm:$0xff] }
0x1c09   :  { %12504 = vtanh.f32 %v6035_v36  ;;  %v17288_v36 = vld [vmem:[#allocation126_spill] sm:$0xff] }
0x1c0a   :  { %v5943_v23 = vadd.f32 %v15310_v48, %v17288_v36 }
0x1c13   :  { %v12505_v37 = vpop.eup %12504 }
0x1c14   :  { %v6038_v19 = vmul.f32 %v12505_v37, %v6037_v22  ;;  %v17289_v22 = vld [vmem:[#allocation127_spill] sm:$0xff] }
0x1c16   :  { %v15318_v1 = vadd.f32 %v6039_v3, %v6038_v19 }
0x1c18   :  { %6106 = vmatmul.mubr.f32.vlgmr.msra.gmra.mrb[80].mxu1 %v15318_v1 }
0x1c19   :  { %11659 = vmatpush3.bf16.msra.mxu1 %v13136_v6  ;;  %8066 = vmatprep.mubr.msk.f32.mxu1 %vm12635_vm0, %v15996_v53 }
0x1c1a   :  { %11660 = vmatprep.subr.bf16.mxu1 %v16051_v54 }
0x1c1d   :  { %11662 = vmatpush3.bf16.msra.mxu1 %v13142_v4 }
0x1c1e   :  { %11663 = vmatprep.subr.bf16.mxu1 %v16051_v54 }
0x1c21   :  { %11665 = vmatpush3.bf16.msra.mxu1 %v13148_v0 }
0x1c22   :  { %11666 = vmatprep.subr.bf16.mxu1 %v16051_v54 }
0x1c25   :  { %11668 = vmatpush3.bf16.msra.mxu1 %v13152_v35 }
0x1c26   :  { %v6011_v26 = vpop.f32.mrb[54].mxu0  ;;  %11669 = vmatprep.subr.bf16.mxu1 %v16051_v54 }
0x1c27   :  { %v6013_v40 = vpop.f32.mrb[55].mxu0  ;;  %v6012_v19 = vadd.f32 %v6011_v26, %v16164_v16 }
0x1c29   :  { %11671 = vmatpush3.bf16.msra.mxu1 %v13156_v7 }
0x1c2a   :  { %11672 = vmatprep.subr.bf16.mxu1 %v16051_v54 }
0x1c2d   :  { %11674 = vmatpush3.bf16.msra.mxu1 %v13160_v33 }
0x1c2e   :  { %11675 = vmatprep.subr.bf16.mxu1 %v16051_v54 }
0x1c31   :  { %11677 = vmatpush3.bf16.msra.mxu1 %v13164_v31 }
0x1c32   :  { %11678 = vmatprep.subr.bf16.mxu1 %v16051_v54 }
0x1c35   :  { %11680 = vmatpush3.bf16.msra.mxu1 %v13168_v38 }
0x1c36   :  { %11746 = vmatprep.subr.bf16.mxu1 %v12702_v29 }
0x1c38   :  { %8067 = vmatmul.mubr.f32.vlgmr.msra.gmra.mrb[82].mxu1 %v15318_v1 }
0x1c39   :  { %11748 = vmatpush1.bf16.msra.mxu1 %v12708_v34 }
0x1c3a   :  { %11750 = vmatprep.subr.bf16.mxu1 %v12713_v39 }
0x1c3d   :  { %11752 = vmatpush1.bf16.msra.mxu1 %v12716_v44 }
0x1c3e   :  { %11754 = vmatprep.subr.bf16.mxu1 %v12722_v49 }
0x1c41   :  { %11756 = vmatpush1.bf16.msra.mxu1 %v12728_v58 }
0x1c42   :  { %11758 = vmatprep.subr.bf16.mxu1 %v16137_v62 }
0x1c45   :  { %11760 = vmatpush1.bf16.msra.mxu1 %v16138_v24 }
0x1c46   :  { %11762 = vmatprep.subr.bf16.mxu1 %v16139_v55 }
0x1c49   :  { %11764 = vmatpush1.bf16.msra.mxu1 %v16140_v63 }
0x1c4a   :  { %11766 = vmatprep.subr.bf16.mxu1 %v16232_v17 }
0x1c4d   :  { %11768 = vmatpush1.bf16.msra.mxu1 %v16233_v45 }
0x1c4e   :  { %11770 = vmatprep.subr.bf16.mxu1 %v16234_v52 }
0x1c51   :  { %11772 = vmatpush1.bf16.msra.mxu1 %v16328_v8 }
0x1c52   :  { %11774 = vmatprep.subr.bf16.mxu1 %v16423_v2 }
0x1c55   :  { %11776 = vmatpush1.bf16.msra.mxu1 %v16518_v5 }
0x1c56   :  { %11778 = vmatprep.subr.bf16.mxu1 %v16613_v28 }
0x1c59   :  { %11780 = vmatpush1.bf16.msra.mxu1 %v16708_v13 }
0x1c5a   :  { %11782 = vmatprep.subr.bf16.mxu1 %v16803_v11 }
0x1c5d   :  { %11784 = vmatpush1.bf16.msra.mxu1 %v16898_v56 }
0x1c5e   :  { %11786 = vmatprep.subr.bf16.mxu1 %v16993_v47 }
0x1c61   :  { %11788 = vmatpush1.bf16.msra.mxu1 %v17088_v27 }
0x1c62   :  { %11790 = vmatprep.subr.bf16.mxu1 %v17183_v9 }
0x1c65   :  { %11792 = vmatpush1.bf16.msra.mxu1 %v17278_v20 }
0x1c66   :  { %11794 = vmatprep.subr.bf16.mxu1 %v17279_v18  ;;  %v6014_v18 = vadd.f32 %v6013_v40, %v13227_v12  ;;  %v17291_v40 = vld [vmem:[#allocation68_spill] sm:$0xff] }
0x1c69   :  { %11796 = vmatpush1.bf16.msra.mxu1 %v17280_v41 }
0x1c6a   :  { %11798 = vmatprep.subr.bf16.mxu1 %v17281_v14 }
0x1c6d   :  { %11800 = vmatpush1.bf16.msra.mxu1 %v17282_v21 }
0x1c6e   :  { %11802 = vmatprep.subr.bf16.mxu1 %v17283_v42 }
0x1c71   :  { %11804 = vmatpush1.bf16.msra.mxu1 %v17284_v43 }
0x1c72   :  { %11806 = vmatprep.subr.bf16.mxu1 %v17285_v25 }
0x1c75   :  { %11808 = vmatpush1.bf16.msra.mxu1 %v17286_v59 }
0x1c76   :  { %11874 = vmatprep.subr.bf16.mxu1 %v17287_v50 }
0x1ceb   :  { %v6107_v51 = vpop.f32.mrb[80].mxu1 }
0x1cec   :  { %v6108_v37 = vadd.f32 %v6107_v51, %v17289_v22  ;;  %v6109_v3 = vpop.f32.mrb[81].mxu1 }
0x1ced   :  { %v6110_v21 = vadd.f32 %v6109_v3, %v13218_v61 }
0x1cee   :  { %v6182_v42 = vadd.f32 %v6108_v37, %v5943_v23  ;;  %v17298_v37 = vld [vmem:[#allocation94_spill] sm:$0xff] }
0x1cef   :  { %v6189_v14 = vadd.f32 %v6110_v21, %v6012_v19  ;;  %v17299_v19 = vld [vmem:[#allocation75_spill] sm:$0xff] }
0x1cf0   :  { %v7261_v43 = vmul.f32 -1.442695, %v6182_v42 }
0x1cf1   :  { %v7262_v25 = vmul.f32 -1.442695, %v6189_v14 }
0x1cf2   :  { %12506 = vpow2.f32 %v7261_v43 }
0x1cf3   :  { %12508 = vpow2.f32 %v7262_v25 }
0x1cfc   :  { %v12507_v59 = vpop.eup %12506 }
0x1cfd   :  { %v6186_v41 = vadd.f32 1.0, %v12507_v59  ;;  %v12509_v50 = vpop.eup %12508  ;;  %v17293_v59 = vld [vmem:[#allocation87_spill] sm:$0xff] }
0x1cfe   :  { %v6193_v48 = vadd.f32 1.0, %v12509_v50  ;;  %v17294_v50 = vld [vmem:[#allocation90_spill] sm:$0xff] }
0x1cff   :  { %12510 = vrcp.f32 %v6186_v41 }
0x1d00   :  { %12512 = vrcp.f32 %v6193_v48  ;;  %v17300_v48 = vld [vmem:[#allocation76_spill] sm:$0xff] }
0x1d09   :  { %v12511_v36 = vpop.eup %12510 }
0x1d0a   :  { %v6196_v51 = vmul.f32 %v12511_v36, %v6014_v18  ;;  %v12513_v21 = vpop.eup %12512  ;;  %v17292_v18 = vld [vmem:[#allocation70_spill] sm:$0xff] }
0x1d0b   :  { %v6178_v22 = vpop.f32.mrb[82].mxu1  ;;  %v6199_v42 = vsub.f32 1.0, %v12513_v21  ;;  %v6201_v25 = vmul.f32 %v12513_v21, %v15217_v15  ;;  %v17295_v15 = vld [vmem:[#allocation72_spill] sm:$0xff]  ;;  %v17296_v36 = vld [vmem:[#allocation74_spill] sm:$0xff]  ;;  %v17305_v21 = vld [vmem:[#allocation99_spill] sm:$0xff] }
0x1d0c   :  { %v6179_v26 = vadd.f32 %v6178_v22, %v13231_v46  ;;  %v8068_v3 = vpop.f32.mrb[83].mxu1  ;;  %v17297_v22 = vld [vmem:[#allocation91_spill] sm:$0xff] }
0x1d0d   :  { %v17303_v3 = vld [vmem:[#allocation77_spill] sm:$0xff] }
0x1d0e   :  { %v6197_v23 = vadd.f32 %v6196_v51, %v6179_v26  ;;  %v17301_v51 = vld [vmem:[#allocation95_spill] sm:$0xff]  ;;  %v17302_v26 = vld [vmem:[#allocation98_spill] sm:$0xff] }
0x1d10   :  { %12514 = vtanh.f32 %v6197_v23  ;;  %v17304_v23 = vld [vmem:[#allocation78_spill] sm:$0xff] }
0x1d1a   :  { %v12515_v14 = vpop.eup %12514 }
0x1d1b   :  { %v6200_v43 = vmul.f32 %v12515_v14, %v6199_v42  ;;  %v17306_v42 = vld [vmem:[#allocation102_spill] sm:$0xff]  ;;  %v17307_v14 = vld [vmem:[#allocation79_spill] sm:$0xff] }
0x1d1d   :  { %v15380_v41 = vadd.f32 %v6201_v25, %v6200_v43  ;;  %v17308_v43 = vld [vmem:[#allocation80_spill] sm:$0xff]  ;;  %v17309_v25 = vld [vmem:[#allocation103_spill] sm:$0xff] }
0x1d1f   :  { %17290 = vst [vmem:[#allocation123_spill] sm:$0xff] %v15380_v41  ;;  %6267 = vmatprep.mubr.f32.mxu0 %v15380_v41  ;;  %6338 = vmatprep.mubr.f32.mxu1 %v15380_v41 }
0x1d20   :  { %6268 = vmatmul.mubr.f32.vlgmr.msra.gmra.mrb[56].mxu0 %v15318_v1  ;;  %6339 = vmatmul.mubr.f32.vlgmr.msra.gmra.mrb[84].mxu1 %v15318_v1 }
0x1d21   :  { %11812 = vmatpush1.bf16.msra.mxu0 %v17291_v40  ;;  %6409 = vmatprep.mubr.f32.mxu0 %v15380_v41 }
0x1d22   :  { %11814 = vmatprep.subr.bf16.mxu0 %v17292_v18  ;;  %11876 = vmatpush1.bf16.msra.mxu1 %v17293_v59 }
0x1d23   :  { %11878 = vmatprep.subr.bf16.mxu1 %v17294_v50  ;;  %6505 = vmatprep.mubr.f32.mxu1 %v15996_v53 }
0x1d25   :  { %11816 = vmatpush1.bf16.msra.mxu0 %v17295_v15 }
0x1d26   :  { %11818 = vmatprep.subr.bf16.mxu0 %v17296_v36  ;;  %11880 = vmatpush1.bf16.msra.mxu1 %v17297_v22 }
0x1d27   :  { %11882 = vmatprep.subr.bf16.mxu1 %v17298_v37 }
0x1d29   :  { %11820 = vmatpush1.bf16.msra.mxu0 %v17299_v19  ;;  %v17310_v19 = vld [vmem:[#allocation106_spill] sm:$0xff] }
0x1d2a   :  { %11822 = vmatprep.subr.bf16.mxu0 %v17300_v48  ;;  %11884 = vmatpush1.bf16.msra.mxu1 %v17301_v51  ;;  %v17311_v48 = vld [vmem:[#allocation81_spill] sm:$0xff]  ;;  %v17312_v51 = vld [vmem:[#allocation82_spill] sm:$0xff] }
0x1d2b   :  { %11886 = vmatprep.subr.bf16.mxu1 %v17302_v26  ;;  %v17313_v26 = vld [vmem:[#allocation107_spill] sm:$0xff] }
0x1d2d   :  { %11824 = vmatpush1.bf16.msra.mxu0 %v17303_v3  ;;  %v17314_v3 = vld [vmem:[#allocation110_spill] sm:$0xff] }
0x1d2e   :  { %11826 = vmatprep.subr.bf16.mxu0 %v17304_v23  ;;  %11888 = vmatpush1.bf16.msra.mxu1 %v17305_v21  ;;  %v17315_v23 = vld [vmem:[#allocation83_spill] sm:$0xff]  ;;  %v17316_v21 = vld [vmem:[#allocation84_spill] sm:$0xff] }
0x1d2f   :  { %11890 = vmatprep.subr.bf16.mxu1 %v17306_v42  ;;  %v17317_v42 = vld [vmem:[#allocation111_spill] sm:$0xff] }
0x1d31   :  { %11828 = vmatpush1.bf16.msra.mxu0 %v17307_v14  ;;  %v17318_v14 = vld [vmem:[#allocation114_spill] sm:$0xff] }
0x1d32   :  { %11830 = vmatprep.subr.bf16.mxu0 %v17308_v43  ;;  %11892 = vmatpush1.bf16.msra.mxu1 %v17309_v25  ;;  %v17319_v43 = vld [vmem:[#allocation85_spill] sm:$0xff]  ;;  %v17320_v25 = vld [vmem:[#allocation88_spill] sm:$0xff] }
0x1d33   :  { %11894 = vmatprep.subr.bf16.mxu1 %v17310_v19  ;;  %v17321_v19 = vld [vmem:[#allocation115_spill] sm:$0xff] }
0x1d35   :  { %11832 = vmatpush1.bf16.msra.mxu0 %v17311_v48  ;;  %v17332_v48 = vld [vmem:[#allocation109_spill] sm:$0xff] }
0x1d36   :  { %11834 = vmatprep.subr.bf16.mxu0 %v17312_v51  ;;  %11896 = vmatpush1.bf16.msra.mxu1 %v17313_v26  ;;  %v17322_v51 = vld [vmem:[#allocation89_spill] sm:$0xff]  ;;  %v17323_v26 = vld [vmem:[#allocation92_spill] sm:$0xff] }
0x1d37   :  { %11898 = vmatprep.subr.bf16.mxu1 %v17314_v3  ;;  %v17324_v3 = vld [vmem:[#allocation93_spill] sm:$0xff] }
0x1d39   :  { %11836 = vmatpush1.bf16.msra.mxu0 %v17315_v23  ;;  %v17325_v23 = vld [vmem:[#allocation96_spill] sm:$0xff] }
0x1d3a   :  { %11838 = vmatprep.subr.bf16.mxu0 %v17316_v21  ;;  %11900 = vmatpush1.bf16.msra.mxu1 %v17317_v42  ;;  %v17326_v21 = vld [vmem:[#allocation97_spill] sm:$0xff]  ;;  %v17327_v42 = vld [vmem:[#allocation100_spill] sm:$0xff] }
0x1d3b   :  { %11902 = vmatprep.subr.bf16.mxu1 %v17318_v14  ;;  %v17328_v14 = vld [vmem:[#allocation101_spill] sm:$0xff] }
0x1d3d   :  { %11840 = vmatpush1.bf16.msra.mxu0 %v17319_v43  ;;  %v17329_v43 = vld [vmem:[#allocation104_spill] sm:$0xff] }
0x1d3e   :  { %11842 = vmatprep.subr.bf16.mxu0 %v17320_v25  ;;  %11904 = vmatpush1.bf16.msra.mxu1 %v17321_v19  ;;  %v17330_v25 = vld [vmem:[#allocation105_spill] sm:$0xff]  ;;  %v17331_v19 = vld [vmem:[#allocation108_spill] sm:$0xff] }
0x1d3f   :  { %11905 = vmatprep.subr.bf16.mxu1 %v16051_v54 }
0x1d41   :  { %11844 = vmatpush1.bf16.msra.mxu0 %v17322_v51  ;;  %v17333_v51 = vld [vmem:[#allocation112_spill] sm:$0xff] }
0x1d42   :  { %11846 = vmatprep.subr.bf16.mxu0 %v17323_v26  ;;  %v17334_v26 = vld [vmem:[#allocation113_spill] sm:$0xff] }
0x1d45   :  { %11848 = vmatpush1.bf16.msra.mxu0 %v17324_v3  ;;  %v17335_v3 = vld [vmem:[#allocation116_spill] sm:$0xff] }
0x1d46   :  { %11850 = vmatprep.subr.bf16.mxu0 %v17325_v23  ;;  %v17336_v23 = vld [vmem:[#allocation117_spill] sm:$0xff] }
0x1d49   :  { %11852 = vmatpush1.bf16.msra.mxu0 %v17326_v21  ;;  %v17337_v21 = vld [vmem:[#allocation12_spill] sm:$0xff] }
0x1d4a   :  { %11854 = vmatprep.subr.bf16.mxu0 %v17327_v42  ;;  %v17348_v42 = vld [vmem:[#allocation24_spill] sm:$0xff] }
0x1d4d   :  { %11856 = vmatpush1.bf16.msra.mxu0 %v17328_v14  ;;  %v17338_v14 = vld [vmem:[#allocation13_spill] sm:$0xff] }
0x1d4e   :  { %11858 = vmatprep.subr.bf16.mxu0 %v17329_v43  ;;  %v17339_v43 = vld [vmem:[#allocation14_spill] sm:$0xff] }
0x1d51   :  { %11860 = vmatpush1.bf16.msra.mxu0 %v17330_v25  ;;  %v17340_v25 = vld [vmem:[#allocation15_spill] sm:$0xff] }
0x1d52   :  { %11862 = vmatprep.subr.bf16.mxu0 %v17331_v19  ;;  %v17341_v19 = vld [vmem:[#allocation16_spill] sm:$0xff] }
0x1d55   :  { %11864 = vmatpush1.bf16.msra.mxu0 %v17332_v48  ;;  %v17342_v48 = vld [vmem:[#allocation17_spill] sm:$0xff] }
0x1d56   :  { %11866 = vmatprep.subr.bf16.mxu0 %v17333_v51  ;;  %v17343_v51 = vld [vmem:[#allocation18_spill] sm:$0xff] }
0x1d59   :  { %11868 = vmatpush1.bf16.msra.mxu0 %v17334_v26  ;;  %v17344_v26 = vld [vmem:[#allocation19_spill] sm:$0xff] }
0x1d5a   :  { %11870 = vmatprep.subr.bf16.mxu0 %v17335_v3  ;;  %v17345_v3 = vld [vmem:[#allocation20_spill] sm:$0xff] }
0x1d5d   :  { %11872 = vmatpush1.bf16.msra.mxu0 %v17336_v23  ;;  %v17346_v23 = vld [vmem:[#allocation21_spill] sm:$0xff] }
0x1d5e   :  { %11930 = vmatprep.subr.bf16.mxu0 %v17337_v21  ;;  %v17347_v21 = vld [vmem:[#allocation22_spill] sm:$0xff] }
0x1d60   :  { %6410 = vmatmul.mubr.f32.vlgmr.msra.gmra.mrb[58].mxu0 %v15318_v1 }
0x1d61   :  { %11932 = vmatpush1.bf16.msra.mxu0 %v17338_v14  ;;  %v17349_v14 = vld [vmem:[#allocation25_spill] sm:$0xff] }
0x1d62   :  { %11934 = vmatprep.subr.bf16.mxu0 %v17339_v43  ;;  %v17350_v43 = vld [vmem:[#allocation28_spill] sm:$0xff] }
0x1d65   :  { %11936 = vmatpush1.bf16.msra.mxu0 %v17340_v25  ;;  %v17351_v25 = vld [vmem:[#allocation29_spill] sm:$0xff] }
0x1d66   :  { %11938 = vmatprep.subr.bf16.mxu0 %v17341_v19  ;;  %v17352_v19 = vld [vmem:[#allocation32_spill] sm:$0xff] }
0x1d69   :  { %11940 = vmatpush1.bf16.msra.mxu0 %v17342_v48  ;;  %v17353_v48 = vld [vmem:[#allocation33_spill] sm:$0xff] }
0x1d6a   :  { %11942 = vmatprep.subr.bf16.mxu0 %v17343_v51  ;;  %v17354_v51 = vld [vmem:[#allocation36_spill] sm:$0xff] }
0x1d6d   :  { %11944 = vmatpush1.bf16.msra.mxu0 %v17344_v26  ;;  %v17355_v26 = vld [vmem:[#allocation37_spill] sm:$0xff] }
0x1d6e   :  { %11946 = vmatprep.subr.bf16.mxu0 %v17345_v3  ;;  %v17356_v3 = vld [vmem:[#allocation40_spill] sm:$0xff] }
0x1d71   :  { %11948 = vmatpush1.bf16.msra.mxu0 %v17346_v23  ;;  %v17357_v23 = vld [vmem:[#allocation41_spill] sm:$0xff] }
0x1d72   :  { %11950 = vmatprep.subr.bf16.mxu0 %v17347_v21  ;;  %v17358_v21 = vld [vmem:[#allocation44_spill] sm:$0xff] }
0x1d75   :  { %11952 = vmatpush1.bf16.msra.mxu0 %v17348_v42  ;;  %v17359_v42 = vld [vmem:[#allocation45_spill] sm:$0xff] }
0x1d76   :  { %11954 = vmatprep.subr.bf16.mxu0 %v17349_v14  ;;  %v17360_v14 = vld [vmem:[#allocation48_spill] sm:$0xff] }
0x1d79   :  { %11956 = vmatpush1.bf16.msra.mxu0 %v17350_v43  ;;  %v17361_v43 = vld [vmem:[#allocation49_spill] sm:$0xff] }
0x1d7a   :  { %11958 = vmatprep.subr.bf16.mxu0 %v17351_v25  ;;  %v17362_v25 = vld [vmem:[#allocation52_spill] sm:$0xff] }
0x1d7d   :  { %11960 = vmatpush1.bf16.msra.mxu0 %v17352_v19  ;;  %v17363_v19 = vld [vmem:[#allocation53_spill] sm:$0xff] }
0x1d7e   :  { %11962 = vmatprep.subr.bf16.mxu0 %v17353_v48  ;;  %v17364_v48 = vld [vmem:[#allocation56_spill] sm:$0xff] }
0x1d81   :  { %11964 = vmatpush1.bf16.msra.mxu0 %v17354_v51  ;;  %v17365_v51 = vld [vmem:[#allocation57_spill] sm:$0xff] }
0x1d82   :  { %11966 = vmatprep.subr.bf16.mxu0 %v17355_v26  ;;  %v17366_v26 = vld [vmem:[#allocation60_spill] sm:$0xff] }
0x1d85   :  { %11968 = vmatpush1.bf16.msra.mxu0 %v17356_v3  ;;  %v17367_v3 = vld [vmem:[#allocation61_spill] sm:$0xff] }
0x1d86   :  { %11970 = vmatprep.subr.bf16.mxu0 %v17357_v23  ;;  %v17368_v23 = vld [vmem:[#allocation64_spill] sm:$0xff] }
0x1d89   :  { %11972 = vmatpush1.bf16.msra.mxu0 %v17358_v21  ;;  %v17369_v21 = vld [vmem:[#allocation66_spill] sm:$0xff] }
0x1d8a   :  { %11974 = vmatprep.subr.bf16.mxu0 %v17359_v42  ;;  %v421_v42 = vpop.permute.xlu0 %420 }
0x1d8d   :  { %11976 = vmatpush1.bf16.msra.mxu0 %v17360_v14  ;;  %v17370_v14 = vld [vmem:[#allocation118_spill] sm:$0xff] }
0x1d8e   :  { %11978 = vmatprep.subr.bf16.mxu0 %v17361_v43  ;;  %v486_v37 = vmul.f32 %v17370_v14, %v421_v42  ;;  %v17371_v43 = vld [vmem:[#allocation119_spill] sm:$0xff] }
0x1d8f   :  { %v487_v22 = vmul.f32 %v17371_v43, %v421_v42 }
0x1d91   :  { %11980 = vmatpush1.bf16.msra.mxu0 %v17362_v25 }
0x1d92   :  { %11982 = vmatprep.subr.bf16.mxu0 %v17363_v19  ;;  %v17372_v19 = vld [vmem:[#allocation120_spill] sm:$0xff] }
0x1d93   :  { %v550_v15 = vadd.f32 %v17372_v19, %v486_v37  ;;  %v488_v37 = vmul.f32 %v16136_v10, %v421_v42 }
0x1d95   :  { %11984 = vmatpush1.bf16.msra.mxu0 %v17364_v48  ;;  %v17373_v48 = vld [vmem:[#allocation121_spill] sm:$0xff] }
0x1d96   :  { %11986 = vmatprep.subr.bf16.mxu0 %v17365_v51 }
0x1d99   :  { %11988 = vmatpush1.bf16.msra.mxu0 %v17366_v26 }
0x1d9a   :  { %11990 = vmatprep.subr.bf16.mxu0 %v17367_v3 }
0x1d9d   :  { %11992 = vmatpush1.bf16.msra.mxu0 %v17368_v23  ;;  %v551_v23 = vadd.f32 %v16327_v60, %v487_v22 }
0x1d9e   :  { %12058 = vmatprep.subr.bf16.mxu0 %v17369_v21 }
0x1df3   :  { %v6269_v25 = vpop.f32.mrb[56].mxu0  ;;  %v6340_v36 = vpop.f32.mrb[84].mxu1 }
0x1df4   :  { %v6270_v50 = vadd.f32 %v6269_v25, %v17373_v48  ;;  %v6271_v51 = vpop.f32.mrb[57].mxu0  ;;  %v15473_v59 = vpop.f32.mrb[85].mxu1  ;;  %v6341_v48 = vadd.f32 %v6340_v36, %v13128_v57 }
0x1df5   :  { %v6272_v26 = vadd.f32 %v6271_v51, %v16134_v32  ;;  %v552_v51 = vadd.f32 %v13132_v30, %v488_v37 }
0x1df6   :  { %v6420_v3 = vadd.f32 %v6270_v50, %v550_v15 }
0x1df7   :  { %v6427_v18 = vadd.f32 %v6272_v26, %v551_v23 }
0x1df8   :  { %v7263_v21 = vmul.f32 -1.442695, %v6420_v3 }
0x1df9   :  { %v7264_v14 = vmul.f32 -1.442695, %v6427_v18 }
0x1dfa   :  { %12516 = vpow2.f32 %v7263_v21 }
0x1dfb   :  { %12518 = vpow2.f32 %v7264_v14 }
0x1e04   :  { %v12517_v43 = vpop.eup %12516 }
0x1e05   :  { %v6424_v40 = vadd.f32 1.0, %v12517_v43  ;;  %v12519_v41 = vpop.eup %12518 }
0x1e06   :  { %v6431_v25 = vadd.f32 1.0, %v12519_v41 }
0x1e07   :  { %12520 = vrcp.f32 %v6424_v40 }
0x1e08   :  { %12522 = vrcp.f32 %v6431_v25 }
0x1e11   :  { %v12521_v19 = vpop.eup %12520 }
0x1e12   :  { %v6434_v50 = vmul.f32 %v12521_v19, %v6341_v48  ;;  %v12523_v22 = vpop.eup %12522 }
0x1e13   :  { %v6437_v26 = vsub.f32 1.0, %v12523_v22  ;;  %v6439_v14 = vmul.f32 %v12523_v22, %v15318_v1 }
0x1e14   :  { %v6435_v15 = vadd.f32 %v6434_v50, %v552_v51 }
0x1e16   :  { %12524 = vtanh.f32 %v6435_v15  ;;  %v17385_v15 = vld [vmem:[#allocation123_spill] sm:$0xff] }
0x1e20   :  { %v12525_v18 = vpop.eup %12524 }
0x1e21   :  { %v6438_v43 = vmul.f32 %v12525_v18, %v6437_v26  ;;  %v17386_v18 = vld [vmem:[#allocation68_spill] sm:$0xff] }
0x1e23   :  { %v15481_v40 = vadd.f32 %v6439_v14, %v6438_v43  ;;  %v17387_v14 = vld [vmem:[#allocation70_spill] sm:$0xff]  ;;  %v17388_v43 = vld [vmem:[#allocation87_spill] sm:$0xff] }
0x1e25   :  { %6506 = vmatmul.mubr.f32.vlgmr.msra.gmra.mrb[86].mxu1 %v15481_v40 }
0x1e26   :  { %11907 = vmatpush3.bf16.msra.mxu1 %v13136_v6  ;;  %8101 = vmatprep.mubr.msk.f32.mxu1 %vm12635_vm0, %v15996_v53 }
0x1e27   :  { %11908 = vmatprep.subr.bf16.mxu1 %v16051_v54 }
0x1e2a   :  { %11910 = vmatpush3.bf16.msra.mxu1 %v13142_v4 }
0x1e2b   :  { %11911 = vmatprep.subr.bf16.mxu1 %v16051_v54 }
0x1e2e   :  { %11913 = vmatpush3.bf16.msra.mxu1 %v13148_v0 }
0x1e2f   :  { %11914 = vmatprep.subr.bf16.mxu1 %v16051_v54 }
0x1e32   :  { %11916 = vmatpush3.bf16.msra.mxu1 %v13152_v35 }
0x1e33   :  { %v6411_v1 = vpop.f32.mrb[58].mxu0  ;;  %11917 = vmatprep.subr.bf16.mxu1 %v16051_v54 }
0x1e34   :  { %v6413_v41 = vpop.f32.mrb[59].mxu0 }
0x1e35   :  { %v6414_v36 = vadd.f32 %v6413_v41, %v13227_v12  ;;  %v17390_v41 = vld [vmem:[#allocation72_spill] sm:$0xff] }
0x1e36   :  { %11919 = vmatpush3.bf16.msra.mxu1 %v13156_v7 }
0x1e37   :  { %11920 = vmatprep.subr.bf16.mxu1 %v16051_v54 }
0x1e3a   :  { %11922 = vmatpush3.bf16.msra.mxu1 %v13160_v33 }
0x1e3b   :  { %11923 = vmatprep.subr.bf16.mxu1 %v16051_v54 }
0x1e3e   :  { %11925 = vmatpush3.bf16.msra.mxu1 %v13164_v31 }
0x1e3f   :  { %11926 = vmatprep.subr.bf16.mxu1 %v16051_v54 }
0x1e42   :  { %11928 = vmatpush3.bf16.msra.mxu1 %v13168_v38 }
0x1e43   :  { %11994 = vmatprep.subr.bf16.mxu1 %v12702_v29  ;;  %v17374_v29 = vld [vmem:[#allocation59_spill] sm:$0xff] }
0x1e45   :  { %8102 = vmatmul.mubr.f32.vlgmr.msra.gmra.mrb[88].mxu1 %v15481_v40 }
0x1e46   :  { %11996 = vmatpush1.bf16.msra.mxu1 %v12708_v34  ;;  %v17375_v34 = vld [vmem:[#allocation62_spill] sm:$0xff] }
0x1e47   :  { %11998 = vmatprep.subr.bf16.mxu1 %v12713_v39  ;;  %v17376_v39 = vld [vmem:[#allocation63_spill] sm:$0xff] }
0x1e4a   :  { %12000 = vmatpush1.bf16.msra.mxu1 %v12716_v44  ;;  %v17377_v44 = vld [vmem:[#allocation65_spill] sm:$0xff] }
0x1e4b   :  { %12002 = vmatprep.subr.bf16.mxu1 %v12722_v49  ;;  %v17378_v49 = vld [vmem:[#allocation67_spill] sm:$0xff] }
0x1e4e   :  { %12004 = vmatpush1.bf16.msra.mxu1 %v12728_v58  ;;  %v17379_v58 = vld [vmem:[#allocation69_spill] sm:$0xff] }
0x1e4f   :  { %12006 = vmatprep.subr.bf16.mxu1 %v16137_v62  ;;  %v17380_v62 = vld [vmem:[#allocation71_spill] sm:$0xff] }
0x1e52   :  { %12008 = vmatpush1.bf16.msra.mxu1 %v16138_v24  ;;  %v17381_v24 = vld [vmem:[#allocation73_spill] sm:$0xff] }
0x1e53   :  { %12010 = vmatprep.subr.bf16.mxu1 %v16139_v55  ;;  %v17382_v55 = vld [vmem:[#allocation86_spill] sm:$0xff] }
0x1e56   :  { %12012 = vmatpush1.bf16.msra.mxu1 %v16140_v63 }
0x1e57   :  { %12014 = vmatprep.subr.bf16.mxu1 %v16232_v17  ;;  %v17383_v17 = vld [vmem:[#allocation126_spill] sm:$0xff] }
0x1e5a   :  { %12016 = vmatpush1.bf16.msra.mxu1 %v16233_v45  ;;  %v6343_v45 = vadd.f32 %v15473_v59, %v17383_v17 }
0x1e5b   :  { %12018 = vmatprep.subr.bf16.mxu1 %v16234_v52  ;;  %v17384_v52 = vld [vmem:[#allocation127_spill] sm:$0xff] }
0x1e5e   :  { %12020 = vmatpush1.bf16.msra.mxu1 %v16328_v8 }
0x1e5f   :  { %12022 = vmatprep.subr.bf16.mxu1 %v16423_v2 }
0x1e62   :  { %12024 = vmatpush1.bf16.msra.mxu1 %v16518_v5  ;;  %v6412_v5 = vadd.f32 %v6411_v1, %v16164_v16  ;;  %v17389_v1 = vld [vmem:[#allocation90_spill] sm:$0xff] }
0x1e63   :  { %12026 = vmatprep.subr.bf16.mxu1 %v16613_v28 }
0x1e66   :  { %12028 = vmatpush1.bf16.msra.mxu1 %v16708_v13 }
0x1e67   :  { %12030 = vmatprep.subr.bf16.mxu1 %v16803_v11 }
0x1e6a   :  { %12032 = vmatpush1.bf16.msra.mxu1 %v16898_v56 }
0x1e6b   :  { %12034 = vmatprep.subr.bf16.mxu1 %v16993_v47 }
0x1e6e   :  { %12036 = vmatpush1.bf16.msra.mxu1 %v17088_v27 }
0x1e6f   :  { %12038 = vmatprep.subr.bf16.mxu1 %v17183_v9 }
0x1e72   :  { %12040 = vmatpush1.bf16.msra.mxu1 %v17278_v20 }
0x1e73   :  { %12042 = vmatprep.subr.bf16.mxu1 %v17374_v29  ;;  %v17391_v29 = vld [vmem:[#allocation74_spill] sm:$0xff] }
0x1e76   :  { %12044 = vmatpush1.bf16.msra.mxu1 %v17375_v34  ;;  %v17392_v34 = vld [vmem:[#allocation91_spill] sm:$0xff] }
0x1e77   :  { %12046 = vmatprep.subr.bf16.mxu1 %v17376_v39  ;;  %v17393_v39 = vld [vmem:[#allocation94_spill] sm:$0xff] }
0x1e7a   :  { %12048 = vmatpush1.bf16.msra.mxu1 %v17377_v44  ;;  %v17394_v44 = vld [vmem:[#allocation75_spill] sm:$0xff] }
0x1e7b   :  { %12050 = vmatprep.subr.bf16.mxu1 %v17378_v49  ;;  %v17395_v49 = vld [vmem:[#allocation76_spill] sm:$0xff] }
0x1e7e   :  { %12052 = vmatpush1.bf16.msra.mxu1 %v17379_v58  ;;  %v17396_v58 = vld [vmem:[#allocation95_spill] sm:$0xff] }
0x1e7f   :  { %12054 = vmatprep.subr.bf16.mxu1 %v17380_v62  ;;  %v17397_v62 = vld [vmem:[#allocation98_spill] sm:$0xff] }
0x1e82   :  { %12056 = vmatpush1.bf16.msra.mxu1 %v17381_v24  ;;  %v17398_v24 = vld [vmem:[#allocation77_spill] sm:$0xff] }
0x1e83   :  { %12122 = vmatprep.subr.bf16.mxu1 %v17382_v55  ;;  %v17399_v55 = vld [vmem:[#allocation78_spill] sm:$0xff] }
0x1ef8   :  { %v6507_v63 = vpop.f32.mrb[86].mxu1 }
0x1ef9   :  { %v6508_v8 = vadd.f32 %v6507_v63, %v17384_v52  ;;  %v6509_v2 = vpop.f32.mrb[87].mxu1  ;;  %v17400_v63 = vld [vmem:[#allocation99_spill] sm:$0xff] }
0x1efa   :  { %v6510_v28 = vadd.f32 %v6509_v2, %v13218_v61  ;;  %v17403_v2 = vld [vmem:[#allocation80_spill] sm:$0xff] }
0x1efb   :  { %v6582_v13 = vadd.f32 %v6508_v8, %v6343_v45  ;;  %v17401_v45 = vld [vmem:[#allocation102_spill] sm:$0xff]  ;;  %v17402_v8 = vld [vmem:[#allocation79_spill] sm:$0xff] }
0x1efc   :  { %v6589_v11 = vadd.f32 %v6510_v28, %v6412_v5  ;;  %v17404_v5 = vld [vmem:[#allocation103_spill] sm:$0xff]  ;;  %v17405_v28 = vld [vmem:[#allocation106_spill] sm:$0xff] }
0x1efd   :  { %v7265_v56 = vmul.f32 -1.442695, %v6582_v13  ;;  %v17406_v13 = vld [vmem:[#allocation81_spill] sm:$0xff] }
0x1efe   :  { %v7266_v47 = vmul.f32 -1.442695, %v6589_v11  ;;  %v17407_v11 = vld [vmem:[#allocation82_spill] sm:$0xff] }
0x1eff   :  { %12526 = vpow2.f32 %v7265_v56  ;;  %v17408_v56 = vld [vmem:[#allocation107_spill] sm:$0xff] }
0x1f00   :  { %12528 = vpow2.f32 %v7266_v47  ;;  %v17409_v47 = vld [vmem:[#allocation110_spill] sm:$0xff] }
0x1f09   :  { %v12527_v27 = vpop.eup %12526 }
0x1f0a   :  { %v6586_v9 = vadd.f32 1.0, %v12527_v27  ;;  %v12529_v20 = vpop.eup %12528  ;;  %v17410_v27 = vld [vmem:[#allocation83_spill] sm:$0xff] }
0x1f0b   :  { %v6593_v59 = vadd.f32 1.0, %v12529_v20  ;;  %v17412_v20 = vld [vmem:[#allocation111_spill] sm:$0xff] }
0x1f0c   :  { %12530 = vrcp.f32 %v6586_v9  ;;  %v17411_v9 = vld [vmem:[#allocation84_spill] sm:$0xff] }
0x1f0d   :  { %12532 = vrcp.f32 %v6593_v59  ;;  %v17414_v59 = vld [vmem:[#allocation85_spill] sm:$0xff] }
0x1f16   :  { %v12531_v42 = vpop.eup %12530 }
0x1f17   :  { %v6596_v19 = vmul.f32 %v12531_v42, %v6414_v36  ;;  %v12533_v37 = vpop.eup %12532  ;;  %v17413_v36 = vld [vmem:[#allocation114_spill] sm:$0xff]  ;;  %v17415_v42 = vld [vmem:[#allocation88_spill] sm:$0xff] }
0x1f18   :  { %v6578_v48 = vpop.f32.mrb[88].mxu1  ;;  %v6599_v25 = vsub.f32 1.0, %v12533_v37  ;;  %v6601_v22 = vmul.f32 %v12533_v37, %v17385_v15  ;;  %v17421_v37 = vld [vmem:[#allocation97_spill] sm:$0xff] }
0x1f19   :  { %v6579_v3 = vadd.f32 %v6578_v48, %v13231_v46  ;;  %v8103_v23 = vpop.f32.mrb[89].mxu1  ;;  %v17417_v48 = vld [vmem:[#allocation89_spill] sm:$0xff] }
0x1f1a   :  { %v17419_v23 = vld [vmem:[#allocation93_spill] sm:$0xff] }
0x1f1b   :  { %v6597_v21 = vadd.f32 %v6596_v19, %v6579_v3  ;;  %v17416_v19 = vld [vmem:[#allocation115_spill] sm:$0xff]  ;;  %v17418_v3 = vld [vmem:[#allocation92_spill] sm:$0xff]  ;;  %v17425_v15 = vld [vmem:[#allocation105_spill] sm:$0xff] }
0x1f1d   :  { %12534 = vtanh.f32 %v6597_v21  ;;  %v17420_v21 = vld [vmem:[#allocation96_spill] sm:$0xff] }
0x1f27   :  { %v12535_v51 = vpop.eup %12534 }
0x1f28   :  { %v6600_v50 = vmul.f32 %v12535_v51, %v6599_v25  ;;  %v17422_v25 = vld [vmem:[#allocation100_spill] sm:$0xff]  ;;  %v17423_v51 = vld [vmem:[#allocation101_spill] sm:$0xff] }
0x1f2a   :  { %v15543_v26 = vadd.f32 %v6601_v22, %v6600_v50  ;;  %v17424_v50 = vld [vmem:[#allocation104_spill] sm:$0xff] }
0x1f2b   :  { %v17426_v22 = vld [vmem:[#allocation108_spill] sm:$0xff] }
0x1f2c   :  { %6667 = vmatprep.mubr.f32.mxu0 %v15543_v26  ;;  %6738 = vmatprep.mubr.f32.mxu1 %v15543_v26 }
0x1f2d   :  { %6668 = vmatmul.mubr.f32.vlgmr.msra.gmra.mrb[60].mxu0 %v15481_v40  ;;  %6739 = vmatmul.mubr.f32.vlgmr.msra.gmra.mrb[90].mxu1 %v15481_v40 }
0x1f2e   :  { %12060 = vmatpush1.bf16.msra.mxu0 %v17386_v18  ;;  %6809 = vmatprep.mubr.f32.mxu0 %v15543_v26  ;;  %v17427_v18 = vld [vmem:[#allocation109_spill] sm:$0xff] }
0x1f2f   :  { %12062 = vmatprep.subr.bf16.mxu0 %v17387_v14  ;;  %12124 = vmatpush1.bf16.msra.mxu1 %v17388_v43  ;;  %v17428_v14 = vld [vmem:[#allocation112_spill] sm:$0xff]  ;;  %v17429_v43 = vld [vmem:[#allocation113_spill] sm:$0xff] }
0x1f30   :  { %12126 = vmatprep.subr.bf16.mxu1 %v17389_v1  ;;  %6905 = vmatprep.mubr.f32.mxu1 %v15996_v53  ;;  %v17430_v1 = vld [vmem:[#allocation116_spill] sm:$0xff] }
0x1f32   :  { %12064 = vmatpush1.bf16.msra.mxu0 %v17390_v41  ;;  %v17431_v41 = vld [vmem:[#allocation117_spill] sm:$0xff] }
0x1f33   :  { %12066 = vmatprep.subr.bf16.mxu0 %v17391_v29  ;;  %12128 = vmatpush1.bf16.msra.mxu1 %v17392_v34  ;;  %v426_v29 = vpop.permute.xlu1 %425  ;;  %v17432_v34 = vld [vmem:[#allocation118_spill] sm:$0xff] }
0x1f34   :  { %12130 = vmatprep.subr.bf16.mxu1 %v17393_v39  ;;  %v489_v39 = vmul.f32 %v17432_v34, %v426_v29 }
0x1f36   :  { %12068 = vmatpush1.bf16.msra.mxu0 %v17394_v44  ;;  %v17433_v44 = vld [vmem:[#allocation119_spill] sm:$0xff] }
0x1f37   :  { %12070 = vmatprep.subr.bf16.mxu0 %v17395_v49  ;;  %12132 = vmatpush1.bf16.msra.mxu1 %v17396_v58  ;;  %v490_v49 = vmul.f32 %v17433_v44, %v426_v29  ;;  %v7018_v44 = vld [vmem:[#allocation3 + $0x8e8] sm:$0xff] }
0x1f38   :  { %12134 = vmatprep.subr.bf16.mxu1 %v17397_v62 }
0x1f3a   :  { %12072 = vmatpush1.bf16.msra.mxu0 %v17398_v24  ;;  %v17434_v24 = vld [vmem:[#allocation120_spill] sm:$0xff] }
0x1f3b   :  { %12074 = vmatprep.subr.bf16.mxu0 %v17399_v55  ;;  %12136 = vmatpush1.bf16.msra.mxu1 %v17400_v63  ;;  %v553_v55 = vadd.f32 %v17434_v24, %v489_v39  ;;  %v17435_v63 = vld [vmem:[#allocation121_spill] sm:$0xff]  ;;  %v7017_v39 = vld [vmem:[#allocation3 + $0x8b8] sm:$0xff] }
0x1f3c   :  { %12138 = vmatprep.subr.bf16.mxu1 %v17401_v45  ;;  %v7021_v24 = vld [vmem:[#allocation3 + $0x680] sm:$0xff] }
0x1f3e   :  { %12076 = vmatpush1.bf16.msra.mxu0 %v17402_v8 }
0x1f3f   :  { %12078 = vmatprep.subr.bf16.mxu0 %v17403_v2  ;;  %12140 = vmatpush1.bf16.msra.mxu1 %v17404_v5 }
0x1f40   :  { %12142 = vmatprep.subr.bf16.mxu1 %v17405_v28 }
0x1f42   :  { %12080 = vmatpush1.bf16.msra.mxu0 %v17406_v13  ;;  %v554_v13 = vadd.f32 %v16327_v60, %v490_v49  ;;  %v12199_v49 = vpack.c.bf16 %v7018_v44, %v7017_v39 }
0x1f43   :  { %12082 = vmatprep.subr.bf16.mxu0 %v17407_v11  ;;  %12144 = vmatpush1.bf16.msra.mxu1 %v17408_v56 }
0x1f44   :  { %12146 = vmatprep.subr.bf16.mxu1 %v17409_v47 }
0x1f46   :  { %12084 = vmatpush1.bf16.msra.mxu0 %v17410_v27 }
0x1f47   :  { %12086 = vmatprep.subr.bf16.mxu0 %v17411_v9  ;;  %12148 = vmatpush1.bf16.msra.mxu1 %v17412_v20 }
0x1f48   :  { %12150 = vmatprep.subr.bf16.mxu1 %v17413_v36  ;;  %v491_v36 = vmul.f32 %v16136_v10, %v426_v29  ;;  %v7008_v10 = vld [vmem:[#allocation3 + $0x708] sm:$0xff] }
0x1f49   :  { %v7016_v29 = vld [vmem:[#allocation3 + $0x888] sm:$0xff] }
0x1f4a   :  { %12088 = vmatpush1.bf16.msra.mxu0 %v17414_v59 }
0x1f4b   :  { %12090 = vmatprep.subr.bf16.mxu0 %v17415_v42  ;;  %12152 = vmatpush1.bf16.msra.mxu1 %v17416_v19 }
0x1f4c   :  { %12153 = vmatprep.subr.bf16.mxu1 %v16051_v54 }
0x1f4e   :  { %12092 = vmatpush1.bf16.msra.mxu0 %v17417_v48 }
0x1f4f   :  { %12094 = vmatprep.subr.bf16.mxu0 %v17418_v3 }
0x1f52   :  { %12096 = vmatpush1.bf16.msra.mxu0 %v17419_v23 }
0x1f53   :  { %12098 = vmatprep.subr.bf16.mxu0 %v17420_v21 }
0x1f56   :  { %12100 = vmatpush1.bf16.msra.mxu0 %v17421_v37 }
0x1f57   :  { %12102 = vmatprep.subr.bf16.mxu0 %v17422_v25 }
0x1f5a   :  { %12104 = vmatpush1.bf16.msra.mxu0 %v17423_v51 }
0x1f5b   :  { %12106 = vmatprep.subr.bf16.mxu0 %v17424_v50 }
0x1f5e   :  { %12108 = vmatpush1.bf16.msra.mxu0 %v17425_v15  ;;  %v7011_v15 = vld [vmem:[#allocation3 + $0x798] sm:$0xff] }
0x1f5f   :  { %12110 = vmatprep.subr.bf16.mxu0 %v17426_v22  ;;  %v7012_v22 = vld [vmem:[#allocation3 + $0x7c8] sm:$0xff] }
0x1f62   :  { %12112 = vmatpush1.bf16.msra.mxu0 %v17427_v18  ;;  %v12190_v18 = vpack.c.bf16 %v7012_v22, %v7011_v15  ;;  %v7033_v15 = vld [vmem:[#allocation3 + $0x8c0] sm:$0xff]  ;;  %v7271_v22 = vld [vmem:[#allocation6 + $0xf] ss:$0 sm:$0xff] }
0x1f63   :  { %12114 = vmatprep.subr.bf16.mxu0 %v17428_v14  ;;  %v7013_v14 = vld [vmem:[#allocation3 + $0x7f8] sm:$0xff] }
0x1f66   :  { %12116 = vmatpush1.bf16.msra.mxu0 %v17429_v43  ;;  %v7014_v43 = vld [vmem:[#allocation3 + $0x828] sm:$0xff] }
0x1f67   :  { %12118 = vmatprep.subr.bf16.mxu0 %v17430_v1  ;;  %v12193_v1 = vpack.c.bf16 %v7014_v43, %v7013_v14 }
0x1f6a   :  { %12120 = vmatpush1.bf16.msra.mxu0 %v17431_v41  ;;  %v7015_v41 = vld [vmem:[#allocation3 + $0x858] sm:$0xff] }
0x1f6b   :  { %12177 = vmatprep.subr.bf16.mxu0 %v16051_v54  ;;  %v12196_v34 = vpack.c.bf16 %v7016_v29, %v7015_v41 }
0x1f6d   :  { %6810 = vmatmul.mubr.f32.vlgmr.msra.gmra.mrb[62].mxu0 %v15481_v40 }
0x1f6e   :  { %8171 = vmatprep.mubr.msk.f32.mxu0 %vm12635_vm0, %v15996_v53 }
0x2000   :  { %v6669_v58 = vpop.f32.mrb[60].mxu0  ;;  %v6740_v62 = vpop.f32.mrb[90].mxu1 }
0x2001   :  { %v6670_v45 = vadd.f32 %v6669_v58, %v17435_v63  ;;  %v6671_v8 = vpop.f32.mrb[61].mxu0  ;;  %v15606_v2 = vpop.f32.mrb[91].mxu1  ;;  %v6741_v42 = vadd.f32 %v6740_v62, %v13128_v57  ;;  %v7019_v58 = vld [vmem:[#allocation3 + $0x620] sm:$0xff]  ;;  %v7020_v62 = vld [vmem:[#allocation3 + $0x650] sm:$0xff] }
0x2002   :  { %v6672_v5 = vadd.f32 %v6671_v8, %v16134_v32  ;;  %v555_v32 = vadd.f32 %v13132_v30, %v491_v36  ;;  %v7003_v30 = vld [vmem:[#allocation3 + $0x618] sm:$0xff]  ;;  %v7022_v63 = vld [vmem:[#allocation3 + $0x6b0] sm:$0xff]  ;;  %v7023_v8 = vld [vmem:[#allocation3 + $0x6e0] sm:$0xff] }
0x2003   :  { %v6820_v28 = vadd.f32 %v6670_v45, %v553_v55  ;;  %v12202_v55 = vpack.c.bf16 %v7020_v62, %v7019_v58  ;;  %v12205_v45 = vpack.c.bf16 %v7022_v63, %v7021_v24  ;;  %v7030_v36 = vld [vmem:[#allocation3 + $0x830] sm:$0xff] }
0x2004   :  { %v6827_v56 = vadd.f32 %v6672_v5, %v554_v13  ;;  %v7024_v5 = vld [vmem:[#allocation3 + $0x710] sm:$0xff]  ;;  %v7025_v13 = vld [vmem:[#allocation3 + $0x740] sm:$0xff] }
0x2005   :  { %v7267_v11 = vmul.f32 -1.442695, %v6820_v28  ;;  %v12208_v28 = vpack.c.bf16 %v7024_v5, %v7023_v8 }
0x2006   :  { %v7268_v47 = vmul.f32 -1.442695, %v6827_v56 }
0x2007   :  { %12536 = vpow2.f32 %v7267_v11  ;;  %v7026_v11 = vld [vmem:[#allocation3 + $0x770] sm:$0xff] }
0x2008   :  { %12538 = vpow2.f32 %v7268_v47  ;;  %v12211_v56 = vpack.c.bf16 %v7026_v11, %v7025_v13  ;;  %v7027_v47 = vld [vmem:[#allocation3 + $0x7a0] sm:$0xff] }
0x2011   :  { %v12537_v27 = vpop.eup %12536 }
0x2012   :  { %v6824_v9 = vadd.f32 1.0, %v12537_v27  ;;  %v12539_v20 = vpop.eup %12538  ;;  %v7028_v27 = vld [vmem:[#allocation3 + $0x7d0] sm:$0xff] }
0x2013   :  { %v6831_v59 = vadd.f32 1.0, %v12539_v20  ;;  %v7029_v20 = vld [vmem:[#allocation3 + $0x800] sm:$0xff] }
0x2014   :  { %12540 = vrcp.f32 %v6824_v9  ;;  %v12214_v9 = vpack.c.bf16 %v7028_v27, %v7027_v47 }
0x2015   :  { %12542 = vrcp.f32 %v6831_v59  ;;  %v12217_v59 = vpack.c.bf16 %v7030_v36, %v7029_v20 }
0x201e   :  { %v12541_v19 = vpop.eup %12540 }
0x201f   :  { %v6834_v48 = vmul.f32 %v12541_v19, %v6741_v42  ;;  %v12543_v3 = vpop.eup %12542  ;;  %v7031_v42 = vld [vmem:[#allocation3 + $0x860] sm:$0xff]  ;;  %v7032_v19 = vld [vmem:[#allocation3 + $0x890] sm:$0xff] }
0x2020   :  { %v6837_v23 = vsub.f32 1.0, %v12543_v3  ;;  %v6839_v25 = vmul.f32 %v12543_v3, %v15481_v40 }
0x2021   :  { %v6835_v60 = vadd.f32 %v6834_v48, %v555_v32  ;;  %v12220_v32 = vpack.c.bf16 %v7032_v19, %v7031_v42 }
0x2023   :  { %12544 = vtanh.f32 %v6835_v60  ;;  %v6743_v60 = vadd.f32 %v15606_v2, %v17383_v17 }
0x202d   :  { %v12545_v21 = vpop.eup %12544 }
0x202e   :  { %v6838_v37 = vmul.f32 %v12545_v21, %v6837_v23 }
0x2030   :  { %v6840_v51 = vadd.f32 %v6839_v25, %v6838_v37 }
0x2032   :  { %6906 = vmatmul.mubr.f32.vlgmr.msra.gmra.mrb[92].mxu1 %v6840_v51 }
0x2033   :  { %12155 = vmatpush3.bf16.msra.mxu1 %v13136_v6  ;;  %8136 = vmatprep.mubr.msk.f32.mxu1 %vm12635_vm0, %v15996_v53 }
0x2034   :  { %12156 = vmatprep.subr.bf16.mxu1 %v16051_v54 }
0x2037   :  { %12158 = vmatpush3.bf16.msra.mxu1 %v13142_v4  ;;  %v7004_v4 = vld [vmem:[#allocation3 + $0x648] sm:$0xff] }
0x2038   :  { %12159 = vmatprep.subr.bf16.mxu1 %v16051_v54 }
0x203b   :  { %12161 = vmatpush3.bf16.msra.mxu1 %v13148_v0  ;;  %v12178_v0 = vpack.c.bf16 %v7004_v4, %v7003_v30 }
0x203c   :  { %12162 = vmatprep.subr.bf16.mxu1 %v16051_v54 }
0x203d   :  { %12179 = vmatpush3.bf16.msra.mxu0 %v12178_v0 }
0x203e   :  { %12180 = vmatprep.subr.bf16.mxu0 %v16051_v54 }
0x203f   :  { %12164 = vmatpush3.bf16.msra.mxu1 %v13152_v35  ;;  %v7005_v35 = vld [vmem:[#allocation3 + $0x678] sm:$0xff] }
0x2040   :  { %v15623_v57 = vpop.f32.mrb[62].mxu0  ;;  %12165 = vmatprep.subr.bf16.mxu1 %v16051_v54 }
0x2041   :  { %v15626_v6 = vpop.f32.mrb[63].mxu0  ;;  %v6812_v21 = vadd.f32 %v15623_v57, %v16164_v16 }
0x2042   :  { %v6814_v17 = vadd.f32 %v15626_v6, %v13227_v12  ;;  %v7034_v12 = vld [vmem:[#allocation3 + $0x8f0] sm:$0xff] }
0x2043   :  { %12167 = vmatpush3.bf16.msra.mxu1 %v13156_v7  ;;  %v7006_v7 = vld [vmem:[#allocation3 + $0x6a8] sm:$0xff]  ;;  %v12223_v6 = vpack.c.bf16 %v7034_v12, %v7033_v15 }
0x2044   :  { %12168 = vmatprep.subr.bf16.mxu1 %v16051_v54 }
0x2047   :  { %12170 = vmatpush3.bf16.msra.mxu1 %v13160_v33  ;;  %v12181_v33 = vpack.c.bf16 %v7006_v7, %v7005_v35 }
0x2048   :  { %12171 = vmatprep.subr.bf16.mxu1 %v16051_v54 }
0x2049   :  { %12182 = vmatpush3.bf16.msra.mxu0 %v12181_v33 }
0x204a   :  { %12183 = vmatprep.subr.bf16.mxu0 %v16051_v54 }
0x204b   :  { %12173 = vmatpush3.bf16.msra.mxu1 %v13164_v31  ;;  %v7007_v31 = vld [vmem:[#allocation3 + $0x6d8] sm:$0xff] }
0x204c   :  { %12174 = vmatprep.subr.bf16.mxu1 %v16051_v54  ;;  %v12184_v40 = vpack.c.bf16 %v7008_v10, %v7007_v31 }
0x204e   :  { %12185 = vmatpush3.bf16.msra.mxu0 %v12184_v40 }
0x204f   :  { %12176 = vmatpush3.bf16.msra.mxu1 %v13168_v38  ;;  %12186 = vmatprep.subr.bf16.mxu0 %v16051_v54  ;;  %v7009_v38 = vld [vmem:[#allocation3 + $0x738] sm:$0xff] }
0x2050   :  { %12201 = vmatprep.subr.bf16.mxu1 %v16051_v54 }
0x2052   :  { %8137 = vmatmul.mubr.f32.vlgmr.msra.gmra.mrb[94].mxu1 %v6840_v51 }
0x2053   :  { %8206 = vmatprep.mubr.msk.f32.mxu1 %vm12635_vm0, %v15996_v53  ;;  %v7010_v53 = vld [vmem:[#allocation3 + $0x768] sm:$0xff]  ;;  %12203 = vmatpush3.bf16.msra.mxu1 %v12202_v55 }
0x2054   :  { %v12187_v50 = vpack.c.bf16 %v7010_v53, %v7009_v38  ;;  %12204 = vmatprep.subr.bf16.mxu1 %v16051_v54 }
0x2056   :  { %12188 = vmatpush3.bf16.msra.mxu0 %v12187_v50 }
0x2057   :  { %12189 = vmatprep.subr.bf16.mxu0 %v16051_v54  ;;  %12206 = vmatpush3.bf16.msra.mxu1 %v12205_v45 }
0x2058   :  { %12207 = vmatprep.subr.bf16.mxu1 %v16051_v54 }
0x205a   :  { %12191 = vmatpush3.bf16.msra.mxu0 %v12190_v18 }
0x205b   :  { %12192 = vmatprep.subr.bf16.mxu0 %v16051_v54  ;;  %12209 = vmatpush3.bf16.msra.mxu1 %v12208_v28 }
0x205c   :  { %12210 = vmatprep.subr.bf16.mxu1 %v16051_v54 }
0x205e   :  { %12194 = vmatpush3.bf16.msra.mxu0 %v12193_v1  ;;  %v7272_v1 = vld [vmem:[#allocation6 + $0x10] ss:$0 sm:$0xff] }
0x205f   :  { %12195 = vmatprep.subr.bf16.mxu0 %v16051_v54  ;;  %12212 = vmatpush3.bf16.msra.mxu1 %v12211_v56 }
0x2060   :  { %12213 = vmatprep.subr.bf16.mxu1 %v16051_v54 }
0x2062   :  { %12197 = vmatpush3.bf16.msra.mxu0 %v12196_v34 }
0x2063   :  { %12198 = vmatprep.subr.bf16.mxu0 %v16051_v54  ;;  %12215 = vmatpush3.bf16.msra.mxu1 %v12214_v9 }
0x2064   :  { %12216 = vmatprep.subr.bf16.mxu1 %v16051_v54 }
0x2066   :  { %12200 = vmatpush3.bf16.msra.mxu0 %v12199_v49 }
0x2067   :  { %12218 = vmatpush3.bf16.msra.mxu1 %v12217_v59 }
0x2068   :  { %12219 = vmatprep.subr.bf16.mxu1 %v16051_v54 }
0x206b   :  { %12221 = vmatpush3.bf16.msra.mxu1 %v12220_v32 }
0x206c   :  { %12222 = vmatprep.subr.bf16.mxu1 %v16051_v54 }
0x206f   :  { %12224 = vmatpush3.bf16.msra.mxu1 %v12223_v6 }
0x2105   :  { %v6907_v48 = vpop.f32.mrb[92].mxu1 }
0x2106   :  { %v6908_v3 = vadd.f32 %v6907_v48, %v17384_v52  ;;  %v6909_v23 = vpop.f32.mrb[93].mxu1 }
0x2107   :  { %v6910_v37 = vadd.f32 %v6909_v23, %v13218_v61 }
0x2108   :  { %v6982_v25 = vadd.f32 %v6908_v3, %v6743_v60 }
0x2109   :  { %v6989_v51 = vadd.f32 %v6910_v37, %v6812_v21 }
0x210a   :  { %v7269_v30 = vmul.f32 -1.442695, %v6982_v25 }
0x210b   :  { %v7270_v4 = vmul.f32 -1.442695, %v6989_v51 }
0x210c   :  { %12546 = vpow2.f32 %v7269_v30 }
0x210d   :  { %12548 = vpow2.f32 %v7270_v4 }
0x2116   :  { %v12547_v0 = vpop.eup %12546 }
0x2117   :  { %v6986_v54 = vadd.f32 1.0, %v12547_v0  ;;  %v12549_v35 = vpop.eup %12548 }
0x2118   :  { %v6993_v52 = vadd.f32 1.0, %v12549_v35 }
0x2119   :  { %12550 = vrcp.f32 %v6986_v54 }
0x211a   :  { %12552 = vrcp.f32 %v6993_v52 }
0x2123   :  { %v12551_v2 = vpop.eup %12550 }
0x2124   :  { %v6996_v7 = vmul.f32 %v12551_v2, %v6814_v17  ;;  %v12553_v31 = vpop.eup %12552 }
0x2125   :  { %v6978_v33 = vpop.f32.mrb[94].mxu1  ;;  %v6999_v10 = vsub.f32 1.0, %v12553_v31  ;;  %v7001_v53 = vmul.f32 %v12553_v31, %v15543_v26 }
0x2126   :  { %v6979_v61 = vadd.f32 %v6978_v33, %v13231_v46  ;;  %v8138_v16 = vpop.f32.mrb[95].mxu1 }
0x2128   :  { %v6997_v57 = vadd.f32 %v6996_v7, %v6979_v61 }
0x212a   :  { %12554 = vtanh.f32 %v6997_v57 }
0x2134   :  { %v12555_v40 = vpop.eup %12554 }
0x2135   :  { %v7000_v38 = vmul.f32 %v12555_v40, %v6999_v10 }
0x2137   :  { %v7002_v50 = vadd.f32 %v7001_v53, %v7000_v38 }
0x2139   :  { %8172 = vmatmul.mubr.f32.vlgmr.msra.gmra.mrb[64].mxu0 %v7002_v50 }
0x220c   :  { %v7109_v18 = vpop.f32.mrb[64].mxu0 }
0x220d   :  { %v7110_v14 = vadd.f32 %v7271_v22, %v7109_v18  ;;  %v8173_v43 = vpop.f32.mrb[65].mxu0 }
0x220f   :  { %v7113_v46 = vmax.f32 %v7110_v14, 0.0 }
0x2211   :  { %8207 = vmatmul.mubr.f32.vlgmr.msra.gmra.mrb[96].mxu1 %v7113_v46 }
0x22e4   :  { %v7186_v41 = vpop.f32.mrb[96].mxu1 }
0x22e5   :  { %v7187_v29 = vadd.f32 %v7272_v1, %v7186_v41  ;;  %v8208_v34 = vpop.f32.mrb[97].mxu1 }
0x22e7   :  { %7190 = vst [vmem:[#allocation8] sm:$0xff] %v7187_v29 }
0x22e8   :  { %12611 = shalt.err (!%p12608_p6)
}
0x22e9   :  { %s12612_s17 = scalar_lea.hbm %s15677_s3, 128 }
0x22ea   :  { %p12613_p7 = scmp.ne.s32.totalorder %s15677_s3, %s12612_s17  ;;  %p12616_p8 = scmp.lt.u32.totalorder %s12612_s17, %s15677_s3 }
0x22ec   :  { %p12618_p9 = pnand %p12616_p8, %p12613_p7 }
0x22ee   :  { %12621 = shalt.err (!%p12618_p9)
}
0x22ef   :  { %7200 = dma.vmem_to_hbm [thread:$0]  %s7198_s13, 128, %s15677_s3, [#allocation5]  }
0x22f0   :  { %12626 = dma.done.wait [#allocation5], 128  }
0x22f1   :  { %12627 = vsyncadd [#allocation5], 4294967168 }
0x22f2   :  { %7204 = vsyncpa [#allocation4], 1 }
0x22f3   :  { %7205 = vsyncpa [#allocation7], 1 }
0x22f4   :  { %7206 = vsyncpa [#allocation5], 1 }

</bundles_post_ra>
